<compile_context>
chip_gen: v6e
topology: v6e:2x2x1
jax: 0.10.0
libtpu: 0.0.40
codegen_flags: <defaults>
</compile_context>

<pallas_src>
import math
import functools

import jax
import jax.numpy as jnp
from jax.experimental import pallas as pl
from jax.experimental.pallas import tpu as pltpu

EPS = 1e-5          # nn.LayerNorm default
NEG_INF = -1e9
VMEM_LIMIT = 48 * 1024 * 1024   # safe on v7x (64 MiB physical), below v5e/v6e 128 MiB


# ----------------------------- in-kernel helpers -----------------------------

def _ln(y, g, b):
    """LayerNorm over last dim, f32 statistics (PyTorch semantics)."""
    mu = jnp.mean(y, axis=-1, keepdims=True)
    var = jnp.mean((y - mu) ** 2, axis=-1, keepdims=True)
    return (y - mu) * jax.lax.rsqrt(var + EPS) * g + b


def _softmax_rows(s):
    """Row softmax in f32; reciprocal goes to the EUP slot, not a VPU divide."""
    s = s - jnp.max(s, axis=-1, keepdims=True)
    p = jnp.exp(s)
    return p * pl.reciprocal(jnp.sum(p, axis=-1, keepdims=True), approx=True)


def _heads_attention(q, k, v, mask, n_head, scale):
    """q:[Tq,E] k/v:[Tk,E] f32, mask:[Tq,Tk] f32 -> [Tq,E] f32. Static per-head column slices
    stay in VMEM; with dk a multiple of 128 (example config) slices are lane-aligned."""
    E = q.shape[-1]
    dk = E // n_head
    outs = []
    for h in range(n_head):
        qh = q[:, h * dk:(h + 1) * dk].astype(jnp.bfloat16)
        kh = k[:, h * dk:(h + 1) * dk].astype(jnp.bfloat16)
        vh = v[:, h * dk:(h + 1) * dk].astype(jnp.bfloat16)
        s = jax.lax.dot_general(qh, kh, (((1,), (1,)), ((), ())),
                                preferred_element_type=jnp.float32) * scale + mask
        p = _softmax_rows(s)
        outs.append(jnp.dot(p.astype(jnp.bfloat16), vh,
                            preferred_element_type=jnp.float32))
    return jnp.concatenate(outs, axis=-1)


# ----------------------------- Pallas kernels -----------------------------

def _self_attn_kernel(x_ref, wqkv_ref, bqkv_ref, wo_ref, bo_ref, g_ref, b_ref,
                      mask_ref, o_ref, *, n_head, scale):
    # One batch row per grid step: x [T, E] bf16, mask block [1, T, T] f32.
    x = x_ref[...]
    E = x.shape[-1]
    qkv = jnp.dot(x, wqkv_ref[...], preferred_element_type=jnp.float32) + bqkv_ref[...]
    attn = _heads_attention(qkv[:, :E], qkv[:, E:2 * E], qkv[:, 2 * E:],
                            mask_ref[0], n_head, scale)
    proj = jnp.dot(attn.astype(jnp.bfloat16), wo_ref[...],
                   preferred_element_type=jnp.float32) + bo_ref[...]
    o_ref[...] = _ln(x.astype(jnp.float32) + proj, g_ref[...], b_ref[...]).astype(o_ref.dtype)


def _cross_attn_kernel(x_ref, m_ref, wq_ref, bq_ref, wkv_ref, bkv_ref,
                       wo_ref, bo_ref, g_ref, b_ref, mask_ref, o_ref, *, n_head, scale):
    # Q from decoder state [T, E], packed KV from memory [S, E]; all in one launch.
    x = x_ref[...]
    m = m_ref[...]
    E = x.shape[-1]
    q = jnp.dot(x, wq_ref[...], preferred_element_type=jnp.float32) + bq_ref[...]
    kv = jnp.dot(m, wkv_ref[...], preferred_element_type=jnp.float32) + bkv_ref[...]
    attn = _heads_attention(q, kv[:, :E], kv[:, E:], mask_ref[0], n_head, scale)
    proj = jnp.dot(attn.astype(jnp.bfloat16), wo_ref[...],
                   preferred_element_type=jnp.float32) + bo_ref[...]
    o_ref[...] = _ln(x.astype(jnp.float32) + proj, g_ref[...], b_ref[...]).astype(o_ref.dtype)


def _ffn_kernel(x_ref, w1_ref, b1_ref, w2_ref, b2_ref, g_ref, bb_ref, o_ref, acc_ref):
    # grid = (M tiles, FF tiles): FF is the contraction axis -> VMEM f32 accumulator.
    j = pl.program_id(1)

    @pl.when(j == 0)
    def _():
        acc_ref[...] = jnp.zeros_like(acc_ref)

    h = jnp.maximum(jnp.dot(x_ref[...], w1_ref[...],
                            preferred_element_type=jnp.float32) + b1_ref[...], 0.0)
    acc_ref[...] += jnp.dot(h.astype(jnp.bfloat16), w2_ref[...],
                            preferred_element_type=jnp.float32)

    @pl.when(j == pl.num_programs(1) - 1)
    def _():
        y = x_ref[...].astype(jnp.float32) + acc_ref[...] + b2_ref[...]
        o_ref[...] = _ln(y, g_ref[...], bb_ref[...]).astype(o_ref.dtype)


def _ln_kernel(x_ref, g_ref, b_ref, o_ref):
    o_ref[...] = _ln(x_ref[...].astype(jnp.float32), g_ref[...], b_ref[...]).astype(o_ref.dtype)


def _ln_linear_kernel(x_ref, g_ref, b_ref, w_ref, bw_ref, o_ref):
    # final decoder LayerNorm fused with the generator linear; grid = (M tiles, V tiles).
    xn = _ln(x_ref[...].astype(jnp.float32), g_ref[...], b_ref[...])
    o_ref[...] = jnp.dot(xn.astype(jnp.bfloat16), w_ref[...],
                         preferred_element_type=jnp.float32) + bw_ref[...]


# ----------------------------- tiling / compiler params helpers -----------------------------

def _pick_tile(dim, cap, align):
    if dim <= cap:
        return dim
    t = (cap // align) * align
    while t >= align:
        if dim % t == 0:
            return t
        t -= align
    return dim


def _cparams(sem):
    return pltpu.CompilerParams(dimension_semantics=sem, vmem_limit_bytes=VMEM_LIMIT)


# ----------------------------- kernel wrappers -----------------------------

def self_attn_block(x, p, ln_g, ln_b, mask, n_head, T):
    M, E = x.shape
    N = M // T
    scale = 1.0 / math.sqrt(E // n_head)
    return pl.pallas_call(
        functools.partial(_self_attn_kernel, n_head=n_head, scale=scale),
        grid=(N,),
        in_specs=[
            pl.BlockSpec((T, E), lambda n: (n, 0)),          # x (per-batch slab)
            pl.BlockSpec((E, 3 * E), lambda n: (0, 0)),      # wqkv (DMA'd once)
            pl.BlockSpec((1, 3 * E), lambda n: (0, 0)),      # bqkv
            pl.BlockSpec((E, E), lambda n: (0, 0)),          # wo
            pl.BlockSpec((1, E), lambda n: (0, 0)),          # bo
            pl.BlockSpec((1, E), lambda n: (0, 0)),          # ln gamma
            pl.BlockSpec((1, E), lambda n: (0, 0)),          # ln beta
            pl.BlockSpec((1, T, T), lambda n: (n, 0, 0)),    # combined additive mask
        ],
        out_specs=pl.BlockSpec((T, E), lambda n: (n, 0)),
        out_shape=jax.ShapeDtypeStruct((M, E), jnp.bfloat16),
        compiler_params=_cparams(("parallel",)),
    )(x, p['wqkv'], p['bqkv'], p['wo'], p['bo'], ln_g, ln_b, mask)


def cross_attn_block(x, mem, p, ln_g, ln_b, mask, n_head, T, S):
    M, E = x.shape
    N = M // T
    scale = 1.0 / math.sqrt(E // n_head)
    return pl.pallas_call(
        functools.partial(_cross_attn_kernel, n_head=n_head, scale=scale),
        grid=(N,),
        in_specs=[
            pl.BlockSpec((T, E), lambda n: (n, 0)),          # decoder state
            pl.BlockSpec((S, E), lambda n: (n, 0)),          # encoder memory
            pl.BlockSpec((E, E), lambda n: (0, 0)),          # wq
            pl.BlockSpec((1, E), lambda n: (0, 0)),          # bq
            pl.BlockSpec((E, 2 * E), lambda n: (0, 0)),      # wkv (packed)
            pl.BlockSpec((1, 2 * E), lambda n: (0, 0)),      # bkv
            pl.BlockSpec((E, E), lambda n: (0, 0)),          # wo
            pl.BlockSpec((1, E), lambda n: (0, 0)),          # bo
            pl.BlockSpec((1, E), lambda n: (0, 0)),          # ln gamma
            pl.BlockSpec((1, E), lambda n: (0, 0)),          # ln beta
            pl.BlockSpec((1, T, S), lambda n: (n, 0, 0)),    # combined additive mask
        ],
        out_specs=pl.BlockSpec((T, E), lambda n: (n, 0)),
        out_shape=jax.ShapeDtypeStruct((M, E), jnp.bfloat16),
        compiler_params=_cparams(("parallel",)),
    )(x, mem, p['wq'], p['bq'], p['wkv'], p['bkv'], p['wo'], p['bo'], ln_g, ln_b, mask)


def ffn_block(x, w1, b1, w2, b2, ln_g, ln_b):
    M, E = x.shape
    FF = w1.shape[1]
    tm = _pick_tile(M, 256, 8)
    tf = _pick_tile(FF, 256, 128)
    return pl.pallas_call(
        _ffn_kernel,
        grid=(M // tm, FF // tf),
        in_specs=[
            pl.BlockSpec((tm, E), lambda i, j: (i, 0)),
            pl.BlockSpec((E, tf), lambda i, j: (0, j)),
            pl.BlockSpec((1, tf), lambda i, j: (0, j)),
            pl.BlockSpec((tf, E), lambda i, j: (j, 0)),
            pl.BlockSpec((1, E), lambda i, j: (0, 0)),
            pl.BlockSpec((1, E), lambda i, j: (0, 0)),
            pl.BlockSpec((1, E), lambda i, j: (0, 0)),
        ],
        out_specs=pl.BlockSpec((tm, E), lambda i, j: (i, 0)),
        out_shape=jax.ShapeDtypeStruct((M, E), jnp.bfloat16),
        scratch_shapes=[pltpu.VMEM((tm, E), jnp.float32)],
        compiler_params=_cparams(("parallel", "arbitrary")),
    )(x, w1, b1, w2, b2, ln_g, ln_b)


def layer_norm(x, g, b):
    M, E = x.shape
    tm = _pick_tile(M, 512, 8)
    return pl.pallas_call(
        _ln_kernel,
        grid=(M // tm,),
        in_specs=[pl.BlockSpec((tm, E), lambda i: (i, 0)),
                  pl.BlockSpec((1, E), lambda i: (0, 0)),
                  pl.BlockSpec((1, E), lambda i: (0, 0))],
        out_specs=pl.BlockSpec((tm, E), lambda i: (i, 0)),
        out_shape=jax.ShapeDtypeStruct((M, E), jnp.bfloat16),
        compiler_params=_cparams(("parallel",)),
    )(x, g, b)


def ln_generator(x, g, b, w, bw):
    M, E = x.shape
    V = w.shape[1]
    tm = _pick_tile(M, 256, 8)
    tv = _pick_tile(V, 256, 128)
    return pl.pallas_call(
        _ln_linear_kernel,
        grid=(M // tm, V // tv),
        in_specs=[
            pl.BlockSpec((tm, E), lambda i, j: (i, 0)),
            pl.BlockSpec((1, E), lambda i, j: (0, 0)),
            pl.BlockSpec((1, E), lambda i, j: (0, 0)),
            pl.BlockSpec((E, tv), lambda i, j: (0, j)),
            pl.BlockSpec((1, tv), lambda i, j: (0, j)),
        ],
        out_specs=pl.BlockSpec((tm, tv), lambda i, j: (i, j)),
        out_shape=jax.ShapeDtypeStruct((M, V), jnp.float32),
        compiler_params=_cparams(("parallel", "parallel")),
    )(x, g, b, w, bw)


# ----------------------------- model pieces (XLA glue) -----------------------------

def make_pos_embedding(emb_size, maxlen=128):
    den = jnp.exp(-jnp.arange(0, emb_size, 2, dtype=jnp.float32) * math.log(10000.0) / emb_size)
    pos = jnp.arange(0, maxlen, dtype=jnp.float32).reshape(maxlen, 1)
    pe = jnp.zeros((maxlen, emb_size), jnp.float32)
    pe = pe.at[:, 0::2].set(jnp.sin(pos * den))
    pe = pe.at[:, 1::2].set(jnp.cos(pos * den))
    return pe[:, None, :]  # [maxlen, 1, E]


def embed_posenc(tokens, table, pos_emb):
    # gather * sqrt(E) + pos left to XLA fusion (review: dedicated kernel was pure overhead),
    # output re-laid batch-major [N*L, E] bf16 so every later block is a contiguous row slab.
    L, N = tokens.shape
    E = table.shape[1]
    assert L <= pos_emb.shape[0], "sequence longer than positional-encoding table"
    e = jnp.take(table, tokens, axis=0) * math.sqrt(E) + pos_emb[:L]     # [L, N, E] f32
    return e.transpose(1, 0, 2).reshape(N * L, E).astype(jnp.bfloat16)


def combined_mask(attn_mask, pad_mask_bool):
    # attn_mask [Tq, Tk] f32 additive, pad [N, Tk] bool -> [N, Tq, Tk] f32 additive (kept f32
    # so causal + padding (-2e9) never overflows).
    pad_add = jnp.where(pad_mask_bool, NEG_INF, 0.0).astype(jnp.float32)
    return attn_mask[None, :, :] + pad_add[:, None, :]


def seq2seq_forward(params, src, tgt, src_mask, tgt_mask,
                    src_padding_mask, tgt_padding_mask, memory_padding_mask, n_head):
    S, N = src.shape
    T = tgt.shape[0]

    src_x = embed_posenc(src, params['src_emb'], params['pos_emb'])   # [N*S, E] bf16
    tgt_x = embed_posenc(tgt, params['tgt_emb'], params['pos_emb'])   # [N*T, E] bf16

    enc_mask = combined_mask(src_mask.astype(jnp.float32), src_padding_mask)         # [N,S,S]
    dec_mask = combined_mask(tgt_mask.astype(jnp.float32), tgt_padding_mask)          # [N,T,T]
    crs_mask = combined_mask(jnp.zeros((T, S), jnp.float32), memory_padding_mask)     # [N,T,S]

    # Encoder (post-norm layers) + final encoder LayerNorm (as in nn.Transformer)
    mem = src_x
    for p in params['enc_layers']:
        mem = self_attn_block(mem, p['self_attn'], p['ln1_g'], p['ln1_b'], enc_mask, n_head, S)
        mem = ffn_block(mem, p['ff_w1'], p['ff_b1'], p['ff_w2'], p['ff_b2'],
                        p['ln2_g'], p['ln2_b'])
    mem = layer_norm(mem, params['enc_norm_g'], params['enc_norm_b'])

    # Decoder
    out = tgt_x
    for p in params['dec_layers']:
        out = self_attn_block(out, p['self_attn'], p['ln1_g'], p['ln1_b'], dec_mask, n_head, T)
        out = cross_attn_block(out, mem, p['cross_attn'], p['ln2_g'], p['ln2_b'],
                               crs_mask, n_head, T, S)
        out = ffn_block(out, p['ff_w1'], p['ff_b1'], p['ff_w2'], p['ff_b2'],
                        p['ln3_g'], p['ln3_b'])

    # Final decoder LayerNorm + generator (fused, tiled over M and V)
    logits = ln_generator(out, params['dec_norm_g'], params['dec_norm_b'],
                          params['gen_w'], params['gen_b'])
    V = logits.shape[-1]
    return logits.reshape(N, T, V).transpose(1, 0, 2)     # [T, N, V] (PyTorch layout)


# ----------------------------- parameter init -----------------------------

def init_params(key, n_enc, n_dec, E, ff, src_vocab, tgt_vocab, maxlen=128):
    keys = iter(jax.random.split(key, 256))

    def w(shape, scale=0.02, dtype=jnp.bfloat16):
        return (scale * jax.random.normal(next(keys), shape, jnp.float32)).astype(dtype)

    zeros = lambda s: jnp.zeros(s, jnp.float32)
    ones = lambda s: jnp.ones(s, jnp.float32)

    def self_attn():
        return dict(wqkv=w((E, 3 * E)), bqkv=zeros((1, 3 * E)),
                    wo=w((E, E)), bo=zeros((1, E)))

    def cross_attn():
        return dict(wq=w((E, E)), bq=zeros((1, E)),
                    wkv=w((E, 2 * E)), bkv=zeros((1, 2 * E)),
                    wo=w((E, E)), bo=zeros((1, E)))

    def enc_layer():
        return dict(self_attn=self_attn(),
                    ff_w1=w((E, ff)), ff_b1=zeros((1, ff)),
                    ff_w2=w((ff, E)), ff_b2=zeros((1, E)),
                    ln1_g=ones((1, E)), ln1_b=zeros((1, E)),
                    ln2_g=ones((1, E)), ln2_b=zeros((1, E)))

    def dec_layer():
        return dict(self_attn=self_attn(), cross_attn=cross_attn(),
                    ff_w1=w((E, ff)), ff_b1=zeros((1, ff)),
                    ff_w2=w((ff, E)), ff_b2=zeros((1, E)),
                    ln1_g=ones((1, E)), ln1_b=zeros((1, E)),
                    ln2_g=ones((1, E)), ln2_b=zeros((1, E)),
                    ln3_g=ones((1, E)), ln3_b=zeros((1, E)))

    return dict(
        src_emb=w((src_vocab, E), 1.0, jnp.float32),
        tgt_emb=w((tgt_vocab, E), 1.0, jnp.float32),
        pos_emb=make_pos_embedding(E, maxlen),
        enc_layers=[enc_layer() for _ in range(n_enc)],
        dec_layers=[dec_layer() for _ in range(n_dec)],
        enc_norm_g=ones((1, E)), enc_norm_b=zeros((1, E)),
        dec_norm_g=ones((1, E)), dec_norm_b=zeros((1, E)),
        gen_w=w((E, tgt_vocab)), gen_b=zeros((1, tgt_vocab)),
    )


# ----------------------------- main -----------------------------

if __name__ == "__main__":
    # Small but TPU-friendly shapes: lane dims (E, 3E, FF, V) are 128-multiples, dk = E/H = 128
    # so the in-kernel head slices are lane-aligned, and seq lens are 8-multiples.
    S, T, N = 32, 32, 4           # src len, tgt len, batch
    E, H, FF = 256, 2, 512        # emb size, heads, feed-forward dim
    SRC_V, TGT_V = 512, 512       # vocab sizes
    NUM_ENC, NUM_DEC = 2, 2

    root = jax.random.PRNGKey(0)
    k_params, k_src, k_tgt = jax.random.split(root, 3)

    params = init_params(k_params, NUM_ENC, NUM_DEC, E, FF, SRC_V, TGT_V)

    src = jax.random.randint(k_src, (S, N), 0, SRC_V, dtype=jnp.int32)
    tgt = jax.random.randint(k_tgt, (T, N), 0, TGT_V, dtype=jnp.int32)

    # src_mask: zeros; tgt_mask: causal additive; padding masks: last two positions padded
    src_mask = jnp.zeros((S, S), jnp.float32)
    tgt_mask = jnp.triu(jnp.full((T, T), NEG_INF, jnp.float32), k=1)
    src_padding_mask = jnp.zeros((N, S), bool).at[:, -2:].set(True)
    tgt_padding_mask = jnp.zeros((N, T), bool).at[:, -2:].set(True)
    memory_padding_mask = src_padding_mask

    fwd = jax.jit(functools.partial(seq2seq_forward, n_head=H))
    logits = fwd(params, src, tgt, src_mask, tgt_mask,
                 src_padding_mask, tgt_padding_mask, memory_padding_mask)
    logits = jax.block_until_ready(logits)
    assert logits.shape == (T, N, TGT_V), logits.shape
    assert bool(jnp.all(jnp.isfinite(logits)))
    print("KERNEL_OK")
</pallas_src>

<mosaic_0001>
module attributes {stable_mosaic.version = 11 : i64} {
  func.func @_ln_kernel(%arg0: i32, %arg1: memref<128x256xbf16, #tpu.memory_space<vmem>>, %arg2: memref<1x256xf32, #tpu.memory_space<vmem>>, %arg3: memref<1x256xf32, #tpu.memory_space<vmem>>, %arg4: memref<128x256xbf16, #tpu.memory_space<vmem>>) attributes {dimension_semantics = [#tpu.dimension_semantics<parallel>], iteration_bounds = array<i64: 1>, scalar_prefetch = 0 : i64, scratch_operands = 0 : i64, tpu.core_type = #tpu.core_type<tc>, window_params = [{transform_indices = @transform_0, window_bounds = array<i64: 128, 256>}, {pipeline_mode = #tpu.pipeline_mode<synchronous>, transform_indices = @transform_1, window_bounds = array<i64: 1, 256>}, {pipeline_mode = #tpu.pipeline_mode<synchronous>, transform_indices = @transform_2, window_bounds = array<i64: 1, 256>}, {transform_indices = @transform_3, window_bounds = array<i64: 128, 256>}]} {
    %c0 = arith.constant 0 : index
    %c0_0 = arith.constant 0 : index
    %0 = vector.load %arg1[%c0, %c0_0] : memref<128x256xbf16, #tpu.memory_space<vmem>>, vector<128x256xbf16>
    %1 = arith.extf %0 : vector<128x256xbf16> to vector<128x256xf32>
    %c0_1 = arith.constant 0 : index
    %c0_2 = arith.constant 0 : index
    %2 = vector.load %arg2[%c0_1, %c0_2] : memref<1x256xf32, #tpu.memory_space<vmem>>, vector<1x256xf32>
    %c0_3 = arith.constant 0 : index
    %c0_4 = arith.constant 0 : index
    %3 = vector.load %arg3[%c0_3, %c0_4] : memref<1x256xf32, #tpu.memory_space<vmem>>, vector<1x256xf32>
    %cst = arith.constant dense<0.000000e+00> : vector<128xf32>
    %4 = vector.multi_reduction <add>, %1, %cst [1] : vector<128x256xf32> to vector<128xf32>
    %5 = vector.shape_cast %4 : vector<128xf32> to vector<128x1xf32>
    %cst_5 = arith.constant 2.560000e+02 : f32
    %6 = vector.broadcast %cst_5 : f32 to vector<128x1xf32>
    %7 = arith.divf %5, %6 : vector<128x1xf32>
    %8 = vector.broadcast %7 : vector<128x1xf32> to vector<128x256xf32>
    %9 = arith.subf %1, %8 : vector<128x256xf32>
    %10 = arith.mulf %9, %9 : vector<128x256xf32>
    %cst_6 = arith.constant dense<0.000000e+00> : vector<128xf32>
    %11 = vector.multi_reduction <add>, %10, %cst_6 [1] : vector<128x256xf32> to vector<128xf32>
    %12 = vector.shape_cast %11 : vector<128xf32> to vector<128x1xf32>
    %cst_7 = arith.constant 2.560000e+02 : f32
    %13 = vector.broadcast %cst_7 : f32 to vector<128x1xf32>
    %14 = arith.divf %12, %13 : vector<128x1xf32>
    %15 = vector.broadcast %7 : vector<128x1xf32> to vector<128x256xf32>
    %16 = arith.subf %1, %15 : vector<128x256xf32>
    %cst_8 = arith.constant 9.99999974E-6 : f32
    %17 = vector.broadcast %cst_8 : f32 to vector<128x1xf32>
    %18 = arith.addf %14, %17 : vector<128x1xf32>
    %19 = math.rsqrt %18 : vector<128x1xf32>
    %20 = vector.broadcast %19 : vector<128x1xf32> to vector<128x256xf32>
    %21 = arith.mulf %16, %20 : vector<128x256xf32>
    %22 = vector.broadcast %2 : vector<1x256xf32> to vector<128x256xf32>
    %23 = arith.mulf %21, %22 : vector<128x256xf32>
    %24 = vector.broadcast %3 : vector<1x256xf32> to vector<128x256xf32>
    %25 = arith.addf %23, %24 : vector<128x256xf32>
    %26 = arith.truncf %25 : vector<128x256xf32> to vector<128x256xbf16>
    %c0_9 = arith.constant 0 : index
    %c0_10 = arith.constant 0 : index
    %27 = vector.load %arg4[%c0_9, %c0_10] : memref<128x256xbf16, #tpu.memory_space<vmem>>, vector<128x256xbf16>
    tpu.vector_store %arg4[%c0_9, %c0_10], %26 {strides = array<i32>} : memref<128x256xbf16, #tpu.memory_space<vmem>>, vector<128x256xbf16>,
    return
  }
  func.func @transform_0(%arg0: i32) -> (i32, i32) {
    %c0_i32 = arith.constant 0 : i32
    %c0_i32_0 = arith.constant 0 : i32
    return %arg0, %c0_i32 : i32, i32
  }
  func.func @transform_1(%arg0: i32) -> (i32, i32) {
    %c0_i32 = arith.constant 0 : i32
    %c0_i32_0 = arith.constant 0 : i32
    %c0_i32_1 = arith.constant 0 : i32
    return %c0_i32, %c0_i32_0 : i32, i32
  }
  func.func @transform_2(%arg0: i32) -> (i32, i32) {
    %c0_i32 = arith.constant 0 : i32
    %c0_i32_0 = arith.constant 0 : i32
    %c0_i32_1 = arith.constant 0 : i32
    return %c0_i32, %c0_i32_0 : i32, i32
  }
  func.func @transform_3(%arg0: i32) -> (i32, i32) {
    %c0_i32 = arith.constant 0 : i32
    %c0_i32_0 = arith.constant 0 : i32
    return %arg0, %c0_i32 : i32, i32
  }
}

module attributes {stable_mosaic.version = 11 : i64} {
  func.func @_self_attn_kernel(%arg0: i32, %arg1: memref<32x256xbf16, #tpu.memory_space<vmem>>, %arg2: memref<256x768xbf16, #tpu.memory_space<vmem>>, %arg3: memref<1x768xf32, #tpu.memory_space<vmem>>, %arg4: memref<256x256xbf16, #tpu.memory_space<vmem>>, %arg5: memref<1x256xf32, #tpu.memory_space<vmem>>, %arg6: memref<1x256xf32, #tpu.memory_space<vmem>>, %arg7: memref<1x256xf32, #tpu.memory_space<vmem>>, %arg8: memref<1x32x32xf32, #tpu.memory_space<vmem>>, %arg9: memref<32x256xbf16, #tpu.memory_space<vmem>>) attributes {dimension_semantics = [#tpu.dimension_semantics<parallel>], iteration_bounds = array<i64: 4>, scalar_prefetch = 0 : i64, scratch_operands = 0 : i64, tpu.core_type = #tpu.core_type<tc>, window_params = [{transform_indices = @transform_0, window_bounds = array<i64: 32, 256>}, {pipeline_mode = #tpu.pipeline_mode<synchronous>, transform_indices = @transform_1, window_bounds = array<i64: 256, 768>}, {pipeline_mode = #tpu.pipeline_mode<synchronous>, transform_indices = @transform_2, window_bounds = array<i64: 1, 768>}, {pipeline_mode = #tpu.pipeline_mode<synchronous>, transform_indices = @transform_3, window_bounds = array<i64: 256, 256>}, {pipeline_mode = #tpu.pipeline_mode<synchronous>, transform_indices = @transform_4, window_bounds = array<i64: 1, 256>}, {pipeline_mode = #tpu.pipeline_mode<synchronous>, transform_indices = @transform_5, window_bounds = array<i64: 1, 256>}, {pipeline_mode = #tpu.pipeline_mode<synchronous>, transform_indices = @transform_6, window_bounds = array<i64: 1, 256>}, {transform_indices = @transform_7, window_bounds = array<i64: 1, 32, 32>}, {transform_indices = @transform_8, window_bounds = array<i64: 32, 256>}]} {
    %c0 = arith.constant 0 : index
    %c0_0 = arith.constant 0 : index
    %0 = vector.load %arg1[%c0, %c0_0] : memref<32x256xbf16, #tpu.memory_space<vmem>>, vector<32x256xbf16>
    %c0_1 = arith.constant 0 : index
    %c0_2 = arith.constant 0 : index
    %1 = vector.load %arg2[%c0_1, %c0_2] : memref<256x768xbf16, #tpu.memory_space<vmem>>, vector<256x768xbf16>
    %cst = arith.constant dense<0.000000e+00> : vector<32x768xf32>
    %2 = tpu.matmul %0, %1, %cst {dimension_numbers = #tpu.dot_dimension_numbers<[1], [0], [0], [1], [0, 0, 1, 1], [], []>} : vector<32x256xbf16>, vector<256x768xbf16>, vector<32x768xf32> -> vector<32x768xf32>
    %c0_3 = arith.constant 0 : index
    %c0_4 = arith.constant 0 : index
    %3 = vector.load %arg3[%c0_3, %c0_4] : memref<1x768xf32, #tpu.memory_space<vmem>>, vector<1x768xf32>
    %4 = vector.broadcast %3 : vector<1x768xf32> to vector<32x768xf32>
    %5 = arith.addf %2, %4 : vector<32x768xf32>
    %6 = vector.extract_strided_slice %5 {offsets = [0, 0], sizes = [32, 256], strides = [1, 1]} : vector<32x768xf32> to vector<32x256xf32>
    %7 = vector.extract_strided_slice %5 {offsets = [0, 256], sizes = [32, 256], strides = [1, 1]} : vector<32x768xf32> to vector<32x256xf32>
    %8 = vector.extract_strided_slice %5 {offsets = [0, 512], sizes = [32, 256], strides = [1, 1]} : vector<32x768xf32> to vector<32x256xf32>
    %c0_5 = arith.constant 0 : index
    %c0_6 = arith.constant 0 : index
    %c0_7 = arith.constant 0 : index
    %9 = vector.load %arg8[%c0_5, %c0_6, %c0_7] : memref<1x32x32xf32, #tpu.memory_space<vmem>>, vector<1x32x32xf32>
    %10 = vector.shape_cast %9 : vector<1x32x32xf32> to vector<32x32xf32>
    %11 = vector.extract_strided_slice %6 {offsets = [0, 0], sizes = [32, 128], strides = [1, 1]} : vector<32x256xf32> to vector<32x128xf32>
    %12 = arith.truncf %11 : vector<32x128xf32> to vector<32x128xbf16>
    %13 = vector.extract_strided_slice %7 {offsets = [0, 0], sizes = [32, 128], strides = [1, 1]} : vector<32x256xf32> to vector<32x128xf32>
    %14 = arith.truncf %13 : vector<32x128xf32> to vector<32x128xbf16>
    %15 = vector.extract_strided_slice %8 {offsets = [0, 0], sizes = [32, 128], strides = [1, 1]} : vector<32x256xf32> to vector<32x128xf32>
    %16 = arith.truncf %15 : vector<32x128xf32> to vector<32x128xbf16>
    %cst_8 = arith.constant dense<0.000000e+00> : vector<32x32xf32>
    %17 = tpu.matmul %12, %14, %cst_8 {dimension_numbers = #tpu.dot_dimension_numbers<[1], [1], [0], [0], [0, 0, 1, 0], [], []>} : vector<32x128xbf16>, vector<32x128xbf16>, vector<32x32xf32> -> vector<32x32xf32>
    %cst_9 = arith.constant 0.0883883461 : f32
    %18 = vector.broadcast %cst_9 : f32 to vector<32x32xf32>
    %19 = arith.mulf %17, %18 : vector<32x32xf32>
    %20 = arith.addf %19, %10 : vector<32x32xf32>
    %cst_10 = arith.constant dense<0xFF800000> : vector<32xf32>
    %21 = vector.multi_reduction <maximumf>, %20, %cst_10 [1] : vector<32x32xf32> to vector<32xf32>
    %22 = vector.shape_cast %21 : vector<32xf32> to vector<32x1xf32>
    %23 = vector.broadcast %22 : vector<32x1xf32> to vector<32x32xf32>
    %24 = arith.subf %20, %23 : vector<32x32xf32>
    %25 = math.exp %24 : vector<32x32xf32>
    %cst_11 = arith.constant dense<0.000000e+00> : vector<32xf32>
    %26 = vector.multi_reduction <add>, %25, %cst_11 [1] : vector<32x32xf32> to vector<32xf32>
    %27 = vector.shape_cast %26 : vector<32xf32> to vector<32x1xf32>
    %28 = tpu.reciprocal %27 {approx = true} : vector<32x1xf32> -> vector<32x1xf32>
    %29 = vector.broadcast %28 : vector<32x1xf32> to vector<32x32xf32>
    %30 = arith.mulf %25, %29 : vector<32x32xf32>
    %31 = arith.truncf %30 : vector<32x32xf32> to vector<32x32xbf16>
    %cst_12 = arith.constant dense<0.000000e+00> : vector<32x128xf32>
    %32 = tpu.matmul %31, %16, %cst_12 {dimension_numbers = #tpu.dot_dimension_numbers<[1], [0], [0], [1], [0, 0, 1, 1], [], []>} : vector<32x32xbf16>, vector<32x128xbf16>, vector<32x128xf32> -> vector<32x128xf32>
    %33 = vector.extract_strided_slice %6 {offsets = [0, 128], sizes = [32, 128], strides = [1, 1]} : vector<32x256xf32> to vector<32x128xf32>
    %34 = arith.truncf %33 : vector<32x128xf32> to vector<32x128xbf16>
    %35 = vector.extract_strided_slice %7 {offsets = [0, 128], sizes = [32, 128], strides = [1, 1]} : vector<32x256xf32> to vector<32x128xf32>
    %36 = arith.truncf %35 : vector<32x128xf32> to vector<32x128xbf16>
    %37 = vector.extract_strided_slice %8 {offsets = [0, 128], sizes = [32, 128], strides = [1, 1]} : vector<32x256xf32> to vector<32x128xf32>
    %38 = arith.truncf %37 : vector<32x128xf32> to vector<32x128xbf16>
    %cst_13 = arith.constant dense<0.000000e+00> : vector<32x32xf32>
    %39 = tpu.matmul %34, %36, %cst_13 {dimension_numbers = #tpu.dot_dimension_numbers<[1], [1], [0], [0], [0, 0, 1, 0], [], []>} : vector<32x128xbf16>, vector<32x128xbf16>, vector<32x32xf32> -> vector<32x32xf32>
    %cst_14 = arith.constant 0.0883883461 : f32
    %40 = vector.broadcast %cst_14 : f32 to vector<32x32xf32>
    %41 = arith.mulf %39, %40 : vector<32x32xf32>
    %42 = arith.addf %41, %10 : vector<32x32xf32>
    %cst_15 = arith.constant dense<0xFF800000> : vector<32xf32>
    %43 = vector.multi_reduction <maximumf>, %42, %cst_15 [1] : vector<32x32xf32> to vector<32xf32>
    %44 = vector.shape_cast %43 : vector<32xf32> to vector<32x1xf32>
    %45 = vector.broadcast %44 : vector<32x1xf32> to vector<32x32xf32>
    %46 = arith.subf %42, %45 : vector<32x32xf32>
    %47 = math.exp %46 : vector<32x32xf32>
    %cst_16 = arith.constant dense<0.000000e+00> : vector<32xf32>
    %48 = vector.multi_reduction <add>, %47, %cst_16 [1] : vector<32x32xf32> to vector<32xf32>
    %49 = vector.shape_cast %48 : vector<32xf32> to vector<32x1xf32>
    %50 = tpu.reciprocal %49 {approx = true} : vector<32x1xf32> -> vector<32x1xf32>
    %51 = vector.broadcast %50 : vector<32x1xf32> to vector<32x32xf32>
    %52 = arith.mulf %47, %51 : vector<32x32xf32>
    %53 = arith.truncf %52 : vector<32x32xf32> to vector<32x32xbf16>
    %cst_17 = arith.constant dense<0.000000e+00> : vector<32x128xf32>
    %54 = tpu.matmul %53, %38, %cst_17 {dimension_numbers = #tpu.dot_dimension_numbers<[1], [0], [0], [1], [0, 0, 1, 1], [], []>} : vector<32x32xbf16>, vector<32x128xbf16>, vector<32x128xf32> -> vector<32x128xf32>
    %55 = tpu.concatenate %32, %54 in 1 : vector<32x128xf32>, vector<32x128xf32> -> vector<32x256xf32>
    %56 = arith.truncf %55 : vector<32x256xf32> to vector<32x256xbf16>
    %c0_18 = arith.constant 0 : index
    %c0_19 = arith.constant 0 : index
    %57 = vector.load %arg4[%c0_18, %c0_19] : memref<256x256xbf16, #tpu.memory_space<vmem>>, vector<256x256xbf16>
    %cst_20 = arith.constant dense<0.000000e+00> : vector<32x256xf32>
    %58 = tpu.matmul %56, %57, %cst_20 {dimension_numbers = #tpu.dot_dimension_numbers<[1], [0], [0], [1], [0, 0, 1, 1], [], []>} : vector<32x256xbf16>, vector<256x256xbf16>, vector<32x256xf32> -> vector<32x256xf32>
    %c0_21 = arith.constant 0 : index
    %c0_22 = arith.constant 0 : index
    %59 = vector.load %arg5[%c0_21, %c0_22] : memref<1x256xf32, #tpu.memory_space<vmem>>, vector<1x256xf32>
    %60 = vector.broadcast %59 : vector<1x256xf32> to vector<32x256xf32>
    %61 = arith.addf %58, %60 : vector<32x256xf32>
    %62 = arith.extf %0 : vector<32x256xbf16> to vector<32x256xf32>
    %63 = arith.addf %62, %61 : vector<32x256xf32>
    %c0_23 = arith.constant 0 : index
    %c0_24 = arith.constant 0 : index
    %64 = vector.load %arg6[%c0_23, %c0_24] : memref<1x256xf32, #tpu.memory_space<vmem>>, vector<1x256xf32>
    %c0_25 = arith.constant 0 : index
    %c0_26 = arith.constant 0 : index
    %65 = vector.load %arg7[%c0_25, %c0_26] : memref<1x256xf32, #tpu.memory_space<vmem>>, vector<1x256xf32>
    %cst_27 = arith.constant dense<0.000000e+00> : vector<32xf32>
    %66 = vector.multi_reduction <add>, %63, %cst_27 [1] : vector<32x256xf32> to vector<32xf32>
    %67 = vector.shape_cast %66 : vector<32xf32> to vector<32x1xf32>
    %cst_28 = arith.constant 2.560000e+02 : f32
    %68 = vector.broadcast %cst_28 : f32 to vector<32x1xf32>
    %69 = arith.divf %67, %68 : vector<32x1xf32>
    %70 = vector.broadcast %69 : vector<32x1xf32> to vector<32x256xf32>
    %71 = arith.subf %63, %70 : vector<32x256xf32>
    %72 = arith.mulf %71, %71 : vector<32x256xf32>
    %cst_29 = arith.constant dense<0.000000e+00> : vector<32xf32>
    %73 = vector.multi_reduction <add>, %72, %cst_29 [1] : vector<32x256xf32> to vector<32xf32>
    %74 = vector.shape_cast %73 : vector<32xf32> to vector<32x1xf32>
    %cst_30 = arith.constant 2.560000e+02 : f32
    %75 = vector.broadcast %cst_30 : f32 to vector<32x1xf32>
    %76 = arith.divf %74, %75 : vector<32x1xf32>
    %77 = vector.broadcast %69 : vector<32x1xf32> to vector<32x256xf32>
    %78 = arith.subf %63, %77 : vector<32x256xf32>
    %cst_31 = arith.constant 9.99999974E-6 : f32
    %79 = vector.broadcast %cst_31 : f32 to vector<32x1xf32>
    %80 = arith.addf %76, %79 : vector<32x1xf32>
    %81 = math.rsqrt %80 : vector<32x1xf32>
    %82 = vector.broadcast %81 : vector<32x1xf32> to vector<32x256xf32>
    %83 = arith.mulf %78, %82 : vector<32x256xf32>
    %84 = vector.broadcast %64 : vector<1x256xf32> to vector<32x256xf32>
    %85 = arith.mulf %83, %84 : vector<32x256xf32>
    %86 = vector.broadcast %65 : vector<1x256xf32> to vector<32x256xf32>
    %87 = arith.addf %85, %86 : vector<32x256xf32>
    %88 = arith.truncf %87 : vector<32x256xf32> to vector<32x256xbf16>
    %c0_32 = arith.constant 0 : index
    %c0_33 = arith.constant 0 : index
    %89 = vector.load %arg9[%c0_32, %c0_33] : memref<32x256xbf16, #tpu.memory_space<vmem>>, vector<32x256xbf16>
    tpu.vector_store %arg9[%c0_32, %c0_33], %88 {strides = array<i32>} : memref<32x256xbf16, #tpu.memory_space<vmem>>, vector<32x256xbf16>,
    return
  }
  func.func @transform_0(%arg0: i32) -> (i32, i32) {
    %c0_i32 = arith.constant 0 : i32
    %c0_i32_0 = arith.constant 0 : i32
    return %arg0, %c0_i32 : i32, i32
  }
  func.func @transform_1(%arg0: i32) -> (i32, i32) {
    %c0_i32 = arith.constant 0 : i32
    %c0_i32_0 = arith.constant 0 : i32
    %c0_i32_1 = arith.constant 0 : i32
    return %c0_i32, %c0_i32_0 : i32, i32
  }
  func.func @transform_2(%arg0: i32) -> (i32, i32) {
    %c0_i32 = arith.constant 0 : i32
    %c0_i32_0 = arith.constant 0 : i32
    %c0_i32_1 = arith.constant 0 : i32
    return %c0_i32, %c0_i32_0 : i32, i32
  }
  func.func @transform_3(%arg0: i32) -> (i32, i32) {
    %c0_i32 = arith.constant 0 : i32
    %c0_i32_0 = arith.constant 0 : i32
    %c0_i32_1 = arith.constant 0 : i32
    return %c0_i32, %c0_i32_0 : i32, i32
  }
  func.func @transform_4(%arg0: i32) -> (i32, i32) {
    %c0_i32 = arith.constant 0 : i32
    %c0_i32_0 = arith.constant 0 : i32
    %c0_i32_1 = arith.constant 0 : i32
    return %c0_i32, %c0_i32_0 : i32, i32
  }
  func.func @transform_5(%arg0: i32) -> (i32, i32) {
    %c0_i32 = arith.constant 0 : i32
    %c0_i32_0 = arith.constant 0 : i32
    %c0_i32_1 = arith.constant 0 : i32
    return %c0_i32, %c0_i32_0 : i32, i32
  }
  func.func @transform_6(%arg0: i32) -> (i32, i32) {
    %c0_i32 = arith.constant 0 : i32
    %c0_i32_0 = arith.constant 0 : i32
    %c0_i32_1 = arith.constant 0 : i32
    return %c0_i32, %c0_i32_0 : i32, i32
  }
  func.func @transform_7(%arg0: i32) -> (i32, i32, i32) {
    %c0_i32 = arith.constant 0 : i32
    %c0_i32_0 = arith.constant 0 : i32
    %c0_i32_1 = arith.constant 0 : i32
    return %arg0, %c0_i32, %c0_i32_0 : i32, i32, i32
  }
  func.func @transform_8(%arg0: i32) -> (i32, i32) {
    %c0_i32 = arith.constant 0 : i32
    %c0_i32_0 = arith.constant 0 : i32
    return %arg0, %c0_i32 : i32, i32
  }
}

module attributes {stable_mosaic.version = 11 : i64} {
  func.func @_ffn_kernel(%arg0: i32, %arg1: i32, %arg2: memref<128x256xbf16, #tpu.memory_space<vmem>>, %arg3: memref<256x256xbf16, #tpu.memory_space<vmem>>, %arg4: memref<1x256xf32, #tpu.memory_space<vmem>>, %arg5: memref<256x256xbf16, #tpu.memory_space<vmem>>, %arg6: memref<1x256xf32, #tpu.memory_space<vmem>>, %arg7: memref<1x256xf32, #tpu.memory_space<vmem>>, %arg8: memref<1x256xf32, #tpu.memory_space<vmem>>, %arg9: memref<128x256xbf16, #tpu.memory_space<vmem>>, %arg10: memref<128x256xf32, #tpu.memory_space<vmem>>) attributes {dimension_semantics = [#tpu.dimension_semantics<parallel>, #tpu.dimension_semantics<arbitrary>], iteration_bounds = array<i64: 1, 2>, scalar_prefetch = 0 : i64, scratch_operands = 1 : i64, tpu.core_type = #tpu.core_type<tc>, window_params = [{transform_indices = @transform_0, window_bounds = array<i64: 128, 256>}, {transform_indices = @transform_1, window_bounds = array<i64: 256, 256>}, {transform_indices = @transform_2, window_bounds = array<i64: 1, 256>}, {transform_indices = @transform_3, window_bounds = array<i64: 256, 256>}, {pipeline_mode = #tpu.pipeline_mode<synchronous>, transform_indices = @transform_4, window_bounds = array<i64: 1, 256>}, {pipeline_mode = #tpu.pipeline_mode<synchronous>, transform_indices = @transform_5, window_bounds = array<i64: 1, 256>}, {pipeline_mode = #tpu.pipeline_mode<synchronous>, transform_indices = @transform_6, window_bounds = array<i64: 1, 256>}, {transform_indices = @transform_7, window_bounds = array<i64: 128, 256>}]} {
    %c0_i32 = arith.constant 0 : i32
    %0 = arith.cmpi eq, %arg1, %c0_i32 : i32
    %1 = arith.extui %0 : i1 to i32
    %c0_i32_0 = arith.constant 0 : i32
    %2 = arith.cmpi ne, %1, %c0_i32_0 : i32
    scf.if %2 {
      %cst_15 = arith.constant 0.000000e+00 : f32
      %20 = vector.broadcast %cst_15 : f32 to vector<128x256xf32>
      %c0_16 = arith.constant 0 : index
      %c0_17 = arith.constant 0 : index
      %21 = vector.load %arg10[%c0_16, %c0_17] : memref<128x256xf32, #tpu.memory_space<vmem>>, vector<128x256xf32>
      tpu.vector_store %arg10[%c0_16, %c0_17], %20 {strides = array<i32>} : memref<128x256xf32, #tpu.memory_space<vmem>>, vector<128x256xf32>,
    } else {
    }
    %c0 = arith.constant 0 : index
    %c0_1 = arith.constant 0 : index
    %3 = vector.load %arg2[%c0, %c0_1] : memref<128x256xbf16, #tpu.memory_space<vmem>>, vector<128x256xbf16>
    %c0_2 = arith.constant 0 : index
    %c0_3 = arith.constant 0 : index
    %4 = vector.load %arg3[%c0_2, %c0_3] : memref<256x256xbf16, #tpu.memory_space<vmem>>, vector<256x256xbf16>
    %cst = arith.constant dense<0.000000e+00> : vector<128x256xf32>
    %5 = tpu.matmul %3, %4, %cst {dimension_numbers = #tpu.dot_dimension_numbers<[1], [0], [0], [1], [0, 0, 1, 1], [], []>} : vector<128x256xbf16>, vector<256x256xbf16>, vector<128x256xf32> -> vector<128x256xf32>
    %c0_4 = arith.constant 0 : index
    %c0_5 = arith.constant 0 : index
    %6 = vector.load %arg4[%c0_4, %c0_5] : memref<1x256xf32, #tpu.memory_space<vmem>>, vector<1x256xf32>
    %7 = vector.broadcast %6 : vector<1x256xf32> to vector<128x256xf32>
    %8 = arith.addf %5, %7 : vector<128x256xf32>
    %cst_6 = arith.constant 0.000000e+00 : f32
    %9 = vector.broadcast %cst_6 : f32 to vector<128x256xf32>
    %10 = arith.maximumf %8, %9 : vector<128x256xf32>
    %c0_7 = arith.constant 0 : index
    %c0_8 = arith.constant 0 : index
    %11 = vector.load %arg10[%c0_7, %c0_8] : memref<128x256xf32, #tpu.memory_space<vmem>>, vector<128x256xf32>
    %12 = arith.truncf %10 : vector<128x256xf32> to vector<128x256xbf16>
    %c0_9 = arith.constant 0 : index
    %c0_10 = arith.constant 0 : index
    %13 = vector.load %arg5[%c0_9, %c0_10] : memref<256x256xbf16, #tpu.memory_space<vmem>>, vector<256x256xbf16>
    %cst_11 = arith.constant dense<0.000000e+00> : vector<128x256xf32>
    %14 = tpu.matmul %12, %13, %cst_11 {dimension_numbers = #tpu.dot_dimension_numbers<[1], [0], [0], [1], [0, 0, 1, 1], [], []>} : vector<128x256xbf16>, vector<256x256xbf16>, vector<128x256xf32> -> vector<128x256xf32>
    %15 = arith.addf %11, %14 : vector<128x256xf32>
    %c0_12 = arith.constant 0 : index
    %c0_13 = arith.constant 0 : index
    %16 = vector.load %arg10[%c0_12, %c0_13] : memref<128x256xf32, #tpu.memory_space<vmem>>, vector<128x256xf32>
    tpu.vector_store %arg10[%c0_12, %c0_13], %15 {strides = array<i32>} : memref<128x256xf32, #tpu.memory_space<vmem>>, vector<128x256xf32>,
    %c1_i32 = arith.constant 1 : i32
    %17 = arith.cmpi eq, %arg1, %c1_i32 : i32
    %18 = arith.extui %17 : i1 to i32
    %c0_i32_14 = arith.constant 0 : i32
    %19 = arith.cmpi ne, %18, %c0_i32_14 : i32
    scf.if %19 {
      %c0_15 = arith.constant 0 : index
      %c0_16 = arith.constant 0 : index
      %20 = vector.load %arg2[%c0_15, %c0_16] : memref<128x256xbf16, #tpu.memory_space<vmem>>, vector<128x256xbf16>
      %21 = arith.extf %20 : vector<128x256xbf16> to vector<128x256xf32>
      %c0_17 = arith.constant 0 : index
      %c0_18 = arith.constant 0 : index
      %22 = vector.load %arg10[%c0_17, %c0_18] : memref<128x256xf32, #tpu.memory_space<vmem>>, vector<128x256xf32>
      %23 = arith.addf %21, %22 : vector<128x256xf32>
      %c0_19 = arith.constant 0 : index
      %c0_20 = arith.constant 0 : index
      %24 = vector.load %arg6[%c0_19, %c0_20] : memref<1x256xf32, #tpu.memory_space<vmem>>, vector<1x256xf32>
      %25 = vector.broadcast %24 : vector<1x256xf32> to vector<128x256xf32>
      %26 = arith.addf %23, %25 : vector<128x256xf32>
      %c0_21 = arith.constant 0 : index
      %c0_22 = arith.constant 0 : index
      %27 = vector.load %arg7[%c0_21, %c0_22] : memref<1x256xf32, #tpu.memory_space<vmem>>, vector<1x256xf32>
      %c0_23 = arith.constant 0 : index
      %c0_24 = arith.constant 0 : index
      %28 = vector.load %arg8[%c0_23, %c0_24] : memref<1x256xf32, #tpu.memory_space<vmem>>, vector<1x256xf32>
      %cst_25 = arith.constant dense<0.000000e+00> : vector<128xf32>
      %29 = vector.multi_reduction <add>, %26, %cst_25 [1] : vector<128x256xf32> to vector<128xf32>
      %30 = vector.shape_cast %29 : vector<128xf32> to vector<128x1xf32>
      %cst_26 = arith.constant 2.560000e+02 : f32
      %31 = vector.broadcast %cst_26 : f32 to vector<128x1xf32>
      %32 = arith.divf %30, %31 : vector<128x1xf32>
      %33 = vector.broadcast %32 : vector<128x1xf32> to vector<128x256xf32>
      %34 = arith.subf %26, %33 : vector<128x256xf32>
      %35 = arith.mulf %34, %34 : vector<128x256xf32>
      %cst_27 = arith.constant dense<0.000000e+00> : vector<128xf32>
      %36 = vector.multi_reduction <add>, %35, %cst_27 [1] : vector<128x256xf32> to vector<128xf32>
      %37 = vector.shape_cast %36 : vector<128xf32> to vector<128x1xf32>
      %cst_28 = arith.constant 2.560000e+02 : f32
      %38 = vector.broadcast %cst_28 : f32 to vector<128x1xf32>
      %39 = arith.divf %37, %38 : vector<128x1xf32>
      %40 = vector.broadcast %32 : vector<128x1xf32> to vector<128x256xf32>
      %41 = arith.subf %26, %40 : vector<128x256xf32>
      %cst_29 = arith.constant 9.99999974E-6 : f32
      %42 = vector.broadcast %cst_29 : f32 to vector<128x1xf32>
      %43 = arith.addf %39, %42 : vector<128x1xf32>
      %44 = math.rsqrt %43 : vector<128x1xf32>
      %45 = vector.broadcast %44 : vector<128x1xf32> to vector<128x256xf32>
      %46 = arith.mulf %41, %45 : vector<128x256xf32>
      %47 = vector.broadcast %27 : vector<1x256xf32> to vector<128x256xf32>
      %48 = arith.mulf %46, %47 : vector<128x256xf32>
      %49 = vector.broadcast %28 : vector<1x256xf32> to vector<128x256xf32>
      %50 = arith.addf %48, %49 : vector<128x256xf32>
      %51 = arith.truncf %50 : vector<128x256xf32> to vector<128x256xbf16>
      %c0_30 = arith.constant 0 : index
      %c0_31 = arith.constant 0 : index
      %52 = vector.load %arg9[%c0_30, %c0_31] : memref<128x256xbf16, #tpu.memory_space<vmem>>, vector<128x256xbf16>
      tpu.vector_store %arg9[%c0_30, %c0_31], %51 {strides = array<i32>} : memref<128x256xbf16, #tpu.memory_space<vmem>>, vector<128x256xbf16>,
    } else {
    }
    return
  }
  func.func @transform_0(%arg0: i32, %arg1: i32) -> (i32, i32) {
    %c0_i32 = arith.constant 0 : i32
    %c0_i32_0 = arith.constant 0 : i32
    return %arg0, %c0_i32 : i32, i32
  }
  func.func @transform_1(%arg0: i32, %arg1: i32) -> (i32, i32) {
    %c0_i32 = arith.constant 0 : i32
    %c0_i32_0 = arith.constant 0 : i32
    return %c0_i32, %arg1 : i32, i32
  }
  func.func @transform_2(%arg0: i32, %arg1: i32) -> (i32, i32) {
    %c0_i32 = arith.constant 0 : i32
    %c0_i32_0 = arith.constant 0 : i32
    return %c0_i32, %arg1 : i32, i32
  }
  func.func @transform_3(%arg0: i32, %arg1: i32) -> (i32, i32) {
    %c0_i32 = arith.constant 0 : i32
    %c0_i32_0 = arith.constant 0 : i32
    return %arg1, %c0_i32 : i32, i32
  }
  func.func @transform_4(%arg0: i32, %arg1: i32) -> (i32, i32) {
    %c0_i32 = arith.constant 0 : i32
    %c0_i32_0 = arith.constant 0 : i32
    %c0_i32_1 = arith.constant 0 : i32
    return %c0_i32, %c0_i32_0 : i32, i32
  }
  func.func @transform_5(%arg0: i32, %arg1: i32) -> (i32, i32) {
    %c0_i32 = arith.constant 0 : i32
    %c0_i32_0 = arith.constant 0 : i32
    %c0_i32_1 = arith.constant 0 : i32
    return %c0_i32, %c0_i32_0 : i32, i32
  }
  func.func @transform_6(%arg0: i32, %arg1: i32) -> (i32, i32) {
    %c0_i32 = arith.constant 0 : i32
    %c0_i32_0 = arith.constant 0 : i32
    %c0_i32_1 = arith.constant 0 : i32
    return %c0_i32, %c0_i32_0 : i32, i32
  }
  func.func @transform_7(%arg0: i32, %arg1: i32) -> (i32, i32) {
    %c0_i32 = arith.constant 0 : i32
    %c0_i32_0 = arith.constant 0 : i32
    return %arg0, %c0_i32 : i32, i32
  }
}

module attributes {stable_mosaic.version = 11 : i64} {
  func.func @_cross_attn_kernel(%arg0: i32, %arg1: memref<32x256xbf16, #tpu.memory_space<vmem>>, %arg2: memref<32x256xbf16, #tpu.memory_space<vmem>>, %arg3: memref<256x256xbf16, #tpu.memory_space<vmem>>, %arg4: memref<1x256xf32, #tpu.memory_space<vmem>>, %arg5: memref<256x512xbf16, #tpu.memory_space<vmem>>, %arg6: memref<1x512xf32, #tpu.memory_space<vmem>>, %arg7: memref<256x256xbf16, #tpu.memory_space<vmem>>, %arg8: memref<1x256xf32, #tpu.memory_space<vmem>>, %arg9: memref<1x256xf32, #tpu.memory_space<vmem>>, %arg10: memref<1x256xf32, #tpu.memory_space<vmem>>, %arg11: memref<1x32x32xf32, #tpu.memory_space<vmem>>, %arg12: memref<32x256xbf16, #tpu.memory_space<vmem>>) attributes {dimension_semantics = [#tpu.dimension_semantics<parallel>], iteration_bounds = array<i64: 4>, scalar_prefetch = 0 : i64, scratch_operands = 0 : i64, tpu.core_type = #tpu.core_type<tc>, window_params = [{transform_indices = @transform_0, window_bounds = array<i64: 32, 256>}, {transform_indices = @transform_1, window_bounds = array<i64: 32, 256>}, {pipeline_mode = #tpu.pipeline_mode<synchronous>, transform_indices = @transform_2, window_bounds = array<i64: 256, 256>}, {pipeline_mode = #tpu.pipeline_mode<synchronous>, transform_indices = @transform_3, window_bounds = array<i64: 1, 256>}, {pipeline_mode = #tpu.pipeline_mode<synchronous>, transform_indices = @transform_4, window_bounds = array<i64: 256, 512>}, {pipeline_mode = #tpu.pipeline_mode<synchronous>, transform_indices = @transform_5, window_bounds = array<i64: 1, 512>}, {pipeline_mode = #tpu.pipeline_mode<synchronous>, transform_indices = @transform_6, window_bounds = array<i64: 256, 256>}, {pipeline_mode = #tpu.pipeline_mode<synchronous>, transform_indices = @transform_7, window_bounds = array<i64: 1, 256>}, {pipeline_mode = #tpu.pipeline_mode<synchronous>, transform_indices = @transform_8, window_bounds = array<i64: 1, 256>}, {pipeline_mode = #tpu.pipeline_mode<synchronous>, transform_indices = @transform_9, window_bounds = array<i64: 1, 256>}, {transform_indices = @transform_10, window_bounds = array<i64: 1, 32, 32>}, {transform_indices = @transform_11, window_bounds = array<i64: 32, 256>}]} {
    %c0 = arith.constant 0 : index
    %c0_0 = arith.constant 0 : index
    %0 = vector.load %arg1[%c0, %c0_0] : memref<32x256xbf16, #tpu.memory_space<vmem>>, vector<32x256xbf16>
    %c0_1 = arith.constant 0 : index
    %c0_2 = arith.constant 0 : index
    %1 = vector.load %arg2[%c0_1, %c0_2] : memref<32x256xbf16, #tpu.memory_space<vmem>>, vector<32x256xbf16>
    %c0_3 = arith.constant 0 : index
    %c0_4 = arith.constant 0 : index
    %2 = vector.load %arg3[%c0_3, %c0_4] : memref<256x256xbf16, #tpu.memory_space<vmem>>, vector<256x256xbf16>
    %cst = arith.constant dense<0.000000e+00> : vector<32x256xf32>
    %3 = tpu.matmul %0, %2, %cst {dimension_numbers = #tpu.dot_dimension_numbers<[1], [0], [0], [1], [0, 0, 1, 1], [], []>} : vector<32x256xbf16>, vector<256x256xbf16>, vector<32x256xf32> -> vector<32x256xf32>
    %c0_5 = arith.constant 0 : index
    %c0_6 = arith.constant 0 : index
    %4 = vector.load %arg4[%c0_5, %c0_6] : memref<1x256xf32, #tpu.memory_space<vmem>>, vector<1x256xf32>
    %5 = vector.broadcast %4 : vector<1x256xf32> to vector<32x256xf32>
    %6 = arith.addf %3, %5 : vector<32x256xf32>
    %c0_7 = arith.constant 0 : index
    %c0_8 = arith.constant 0 : index
    %7 = vector.load %arg5[%c0_7, %c0_8] : memref<256x512xbf16, #tpu.memory_space<vmem>>, vector<256x512xbf16>
    %cst_9 = arith.constant dense<0.000000e+00> : vector<32x512xf32>
    %8 = tpu.matmul %1, %7, %cst_9 {dimension_numbers = #tpu.dot_dimension_numbers<[1], [0], [0], [1], [0, 0, 1, 1], [], []>} : vector<32x256xbf16>, vector<256x512xbf16>, vector<32x512xf32> -> vector<32x512xf32>
    %c0_10 = arith.constant 0 : index
    %c0_11 = arith.constant 0 : index
    %9 = vector.load %arg6[%c0_10, %c0_11] : memref<1x512xf32, #tpu.memory_space<vmem>>, vector<1x512xf32>
    %10 = vector.broadcast %9 : vector<1x512xf32> to vector<32x512xf32>
    %11 = arith.addf %8, %10 : vector<32x512xf32>
    %12 = vector.extract_strided_slice %11 {offsets = [0, 0], sizes = [32, 256], strides = [1, 1]} : vector<32x512xf32> to vector<32x256xf32>
    %13 = vector.extract_strided_slice %11 {offsets = [0, 256], sizes = [32, 256], strides = [1, 1]} : vector<32x512xf32> to vector<32x256xf32>
    %c0_12 = arith.constant 0 : index
    %c0_13 = arith.constant 0 : index
    %c0_14 = arith.constant 0 : index
    %14 = vector.load %arg11[%c0_12, %c0_13, %c0_14] : memref<1x32x32xf32, #tpu.memory_space<vmem>>, vector<1x32x32xf32>
    %15 = vector.shape_cast %14 : vector<1x32x32xf32> to vector<32x32xf32>
    %16 = vector.extract_strided_slice %6 {offsets = [0, 0], sizes = [32, 128], strides = [1, 1]} : vector<32x256xf32> to vector<32x128xf32>
    %17 = arith.truncf %16 : vector<32x128xf32> to vector<32x128xbf16>
    %18 = vector.extract_strided_slice %12 {offsets = [0, 0], sizes = [32, 128], strides = [1, 1]} : vector<32x256xf32> to vector<32x128xf32>
    %19 = arith.truncf %18 : vector<32x128xf32> to vector<32x128xbf16>
    %20 = vector.extract_strided_slice %13 {offsets = [0, 0], sizes = [32, 128], strides = [1, 1]} : vector<32x256xf32> to vector<32x128xf32>
    %21 = arith.truncf %20 : vector<32x128xf32> to vector<32x128xbf16>
    %cst_15 = arith.constant dense<0.000000e+00> : vector<32x32xf32>
    %22 = tpu.matmul %17, %19, %cst_15 {dimension_numbers = #tpu.dot_dimension_numbers<[1], [1], [0], [0], [0, 0, 1, 0], [], []>} : vector<32x128xbf16>, vector<32x128xbf16>, vector<32x32xf32> -> vector<32x32xf32>
    %cst_16 = arith.constant 0.0883883461 : f32
    %23 = vector.broadcast %cst_16 : f32 to vector<32x32xf32>
    %24 = arith.mulf %22, %23 : vector<32x32xf32>
    %25 = arith.addf %24, %15 : vector<32x32xf32>
    %cst_17 = arith.constant dense<0xFF800000> : vector<32xf32>
    %26 = vector.multi_reduction <maximumf>, %25, %cst_17 [1] : vector<32x32xf32> to vector<32xf32>
    %27 = vector.shape_cast %26 : vector<32xf32> to vector<32x1xf32>
    %28 = vector.broadcast %27 : vector<32x1xf32> to vector<32x32xf32>
    %29 = arith.subf %25, %28 : vector<32x32xf32>
    %30 = math.exp %29 : vector<32x32xf32>
    %cst_18 = arith.constant dense<0.000000e+00> : vector<32xf32>
    %31 = vector.multi_reduction <add>, %30, %cst_18 [1] : vector<32x32xf32> to vector<32xf32>
    %32 = vector.shape_cast %31 : vector<32xf32> to vector<32x1xf32>
    %33 = tpu.reciprocal %32 {approx = true} : vector<32x1xf32> -> vector<32x1xf32>
    %34 = vector.broadcast %33 : vector<32x1xf32> to vector<32x32xf32>
    %35 = arith.mulf %30, %34 : vector<32x32xf32>
    %36 = arith.truncf %35 : vector<32x32xf32> to vector<32x32xbf16>
    %cst_19 = arith.constant dense<0.000000e+00> : vector<32x128xf32>
    %37 = tpu.matmul %36, %21, %cst_19 {dimension_numbers = #tpu.dot_dimension_numbers<[1], [0], [0], [1], [0, 0, 1, 1], [], []>} : vector<32x32xbf16>, vector<32x128xbf16>, vector<32x128xf32> -> vector<32x128xf32>
    %38 = vector.extract_strided_slice %6 {offsets = [0, 128], sizes = [32, 128], strides = [1, 1]} : vector<32x256xf32> to vector<32x128xf32>
    %39 = arith.truncf %38 : vector<32x128xf32> to vector<32x128xbf16>
    %40 = vector.extract_strided_slice %12 {offsets = [0, 128], sizes = [32, 128], strides = [1, 1]} : vector<32x256xf32> to vector<32x128xf32>
    %41 = arith.truncf %40 : vector<32x128xf32> to vector<32x128xbf16>
    %42 = vector.extract_strided_slice %13 {offsets = [0, 128], sizes = [32, 128], strides = [1, 1]} : vector<32x256xf32> to vector<32x128xf32>
    %43 = arith.truncf %42 : vector<32x128xf32> to vector<32x128xbf16>
    %cst_20 = arith.constant dense<0.000000e+00> : vector<32x32xf32>
    %44 = tpu.matmul %39, %41, %cst_20 {dimension_numbers = #tpu.dot_dimension_numbers<[1], [1], [0], [0], [0, 0, 1, 0], [], []>} : vector<32x128xbf16>, vector<32x128xbf16>, vector<32x32xf32> -> vector<32x32xf32>
    %cst_21 = arith.constant 0.0883883461 : f32
    %45 = vector.broadcast %cst_21 : f32 to vector<32x32xf32>
    %46 = arith.mulf %44, %45 : vector<32x32xf32>
    %47 = arith.addf %46, %15 : vector<32x32xf32>
    %cst_22 = arith.constant dense<0xFF800000> : vector<32xf32>
    %48 = vector.multi_reduction <maximumf>, %47, %cst_22 [1] : vector<32x32xf32> to vector<32xf32>
    %49 = vector.shape_cast %48 : vector<32xf32> to vector<32x1xf32>
    %50 = vector.broadcast %49 : vector<32x1xf32> to vector<32x32xf32>
    %51 = arith.subf %47, %50 : vector<32x32xf32>
    %52 = math.exp %51 : vector<32x32xf32>
    %cst_23 = arith.constant dense<0.000000e+00> : vector<32xf32>
    %53 = vector.multi_reduction <add>, %52, %cst_23 [1] : vector<32x32xf32> to vector<32xf32>
    %54 = vector.shape_cast %53 : vector<32xf32> to vector<32x1xf32>
    %55 = tpu.reciprocal %54 {approx = true} : vector<32x1xf32> -> vector<32x1xf32>
    %56 = vector.broadcast %55 : vector<32x1xf32> to vector<32x32xf32>
    %57 = arith.mulf %52, %56 : vector<32x32xf32>
    %58 = arith.truncf %57 : vector<32x32xf32> to vector<32x32xbf16>
    %cst_24 = arith.constant dense<0.000000e+00> : vector<32x128xf32>
    %59 = tpu.matmul %58, %43, %cst_24 {dimension_numbers = #tpu.dot_dimension_numbers<[1], [0], [0], [1], [0, 0, 1, 1], [], []>} : vector<32x32xbf16>, vector<32x128xbf16>, vector<32x128xf32> -> vector<32x128xf32>
    %60 = tpu.concatenate %37, %59 in 1 : vector<32x128xf32>, vector<32x128xf32> -> vector<32x256xf32>
    %61 = arith.truncf %60 : vector<32x256xf32> to vector<32x256xbf16>
    %c0_25 = arith.constant 0 : index
    %c0_26 = arith.constant 0 : index
    %62 = vector.load %arg7[%c0_25, %c0_26] : memref<256x256xbf16, #tpu.memory_space<vmem>>, vector<256x256xbf16>
    %cst_27 = arith.constant dense<0.000000e+00> : vector<32x256xf32>
    %63 = tpu.matmul %61, %62, %cst_27 {dimension_numbers = #tpu.dot_dimension_numbers<[1], [0], [0], [1], [0, 0, 1, 1], [], []>} : vector<32x256xbf16>, vector<256x256xbf16>, vector<32x256xf32> -> vector<32x256xf32>
    %c0_28 = arith.constant 0 : index
    %c0_29 = arith.constant 0 : index
    %64 = vector.load %arg8[%c0_28, %c0_29] : memref<1x256xf32, #tpu.memory_space<vmem>>, vector<1x256xf32>
    %65 = vector.broadcast %64 : vector<1x256xf32> to vector<32x256xf32>
    %66 = arith.addf %63, %65 : vector<32x256xf32>
    %67 = arith.extf %0 : vector<32x256xbf16> to vector<32x256xf32>
    %68 = arith.addf %67, %66 : vector<32x256xf32>
    %c0_30 = arith.constant 0 : index
    %c0_31 = arith.constant 0 : index
    %69 = vector.load %arg9[%c0_30, %c0_31] : memref<1x256xf32, #tpu.memory_space<vmem>>, vector<1x256xf32>
    %c0_32 = arith.constant 0 : index
    %c0_33 = arith.constant 0 : index
    %70 = vector.load %arg10[%c0_32, %c0_33] : memref<1x256xf32, #tpu.memory_space<vmem>>, vector<1x256xf32>
    %cst_34 = arith.constant dense<0.000000e+00> : vector<32xf32>
    %71 = vector.multi_reduction <add>, %68, %cst_34 [1] : vector<32x256xf32> to vector<32xf32>
    %72 = vector.shape_cast %71 : vector<32xf32> to vector<32x1xf32>
    %cst_35 = arith.constant 2.560000e+02 : f32
    %73 = vector.broadcast %cst_35 : f32 to vector<32x1xf32>
    %74 = arith.divf %72, %73 : vector<32x1xf32>
    %75 = vector.broadcast %74 : vector<32x1xf32> to vector<32x256xf32>
    %76 = arith.subf %68, %75 : vector<32x256xf32>
    %77 = arith.mulf %76, %76 : vector<32x256xf32>
    %cst_36 = arith.constant dense<0.000000e+00> : vector<32xf32>
    %78 = vector.multi_reduction <add>, %77, %cst_36 [1] : vector<32x256xf32> to vector<32xf32>
    %79 = vector.shape_cast %78 : vector<32xf32> to vector<32x1xf32>
    %cst_37 = arith.constant 2.560000e+02 : f32
    %80 = vector.broadcast %cst_37 : f32 to vector<32x1xf32>
    %81 = arith.divf %79, %80 : vector<32x1xf32>
    %82 = vector.broadcast %74 : vector<32x1xf32> to vector<32x256xf32>
    %83 = arith.subf %68, %82 : vector<32x256xf32>
    %cst_38 = arith.constant 9.99999974E-6 : f32
    %84 = vector.broadcast %cst_38 : f32 to vector<32x1xf32>
    %85 = arith.addf %81, %84 : vector<32x1xf32>
    %86 = math.rsqrt %85 : vector<32x1xf32>
    %87 = vector.broadcast %86 : vector<32x1xf32> to vector<32x256xf32>
    %88 = arith.mulf %83, %87 : vector<32x256xf32>
    %89 = vector.broadcast %69 : vector<1x256xf32> to vector<32x256xf32>
    %90 = arith.mulf %88, %89 : vector<32x256xf32>
    %91 = vector.broadcast %70 : vector<1x256xf32> to vector<32x256xf32>
    %92 = arith.addf %90, %91 : vector<32x256xf32>
    %93 = arith.truncf %92 : vector<32x256xf32> to vector<32x256xbf16>
    %c0_39 = arith.constant 0 : index
    %c0_40 = arith.constant 0 : index
    %94 = vector.load %arg12[%c0_39, %c0_40] : memref<32x256xbf16, #tpu.memory_space<vmem>>, vector<32x256xbf16>
    tpu.vector_store %arg12[%c0_39, %c0_40], %93 {strides = array<i32>} : memref<32x256xbf16, #tpu.memory_space<vmem>>, vector<32x256xbf16>,
    return
  }
  func.func @transform_0(%arg0: i32) -> (i32, i32) {
    %c0_i32 = arith.constant 0 : i32
    %c0_i32_0 = arith.constant 0 : i32
    return %arg0, %c0_i32 : i32, i32
  }
  func.func @transform_1(%arg0: i32) -> (i32, i32) {
    %c0_i32 = arith.constant 0 : i32
    %c0_i32_0 = arith.constant 0 : i32
    return %arg0, %c0_i32 : i32, i32
  }
  func.func @transform_2(%arg0: i32) -> (i32, i32) {
    %c0_i32 = arith.constant 0 : i32
    %c0_i32_0 = arith.constant 0 : i32
    %c0_i32_1 = arith.constant 0 : i32
    return %c0_i32, %c0_i32_0 : i32, i32
  }
  func.func @transform_3(%arg0: i32) -> (i32, i32) {
    %c0_i32 = arith.constant 0 : i32
    %c0_i32_0 = arith.constant 0 : i32
    %c0_i32_1 = arith.constant 0 : i32
    return %c0_i32, %c0_i32_0 : i32, i32
  }
  func.func @transform_4(%arg0: i32) -> (i32, i32) {
    %c0_i32 = arith.constant 0 : i32
    %c0_i32_0 = arith.constant 0 : i32
    %c0_i32_1 = arith.constant 0 : i32
    return %c0_i32, %c0_i32_0 : i32, i32
  }
  func.func @transform_5(%arg0: i32) -> (i32, i32) {
    %c0_i32 = arith.constant 0 : i32
    %c0_i32_0 = arith.constant 0 : i32
    %c0_i32_1 = arith.constant 0 : i32
    return %c0_i32, %c0_i32_0 : i32, i32
  }
  func.func @transform_6(%arg0: i32) -> (i32, i32) {
    %c0_i32 = arith.constant 0 : i32
    %c0_i32_0 = arith.constant 0 : i32
    %c0_i32_1 = arith.constant 0 : i32
    return %c0_i32, %c0_i32_0 : i32, i32
  }
  func.func @transform_7(%arg0: i32) -> (i32, i32) {
    %c0_i32 = arith.constant 0 : i32
    %c0_i32_0 = arith.constant 0 : i32
    %c0_i32_1 = arith.constant 0 : i32
    return %c0_i32, %c0_i32_0 : i32, i32
  }
  func.func @transform_8(%arg0: i32) -> (i32, i32) {
    %c0_i32 = arith.constant 0 : i32
    %c0_i32_0 = arith.constant 0 : i32
    %c0_i32_1 = arith.constant 0 : i32
    return %c0_i32, %c0_i32_0 : i32, i32
  }
  func.func @transform_9(%arg0: i32) -> (i32, i32) {
    %c0_i32 = arith.constant 0 : i32
    %c0_i32_0 = arith.constant 0 : i32
    %c0_i32_1 = arith.constant 0 : i32
    return %c0_i32, %c0_i32_0 : i32, i32
  }
  func.func @transform_10(%arg0: i32) -> (i32, i32, i32) {
    %c0_i32 = arith.constant 0 : i32
    %c0_i32_0 = arith.constant 0 : i32
    %c0_i32_1 = arith.constant 0 : i32
    return %arg0, %c0_i32, %c0_i32_0 : i32, i32, i32
  }
  func.func @transform_11(%arg0: i32) -> (i32, i32) {
    %c0_i32 = arith.constant 0 : i32
    %c0_i32_0 = arith.constant 0 : i32
    return %arg0, %c0_i32 : i32, i32
  }
}

module attributes {stable_mosaic.version = 11 : i64} {
  func.func @_ln_linear_kernel(%arg0: i32, %arg1: i32, %arg2: memref<128x256xbf16, #tpu.memory_space<vmem>>, %arg3: memref<1x256xf32, #tpu.memory_space<vmem>>, %arg4: memref<1x256xf32, #tpu.memory_space<vmem>>, %arg5: memref<256x256xbf16, #tpu.memory_space<vmem>>, %arg6: memref<1x256xf32, #tpu.memory_space<vmem>>, %arg7: memref<128x256xf32, #tpu.memory_space<vmem>>) attributes {dimension_semantics = [#tpu.dimension_semantics<parallel>, #tpu.dimension_semantics<parallel>], iteration_bounds = array<i64: 1, 2>, scalar_prefetch = 0 : i64, scratch_operands = 0 : i64, tpu.core_type = #tpu.core_type<tc>, window_params = [{transform_indices = @transform_0, window_bounds = array<i64: 128, 256>}, {pipeline_mode = #tpu.pipeline_mode<synchronous>, transform_indices = @transform_1, window_bounds = array<i64: 1, 256>}, {pipeline_mode = #tpu.pipeline_mode<synchronous>, transform_indices = @transform_2, window_bounds = array<i64: 1, 256>}, {transform_indices = @transform_3, window_bounds = array<i64: 256, 256>}, {transform_indices = @transform_4, window_bounds = array<i64: 1, 256>}, {transform_indices = @transform_5, window_bounds = array<i64: 128, 256>}]} {
    %c0 = arith.constant 0 : index
    %c0_0 = arith.constant 0 : index
    %0 = vector.load %arg2[%c0, %c0_0] : memref<128x256xbf16, #tpu.memory_space<vmem>>, vector<128x256xbf16>
    %1 = arith.extf %0 : vector<128x256xbf16> to vector<128x256xf32>
    %c0_1 = arith.constant 0 : index
    %c0_2 = arith.constant 0 : index
    %2 = vector.load %arg3[%c0_1, %c0_2] : memref<1x256xf32, #tpu.memory_space<vmem>>, vector<1x256xf32>
    %c0_3 = arith.constant 0 : index
    %c0_4 = arith.constant 0 : index
    %3 = vector.load %arg4[%c0_3, %c0_4] : memref<1x256xf32, #tpu.memory_space<vmem>>, vector<1x256xf32>
    %cst = arith.constant dense<0.000000e+00> : vector<128xf32>
    %4 = vector.multi_reduction <add>, %1, %cst [1] : vector<128x256xf32> to vector<128xf32>
    %5 = vector.shape_cast %4 : vector<128xf32> to vector<128x1xf32>
    %cst_5 = arith.constant 2.560000e+02 : f32
    %6 = vector.broadcast %cst_5 : f32 to vector<128x1xf32>
    %7 = arith.divf %5, %6 : vector<128x1xf32>
    %8 = vector.broadcast %7 : vector<128x1xf32> to vector<128x256xf32>
    %9 = arith.subf %1, %8 : vector<128x256xf32>
    %10 = arith.mulf %9, %9 : vector<128x256xf32>
    %cst_6 = arith.constant dense<0.000000e+00> : vector<128xf32>
    %11 = vector.multi_reduction <add>, %10, %cst_6 [1] : vector<128x256xf32> to vector<128xf32>
    %12 = vector.shape_cast %11 : vector<128xf32> to vector<128x1xf32>
    %cst_7 = arith.constant 2.560000e+02 : f32
    %13 = vector.broadcast %cst_7 : f32 to vector<128x1xf32>
    %14 = arith.divf %12, %13 : vector<128x1xf32>
    %15 = vector.broadcast %7 : vector<128x1xf32> to vector<128x256xf32>
    %16 = arith.subf %1, %15 : vector<128x256xf32>
    %cst_8 = arith.constant 9.99999974E-6 : f32
    %17 = vector.broadcast %cst_8 : f32 to vector<128x1xf32>
    %18 = arith.addf %14, %17 : vector<128x1xf32>
    %19 = math.rsqrt %18 : vector<128x1xf32>
    %20 = vector.broadcast %19 : vector<128x1xf32> to vector<128x256xf32>
    %21 = arith.mulf %16, %20 : vector<128x256xf32>
    %22 = vector.broadcast %2 : vector<1x256xf32> to vector<128x256xf32>
    %23 = arith.mulf %21, %22 : vector<128x256xf32>
    %24 = vector.broadcast %3 : vector<1x256xf32> to vector<128x256xf32>
    %25 = arith.addf %23, %24 : vector<128x256xf32>
    %26 = arith.truncf %25 : vector<128x256xf32> to vector<128x256xbf16>
    %c0_9 = arith.constant 0 : index
    %c0_10 = arith.constant 0 : index
    %27 = vector.load %arg5[%c0_9, %c0_10] : memref<256x256xbf16, #tpu.memory_space<vmem>>, vector<256x256xbf16>
    %cst_11 = arith.constant dense<0.000000e+00> : vector<128x256xf32>
    %28 = tpu.matmul %26, %27, %cst_11 {dimension_numbers = #tpu.dot_dimension_numbers<[1], [0], [0], [1], [0, 0, 1, 1], [], []>} : vector<128x256xbf16>, vector<256x256xbf16>, vector<128x256xf32> -> vector<128x256xf32>
    %c0_12 = arith.constant 0 : index
    %c0_13 = arith.constant 0 : index
    %29 = vector.load %arg6[%c0_12, %c0_13] : memref<1x256xf32, #tpu.memory_space<vmem>>, vector<1x256xf32>
    %30 = vector.broadcast %29 : vector<1x256xf32> to vector<128x256xf32>
    %31 = arith.addf %28, %30 : vector<128x256xf32>
    %c0_14 = arith.constant 0 : index
    %c0_15 = arith.constant 0 : index
    %32 = vector.load %arg7[%c0_14, %c0_15] : memref<128x256xf32, #tpu.memory_space<vmem>>, vector<128x256xf32>
    tpu.vector_store %arg7[%c0_14, %c0_15], %31 {strides = array<i32>} : memref<128x256xf32, #tpu.memory_space<vmem>>, vector<128x256xf32>,
    return
  }
  func.func @transform_0(%arg0: i32, %arg1: i32) -> (i32, i32) {
    %c0_i32 = arith.constant 0 : i32
    %c0_i32_0 = arith.constant 0 : i32
    return %arg0, %c0_i32 : i32, i32
  }
  func.func @transform_1(%arg0: i32, %arg1: i32) -> (i32, i32) {
    %c0_i32 = arith.constant 0 : i32
    %c0_i32_0 = arith.constant 0 : i32
    %c0_i32_1 = arith.constant 0 : i32
    return %c0_i32, %c0_i32_0 : i32, i32
  }
  func.func @transform_2(%arg0: i32, %arg1: i32) -> (i32, i32) {
    %c0_i32 = arith.constant 0 : i32
    %c0_i32_0 = arith.constant 0 : i32
    %c0_i32_1 = arith.constant 0 : i32
    return %c0_i32, %c0_i32_0 : i32, i32
  }
  func.func @transform_3(%arg0: i32, %arg1: i32) -> (i32, i32) {
    %c0_i32 = arith.constant 0 : i32
    %c0_i32_0 = arith.constant 0 : i32
    return %c0_i32, %arg1 : i32, i32
  }
  func.func @transform_4(%arg0: i32, %arg1: i32) -> (i32, i32) {
    %c0_i32 = arith.constant 0 : i32
    %c0_i32_0 = arith.constant 0 : i32
    return %c0_i32, %arg1 : i32, i32
  }
  func.func @transform_5(%arg0: i32, %arg1: i32) -> (i32, i32) {
    %c0_i32 = arith.constant 0 : i32
    return %arg0, %arg1 : i32, i32
  }
}

</mosaic_0001>

<bundles_post_ra>
// kernel: seq2seq_forward.16
= control target key start
LH: loop header
LB: loop body
LE: loop exit
PB: predicated region body
PF: predicated region fallthrough
CT: control target
= control target key end

     0   :  { %s1133_s0 = inlined_call_operand.vmem [shape: bf16[128,256], index: 0, kind: input, shape index: {}]   ;;  %s1134_s1 = inlined_call_operand.vmem [shape: f32[1,256], index: 1, kind: input, shape index: {}]   ;;  %s1135_s2 = inlined_call_operand.vmem [shape: f32[1,256], index: 2, kind: input, shape index: {}]   ;;  %s1136_s3 = inlined_call_operand.vmem [shape: bf16[128,256], index: 3, kind: output, shape index: {}]  }
   0x1   :  { %v610_v0 = vld [vmem:[%s1133_s0] sm:$0xff]  ;;  %v615_v1 = vld [vmem:[%s1133_s0 + $0x10] sm:$0xff]  ;;  %v620_v2 = vld [vmem:[%s1133_s0 + $0x8] sm:$0xff] }
   0x2   :  { %v30_v3 = vunpack.c.l.bf16 %v610_v0  ;;  %v31_v4 = vunpack.c.h.bf16 %v610_v0  ;;  %v34_v5 = vunpack.c.l.bf16 %v615_v1  ;;  %v35_v6 = vunpack.c.h.bf16 %v615_v1  ;;  %v629_v7 = vld [vmem:[%s1133_s0 + $0x18] sm:$0xff]  ;;  %v634_v8 = vld [vmem:[%s1133_s0 + $0x20] sm:$0xff]  ;;  %v643_v13 = vld [vmem:[%s1133_s0 + $0x28] sm:$0xff] }
   0x3   :  { %v32_v9 = vunpack.c.l.bf16 %v620_v2  ;;  %v33_v10 = vunpack.c.h.bf16 %v620_v2  ;;  %v36_v11 = vunpack.c.l.bf16 %v629_v7  ;;  %v37_v12 = vunpack.c.h.bf16 %v629_v7  ;;  %v668_v22 = vld [vmem:[%s1133_s0 + $0x30] sm:$0xff]  ;;  %v673_v23 = vld [vmem:[%s1133_s0 + $0x38] sm:$0xff]  ;;  %v690_v30 = vld [vmem:[%s1133_s0 + $0x40] sm:$0xff] }
   0x4   :  { %v64_v14 = vadd.f32 %v31_v4, %v30_v3  ;;  %v70_v15 = vadd.f32 %v35_v6, %v34_v5  ;;  %v38_v16 = vunpack.c.l.bf16 %v634_v8  ;;  %v39_v17 = vunpack.c.h.bf16 %v634_v8  ;;  %v695_v31 = vld [vmem:[%s1133_s0 + $0x48] sm:$0xff]  ;;  %v712_v38 = vld [vmem:[%s1133_s0 + $0x50] sm:$0xff]  ;;  %v717_v39 = vld [vmem:[%s1133_s0 + $0x58] sm:$0xff] }
   0x5   :  { %v67_v18 = vadd.f32 %v33_v10, %v32_v9  ;;  %v73_v19 = vadd.f32 %v37_v12, %v36_v11  ;;  %v40_v20 = vunpack.c.l.bf16 %v643_v13  ;;  %v41_v21 = vunpack.c.h.bf16 %v643_v13  ;;  %v734_v46 = vld [vmem:[%s1133_s0 + $0x60] sm:$0xff]  ;;  %v739_v47 = vld [vmem:[%s1133_s0 + $0x68] sm:$0xff]  ;;  %v756_v54 = vld [vmem:[%s1133_s0 + $0x70] sm:$0xff] }
   0x6   :  { %65 = vadd.xlane.f32.xlu0 %v64_v14  ;;  %71 = vadd.xlane.f32.xlu1 %v70_v15  ;;  %v76_v24 = vadd.f32 %v39_v17, %v38_v16  ;;  %v42_v25 = vunpack.c.l.bf16 %v668_v22  ;;  %v43_v27 = vunpack.c.h.bf16 %v668_v22  ;;  %v44_v28 = vunpack.c.l.bf16 %v673_v23  ;;  %v761_v55 = vld [vmem:[%s1133_s0 + $0x78] sm:$0xff] }
   0x7   :  { %v79_v26 = vadd.f32 %v41_v21, %v40_v20  ;;  %v45_v29 = vunpack.c.h.bf16 %v673_v23  ;;  %v46_v32 = vunpack.c.l.bf16 %v690_v30  ;;  %v47_v33 = vunpack.c.h.bf16 %v690_v30 }
   0x8   :  { %v82_v34 = vadd.f32 %v43_v27, %v42_v25  ;;  %v48_v36 = vunpack.c.l.bf16 %v695_v31  ;;  %v49_v37 = vunpack.c.h.bf16 %v695_v31  ;;  %v50_v41 = vunpack.c.l.bf16 %v712_v38 }
   0x9   :  { %v85_v35 = vadd.f32 %v45_v29, %v44_v28  ;;  %v88_v40 = vadd.f32 %v47_v33, %v46_v32  ;;  %v51_v43 = vunpack.c.h.bf16 %v712_v38  ;;  %v52_v44 = vunpack.c.l.bf16 %v717_v39 }
   0xa   :  { %68 = vadd.xlane.f32.xlu0 %v67_v18  ;;  %74 = vadd.xlane.f32.xlu1 %v73_v19  ;;  %v91_v42 = vadd.f32 %v49_v37, %v48_v36  ;;  %v53_v45 = vunpack.c.h.bf16 %v717_v39  ;;  %v54_v48 = vunpack.c.l.bf16 %v734_v46  ;;  %v55_v49 = vunpack.c.h.bf16 %v734_v46 }
   0xb   :  { %v94_v50 = vadd.f32 %v51_v43, %v50_v41  ;;  %v56_v52 = vunpack.c.l.bf16 %v739_v47  ;;  %v57_v53 = vunpack.c.h.bf16 %v739_v47  ;;  %v58_v57 = vunpack.c.l.bf16 %v756_v54 }
   0xc   :  { %v97_v51 = vadd.f32 %v53_v45, %v52_v44  ;;  %v100_v56 = vadd.f32 %v55_v49, %v54_v48  ;;  %v59_v59 = vunpack.c.h.bf16 %v756_v54  ;;  %v60_v60 = vunpack.c.l.bf16 %v761_v55 }
   0xd   :  { %v103_v58 = vadd.f32 %v57_v53, %v56_v52  ;;  %v61_v61 = vunpack.c.h.bf16 %v761_v55 }
   0xe   :  { %77 = vadd.xlane.f32.xlu0 %v76_v24  ;;  %80 = vadd.xlane.f32.xlu1 %v79_v26  ;;  %v106_v62 = vadd.f32 %v59_v59, %v58_v57 }
   0xf   :  { %v109_v63 = vadd.f32 %v61_v61, %v60_v60 }
  0x12   :  { %83 = vadd.xlane.f32.xlu0 %v82_v34  ;;  %86 = vadd.xlane.f32.xlu1 %v85_v35 }
  0x16   :  { %89 = vadd.xlane.f32.xlu0 %v88_v40  ;;  %92 = vadd.xlane.f32.xlu1 %v91_v42 }
  0x1a   :  { %95 = vadd.xlane.f32.xlu0 %v94_v50  ;;  %98 = vadd.xlane.f32.xlu1 %v97_v51 }
  0x1e   :  { %101 = vadd.xlane.f32.xlu0 %v100_v56  ;;  %104 = vadd.xlane.f32.xlu1 %v103_v58 }
  0x22   :  { %107 = vadd.xlane.f32.xlu0 %v106_v62  ;;  %110 = vadd.xlane.f32.xlu1 %v109_v63 }
  0x8f   :  { %v66_v14 = vpop.xlane.xlu0 %65  ;;  %v72_v15 = vpop.xlane.xlu1 %71 }
  0x90   :  { %v113_v18 = vmul.f32 0.00390625, %v66_v14  ;;  %v115_v19 = vmul.f32 0.00390625, %v72_v15 }
  0x92   :  { %v785_v24 = vsub.f32 %v30_v3, %v113_v18  ;;  %v789_v26 = vsub.f32 %v31_v4, %v113_v18  ;;  %v793_v34 = vsub.f32 %v34_v5, %v115_v19  ;;  %v797_v35 = vsub.f32 %v35_v6, %v115_v19 }
  0x93   :  { %v69_v40 = vpop.xlane.xlu0 %68  ;;  %v75_v42 = vpop.xlane.xlu1 %74 }
  0x94   :  { %v114_v50 = vmul.f32 0.00390625, %v69_v40  ;;  %v116_v51 = vmul.f32 0.00390625, %v75_v42  ;;  %v161_v3 = vmul.f32 %v785_v24, %v785_v24  ;;  %v162_v0 = vmul.f32 %v789_v26, %v789_v26 }
  0x95   :  { %v165_v4 = vmul.f32 %v793_v34, %v793_v34  ;;  %v166_v5 = vmul.f32 %v797_v35, %v797_v35 }
  0x96   :  { %v809_v1 = vsub.f32 %v32_v9, %v114_v50  ;;  %v813_v6 = vsub.f32 %v33_v10, %v114_v50  ;;  %v817_v56 = vsub.f32 %v36_v11, %v116_v51  ;;  %v821_v58 = vsub.f32 %v37_v12, %v116_v51 }
  0x97   :  { %v78_v62 = vpop.xlane.xlu0 %77  ;;  %v193_v63 = vadd.f32 %v162_v0, %v161_v3  ;;  %v81_v14 = vpop.xlane.xlu1 %80  ;;  %v199_v10 = vadd.f32 %v166_v5, %v165_v4 }
  0x98   :  { %v117_v15 = vmul.f32 0.00390625, %v78_v62  ;;  %v118_v18 = vmul.f32 0.00390625, %v81_v14  ;;  %v163_v9 = vmul.f32 %v809_v1, %v809_v1  ;;  %v164_v2 = vmul.f32 %v813_v6, %v813_v6 }
  0x99   :  { %194 = vadd.xlane.f32.xlu0 %v193_v63  ;;  %v167_v11 = vmul.f32 %v817_v56, %v817_v56  ;;  %v168_v7 = vmul.f32 %v821_v58, %v821_v58 }
  0x9a   :  { %v833_v12 = vsub.f32 %v38_v16, %v117_v15  ;;  %v837_v19 = vsub.f32 %v39_v17, %v117_v15  ;;  %v841_v40 = vsub.f32 %v40_v20, %v118_v18  ;;  %v845_v42 = vsub.f32 %v41_v21, %v118_v18 }
  0x9b   :  { %v84_v50 = vpop.xlane.xlu0 %83  ;;  %v196_v51 = vadd.f32 %v164_v2, %v163_v9  ;;  %v87_v3 = vpop.xlane.xlu1 %86  ;;  %v202_v17 = vadd.f32 %v168_v7, %v167_v11 }
  0x9c   :  { %v119_v0 = vmul.f32 0.00390625, %v84_v50  ;;  %v120_v4 = vmul.f32 0.00390625, %v87_v3  ;;  %v169_v16 = vmul.f32 %v833_v12, %v833_v12  ;;  %v170_v8 = vmul.f32 %v837_v19, %v837_v19 }
  0x9d   :  { %200 = vadd.xlane.f32.xlu0 %v199_v10  ;;  %197 = vadd.xlane.f32.xlu1 %v196_v51  ;;  %v171_v20 = vmul.f32 %v841_v40, %v841_v40  ;;  %v172_v13 = vmul.f32 %v845_v42, %v845_v42 }
  0x9e   :  { %v857_v21 = vsub.f32 %v42_v25, %v119_v0  ;;  %v861_v5 = vsub.f32 %v43_v27, %v119_v0  ;;  %v865_v62 = vsub.f32 %v44_v28, %v120_v4  ;;  %v869_v63 = vsub.f32 %v45_v29, %v120_v4 }
  0x9f   :  { %v90_v14 = vpop.xlane.xlu0 %89  ;;  %v205_v15 = vadd.f32 %v170_v8, %v169_v16  ;;  %v93_v18 = vpop.xlane.xlu1 %92  ;;  %v208_v27 = vadd.f32 %v172_v13, %v171_v20 }
  0xa0   :  { %v121_v9 = vmul.f32 0.00390625, %v90_v14  ;;  %v122_v2 = vmul.f32 0.00390625, %v93_v18  ;;  %v173_v25 = vmul.f32 %v857_v21, %v857_v21  ;;  %v174_v22 = vmul.f32 %v861_v5, %v861_v5 }
  0xa1   :  { %203 = vadd.xlane.f32.xlu1 %v202_v17  ;;  %206 = vadd.xlane.f32.xlu0 %v205_v15  ;;  %v175_v28 = vmul.f32 %v865_v62, %v865_v62  ;;  %v176_v23 = vmul.f32 %v869_v63, %v869_v63 }
  0xa2   :  { %v881_v29 = vsub.f32 %v46_v32, %v121_v9  ;;  %v885_v10 = vsub.f32 %v47_v33, %v121_v9  ;;  %v889_v11 = vsub.f32 %v48_v36, %v122_v2  ;;  %v893_v7 = vsub.f32 %v49_v37, %v122_v2 }
  0xa3   :  { %v96_v50 = vpop.xlane.xlu0 %95  ;;  %v211_v51 = vadd.f32 %v174_v22, %v173_v25  ;;  %v99_v3 = vpop.xlane.xlu1 %98  ;;  %v214_v33 = vadd.f32 %v176_v23, %v175_v28 }
  0xa4   :  { %v123_v0 = vmul.f32 0.00390625, %v96_v50  ;;  %v124_v4 = vmul.f32 0.00390625, %v99_v3  ;;  %v177_v32 = vmul.f32 %v881_v29, %v881_v29  ;;  %v178_v30 = vmul.f32 %v885_v10, %v885_v10 }
  0xa5   :  { %209 = vadd.xlane.f32.xlu1 %v208_v27  ;;  %212 = vadd.xlane.f32.xlu0 %v211_v51  ;;  %v179_v36 = vmul.f32 %v889_v11, %v889_v11  ;;  %v180_v31 = vmul.f32 %v893_v7, %v893_v7 }
  0xa6   :  { %v905_v37 = vsub.f32 %v50_v41, %v123_v0  ;;  %v909_v16 = vsub.f32 %v51_v43, %v123_v0  ;;  %v913_v8 = vsub.f32 %v52_v44, %v124_v4  ;;  %v917_v17 = vsub.f32 %v53_v45, %v124_v4 }
  0xa7   :  { %v102_v20 = vpop.xlane.xlu0 %101  ;;  %v217_v13 = vadd.f32 %v178_v30, %v177_v32  ;;  %v105_v14 = vpop.xlane.xlu1 %104  ;;  %v220_v43 = vadd.f32 %v180_v31, %v179_v36  ;;  %v322_v31 = vlaneseq }
  0xa8   :  { %v125_v15 = vmul.f32 0.00390625, %v102_v20  ;;  %v126_v18 = vmul.f32 0.00390625, %v105_v14  ;;  %v181_v41 = vmul.f32 %v905_v37, %v905_v37  ;;  %v182_v38 = vmul.f32 %v909_v16, %v909_v16 }
  0xa9   :  { %215 = vadd.xlane.f32.xlu1 %v214_v33  ;;  %218 = vadd.xlane.f32.xlu0 %v217_v13  ;;  %v183_v44 = vmul.f32 %v913_v8, %v913_v8  ;;  %v184_v39 = vmul.f32 %v917_v17, %v917_v17 }
  0xaa   :  { %v929_v45 = vsub.f32 %v54_v48, %v125_v15  ;;  %v933_v9 = vsub.f32 %v55_v49, %v125_v15  ;;  %v937_v2 = vsub.f32 %v56_v52, %v126_v18  ;;  %v941_v25 = vsub.f32 %v57_v53, %v126_v18 }
  0xab   :  { %v108_v22 = vpop.xlane.xlu0 %107  ;;  %v223_v27 = vadd.f32 %v182_v38, %v181_v41  ;;  %v111_v28 = vpop.xlane.xlu1 %110  ;;  %v226_v49 = vadd.f32 %v184_v39, %v183_v44  ;;  %v323_v38 = vshrl.u32 %v322_v31, 7 }
  0xac   :  { %v127_v23 = vmul.f32 0.00390625, %v108_v22  ;;  %v128_v50 = vmul.f32 0.00390625, %v111_v28  ;;  %v185_v48 = vmul.f32 %v929_v45, %v929_v45  ;;  %v186_v46 = vmul.f32 %v933_v9, %v933_v9 }
  0xad   :  { %221 = vadd.xlane.f32.xlu1 %v220_v43  ;;  %224 = vadd.xlane.f32.xlu0 %v223_v27  ;;  %v187_v52 = vmul.f32 %v937_v2, %v937_v2  ;;  %v188_v47 = vmul.f32 %v941_v25, %v941_v25 }
  0xae   :  { %v953_v53 = vsub.f32 %v58_v57, %v127_v23  ;;  %v957_v51 = vsub.f32 %v59_v59, %v127_v23  ;;  %v961_v3 = vsub.f32 %v60_v60, %v128_v50  ;;  %v965_v0 = vsub.f32 %v61_v61, %v128_v50 }
  0xaf   :  { %v229_v4 = vadd.f32 %v186_v46, %v185_v48  ;;  %v232_v54 = vadd.f32 %v188_v47, %v187_v52  ;;  %v324_v23 = vsub.s32 0, %v323_v38  ;;  %v62_v46 = vld [vmem:[%s1134_s1] sm:$0x3] }
  0xb0   :  { %v189_v32 = vmul.f32 %v953_v53, %v953_v53  ;;  %v190_v57 = vmul.f32 %v957_v51, %v957_v51  ;;  %v191_v59 = vmul.f32 %v961_v3, %v961_v3  ;;  %v192_v60 = vmul.f32 %v965_v0, %v965_v0 }
  0xb1   :  { %227 = vadd.xlane.f32.xlu1 %v226_v49  ;;  %230 = vadd.xlane.f32.xlu0 %v229_v4  ;;  %v328_v49 = vsub.s32 1, %v323_v38  ;;  %v63_v4 = vld [vmem:[%s1135_s2] sm:$0x3] }
  0xb2   :  { %v235_v30 = vadd.f32 %v190_v57, %v189_v32  ;;  %v238_v55 = vadd.f32 %v192_v60, %v191_v59 }
  0xb3   :  { %v987_v31 = vrot.slane %v63_v4, %v328_v49 }
  0xb5   :  { %233 = vadd.xlane.f32.xlu1 %v232_v54  ;;  %236 = vadd.xlane.f32.xlu0 %v235_v30  ;;  %v981_v54 = vrot.slane %v62_v46, %v324_v23  ;;  %v983_v30 = vrot.slane %v62_v46, %v328_v49 }
  0xb9   :  { %239 = vadd.xlane.f32.xlu1 %v238_v55 }
 0x122   :  { %v195_v61 = vpop.xlane.xlu0 %194 }
 0x123   :  { %v241_v33 = vmul.f32 0.00390625, %v195_v61 }
 0x125   :  { %v257_v36 = vadd.f32 1e-05, %v241_v33 }
 0x126   :  { %v198_v20 = vpop.xlane.xlu1 %197  ;;  %v201_v13 = vpop.xlane.xlu0 %200 }
 0x127   :  { %555 = vrsqrt.f32 %v257_v36  ;;  %v242_v14 = vmul.f32 0.00390625, %v198_v20  ;;  %v243_v15 = vmul.f32 0.00390625, %v201_v13  ;;  %v985_v36 = vrot.slane %v63_v4, %v324_v23 }
 0x129   :  { %v258_v18 = vadd.f32 1e-05, %v242_v14  ;;  %v259_v41 = vadd.f32 1e-05, %v243_v15 }
 0x12a   :  { %v204_v43 = vpop.xlane.xlu1 %203  ;;  %v207_v44 = vpop.xlane.xlu0 %206 }
 0x12b   :  { %557 = vrsqrt.f32 %v258_v18  ;;  %v244_v39 = vmul.f32 0.00390625, %v204_v43  ;;  %v245_v22 = vmul.f32 0.00390625, %v207_v44 }
 0x12c   :  { %559 = vrsqrt.f32 %v259_v41 }
 0x12d   :  { %v260_v27 = vadd.f32 1e-05, %v244_v39  ;;  %v261_v28 = vadd.f32 1e-05, %v245_v22 }
 0x12e   :  { %v210_v50 = vpop.xlane.xlu1 %209  ;;  %v213_v48 = vpop.xlane.xlu0 %212 }
 0x12f   :  { %561 = vrsqrt.f32 %v260_v27  ;;  %v246_v52 = vmul.f32 0.00390625, %v210_v50  ;;  %v247_v47 = vmul.f32 0.00390625, %v213_v48 }
 0x130   :  { %563 = vrsqrt.f32 %v261_v28 }
 0x131   :  { %v262_v32 = vadd.f32 1e-05, %v246_v52  ;;  %v263_v57 = vadd.f32 1e-05, %v247_v47 }
 0x132   :  { %v216_v59 = vpop.xlane.xlu1 %215  ;;  %v219_v60 = vpop.xlane.xlu0 %218 }
 0x133   :  { %565 = vrsqrt.f32 %v262_v32  ;;  %v248_v55 = vmul.f32 0.00390625, %v216_v59  ;;  %v249_v61 = vmul.f32 0.00390625, %v219_v60 }
 0x134   :  { %v556_v33 = vpop.eup %555  ;;  %567 = vrsqrt.f32 %v263_v57 }
 0x135   :  { %v289_v20 = vmul.f32 %v556_v33, %v785_v24  ;;  %v290_v13 = vmul.f32 %v556_v33, %v789_v26  ;;  %v264_v14 = vadd.f32 1e-05, %v248_v55  ;;  %v265_v15 = vadd.f32 1e-05, %v249_v61 }
 0x136   :  { %v222_v18 = vpop.xlane.xlu1 %221  ;;  %v225_v41 = vpop.xlane.xlu0 %224 }
 0x137   :  { %v332_v38 = vmul.f32 %v981_v54, %v289_v20  ;;  %v333_v43 = vmul.f32 %v983_v30, %v290_v13  ;;  %569 = vrsqrt.f32 %v264_v14  ;;  %v250_v44 = vmul.f32 0.00390625, %v222_v18 }
 0x138   :  { %v558_v39 = vpop.eup %557  ;;  %571 = vrsqrt.f32 %v265_v15  ;;  %v251_v22 = vmul.f32 0.00390625, %v225_v41 }
 0x139   :  { %v560_v27 = vpop.eup %559  ;;  %v375_v28 = vadd.f32 %v985_v36, %v332_v38  ;;  %v376_v24 = vadd.f32 %v987_v31, %v333_v43  ;;  %v291_v26 = vmul.f32 %v558_v39, %v809_v1  ;;  %v292_v23 = vmul.f32 %v558_v39, %v813_v6 }
 0x13a   :  { %v293_v50 = vmul.f32 %v560_v27, %v793_v34  ;;  %v294_v48 = vmul.f32 %v560_v27, %v797_v35  ;;  %v266_v46 = vadd.f32 1e-05, %v250_v44  ;;  %v267_v49 = vadd.f32 1e-05, %v251_v22  ;;  %v228_v52 = vpop.xlane.xlu1 %227  ;;  %v231_v47 = vpop.xlane.xlu0 %230 }
 0x13b   :  { %v539_v4 = vpack.c.bf16 %v376_v24, %v375_v28  ;;  %v334_v32 = vmul.f32 %v981_v54, %v291_v26  ;;  %v335_v57 = vmul.f32 %v983_v30, %v292_v23  ;;  %v252_v59 = vmul.f32 0.00390625, %v228_v52 }
 0x13c   :  { %v562_v60 = vpop.eup %561  ;;  %v336_v55 = vmul.f32 %v981_v54, %v293_v50  ;;  %v337_v1 = vmul.f32 %v983_v30, %v294_v48  ;;  %573 = vrsqrt.f32 %v266_v46  ;;  %v253_v6 = vmul.f32 0.00390625, %v231_v47 }
 0x13d   :  { %v564_v34 = vpop.eup %563  ;;  %503 = vst [vmem:[%s1136_s3] sm:$0xff] %v539_v4  ;;  %v377_v35 = vadd.f32 %v985_v36, %v334_v32  ;;  %v378_v61 = vadd.f32 %v987_v31, %v335_v57  ;;  %v295_v33 = vmul.f32 %v562_v60, %v817_v56  ;;  %v296_v20 = vmul.f32 %v562_v60, %v821_v58 }
 0x13e   :  { %v379_v13 = vadd.f32 %v985_v36, %v336_v55  ;;  %v380_v14 = vadd.f32 %v987_v31, %v337_v1  ;;  %v297_v15 = vmul.f32 %v564_v34, %v833_v12  ;;  %v298_v18 = vmul.f32 %v564_v34, %v837_v19  ;;  %v234_v27 = vpop.xlane.xlu1 %233 }
 0x13f   :  { %v540_v41 = vpack.c.bf16 %v378_v61, %v377_v35  ;;  %v338_v38 = vmul.f32 %v981_v54, %v295_v33  ;;  %v339_v43 = vmul.f32 %v983_v30, %v296_v20  ;;  %575 = vrsqrt.f32 %v267_v49  ;;  %v237_v61 = vpop.xlane.xlu0 %236 }
 0x140   :  { %v566_v44 = vpop.eup %565  ;;  %v541_v39 = vpack.c.bf16 %v380_v14, %v379_v13  ;;  %v340_v56 = vmul.f32 %v981_v54, %v297_v15  ;;  %v341_v58 = vmul.f32 %v983_v30, %v298_v18  ;;  %v268_v22 = vadd.f32 1e-05, %v252_v59 }
 0x141   :  { %v568_v28 = vpop.eup %567  ;;  %504 = vst [vmem:[%s1136_s3 + $0x8] sm:$0xff] %v540_v41  ;;  %v381_v12 = vadd.f32 %v985_v36, %v338_v38  ;;  %v382_v19 = vadd.f32 %v987_v31, %v339_v43  ;;  %v299_v24 = vmul.f32 %v566_v44, %v841_v40  ;;  %v300_v26 = vmul.f32 %v566_v44, %v845_v42 }
 0x142   :  { %505 = vst [vmem:[%s1136_s3 + $0x10] sm:$0xff] %v541_v39  ;;  %v383_v23 = vadd.f32 %v985_v36, %v340_v56  ;;  %v384_v50 = vadd.f32 %v987_v31, %v341_v58  ;;  %v301_v48 = vmul.f32 %v568_v28, %v857_v21  ;;  %v302_v46 = vmul.f32 %v568_v28, %v861_v5  ;;  %v240_v33 = vpop.xlane.xlu1 %239 }
 0x143   :  { %v542_v49 = vpack.c.bf16 %v382_v19, %v381_v12  ;;  %v342_v52 = vmul.f32 %v981_v54, %v299_v24  ;;  %v343_v47 = vmul.f32 %v983_v30, %v300_v26  ;;  %577 = vrsqrt.f32 %v268_v22 }
 0x144   :  { %v570_v40 = vpop.eup %569  ;;  %v543_v42 = vpack.c.bf16 %v384_v50, %v383_v23  ;;  %v344_v4 = vmul.f32 %v981_v54, %v301_v48  ;;  %v345_v32 = vmul.f32 %v983_v30, %v302_v46  ;;  %v269_v57 = vadd.f32 1e-05, %v253_v6 }
 0x145   :  { %v572_v59 = vpop.eup %571  ;;  %506 = vst [vmem:[%s1136_s3 + $0x18] sm:$0xff] %v542_v49  ;;  %v385_v21 = vadd.f32 %v985_v36, %v342_v52  ;;  %v386_v5 = vadd.f32 %v987_v31, %v343_v47  ;;  %v303_v60 = vmul.f32 %v570_v40, %v865_v62  ;;  %v304_v55 = vmul.f32 %v570_v40, %v869_v63 }
 0x146   :  { %507 = vst [vmem:[%s1136_s3 + $0x20] sm:$0xff] %v543_v42  ;;  %v387_v1 = vadd.f32 %v985_v36, %v344_v4  ;;  %v388_v6 = vadd.f32 %v987_v31, %v345_v32  ;;  %v305_v34 = vmul.f32 %v572_v59, %v881_v29  ;;  %v306_v35 = vmul.f32 %v572_v59, %v885_v10 }
 0x147   :  { %v544_v20 = vpack.c.bf16 %v386_v5, %v385_v21  ;;  %v346_v13 = vmul.f32 %v981_v54, %v303_v60  ;;  %v347_v62 = vmul.f32 %v983_v30, %v304_v55  ;;  %579 = vrsqrt.f32 %v269_v57 }
 0x148   :  { %v545_v63 = vpack.c.bf16 %v388_v6, %v387_v1  ;;  %v348_v14 = vmul.f32 %v981_v54, %v305_v34  ;;  %v349_v15 = vmul.f32 %v983_v30, %v306_v35  ;;  %v254_v18 = vmul.f32 0.00390625, %v234_v27 }
 0x149   :  { %v574_v41 = vpop.eup %573  ;;  %508 = vst [vmem:[%s1136_s3 + $0x28] sm:$0xff] %v544_v20  ;;  %v389_v29 = vadd.f32 %v985_v36, %v346_v13  ;;  %v390_v10 = vadd.f32 %v987_v31, %v347_v62  ;;  %v255_v38 = vmul.f32 0.00390625, %v237_v61  ;;  %v256_v43 = vmul.f32 0.00390625, %v240_v33 }
 0x14a   :  { %509 = vst [vmem:[%s1136_s3 + $0x30] sm:$0xff] %v545_v63  ;;  %v391_v44 = vadd.f32 %v985_v36, %v348_v14  ;;  %v392_v39 = vadd.f32 %v987_v31, %v349_v15  ;;  %v307_v56 = vmul.f32 %v574_v41, %v889_v11  ;;  %v308_v58 = vmul.f32 %v574_v41, %v893_v7 }
 0x14b   :  { %v546_v22 = vpack.c.bf16 %v390_v10, %v389_v29  ;;  %v270_v27 = vadd.f32 1e-05, %v254_v18  ;;  %v271_v28 = vadd.f32 1e-05, %v255_v38  ;;  %v272_v12 = vadd.f32 1e-05, %v256_v43 }
 0x14c   :  { %v576_v19 = vpop.eup %575  ;;  %v547_v24 = vpack.c.bf16 %v392_v39, %v391_v44  ;;  %v350_v26 = vmul.f32 %v981_v54, %v307_v56  ;;  %v351_v23 = vmul.f32 %v983_v30, %v308_v58 }
 0x14d   :  { %510 = vst [vmem:[%s1136_s3 + $0x38] sm:$0xff] %v546_v22  ;;  %v309_v50 = vmul.f32 %v576_v19, %v905_v37  ;;  %v310_v11 = vmul.f32 %v576_v19, %v909_v16  ;;  %581 = vrsqrt.f32 %v270_v27 }
 0x14e   :  { %511 = vst [vmem:[%s1136_s3 + $0x40] sm:$0xff] %v547_v24  ;;  %v393_v7 = vadd.f32 %v985_v36, %v350_v26  ;;  %v394_v48 = vadd.f32 %v987_v31, %v351_v23  ;;  %583 = vrsqrt.f32 %v271_v28 }
 0x14f   :  { %v352_v46 = vmul.f32 %v981_v54, %v309_v50  ;;  %v353_v49 = vmul.f32 %v983_v30, %v310_v11  ;;  %585 = vrsqrt.f32 %v272_v12 }
 0x150   :  { %v578_v52 = vpop.eup %577  ;;  %v548_v47 = vpack.c.bf16 %v394_v48, %v393_v7 }
 0x151   :  { %v395_v37 = vadd.f32 %v985_v36, %v352_v46  ;;  %v396_v16 = vadd.f32 %v987_v31, %v353_v49  ;;  %v311_v40 = vmul.f32 %v578_v52, %v913_v8  ;;  %v312_v42 = vmul.f32 %v578_v52, %v917_v17 }
 0x152   :  { %512 = vst [vmem:[%s1136_s3 + $0x48] sm:$0xff] %v548_v47 }
 0x153   :  { %v549_v4 = vpack.c.bf16 %v396_v16, %v395_v37  ;;  %v354_v32 = vmul.f32 %v981_v54, %v311_v40  ;;  %v355_v57 = vmul.f32 %v983_v30, %v312_v42 }
 0x154   :  { %v580_v59 = vpop.eup %579 }
 0x155   :  { %513 = vst [vmem:[%s1136_s3 + $0x50] sm:$0xff] %v549_v4  ;;  %v397_v21 = vadd.f32 %v985_v36, %v354_v32  ;;  %v398_v8 = vadd.f32 %v987_v31, %v355_v57  ;;  %v313_v17 = vmul.f32 %v580_v59, %v929_v45  ;;  %v314_v5 = vmul.f32 %v580_v59, %v933_v9 }
 0x157   :  { %v550_v60 = vpack.c.bf16 %v398_v8, %v397_v21  ;;  %v356_v55 = vmul.f32 %v981_v54, %v313_v17  ;;  %v357_v1 = vmul.f32 %v983_v30, %v314_v5 }
 0x159   :  { %514 = vst [vmem:[%s1136_s3 + $0x58] sm:$0xff] %v550_v60  ;;  %v399_v6 = vadd.f32 %v985_v36, %v356_v55  ;;  %v400_v34 = vadd.f32 %v987_v31, %v357_v1 }
 0x15a   :  { %v582_v35 = vpop.eup %581 }
 0x15b   :  { %v584_v61 = vpop.eup %583  ;;  %v551_v33 = vpack.c.bf16 %v400_v34, %v399_v6  ;;  %v315_v45 = vmul.f32 %v582_v35, %v937_v2  ;;  %v316_v9 = vmul.f32 %v582_v35, %v941_v25 }
 0x15c   :  { %v586_v20 = vpop.eup %585  ;;  %v317_v13 = vmul.f32 %v584_v61, %v953_v53  ;;  %v318_v62 = vmul.f32 %v584_v61, %v957_v51 }
 0x15d   :  { %515 = vst [vmem:[%s1136_s3 + $0x60] sm:$0xff] %v551_v33  ;;  %v358_v63 = vmul.f32 %v981_v54, %v315_v45  ;;  %v359_v14 = vmul.f32 %v983_v30, %v316_v9  ;;  %v319_v15 = vmul.f32 %v586_v20, %v961_v3  ;;  %v320_v18 = vmul.f32 %v586_v20, %v965_v0 }
 0x15e   :  { %v360_v2 = vmul.f32 %v981_v54, %v317_v13  ;;  %v361_v25 = vmul.f32 %v983_v30, %v318_v62 }
 0x15f   :  { %v401_v53 = vadd.f32 %v985_v36, %v358_v63  ;;  %v402_v51 = vadd.f32 %v987_v31, %v359_v14  ;;  %v362_v41 = vmul.f32 %v981_v54, %v319_v15  ;;  %v363_v29 = vmul.f32 %v983_v30, %v320_v18 }
 0x160   :  { %v403_v10 = vadd.f32 %v985_v36, %v360_v2  ;;  %v404_v38 = vadd.f32 %v987_v31, %v361_v25 }
 0x161   :  { %v552_v43 = vpack.c.bf16 %v402_v51, %v401_v53  ;;  %v405_v3 = vadd.f32 %v985_v36, %v362_v41  ;;  %v406_v0 = vadd.f32 %v987_v31, %v363_v29 }
 0x162   :  { %v553_v44 = vpack.c.bf16 %v404_v38, %v403_v10 }
 0x163   :  { %516 = vst [vmem:[%s1136_s3 + $0x68] sm:$0xff] %v552_v43  ;;  %v554_v39 = vpack.c.bf16 %v406_v0, %v405_v3 }
 0x164   :  { %517 = vst [vmem:[%s1136_s3 + $0x70] sm:$0xff] %v553_v44 }
 0x165   :  { %518 = vst [vmem:[%s1136_s3 + $0x78] sm:$0xff] %v554_v39 }

// kernel: seq2seq_forward.12
= control target key start
LH: loop header
LB: loop body
LE: loop exit
PB: predicated region body
PF: predicated region fallthrough
CT: control target
= control target key end

     0   :  { %s2448_s27 = smov 0   ;;  %s2972_s0 = inlined_call_operand.vmem [shape: bf16[128,256], index: 0, kind: input, shape index: {}]   ;;  %s2973_s1 = inlined_call_operand.vmem [shape: bf16[256,768], index: 1, kind: input, shape index: {}]   ;;  %s2974_s2 = inlined_call_operand.vmem [shape: f32[1,768], index: 2, kind: input, shape index: {}]   ;;  %s2975_s3 = inlined_call_operand.vmem [shape: bf16[256,256], index: 3, kind: input, shape index: {}]   ;;  %s2976_s4 = inlined_call_operand.vmem [shape: f32[1,256], index: 4, kind: input, shape index: {}]   ;;  %s2977_s5 = inlined_call_operand.vmem [shape: f32[1,256], index: 5, kind: input, shape index: {}]   ;;  %s2978_s6 = inlined_call_operand.vmem [shape: f32[1,256], index: 6, kind: input, shape index: {}]   ;;  %s2979_s7 = inlined_call_operand.vmem [shape: f32[4,32,32], index: 7, kind: input, shape index: {}]   ;;  %s2980_s8 = inlined_call_operand.vmem [shape: bf16[128,256], index: 8, kind: output, shape index: {}]  }
   0x1 LB: > { %s2454_s28 = sadd.s32 4294967295, %s2401_s27   ;;  %p1943_p0 = scmp.ge.s32.totalorder %s2401_s27, 1  ;;  %s2401_s27 = sphi %s2448_s27, %s18_s27  }
   0x2   : > { %p274_p1 = scmp.lt.s32.totalorder %s2401_s27, 5 }
   0x4   : > { %p275_p2 = pnand %p1943_p0, %p274_p1 }
   0x5   : > { %s1944_s17 = sshll.u32 (!%p275_p2), %s2454_s28, 2  ;;  %p322_p4 = scmp.lt.s32.totalorder (!%p275_p2), %s2454_s28, 3 }
   0x6   : > { %278 = sbr.rel (%p275_p2) target bundleno = 1564 (0x61c), region = 52  ;;  %p316_p3 = scmp.lt.s32.totalorder (!%p275_p2), %s1944_s17, 15 }
   0xb   : > { %v2157_v0 = vld [vmem:[%s2973_s1 + $0x15c] ss:$24 sps:$4 sm:$0xff]   ;;  %v2159_v1 = vld [vmem:[%s2973_s1 + $0x158] ss:$24 sps:$4 sm:$0xff]   ;;  %v2160_v2 = vld [vmem:[%s2973_s1 + $0x12c] ss:$24 sps:$4 sm:$0xff]  }
   0xc   : > { %1020 = vmatprep.subr.bf16.mxu1 %v2157_v0  ;;  %v2162_v3 = vld [vmem:[%s2973_s1 + $0x128] ss:$24 sps:$4 sm:$0xff]   ;;  %v2163_v4 = vld [vmem:[%s2973_s1 + $0xfc] ss:$24 sps:$4 sm:$0xff]   ;;  %v2165_v7 = vld [vmem:[%s2973_s1 + $0xf8] ss:$24 sps:$4 sm:$0xff]  }
   0xd   : > { %1021 = vmatpush1.bf16.msra.mxu1 %v2159_v1  ;;  %v2166_v5 = vld [vmem:[%s2973_s1 + $0x154] ss:$24 sps:$4 sm:$0xff]   ;;  %v2168_v6 = vld [vmem:[%s2973_s1 + $0x150] ss:$24 sps:$4 sm:$0xff]   ;;  %v2172_v8 = vld [vmem:[%s2973_s1 + $0x124] ss:$24 sps:$4 sm:$0xff]  }
   0xe   : > { %1022 = vmatprep.subr.bf16.mxu1 %v2160_v2  ;;  %967 = vmatprep.subr.bf16.mxu0 %v2166_v5  ;;  %v2174_v9 = vld [vmem:[%s2973_s1 + $0x120] ss:$24 sps:$4 sm:$0xff]   ;;  %v2169_v10 = vld [vmem:[%s2973_s1 + $0xcc] ss:$24 sps:$4 sm:$0xff]   ;;  %v2175_v13 = vld [vmem:[%s2973_s1 + $0x9c] ss:$24 sps:$4 sm:$0xff]  }
   0xf   : > { %968 = vmatpush1.bf16.msra.mxu0 %v2168_v6  ;;  %v2171_v11 = vld [vmem:[%s2973_s1 + $0xc8] ss:$24 sps:$4 sm:$0xff]   ;;  %v2178_v12 = vld [vmem:[%s2973_s1 + $0xf4] ss:$24 sps:$4 sm:$0xff]   ;;  %v2184_v15 = vld [vmem:[%s2973_s1 + $0xc4] ss:$24 sps:$4 sm:$0xff]  }
  0x10   : > { %969 = vmatprep.subr.bf16.mxu0 %v2172_v8  ;;  %v2180_v14 = vld [vmem:[%s2973_s1 + $0xf0] ss:$24 sps:$4 sm:$0xff]   ;;  %v2181_v17 = vld [vmem:[%s2973_s1 + $0x6c] ss:$24 sps:$4 sm:$0xff]   ;;  %v2186_v18 = vld [vmem:[%s2973_s1 + $0xc0] ss:$24 sps:$4 sm:$0xff]  }
  0x11   : > { %1023 = vmatpush1.bf16.msra.mxu1 %v2162_v3  ;;  %v2177_v16 = vld [vmem:[%s2973_s1 + $0x98] ss:$24 sps:$4 sm:$0xff]   ;;  %v2190_v19 = vld [vmem:[%s2973_s1 + $0x94] ss:$24 sps:$4 sm:$0xff]   ;;  %v2183_v20 = vld [vmem:[%s2973_s1 + $0x68] ss:$24 sps:$4 sm:$0xff]  }
  0x12   : > { %1024 = vmatprep.subr.bf16.mxu1 %v2163_v4  ;;  %v2187_v21 = vld [vmem:[%s2973_s1 + $0x3c] ss:$24 sps:$4 sm:$0xff]   ;;  %v2192_v22 = vld [vmem:[%s2973_s1 + $0x90] ss:$24 sps:$4 sm:$0xff]   ;;  %v2193_v25 = vld [vmem:[%s2973_s1 + $0xc] ss:$24 sps:$4 sm:$0xff]  }
  0x13   : > { %970 = vmatpush1.bf16.msra.mxu0 %v2174_v9  ;;  %v2196_v23 = vld [vmem:[%s2973_s1 + $0x64] ss:$24 sps:$4 sm:$0xff]   ;;  %v2189_v24 = vld [vmem:[%s2973_s1 + $0x38] ss:$24 sps:$4 sm:$0xff]   ;;  %v2202_v27 = vld [vmem:[%s2973_s1 + $0x34] ss:$24 sps:$4 sm:$0xff]  }
  0x14   : > { %971 = vmatprep.subr.bf16.mxu0 %v2178_v12  ;;  %v2198_v26 = vld [vmem:[%s2973_s1 + $0x60] ss:$24 sps:$4 sm:$0xff]   ;;  %v2199_v29 = vld [vmem:[%s2973_s1 + $0x2dc] ss:$24 sps:$4 sm:$0xff]   ;;  %v2204_v30 = vld [vmem:[%s2973_s1 + $0x30] ss:$24 sps:$4 sm:$0xff]  }
  0x15   : > { %1025 = vmatpush1.bf16.msra.mxu1 %v2165_v7  ;;  %v2195_v28 = vld [vmem:[%s2973_s1 + $0x8] ss:$24 sps:$4 sm:$0xff]   ;;  %v2208_v31 = vld [vmem:[%s2973_s1 + $0x4] ss:$24 sps:$4 sm:$0xff]   ;;  %s2982_s17 = smov (!%p316_p3, %s1944_s17), 15  ;;  %s2984_s28 = smov (!%p322_p4, %s2454_s28), 3 }
  0x16   : > { %1026 = vmatprep.subr.bf16.mxu1 %v2169_v10  ;;  %v2201_v32 = vld [vmem:[%s2973_s1 + $0x2d8] ss:$24 sps:$4 sm:$0xff]   ;;  %v2205_v33 = vld [vmem:[%s2973_s1 + $0x2ac] ss:$24 sps:$4 sm:$0xff]   ;;  %s2094_s21 = sshll.u32 %s2982_s17, 3  ;;  %s2095_s29 = sshll.u32 %s2984_s28, 5 }
  0x17   : > { %972 = vmatpush1.bf16.msra.mxu0 %v2180_v14  ;;  %v2210_v34 = vld [vmem:[%s2973_s1] ss:$24 sps:$4 sm:$0xff]   ;;  %v2214_v35 = vld [vmem:[%s2973_s1 + $0x2d4] ss:$24 sps:$4 sm:$0xff]   ;;  %v2216_v38 = vld [vmem:[%s2973_s1 + $0x2d0] ss:$24 sps:$4 sm:$0xff]   ;;  %s2587_s12 = scalar_lea.vmem %s2972_s0, %s2094_s21  ;;  %s326_s10 = scalar_lea.vmem %s2979_s7, %s2095_s29 }
  0x18   : > { %973 = vmatprep.subr.bf16.mxu0 %v2184_v15  ;;  %v2207_v36 = vld [vmem:[%s2973_s1 + $0x2a8] ss:$24 sps:$4 sm:$0xff]   ;;  %v2211_v37 = vld [vmem:[%s2973_s1 + $0x27c] ss:$24 sps:$4 sm:$0xff]   ;;  %v2213_v40 = vld [vmem:[%s2973_s1 + $0x278] ss:$24 sps:$4 sm:$0xff]  }
  0x19   : > { %1027 = vmatpush1.bf16.msra.mxu1 %v2171_v11  ;;  %v2220_v39 = vld [vmem:[%s2973_s1 + $0x2a4] ss:$24 sps:$4 sm:$0xff]   ;;  %v2222_v42 = vld [vmem:[%s2973_s1 + $0x2a0] ss:$24 sps:$4 sm:$0xff]   ;;  %v2226_v44 = vld [vmem:[%s2973_s1 + $0x274] ss:$24 sps:$4 sm:$0xff]  }
  0x1a   : > { %1028 = vmatprep.subr.bf16.mxu1 %v2175_v13  ;;  %v2217_v41 = vld [vmem:[%s2973_s1 + $0x24c] ss:$24 sps:$4 sm:$0xff]   ;;  %v2219_v47 = vld [vmem:[%s2973_s1 + $0x248] ss:$24 sps:$4 sm:$0xff]   ;;  %v2223_v48 = vld [vmem:[%s2973_s1 + $0x21c] ss:$24 sps:$4 sm:$0xff]  }
  0x1b   : > { %974 = vmatpush1.bf16.msra.mxu0 %v2186_v18  ;;  %v335_v43 = vld [vmem:[%s2587_s12] sm:$0xff]  ;;  %v336_v45 = vld [vmem:[%s2587_s12 + $0x8] sm:$0xff]  ;;  %v2225_v51 = vld [vmem:[%s2973_s1 + $0x218] ss:$24 sps:$4 sm:$0xff]   ;;  %vm1193_vm0 = vcmask 261120  }
  0x1c   : > { %975 = vmatprep.subr.bf16.mxu0 %v2190_v19  ;;  %v2603_v46 = vcombine.high %v335_v43, %v336_v45  ;;  %v2228_v49 = vld [vmem:[%s2973_s1 + $0x270] ss:$24 sps:$4 sm:$0xff]   ;;  %v2232_v50 = vld [vmem:[%s2973_s1 + $0x244] ss:$24 sps:$4 sm:$0xff]   ;;  %v2234_v53 = vld [vmem:[%s2973_s1 + $0x240] ss:$24 sps:$4 sm:$0xff]   ;;  %v2670_v4 = vcombine.low %v335_v43, %v336_v45 }
  0x1d   : > { %1029 = vmatpush1.bf16.msra.mxu1 %v2177_v16  ;;  %v2229_v52 = vld [vmem:[%s2973_s1 + $0x1ec] ss:$24 sps:$4 sm:$0xff]   ;;  %v2231_v55 = vld [vmem:[%s2973_s1 + $0x1e8] ss:$24 sps:$4 sm:$0xff]   ;;  %v2235_v56 = vld [vmem:[%s2973_s1 + $0x1bc] ss:$24 sps:$4 sm:$0xff]  }
  0x1e   : > { %1030 = vmatprep.subr.bf16.mxu1 %v2181_v17  ;;  %1052 = vmatprep.mubr.bf16.mxu1 %v2603_v46  ;;  %v2238_v54 = vld [vmem:[%s2973_s1 + $0x214] ss:$24 sps:$4 sm:$0xff]   ;;  %v2240_v57 = vld [vmem:[%s2973_s1 + $0x210] ss:$24 sps:$4 sm:$0xff]   ;;  %v2244_v58 = vld [vmem:[%s2973_s1 + $0x1e4] ss:$24 sps:$4 sm:$0xff]  }
  0x1f   : > { %976 = vmatpush1.bf16.msra.mxu0 %v2192_v22  ;;  %999 = vmatprep.mubr.bf16.mxu0 %v2603_v46  ;;  %v2237_v59 = vld [vmem:[%s2973_s1 + $0x1b8] ss:$24 sps:$4 sm:$0xff]   ;;  %v2241_v60 = vld [vmem:[%s2973_s1 + $0x18c] ss:$24 sps:$4 sm:$0xff]   ;;  %v2243_v63 = vld [vmem:[%s2973_s1 + $0x188] ss:$24 sps:$4 sm:$0xff]  }
  0x20   : > { %977 = vmatprep.subr.bf16.mxu0 %v2196_v23  ;;  %v2247_v61 = vld [vmem:[%s2973_s1 + $0x1e0] ss:$24 sps:$4 sm:$0xff]   ;;  %v2249_v62 = vld [vmem:[%s2973_s1 + $0x1b4] ss:$24 sps:$4 sm:$0xff]   ;;  %v2251_v0 = vld [vmem:[%s2973_s1 + $0x1b0] ss:$24 sps:$4 sm:$0xff]  }
  0x21   : > { %1031 = vmatpush1.bf16.msra.mxu1 %v2183_v20  ;;  %v2252_v1 = vld [vmem:[%s2973_s1 + $0x184] ss:$24 sps:$4 sm:$0xff]   ;;  %v2665_v2 = vld [vmem:[%s2587_s12 + $0x10] sm:$0xff]  ;;  %v2255_v6 = vld [vmem:[%s2973_s1 + $0x180] ss:$24 sps:$4 sm:$0xff]  }
  0x22   : > { %1032 = vmatprep.subr.bf16.mxu1 %v2187_v21  ;;  %v2668_v3 = vld [vmem:[%s2587_s12 + $0x18] sm:$0xff]  ;;  %v2262_v9 = vld [vmem:[%s2973_s1 + $0x134] ss:$24 sps:$4 sm:$0xff]   ;;  %v2260_v10 = vld [vmem:[%s2973_s1 + $0x130] ss:$24 sps:$4 sm:$0xff]  }
  0x23   : > { %978 = vmatpush1.bf16.msra.mxu0 %v2198_v26  ;;  %v2674_v5 = vcombine.high %v2665_v2, %v2668_v3  ;;  %v2259_v7 = vld [vmem:[%s2973_s1 + $0x164] ss:$24 sps:$4 sm:$0xff]   ;;  %v2257_v8 = vld [vmem:[%s2973_s1 + $0x160] ss:$24 sps:$4 sm:$0xff]   ;;  %v2695_v11 = vcombine.low %v2665_v2, %v2668_v3  ;;  %v2268_v14 = vld [vmem:[%s2973_s1 + $0xd4] ss:$24 sps:$4 sm:$0xff]  }
  0x24   : > { %979 = vmatprep.subr.bf16.mxu0 %v2202_v27  ;;  %v2265_v12 = vld [vmem:[%s2973_s1 + $0x104] ss:$24 sps:$4 sm:$0xff]   ;;  %v2263_v13 = vld [vmem:[%s2973_s1 + $0x100] ss:$24 sps:$4 sm:$0xff]   ;;  %v2266_v15 = vld [vmem:[%s2973_s1 + $0xd0] ss:$24 sps:$4 sm:$0xff]  }
  0x25   : > { %1033 = vmatpush1.bf16.msra.mxu1 %v2189_v24  ;;  %v2271_v16 = vld [vmem:[%s2973_s1 + $0xa4] ss:$24 sps:$4 sm:$0xff]   ;;  %v2269_v17 = vld [vmem:[%s2973_s1 + $0xa0] ss:$24 sps:$4 sm:$0xff]   ;;  %v2274_v18 = vld [vmem:[%s2973_s1 + $0x74] ss:$24 sps:$4 sm:$0xff]  }
  0x26   : > { %1034 = vmatprep.subr.bf16.mxu1 %v2193_v25  ;;  %v2272_v19 = vld [vmem:[%s2973_s1 + $0x70] ss:$24 sps:$4 sm:$0xff]   ;;  %v2277_v20 = vld [vmem:[%s2973_s1 + $0x44] ss:$24 sps:$4 sm:$0xff]   ;;  %v2275_v21 = vld [vmem:[%s2973_s1 + $0x40] ss:$24 sps:$4 sm:$0xff]  }
  0x27   : > { %980 = vmatpush1.bf16.msra.mxu0 %v2204_v30  ;;  %v2280_v22 = vld [vmem:[%s2973_s1 + $0x14] ss:$24 sps:$4 sm:$0xff]   ;;  %v2278_v23 = vld [vmem:[%s2973_s1 + $0x10] ss:$24 sps:$4 sm:$0xff]   ;;  %v2283_v24 = vld [vmem:[%s2973_s1 + $0x2e4] ss:$24 sps:$4 sm:$0xff]  }
  0x28   : > { %981 = vmatprep.subr.bf16.mxu0 %v2208_v31  ;;  %v2281_v25 = vld [vmem:[%s2973_s1 + $0x2e0] ss:$24 sps:$4 sm:$0xff]   ;;  %v2286_v26 = vld [vmem:[%s2973_s1 + $0x2b4] ss:$24 sps:$4 sm:$0xff]   ;;  %v2284_v27 = vld [vmem:[%s2973_s1 + $0x2b0] ss:$24 sps:$4 sm:$0xff]  }
  0x29   : > { %1035 = vmatpush1.bf16.msra.mxu1 %v2195_v28  ;;  %v2289_v28 = vld [vmem:[%s2973_s1 + $0x284] ss:$24 sps:$4 sm:$0xff]   ;;  %v2292_v30 = vld [vmem:[%s2973_s1 + $0x254] ss:$24 sps:$4 sm:$0xff]   ;;  %v2290_v31 = vld [vmem:[%s2973_s1 + $0x250] ss:$24 sps:$4 sm:$0xff]  }
  0x2a   : > { %1036 = vmatprep.subr.bf16.mxu1 %v2199_v29  ;;  %v2287_v29 = vld [vmem:[%s2973_s1 + $0x280] ss:$24 sps:$4 sm:$0xff]  }
  0x2b   : > { %982 = vmatpush1.bf16.msra.mxu0 %v2210_v34  ;;  %v2298_v34 = vld [vmem:[%s2973_s1 + $0x1f4] ss:$24 sps:$4 sm:$0xff]  }
  0x2c   : > { %983 = vmatprep.subr.bf16.mxu0 %v2214_v35  ;;  %v2296_v35 = vld [vmem:[%s2973_s1 + $0x1f0] ss:$24 sps:$4 sm:$0xff]  }
  0x2d   : > { %1037 = vmatpush2.bf16.msra.mxu1 %v2201_v32  ;;  %v2295_v32 = vld [vmem:[%s2973_s1 + $0x224] ss:$24 sps:$4 sm:$0xff]  }
  0x2e   : > { %1038 = vmatprep.subr.bf16.mxu1 %v2205_v33  ;;  %v2293_v33 = vld [vmem:[%s2973_s1 + $0x220] ss:$24 sps:$4 sm:$0xff]  }
  0x2f   : > { %984 = vmatpush2.bf16.msra.mxu0 %v2216_v38  ;;  %v2304_v38 = vld [vmem:[%s2973_s1 + $0x194] ss:$24 sps:$4 sm:$0xff]  }
  0x30   : > { %985 = vmatprep.subr.bf16.mxu0 %v2220_v39  ;;  %v2302_v39 = vld [vmem:[%s2973_s1 + $0x190] ss:$24 sps:$4 sm:$0xff]  }
  0x31   : > { %1039 = vmatpush2.bf16.msra.mxu1 %v2207_v36  ;;  %v2301_v36 = vld [vmem:[%s2973_s1 + $0x1c4] ss:$24 sps:$4 sm:$0xff]  }
  0x32   : > { %1040 = vmatprep.subr.bf16.mxu1 %v2211_v37  ;;  %v2299_v37 = vld [vmem:[%s2973_s1 + $0x1c0] ss:$24 sps:$4 sm:$0xff]  }
  0x33   : > { %986 = vmatpush2.bf16.msra.mxu0 %v2222_v42 }
  0x34   : > { %987 = vmatprep.subr.bf16.mxu0 %v2226_v44  ;;  %v2797_v44 = vld [vmem:[%s2974_s2] sm:$0x3f] }
  0x35   : > { %1041 = vmatpush2.bf16.msra.mxu1 %v2213_v40  ;;  %v437_v40 = vlaneseq }
  0x36   : > { %1042 = vmatprep.subr.bf16.mxu1 %v2217_v41 }
  0x37   : > { %988 = vmatpush2.bf16.msra.mxu0 %v2228_v49  ;;  %v2789_v41 = vshrl.u32 %v437_v40, 7 }
  0x38   : > { %989 = vmatprep.subr.bf16.mxu0 %v2232_v50 }
  0x39   : > { %1043 = vmatpush2.bf16.msra.mxu1 %v2219_v47  ;;  %v2792_v42 = vsub.s32 0, %v2789_v41 }
  0x3a   : > { %1044 = vmatprep.subr.bf16.mxu1 %v2223_v48 }
  0x3b   : > { %990 = vmatpush2.bf16.msra.mxu0 %v2234_v53 }
  0x3c   : > { %991 = vmatprep.subr.bf16.mxu0 %v2238_v54 }
  0x3d   : > { %1045 = vmatpush2.bf16.msra.mxu1 %v2225_v51  ;;  %v447_v51 = vsub.s32 2, %v2789_v41 }
  0x3e   : > { %1046 = vmatprep.subr.bf16.mxu1 %v2229_v52 }
  0x3f   : > { %992 = vmatpush2.bf16.msra.mxu0 %v2240_v57  ;;  %v448_v57 = vrot.slane %v2797_v44, %v447_v51 }
  0x40   : > { %993 = vmatprep.subr.bf16.mxu0 %v2244_v58 }
  0x41   : > { %1047 = vmatpush2.bf16.msra.mxu1 %v2231_v55 }
  0x42   : > { %1048 = vmatprep.subr.bf16.mxu1 %v2235_v56 }
  0x43   : > { %994 = vmatpush2.bf16.msra.mxu0 %v2247_v61 }
  0x44   : > { %995 = vmatprep.subr.bf16.mxu0 %v2249_v62 }
  0x45   : > { %1049 = vmatpush2.bf16.msra.mxu1 %v2237_v59 }
  0x46   : > { %1050 = vmatprep.subr.bf16.mxu1 %v2241_v60 }
  0x47   : > { %996 = vmatpush2.bf16.msra.mxu0 %v2251_v0 }
  0x48   : > { %997 = vmatprep.subr.bf16.mxu0 %v2252_v1  ;;  %v451_v1 = vsub.s32 3, %v2789_v41 }
  0x49   : > { %1051 = vmatpush2.bf16.msra.mxu1 %v2243_v63 }
  0x4b   : > { %998 = vmatpush2.bf16.msra.mxu0 %v2255_v6 }
  0x4c   : > { %1053 = vmatmul.mubr.bf16.vlgmr.msra.gmra.mxu1 %v2670_v4  ;;  %1073 = vmatprep.subr.bf16.mxu0 %v2259_v7 }
  0x4d   : > { %1062 = vmatprep.mubr.bf16.mxu1 %v2674_v5 }
  0x4e   : > { %1000 = vmatmul.mubr.bf16.vlgmr.msra.gmra.mxu0 %v2670_v4 }
  0x4f   : > { %1009 = vmatprep.mubr.bf16.mxu0 %v2674_v5  ;;  %1074 = vmatpush1.bf16.msra.mxu0 %v2257_v8  ;;  %v452_v8 = vrot.slane %v2797_v44, %v451_v1 }
  0x50   : > { %1075 = vmatprep.subr.bf16.mxu0 %v2262_v9  ;;  %v2806_v9 = vsub.s32 1, %v2789_v41 }
  0x53   : > { %1076 = vmatpush1.bf16.msra.mxu0 %v2260_v10 }
  0x54   : > { %1063 = vmatmul.mubr.bf16.gmra.mxu1 %v2695_v11  ;;  %1077 = vmatprep.subr.bf16.mxu0 %v2265_v12 }
  0x56   : > { %1010 = vmatmul.mubr.bf16.gmra.mxu0 %v2695_v11 }
  0x57   : > { %1078 = vmatpush1.bf16.msra.mxu0 %v2263_v13  ;;  %1105 = vmatprep.mubr.bf16.mxu0 %v2603_v46  ;;  %v440_v46 = vrot.slane %v2797_v44, %v2792_v42  ;;  %v444_v13 = vrot.slane %v2797_v44, %v2806_v9 }
  0x58   : > { %1079 = vmatprep.subr.bf16.mxu0 %v2268_v14 }
  0x5b   : > { %1080 = vmatpush1.bf16.msra.mxu0 %v2266_v15 }
  0x5c   : > { %1081 = vmatprep.subr.bf16.mxu0 %v2271_v16 }
  0x5f   : > { %1082 = vmatpush1.bf16.msra.mxu0 %v2269_v17 }
  0x60   : > { %1083 = vmatprep.subr.bf16.mxu0 %v2274_v18 }
  0x63   : > { %1084 = vmatpush1.bf16.msra.mxu0 %v2272_v19 }
  0x64   : > { %1085 = vmatprep.subr.bf16.mxu0 %v2277_v20 }
  0x67   : > { %1086 = vmatpush1.bf16.msra.mxu0 %v2275_v21 }
  0x68   : > { %1087 = vmatprep.subr.bf16.mxu0 %v2280_v22 }
  0x6b   : > { %1088 = vmatpush1.bf16.msra.mxu0 %v2278_v23 }
  0x6c   : > { %1089 = vmatprep.subr.bf16.mxu0 %v2283_v24 }
  0x6f   : > { %1090 = vmatpush2.bf16.msra.mxu0 %v2281_v25 }
  0x70   : > { %1091 = vmatprep.subr.bf16.mxu0 %v2286_v26 }
  0x73   : > { %1092 = vmatpush2.bf16.msra.mxu0 %v2284_v27 }
  0x74   : > { %1093 = vmatprep.subr.bf16.mxu0 %v2289_v28 }
  0x77   : > { %1094 = vmatpush2.bf16.msra.mxu0 %v2287_v29  ;;  %v459_v29 = vsub.s32 5, %v2789_v41 }
  0x78   : > { %1095 = vmatprep.subr.bf16.mxu0 %v2292_v30 }
  0x79   : > { %v460_v30 = vrot.slane %v2797_v44, %v459_v29 }
  0x7b   : > { %1096 = vmatpush2.bf16.msra.mxu0 %v2290_v31 }
  0x7c   : > { %1097 = vmatprep.subr.bf16.mxu0 %v2295_v32 }
  0x7f   : > { %1098 = vmatpush2.bf16.msra.mxu0 %v2293_v33  ;;  %v455_v33 = vsub.s32 4, %v2789_v41 }
  0x80   : > { %1099 = vmatprep.subr.bf16.mxu0 %v2298_v34 }
  0x83   : > { %1100 = vmatpush2.bf16.msra.mxu0 %v2296_v35 }
  0x84   : > { %1101 = vmatprep.subr.bf16.mxu0 %v2301_v36 }
  0x87   : > { %1102 = vmatpush2.bf16.msra.mxu0 %v2299_v37  ;;  %v456_v37 = vrot.slane %v2797_v44, %v455_v33 }
  0x88   : > { %1103 = vmatprep.subr.bf16.mxu0 %v2304_v38 }
  0x8b   : > { %1104 = vmatpush2.bf16.msra.mxu0 %v2302_v39 }
  0x8e   : > { %1106 = vmatmul.mubr.bf16.vlgmr.msra.gmra.mxu0 %v2670_v4 }
  0x8f   : > { %1115 = vmatprep.mubr.bf16.mxu0 %v2674_v5 }
  0x96   : > { %1116 = vmatmul.mubr.bf16.gmra.mxu0 %v2695_v11 }
 0x10c   : > { %v1054_v43 = vpop.f32.mrf.mxu1 }
 0x10d   : > { %v1055_v0 = vadd.f32 %v1054_v43, %v448_v57 }
 0x10e   : > { %v1056_v45 = vpop.f32.mrf.mxu1  ;;  %v1001_v48 = vpop.f32.mrf.mxu0 }
 0x10f   : > { %v1002_v52 = vadd.f32 %v1001_v48, %v440_v46  ;;  %v1057_v21 = vadd.f32 %v1056_v45, %v452_v8 }
 0x110   : > { %v1058_v47 = vpop.f32.mrf.mxu1  ;;  %v1003_v50 = vpop.f32.mrf.mxu0 }
 0x111   : > { %v1059_v60 = vadd.f32 %v1058_v47, %v448_v57  ;;  %v1004_v18 = vadd.f32 %v1003_v50, %v444_v13 }
 0x112   : > { %v1060_v49 = vpop.f32.mrf.mxu1  ;;  %v1005_v54 = vpop.f32.mrf.mxu0 }
 0x113   : > { %v1006_v55 = vadd.f32 %v1005_v54, %v440_v46  ;;  %v1132_v5 = vpack.c.bf16 %v1059_v60, %v1055_v0  ;;  %v1061_v20 = vadd.f32 %v1060_v49, %v452_v8 }
 0x114   : > { %v1064_v53 = vpop.f32.mrf.mxu1  ;;  %v1007_v63 = vpop.f32.mrf.mxu0 }
 0x115   : > { %v1130_v58 = vpack.c.bf16 %v1006_v55, %v1002_v52  ;;  %v1065_v61 = vadd.f32 %v1064_v53, %v448_v57  ;;  %v1008_v19 = vadd.f32 %v1007_v63, %v444_v13  ;;  %v1297_v24 = vpack.c.bf16 %v1061_v20, %v1057_v21  ;;  %v1128_v55 = vld [vmem:[%s326_s10 + $0x10] sm:$0xff] }
 0x116   : > { %v1066_v56 = vpop.f32.mrf.mxu1  ;;  %v1011_v7 = vpop.f32.mrf.mxu0 }
 0x117   : > { %2121 = vmatprep.mubr.bf16.mxu0 %v1130_v58  ;;  %v1067_v12 = vadd.f32 %v1066_v56, %v452_v8  ;;  %v1012_v16 = vadd.f32 %v1011_v7, %v440_v46  ;;  %v1295_v23 = vpack.c.bf16 %v1008_v19, %v1004_v18  ;;  %v1126_v58 = vld [vmem:[%s326_s10] sm:$0xff] }
 0x118   : > { %v1068_v59 = vpop.f32.mrf.mxu1  ;;  %v1013_v11 = vpop.f32.mrf.mxu0 }
 0x119   : > { %v1069_v62 = vadd.f32 %v1068_v59, %v448_v57  ;;  %v1014_v26 = vadd.f32 %v1013_v11, %v444_v13 }
 0x11a   : > { %v1070_v6 = vpop.f32.mrf.mxu1  ;;  %v1015_v15 = vpop.f32.mrf.mxu0 }
 0x11b   : > { %v1133_v4 = vpack.c.bf16 %v1069_v62, %v1065_v61  ;;  %v1071_v10 = vadd.f32 %v1070_v6, %v452_v8  ;;  %v1016_v17 = vadd.f32 %v1015_v15, %v440_v46  ;;  %v1129_v62 = vld [vmem:[%s326_s10 + $0x18] sm:$0xff] }
 0x11c   : > { %v1017_v25 = vpop.f32.mrf.mxu0 }
 0x11d   : > { %2117 = vmatprep.subr.bf16.mxu0 %v1133_v4  ;;  %v1298_v14 = vpack.c.bf16 %v1071_v10, %v1067_v12  ;;  %v1131_v22 = vpack.c.bf16 %v1016_v17, %v1012_v16  ;;  %v1018_v27 = vadd.f32 %v1017_v25, %v444_v13 }
 0x11e   : > { %2118 = vmatpush3.bf16.xpose.msra.mxu0 %v1133_v4 }
 0x11f   : > { %2119 = vmatprep.subr.bf16.mxu0 %v1132_v5  ;;  %v1296_v28 = vpack.c.bf16 %v1018_v27, %v1014_v26 }
 0x126   : > { %2120 = vmatpush3.bf16.xpose.msra.mxu0 %v1132_v5  ;;  %v1127_v5 = vld [vmem:[%s326_s10 + $0x8] sm:$0xff]  ;;  %s332_s10 = scalar_lea.vmem %s2980_s8, %s2094_s21 }
 0x127   : > { %2133 = vmatprep.subr.bf16.mxu0 %v1298_v14 }
 0x12d   : > { %2122 = vmatmul.mubr.bf16.vlgmr.msra.gmra.mxu0 %v1131_v22 }
 0x12e   : > { %2134 = vmatpush3.bf16.xpose.msra.mxu0 %v1298_v14  ;;  %2137 = vmatprep.mubr.bf16.mxu0 %v1295_v23 }
 0x12f   : > { %2135 = vmatprep.subr.bf16.mxu0 %v1297_v24 }
 0x136   : > { %2136 = vmatpush3.bf16.xpose.msra.mxu0 %v1297_v24 }
 0x13d   : > { %2138 = vmatmul.mubr.bf16.vlgmr.msra.gmra.mxu0 %v1296_v28 }
 0x14e   : > { %v1107_v31 = vpop.f32.mrf.mxu0 }
 0x14f   : > { %v1108_v45 = vadd.f32 %v1107_v31, %v456_v37 }
 0x150   : > { %v1109_v32 = vpop.f32.mrf.mxu0 }
 0x151   : > { %v1110_v34 = vadd.f32 %v1109_v32, %v460_v30 }
 0x152   : > { %v1111_v35 = vpop.f32.mrf.mxu0 }
 0x153   : > { %v1112_v46 = vadd.f32 %v1111_v35, %v456_v37 }
 0x154   : > { %v1113_v36 = vpop.f32.mrf.mxu0 }
 0x155   : > { %v1114_v38 = vadd.f32 %v1113_v36, %v460_v30  ;;  %v1134_v51 = vpack.c.bf16 %v1112_v46, %v1108_v45 }
 0x156   : > { %v1117_v39 = vpop.f32.mrf.mxu0 }
 0x157   : > { %v2814_v40 = vpack.c.bf16 %v1114_v38, %v1110_v34  ;;  %v1118_v47 = vadd.f32 %v1117_v39, %v456_v37 }
 0x158   : > { %v1119_v43 = vpop.f32.mrf.mxu0 }
 0x159   : > { %v1120_v41 = vadd.f32 %v1119_v43, %v460_v30 }
 0x15a   : > { %v1121_v48 = vpop.f32.mrf.mxu0 }
 0x15b   : > { %v1122_v49 = vadd.f32 %v1121_v48, %v456_v37 }
 0x15c   : > { %v1123_v50 = vpop.f32.mrf.mxu0 }
 0x15d   : > { %v1135_v52 = vpack.c.bf16 %v1122_v49, %v1118_v47  ;;  %v1124_v53 = vadd.f32 %v1123_v50, %v460_v30 }
 0x15f   : > { %2125 = vmatprep.subr.bf16.mxu1 %v1135_v52  ;;  %v2816_v44 = vpack.c.bf16 %v1124_v53, %v1120_v41 }
 0x160   : > { %2126 = vmatpush3.bf16.msra.mxu1 %v1135_v52 }
 0x161   : > { %2127 = vmatprep.subr.bf16.mxu1 %v1134_v51 }
 0x164   : > { %2128 = vmatpush3.bf16.msra.mxu1 %v1134_v51 }
 0x165   : > { %2141 = vmatprep.subr.bf16.mxu1 %v2816_v44 }
 0x1ed   : > { %v2123_v54 = vpop.f32.mrf.mxu0 }
 0x1ee   : > { %v1187_v56 = vmul.f32 0.088388346, %v2123_v54 }
 0x1ef   : > { %v1170_v57 = vpop.f32.mrf.mxu0 }
 0x1f0   : > { %v1185_v59 = vmul.f32 0.088388346, %v1170_v57  ;;  %v1191_v60 = vadd.f32 %v1187_v56, %v1128_v55 }
 0x1f1   : > { %v2124_v61 = vpop.f32.mrf.mxu0 }
 0x1f2   : > { %v1188_v63 = vmul.f32 0.088388346, %v2124_v61  ;;  %v1200_v0 = vsel %vm1193_vm0, %v1191_v60, -inf  ;;  %v1189_v1 = vadd.f32 %v1185_v59, %v1126_v58 }
 0x1f3   : > { %1201 = vmax.xlane.f32.xlu1 %v1200_v0  ;;  %v1173_v4 = vpop.f32.mrf.mxu0 }
 0x1f4   : > { %v1186_v6 = vmul.f32 0.088388346, %v1173_v4  ;;  %v1194_v7 = vsel %vm1193_vm0, %v1189_v1, -inf  ;;  %v1192_v8 = vadd.f32 %v1188_v63, %v1129_v62 }
 0x1f5   : > { %1195 = vmax.xlane.f32.xlu0 %v1194_v7 }
 0x1f6   : > { %v1203_v10 = vsel %vm1193_vm0, %v1192_v8, -inf  ;;  %v1190_v11 = vadd.f32 %v1186_v6, %v1127_v5 }
 0x1f7   : > { %1204 = vmax.xlane.f32.xlu1 %v1203_v10 }
 0x1f8   : > { %v1197_v12 = vsel %vm1193_vm0, %v1190_v11, -inf }
 0x1f9   : > { %1198 = vmax.xlane.f32.xlu0 %v1197_v12 }
 0x1fd   : > { %v2139_v13 = vpop.f32.mrf.mxu0 }
 0x1fe   : > { %v1352_v15 = vmul.f32 0.088388346, %v2139_v13 }
 0x1ff   : > { %v1335_v14 = vpop.f32.mrf.mxu0 }
 0x200   : > { %v1350_v16 = vmul.f32 0.088388346, %v1335_v14  ;;  %v1356_v23 = vadd.f32 %v1352_v15, %v1128_v55 }
 0x201   : > { %v2140_v17 = vpop.f32.mrf.mxu0 }
 0x202   : > { %v1354_v18 = vadd.f32 %v1350_v16, %v1126_v58  ;;  %v1353_v20 = vmul.f32 0.088388346, %v2140_v17  ;;  %v1364_v26 = vsel %vm1193_vm0, %v1356_v23, -inf }
 0x203   : > { %v1338_v19 = vpop.f32.mrf.mxu0 }
 0x204   : > { %v1351_v21 = vmul.f32 0.088388346, %v1338_v19  ;;  %v1358_v22 = vsel %vm1193_vm0, %v1354_v18, -inf  ;;  %v1357_v27 = vadd.f32 %v1353_v20, %v1129_v62 }
 0x205   : > { %1359 = vmax.xlane.f32.xlu0 %v1358_v22 }
 0x206   : > { %v1355_v24 = vadd.f32 %v1351_v21, %v1127_v5  ;;  %v1367_v28 = vsel %vm1193_vm0, %v1357_v27, -inf }
 0x208   : > { %v1361_v25 = vsel %vm1193_vm0, %v1355_v24, -inf }
 0x209   : > { %1362 = vmax.xlane.f32.xlu1 %v1361_v25  ;;  %1365 = vmax.xlane.f32.xlu0 %v1364_v26 }
 0x20d   : > { %1368 = vmax.xlane.f32.xlu1 %v1367_v28 }
 0x27c   : > { %v1202_v29 = vpop.xlane.xlu1 %1201 }
 0x27d   : > { %v1208_v30 = vsub.f32 %v1191_v60, %v1202_v29  ;;  %v2307_v29 = vld [vmem:[%s2975_s3 + $0x74] ss:$8 sps:$4 sm:$0xff]  }
 0x27e   : > { %v1196_v31 = vpop.xlane.xlu0 %1195 }
 0x27f   : > { %v1206_v32 = vsub.f32 %v1189_v1, %v1196_v31  ;;  %v1214_v34 = vmul.f32 1.442695, %v1208_v30 }
 0x280   : > { %v1205_v33 = vpop.xlane.xlu1 %1204 }
 0x281   : > { %v1210_v35 = vmul.f32 1.442695, %v1206_v32  ;;  %v1209_v36 = vsub.f32 %v1192_v8, %v1205_v33 }
 0x282   : > { %v1199_v37 = vpop.xlane.xlu0 %1198 }
 0x283   : > { %2353 = vpow2.f32 %v1210_v35  ;;  %v1207_v38 = vsub.f32 %v1190_v11, %v1199_v37  ;;  %v1216_v39 = vmul.f32 1.442695, %v1209_v36 }
 0x284   : > { %2355 = vpow2.f32 %v1214_v34 }
 0x285   : > { %v1212_v43 = vmul.f32 1.442695, %v1207_v38  ;;  %v2305_v38 = vld [vmem:[%s2975_s3 + $0x70] ss:$8 sps:$4 sm:$0xff]  }
 0x287   : > { %2357 = vpow2.f32 %v1212_v43  ;;  %v2308_v43 = vld [vmem:[%s2975_s3 + $0x60] ss:$8 sps:$4 sm:$0xff]  }
 0x288   : > { %2359 = vpow2.f32 %v1216_v39 }
 0x28e   : > { %v1360_v45 = vpop.xlane.xlu0 %1359 }
 0x28f   : > { %v1370_v46 = vsub.f32 %v1354_v18, %v1360_v45  ;;  %v2313_v45 = vld [vmem:[%s2975_s3 + $0x54] ss:$8 sps:$4 sm:$0xff]  }
 0x290   : > { %v2354_v47 = vpop.eup %2353 }
 0x291   : > { %v1374_v48 = vmul.f32 1.442695, %v1370_v46  ;;  %v1218_v49 = vsel %vm1193_vm0, %v2354_v47, 0.0  ;;  %v2356_v50 = vpop.eup %2355  ;;  %v2311_v46 = vld [vmem:[%s2975_s3 + $0x50] ss:$8 sps:$4 sm:$0xff]  }
 0x292   : > { %v1363_v51 = vpop.xlane.xlu1 %1362  ;;  %1219 = vadd.xlane.f32.xlu0 %v1218_v49  ;;  %v1366_v41 = vpop.xlane.xlu0 %1365  ;;  %v1224_v57 = vsel %vm1193_vm0, %v2356_v50, 0.0  ;;  %v2319_v49 = vld [vmem:[%s2975_s3 + $0x34] ss:$8 sps:$4 sm:$0xff]  }
 0x293   : > { %2361 = vpow2.f32 %v1374_v48  ;;  %v1371_v52 = vsub.f32 %v1355_v24, %v1363_v51  ;;  %v1372_v53 = vsub.f32 %v1356_v23, %v1366_v41  ;;  %v2314_v48 = vld [vmem:[%s2975_s3 + $0x40] ss:$8 sps:$4 sm:$0xff]   ;;  %v2322_v51 = vld [vmem:[%s2975_s3 + $0x24] ss:$8 sps:$4 sm:$0xff]  }
 0x294   : > { %v2358_v54 = vpop.eup %2357  ;;  %v2320_v41 = vld [vmem:[%s2975_s3 + $0x20] ss:$8 sps:$4 sm:$0xff]  }
 0x295   : > { %v1376_v55 = vmul.f32 1.442695, %v1371_v52  ;;  %v1378_v56 = vmul.f32 1.442695, %v1372_v53  ;;  %v1221_v58 = vsel %vm1193_vm0, %v2358_v54, 0.0  ;;  %v2360_v59 = vpop.eup %2359 }
 0x296   : > { %v1369_v60 = vpop.xlane.xlu1 %1368  ;;  %1225 = vadd.xlane.f32.xlu0 %v1224_v57  ;;  %1222 = vadd.xlane.f32.xlu1 %v1221_v58  ;;  %v1227_v63 = vsel %vm1193_vm0, %v2360_v59, 0.0  ;;  %v2325_v52 = vld [vmem:[%s2975_s3 + $0x14] ss:$8 sps:$4 sm:$0xff]   ;;  %v2323_v53 = vld [vmem:[%s2975_s3 + $0x10] ss:$8 sps:$4 sm:$0xff]  }
 0x297   : > { %2363 = vpow2.f32 %v1376_v55  ;;  %v1373_v61 = vsub.f32 %v1357_v27, %v1369_v60  ;;  %v2326_v55 = vld [vmem:[%s2975_s3] ss:$8 sps:$4 sm:$0xff]   ;;  %v2329_v57 = vld [vmem:[%s2975_s3 + $0xf0] ss:$8 sps:$4 sm:$0xff]   ;;  %v2334_v58 = vld [vmem:[%s2975_s3 + $0xe4] ss:$8 sps:$4 sm:$0xff]  }
 0x298   : > { %2365 = vpow2.f32 %v1378_v56  ;;  %v2331_v56 = vld [vmem:[%s2975_s3 + $0xf4] ss:$8 sps:$4 sm:$0xff]  }
 0x299   : > { %v1380_v62 = vmul.f32 1.442695, %v1373_v61  ;;  %v2337_v60 = vld [vmem:[%s2975_s3 + $0xd4] ss:$8 sps:$4 sm:$0xff]   ;;  %v2335_v61 = vld [vmem:[%s2975_s3 + $0xd0] ss:$8 sps:$4 sm:$0xff]  }
 0x29a   : > { %1228 = vadd.xlane.f32.xlu1 %v1227_v63  ;;  %v2338_v63 = vld [vmem:[%s2975_s3 + $0xc0] ss:$8 sps:$4 sm:$0xff]  }
 0x29b   : > { %2367 = vpow2.f32 %v1380_v62  ;;  %v2340_v62 = vld [vmem:[%s2975_s3 + $0xc4] ss:$8 sps:$4 sm:$0xff]  }
 0x2a0   : > { %v2362_v0 = vpop.eup %2361 }
 0x2a1   : > { %v1382_v1 = vsel %vm1193_vm0, %v2362_v0, 0.0 }
 0x2a2   : > { %1383 = vadd.xlane.f32.xlu0 %v1382_v1  ;;  %v2341_v1 = vld [vmem:[%s2975_s3 + $0xb0] ss:$8 sps:$4 sm:$0xff]  }
 0x2a4   : > { %v2364_v4 = vpop.eup %2363 }
 0x2a5   : > { %v2366_v5 = vpop.eup %2365  ;;  %v1385_v6 = vsel %vm1193_vm0, %v2364_v4, 0.0 }
 0x2a6   : > { %1386 = vadd.xlane.f32.xlu1 %v1385_v6  ;;  %v1388_v7 = vsel %vm1193_vm0, %v2366_v5, 0.0  ;;  %v2349_v6 = vld [vmem:[%s2975_s3 + $0x94] ss:$8 sps:$4 sm:$0xff]  }
 0x2a7   : > { %1389 = vadd.xlane.f32.xlu0 %v1388_v7  ;;  %v2347_v7 = vld [vmem:[%s2975_s3 + $0x90] ss:$8 sps:$4 sm:$0xff]  }
 0x2a8   : > { %v2368_v8 = vpop.eup %2367 }
 0x2a9   : > { %v1391_v10 = vsel %vm1193_vm0, %v2368_v8, 0.0 }
 0x2aa   : > { %1392 = vadd.xlane.f32.xlu1 %v1391_v10  ;;  %v2350_v10 = vld [vmem:[%s2975_s3 + $0x80] ss:$8 sps:$4 sm:$0xff]  }
 0x31b   : > { %v1220_v11 = vpop.xlane.xlu0 %1219 }
 0x31c   : > { %2369 = vrcp.f32 %v1220_v11 }
 0x31f   : > { %v1223_v12 = vpop.xlane.xlu1 %1222  ;;  %v1226_v13 = vpop.xlane.xlu0 %1225 }
 0x320   : > { %2371 = vrcp.f32 %v1223_v12 }
 0x321   : > { %2373 = vrcp.f32 %v1226_v13 }
 0x323   : > { %v1229_v14 = vpop.xlane.xlu1 %1228 }
 0x324   : > { %2375 = vrcp.f32 %v1229_v14 }
 0x329   : > { %v2370_v15 = vpop.eup %2369 }
 0x32a   : > { %v1234_v18 = vmul.f32 %v2370_v15, %v2354_v47  ;;  %v2316_v47 = vld [vmem:[%s2975_s3 + $0x44] ss:$8 sps:$4 sm:$0xff]  }
 0x32b   : > { %v1384_v16 = vpop.xlane.xlu0 %1383 }
 0x32c   : > { %2377 = vrcp.f32 %v1384_v16 }
 0x32d   : > { %v2372_v17 = vpop.eup %2371 }
 0x32e   : > { %v1235_v19 = vmul.f32 %v2372_v17, %v2358_v54  ;;  %v2374_v20 = vpop.eup %2373  ;;  %v2328_v54 = vld [vmem:[%s2975_s3 + $0x4] ss:$8 sps:$4 sm:$0xff]  }
 0x32f   : > { %v1387_v21 = vpop.xlane.xlu1 %1386  ;;  %v1236_v25 = vmul.f32 %v2374_v20, %v2356_v50  ;;  %v2317_v50 = vld [vmem:[%s2975_s3 + $0x30] ss:$8 sps:$4 sm:$0xff]  }
 0x330   : > { %2379 = vrcp.f32 %v1387_v21  ;;  %v1390_v22 = vpop.xlane.xlu0 %1389  ;;  %v1238_v23 = vpack.c.bf16 %v1235_v19, %v1234_v18 }
 0x331   : > { %v2376_v24 = vpop.eup %2375  ;;  %2381 = vrcp.f32 %v1390_v22 }
 0x332   : > { %v1237_v26 = vmul.f32 %v2376_v24, %v2360_v59  ;;  %2129 = vmatprep.mubr.msk.bf16.mxu1 %vm1193_vm0, %v1238_v23  ;;  %v2332_v59 = vld [vmem:[%s2975_s3 + $0xe0] ss:$8 sps:$4 sm:$0xff]  }
 0x333   : > { %v1393_v27 = vpop.xlane.xlu1 %1392  ;;  %v1495_v23 = vld [vmem:[%s2976_s4] sm:$0x3] }
 0x334   : > { %v1239_v28 = vpack.c.bf16 %v1237_v26, %v1236_v25  ;;  %2383 = vrcp.f32 %v1393_v27  ;;  %v1500_v24 = vrot.slane %v1495_v23, %v2792_v42  ;;  %v1504_v25 = vrot.slane %v1495_v23, %v2806_v9 }
 0x336   : > { %2130 = vmatmul.mubr.msk.bf16.vlgmr.msra.gmra.mxu1 %vm1193_vm0, %v1239_v28  ;;  %v2393_v28 = vld [vmem:[%s2587_s12] sm:$0xff] }
 0x337   : > { %2142 = vmatpush3.bf16.msra.mxu1 %v2816_v44 }
 0x338   : > { %2143 = vmatprep.subr.bf16.mxu1 %v2814_v40 }
 0x339   : > { %v2378_v30 = vpop.eup %2377 }
 0x33a   : > { %v1398_v32 = vmul.f32 %v2378_v30, %v2362_v0  ;;  %v2343_v0 = vld [vmem:[%s2975_s3 + $0xb4] ss:$8 sps:$4 sm:$0xff]   ;;  %v1721_v30 = vunpack.c.h.bf16 %v2393_v28 }
 0x33b   : > { %2144 = vmatpush3.bf16.msra.mxu1 %v2814_v40  ;;  %v2310_v40 = vld [vmem:[%s2975_s3 + $0x64] ss:$8 sps:$4 sm:$0xff]  }
 0x33c   : > { %1667 = vmatprep.subr.bf16.mxu1 %v2307_v29  ;;  %v1720_v29 = vunpack.c.l.bf16 %v2393_v28 }
 0x33d   : > { %v2380_v31 = vpop.eup %2379 }
 0x33e   : > { %v1399_v33 = vmul.f32 %v2380_v31, %v2364_v4  ;;  %v2382_v34 = vpop.eup %2381  ;;  %v2346_v4 = vld [vmem:[%s2975_s3 + $0xa4] ss:$8 sps:$4 sm:$0xff]  }
 0x33f   : > { %v1400_v37 = vmul.f32 %v2382_v34, %v2366_v5  ;;  %v2344_v5 = vld [vmem:[%s2975_s3 + $0xa0] ss:$8 sps:$4 sm:$0xff]  }
 0x340   : > { %v1402_v35 = vpack.c.bf16 %v1399_v33, %v1398_v32  ;;  %v2394_v34 = vld [vmem:[%s2587_s12 + $0x8] sm:$0xff] }
 0x341   : > { %v2384_v36 = vpop.eup %2383 }
 0x342   : > { %2145 = vmatprep.mubr.msk.bf16.mxu1 %vm1193_vm0, %v1402_v35  ;;  %v1401_v44 = vmul.f32 %v2384_v36, %v2368_v8  ;;  %v2352_v8 = vld [vmem:[%s2975_s3 + $0x84] ss:$8 sps:$4 sm:$0xff]   ;;  %v1722_v35 = vunpack.c.l.bf16 %v2394_v34 }
 0x344   : > { %v1403_v39 = vpack.c.bf16 %v1401_v44, %v1400_v37 }
 0x346   : > { %2146 = vmatmul.mubr.msk.bf16.vlgmr.msra.gmra.mxu1 %vm1193_vm0, %v1403_v39 }
 0x347   : > { %1668 = vmatpush1.bf16.msra.mxu1 %v2305_v38  ;;  %v1723_v38 = vunpack.c.h.bf16 %v2394_v34 }
 0x348   : > { %1669 = vmatprep.subr.bf16.mxu1 %v2310_v40 }
 0x34b   : > { %1670 = vmatpush1.bf16.msra.mxu1 %v2308_v43 }
 0x34c   : > { %1671 = vmatprep.subr.bf16.mxu1 %v2313_v45 }
 0x34f   : > { %1672 = vmatpush1.bf16.msra.mxu1 %v2311_v46  ;;  %v1724_v46 = vunpack.c.l.bf16 %v2665_v2 }
 0x350   : > { %1673 = vmatprep.subr.bf16.mxu1 %v2316_v47 }
 0x353   : > { %1674 = vmatpush1.bf16.msra.mxu1 %v2314_v48 }
 0x354   : > { %1675 = vmatprep.subr.bf16.mxu1 %v2319_v49 }
 0x357   : > { %1676 = vmatpush1.bf16.msra.mxu1 %v2317_v50  ;;  %v1725_v50 = vunpack.c.h.bf16 %v2665_v2 }
 0x358   : > { %1677 = vmatprep.subr.bf16.mxu1 %v2322_v51 }
 0x35b   : > { %1678 = vmatpush1.bf16.msra.mxu1 %v2320_v41 }
 0x35c   : > { %1679 = vmatprep.subr.bf16.mxu1 %v2325_v52 }
 0x35f   : > { %1680 = vmatpush1.bf16.msra.mxu1 %v2323_v53 }
 0x360   : > { %1681 = vmatprep.subr.bf16.mxu1 %v2328_v54  ;;  %v1726_v54 = vunpack.c.l.bf16 %v2668_v3 }
 0x363   : > { %1682 = vmatpush1.bf16.msra.mxu1 %v2326_v55 }
 0x364   : > { %1683 = vmatprep.subr.bf16.mxu1 %v2331_v56 }
 0x367   : > { %1684 = vmatpush2.bf16.msra.mxu1 %v2329_v57 }
 0x368   : > { %1685 = vmatprep.subr.bf16.mxu1 %v2334_v58  ;;  %v1727_v58 = vunpack.c.h.bf16 %v2668_v3 }
 0x36b   : > { %1686 = vmatpush2.bf16.msra.mxu1 %v2332_v59 }
 0x36c   : > { %1687 = vmatprep.subr.bf16.mxu1 %v2337_v60 }
 0x36f   : > { %1688 = vmatpush2.bf16.msra.mxu1 %v2335_v61 }
 0x370   : > { %1689 = vmatprep.subr.bf16.mxu1 %v2340_v62 }
 0x373   : > { %1690 = vmatpush2.bf16.msra.mxu1 %v2338_v63 }
 0x374   : > { %1691 = vmatprep.subr.bf16.mxu1 %v2343_v0 }
 0x377   : > { %1692 = vmatpush2.bf16.msra.mxu1 %v2341_v1 }
 0x378   : > { %1693 = vmatprep.subr.bf16.mxu1 %v2346_v4 }
 0x37b   : > { %1694 = vmatpush2.bf16.msra.mxu1 %v2344_v5 }
 0x37c   : > { %1695 = vmatprep.subr.bf16.mxu1 %v2349_v6 }
 0x37f   : > { %1696 = vmatpush2.bf16.msra.mxu1 %v2347_v7 }
 0x380   : > { %1697 = vmatprep.subr.bf16.mxu1 %v2352_v8 }
 0x383   : > { %1698 = vmatpush2.bf16.msra.mxu1 %v2350_v10 }
 0x3f6   : > { %v2131_v11 = vpop.f32.mrf.mxu1 }
 0x3f8   : > { %v1280_v12 = vpop.f32.mrf.mxu1 }
 0x3fa   : > { %v2132_v13 = vpop.f32.mrf.mxu1 }
 0x3fb   : > { %v1461_v22 = vpack.c.bf16 %v2132_v13, %v2131_v11 }
 0x3fc   : > { %v1283_v14 = vpop.f32.mrf.mxu1 }
 0x3fd   : > { %v1459_v20 = vpack.c.bf16 %v1283_v14, %v1280_v12 }
 0x406   : > { %v2147_v15 = vpop.f32.mrf.mxu1 }
 0x408   : > { %v1444_v16 = vpop.f32.mrf.mxu1 }
 0x40a   : > { %v2148_v17 = vpop.f32.mrf.mxu1 }
 0x40b   : > { %v1462_v21 = vpack.c.bf16 %v2148_v17, %v2147_v15 }
 0x40c   : > { %v1447_v18 = vpop.f32.mrf.mxu1 }
 0x40d   : > { %v1460_v19 = vpack.c.bf16 %v1447_v18, %v1444_v16 }
 0x40f   : > { %1699 = vmatprep.mubr.bf16.mxu1 %v1460_v19 }
 0x410   : > { %1700 = vmatmul.mubr.bf16.vlgmr.msra.gmra.mxu1 %v1459_v20 }
 0x411   : > { %1709 = vmatprep.mubr.bf16.mxu1 %v1462_v21 }
 0x418   : > { %1710 = vmatmul.mubr.bf16.gmra.mxu1 %v1461_v22 }
 0x4d0   : > { %v1701_v26 = vpop.f32.mrf.mxu1 }
 0x4d1   : > { %v1702_v27 = vadd.f32 %v1701_v26, %v1500_v24 }
 0x4d2   : > { %v1703_v31 = vpop.f32.mrf.mxu1 }
 0x4d3   : > { %v1704_v32 = vadd.f32 %v1703_v31, %v1504_v25  ;;  %v1728_v36 = vadd.f32 %v1720_v29, %v1702_v27 }
 0x4d4   : > { %v1705_v33 = vpop.f32.mrf.mxu1 }
 0x4d5   : > { %v1729_v37 = vadd.f32 %v1721_v30, %v1704_v32  ;;  %v1706_v44 = vadd.f32 %v1705_v33, %v1500_v24 }
 0x4d6   : > { %v1707_v39 = vpop.f32.mrf.mxu1 }
 0x4d7   : > { %v1708_v40 = vadd.f32 %v1707_v39, %v1504_v25  ;;  %v1738_v43 = vadd.f32 %v1729_v37, %v1728_v36  ;;  %v1730_v47 = vadd.f32 %v1722_v35, %v1706_v44 }
 0x4d8   : > { %v1711_v45 = vpop.f32.mrf.mxu1 }
 0x4d9   : > { %v1731_v48 = vadd.f32 %v1723_v38, %v1708_v40  ;;  %v1712_v49 = vadd.f32 %v1711_v45, %v1500_v24  ;;  %1739 = vadd.xlane.f32.xlu0 %v1738_v43  ;;  %v1736_v40 = vld [vmem:[%s2977_s5] sm:$0x3] }
 0x4da   : > { %v1713_v51 = vpop.f32.mrf.mxu1  ;;  %v1737_v45 = vld [vmem:[%s2978_s6] sm:$0x3] }
 0x4db   : > { %v1714_v41 = vadd.f32 %v1713_v51, %v1504_v25  ;;  %v1741_v52 = vadd.f32 %v1731_v48, %v1730_v47  ;;  %v1732_v55 = vadd.f32 %v1724_v46, %v1712_v49  ;;  %v1807_v46 = vrot.slane %v1736_v40, %v2792_v42 }
 0x4dc   : > { %v1715_v53 = vpop.f32.mrf.mxu1  ;;  %v1826_v49 = vrot.slane %v1737_v45, %v2792_v42 }
 0x4dd   : > { %v1733_v56 = vadd.f32 %v1725_v50, %v1714_v41  ;;  %v1716_v57 = vadd.f32 %v1715_v53, %v1500_v24  ;;  %1742 = vadd.xlane.f32.xlu1 %v1741_v52  ;;  %v1830_v50 = vrot.slane %v1737_v45, %v2806_v9 }
 0x4de   : > { %v1717_v59 = vpop.f32.mrf.mxu1 }
 0x4df   : > { %v1718_v60 = vadd.f32 %v1717_v59, %v1504_v25  ;;  %v1744_v61 = vadd.f32 %v1733_v56, %v1732_v55  ;;  %v1734_v62 = vadd.f32 %v1726_v54, %v1716_v57 }
 0x4e1   : > { %v1735_v63 = vadd.f32 %v1727_v58, %v1718_v60  ;;  %1745 = vadd.xlane.f32.xlu0 %v1744_v61 }
 0x4e3   : > { %v1747_v0 = vadd.f32 %v1735_v63, %v1734_v62 }
 0x4e5   : > { %1748 = vadd.xlane.f32.xlu1 %v1747_v0 }
 0x562   : > { %v1740_v2 = vpop.xlane.xlu0 %1739 }
 0x563   : > { %v1751_v1 = vmul.f32 0.00390625, %v1740_v2 }
 0x565   : > { %v1755_v4 = vsub.f32 %v1728_v36, %v1751_v1  ;;  %v1756_v5 = vsub.f32 %v1729_v37, %v1751_v1 }
 0x566   : > { %v1743_v6 = vpop.xlane.xlu1 %1742 }
 0x567   : > { %v1752_v7 = vmul.f32 0.00390625, %v1743_v6  ;;  %v1763_v8 = vmul.f32 %v1755_v4, %v1755_v4  ;;  %v1764_v10 = vmul.f32 %v1756_v5, %v1756_v5 }
 0x569   : > { %v1757_v11 = vsub.f32 %v1730_v47, %v1752_v7  ;;  %v1758_v12 = vsub.f32 %v1731_v48, %v1752_v7  ;;  %v1771_v13 = vadd.f32 %v1764_v10, %v1763_v8  ;;  %v1811_v47 = vrot.slane %v1736_v40, %v2806_v9 }
 0x56a   : > { %v1746_v3 = vpop.xlane.xlu0 %1745 }
 0x56b   : > { %v1753_v14 = vmul.f32 0.00390625, %v1746_v3  ;;  %1772 = vadd.xlane.f32.xlu0 %v1771_v13  ;;  %v1765_v15 = vmul.f32 %v1757_v11, %v1757_v11  ;;  %v1766_v16 = vmul.f32 %v1758_v12, %v1758_v12 }
 0x56d   : > { %v1759_v17 = vsub.f32 %v1732_v55, %v1753_v14  ;;  %v1760_v18 = vsub.f32 %v1733_v56, %v1753_v14  ;;  %v1774_v19 = vadd.f32 %v1766_v16, %v1765_v15 }
 0x56e   : > { %v1749_v20 = vpop.xlane.xlu1 %1748 }
 0x56f   : > { %v1754_v21 = vmul.f32 0.00390625, %v1749_v20  ;;  %1775 = vadd.xlane.f32.xlu1 %v1774_v19  ;;  %v1767_v22 = vmul.f32 %v1759_v17, %v1759_v17  ;;  %v1768_v23 = vmul.f32 %v1760_v18, %v1760_v18 }
 0x571   : > { %v1761_v24 = vsub.f32 %v1734_v62, %v1754_v21  ;;  %v1762_v25 = vsub.f32 %v1735_v63, %v1754_v21  ;;  %v1777_v26 = vadd.f32 %v1768_v23, %v1767_v22 }
 0x573   : > { %1778 = vadd.xlane.f32.xlu0 %v1777_v26  ;;  %v1769_v27 = vmul.f32 %v1761_v24, %v1761_v24  ;;  %v1770_v28 = vmul.f32 %v1762_v25, %v1762_v25 }
 0x575   : > { %v1780_v29 = vadd.f32 %v1770_v28, %v1769_v27 }
 0x577   : > { %1781 = vadd.xlane.f32.xlu1 %v1780_v29 }
 0x5f4   : > { %v1773_v30 = vpop.xlane.xlu0 %1772 }
 0x5f5   : > { %v1783_v31 = vmul.f32 0.00390625, %v1773_v30 }
 0x5f7   : > { %v1787_v32 = vadd.f32 1e-05, %v1783_v31 }
 0x5f8   : > { %v1776_v33 = vpop.xlane.xlu1 %1775 }
 0x5f9   : > { %2385 = vrsqrt.f32 %v1787_v32  ;;  %v1784_v34 = vmul.f32 0.00390625, %v1776_v33 }
 0x5fb   : > { %v1788_v35 = vadd.f32 1e-05, %v1784_v34 }
 0x5fc   : > { %v1779_v36 = vpop.xlane.xlu0 %1778 }
 0x5fd   : > { %2387 = vrsqrt.f32 %v1788_v35  ;;  %v1785_v37 = vmul.f32 0.00390625, %v1779_v36 }
 0x5ff   : > { %v1789_v44 = vadd.f32 1e-05, %v1785_v37 }
 0x600   : > { %v1782_v38 = vpop.xlane.xlu1 %1781 }
 0x601   : > { %2389 = vrsqrt.f32 %v1789_v44  ;;  %v1786_v39 = vmul.f32 0.00390625, %v1782_v38 }
 0x603   : > { %v1790_v43 = vadd.f32 1e-05, %v1786_v39 }
 0x605   : > { %2391 = vrsqrt.f32 %v1790_v43 }
 0x606   : > { %v2386_v48 = vpop.eup %2385 }
 0x607   : > { %v1795_v51 = vmul.f32 %v2386_v48, %v1755_v4  ;;  %v1796_v41 = vmul.f32 %v2386_v48, %v1756_v5 }
 0x609   : > { %v1814_v52 = vmul.f32 %v1807_v46, %v1795_v51  ;;  %v1815_v53 = vmul.f32 %v1811_v47, %v1796_v41 }
 0x60a   : > { %v2388_v54 = vpop.eup %2387 }
 0x60b   : > { %v1833_v55 = vadd.f32 %v1826_v49, %v1814_v52  ;;  %v1834_v56 = vadd.f32 %v1830_v50, %v1815_v53  ;;  %v1797_v57 = vmul.f32 %v2388_v54, %v1757_v11  ;;  %v1798_v58 = vmul.f32 %v2388_v54, %v1758_v12 }
 0x60d   : > { %v2097_v59 = vpack.c.bf16 %v1834_v56, %v1833_v55  ;;  %v1816_v60 = vmul.f32 %v1807_v46, %v1797_v57  ;;  %v1817_v61 = vmul.f32 %v1811_v47, %v1798_v58 }
 0x60e   : > { %v2390_v42 = vpop.eup %2389 }
 0x60f   : > { %1865 = vst [vmem:[%s332_s10] sm:$0xff] %v2097_v59  ;;  %v1835_v9 = vadd.f32 %v1826_v49, %v1816_v60  ;;  %v1836_v62 = vadd.f32 %v1830_v50, %v1817_v61  ;;  %v1799_v63 = vmul.f32 %v2390_v42, %v1759_v17  ;;  %v1800_v0 = vmul.f32 %v2390_v42, %v1760_v18 }
 0x611   : > { %v2098_v2 = vpack.c.bf16 %v1836_v62, %v1835_v9  ;;  %v1818_v1 = vmul.f32 %v1807_v46, %v1799_v63  ;;  %v1819_v4 = vmul.f32 %v1811_v47, %v1800_v0 }
 0x612   : > { %v2392_v5 = vpop.eup %2391 }
 0x613   : > { %1866 = vst [vmem:[%s332_s10 + $0x8] sm:$0xff] %v2098_v2  ;;  %v1837_v6 = vadd.f32 %v1826_v49, %v1818_v1  ;;  %v1838_v7 = vadd.f32 %v1830_v50, %v1819_v4  ;;  %v1801_v8 = vmul.f32 %v2392_v5, %v1761_v24  ;;  %v1802_v10 = vmul.f32 %v2392_v5, %v1762_v25 }
 0x615   : > { %v2099_v11 = vpack.c.bf16 %v1838_v7, %v1837_v6  ;;  %v1820_v12 = vmul.f32 %v1807_v46, %v1801_v8  ;;  %v1821_v13 = vmul.f32 %v1811_v47, %v1802_v10 }
 0x617   : > { %1867 = vst [vmem:[%s332_s10 + $0x10] sm:$0xff] %v2099_v11  ;;  %v1839_v3 = vadd.f32 %v1826_v49, %v1820_v12  ;;  %v1840_v14 = vadd.f32 %v1830_v50, %v1821_v13 }
 0x619   : > { %v2100_v15 = vpack.c.bf16 %v1840_v14, %v1839_v3 }
 0x61b   : > { %1868 = vst [vmem:[%s332_s10 + $0x18] sm:$0xff] %v2100_v15 }
 0x61c PF: > { %s18_s27 = sadd.s32 1, %s2401_s27  }
 0x61d   : > { %p15_p5 = scmp.ge.s32.totalorder %s18_s27, 6  }
 0x61f   :  { %17 = sbr.rel (!%p15_p5) target bundleno = 1 (0x1), region = 85 }

// kernel: seq2seq_forward.13
= control target key start
LH: loop header
LB: loop body
LE: loop exit
PB: predicated region body
PF: predicated region fallthrough
CT: control target
= control target key end

     0   :  { %s2552_s24 = smov 0   ;;  %s2554_s25 = smov 0   ;;  %s3364_s0 = inlined_call_operand.vmem [shape: bf16[128,256], index: 0, kind: input, shape index: {}]   ;;  %s3365_s1 = inlined_call_operand.vmem [shape: bf16[256,512], index: 1, kind: input, shape index: {}]   ;;  %s3366_s2 = inlined_call_operand.vmem [shape: f32[1,512], index: 2, kind: input, shape index: {}]   ;;  %s3367_s3 = inlined_call_operand.vmem [shape: bf16[512,256], index: 3, kind: input, shape index: {}]   ;;  %s3368_s4 = inlined_call_operand.vmem [shape: f32[1,256], index: 4, kind: input, shape index: {}]   ;;  %s3369_s5 = inlined_call_operand.vmem [shape: f32[1,256], index: 5, kind: input, shape index: {}]   ;;  %s3370_s6 = inlined_call_operand.vmem [shape: f32[1,256], index: 6, kind: input, shape index: {}]   ;;  %s3371_s7 = inlined_call_operand.vmem [shape: bf16[128,256], index: 7, kind: output, shape index: {}]  }
   0x1   :  { %s2556_s26 = smov 0   ;;  %s2558_s27 = smov 0  }
   0x2   :  { %s2560_s28 = smov 0  }
   0x3 LB: > { %s26_s29 = sadd.s32 1, %s2505_s27  ;;  %p69_p1 = scmp.ne.s32.totalorder %s2497_s25, %s2493_s24  ;;  %s2509_s28 = sphi %s2560_s28, %s17_s28   ;;  %s2505_s27 = sphi %s2558_s27, %s3375_s27   ;;  %s2501_s26 = sphi %s2556_s26, %s3374_s26   ;;  %s2497_s25 = sphi %s2554_s25, %s3373_s25   ;;  %s2493_s24 = sphi %s2552_s24, %s3372_s24  }
   0x4   : > { %p27_p0 = scmp.ge.s32.totalorder %s26_s29, 2  ;;  %p70_p2 = scmp.eq.s32.totalorder %s2509_s28, 0 }
   0x5   : > { %s62_s8 = sadd.s32 1, %s2497_s25  ;;  %p2148_p5 = scmp.ge.s32.totalorder %s2509_s28, 2 }
   0x6   : > { %s3377_s29 = smov (%p27_p0, %s26_s29), 0  ;;  %p71_p3 = por %p70_p2, %p69_p1 }
   0x7   : > { %s59_s30 = ssub.s32 %s2505_s27, %s3377_s29  ;;  %255 = sbr.rel (%p2148_p5) target bundleno = 32 (0x20), region = 32 }
   0x8   : > { %p60_p4 = scmp.eq.s32.totalorder %s59_s30, 0 }
   0xa   : > { %s2587_s9 = scalar_select %p60_p4, %s2497_s25, %s62_s8  }
   0xc   : > { %258 = sbr.rel (!%p71_p3) target bundleno = 32 (0x20), region = 36  ;;  %s260_s10 = sand.u32 (%p71_p3), 1, %s2497_s25  }
   0xd   : > { %s2260_s11 = sshll.u32 (%p71_p3), %s2505_s27, 3  ;;  %s2149_s12 = sshll.u32 (%p71_p3), %s260_s10, 8 }
   0xe   : > { %s2595_s15 = scalar_lea.vmem (%p71_p3), %s3365_s1, %s2260_s11  ;;  %s2600_s16 = scalar_lea.vmem (%p71_p3), [#allocation3], %s2149_s12 }
   0xf   : > { %v356_v0 = vld [vmem:[%s2595_s15] sm:$0xff] (%p71_p3)  ;;  %v358_v1 = vld [vmem:[%s2595_s15 + $0x10] sm:$0xff] (%p71_p3) }
  0x10   : > { %v360_v2 = vld [vmem:[%s2595_s15 + $0x20] sm:$0xff] (%p71_p3)  ;;  %357 = vst [vmem:[%s2600_s16] sm:$0xff] (%p71_p3), %v356_v0  ;;  %359 = vst [vmem:[%s2600_s16 + $0x8] sm:$0xff] (%p71_p3), %v358_v1  ;;  %v362_v3 = vld [vmem:[%s2595_s15 + $0x30] sm:$0xff] (%p71_p3) }
  0x11   : > { %361 = vst [vmem:[%s2600_s16 + $0x10] sm:$0xff] %v360_v2  ;;  %v364_v4 = vld [vmem:[%s2595_s15 + $0x40] sm:$0xff]  ;;  %v366_v5 = vld [vmem:[%s2595_s15 + $0x50] sm:$0xff]  ;;  %363 = vst [vmem:[%s2600_s16 + $0x18] sm:$0xff] %v362_v3 }
  0x12   : > { %365 = vst [vmem:[%s2600_s16 + $0x20] sm:$0xff] %v364_v4  ;;  %367 = vst [vmem:[%s2600_s16 + $0x28] sm:$0xff] %v366_v5  ;;  %v368_v6 = vld [vmem:[%s2595_s15 + $0x60] sm:$0xff]  ;;  %v370_v7 = vld [vmem:[%s2595_s15 + $0x70] sm:$0xff] }
  0x13   : > { %v372_v8 = vld [vmem:[%s2595_s15 + $0x80] sm:$0xff]  ;;  %369 = vst [vmem:[%s2600_s16 + $0x30] sm:$0xff] %v368_v6  ;;  %371 = vst [vmem:[%s2600_s16 + $0x38] sm:$0xff] %v370_v7  ;;  %v374_v9 = vld [vmem:[%s2595_s15 + $0x90] sm:$0xff] }
  0x14   : > { %373 = vst [vmem:[%s2600_s16 + $0x40] sm:$0xff] %v372_v8  ;;  %v376_v10 = vld [vmem:[%s2595_s15 + $0xa0] sm:$0xff]  ;;  %v378_v11 = vld [vmem:[%s2595_s15 + $0xb0] sm:$0xff]  ;;  %375 = vst [vmem:[%s2600_s16 + $0x48] sm:$0xff] %v374_v9 }
  0x15   : > { %377 = vst [vmem:[%s2600_s16 + $0x50] sm:$0xff] %v376_v10  ;;  %379 = vst [vmem:[%s2600_s16 + $0x58] sm:$0xff] %v378_v11  ;;  %v380_v12 = vld [vmem:[%s2595_s15 + $0xc0] sm:$0xff]  ;;  %v382_v13 = vld [vmem:[%s2595_s15 + $0xd0] sm:$0xff] }
  0x16   : > { %v384_v14 = vld [vmem:[%s2595_s15 + $0xe0] sm:$0xff]  ;;  %381 = vst [vmem:[%s2600_s16 + $0x60] sm:$0xff] %v380_v12  ;;  %383 = vst [vmem:[%s2600_s16 + $0x68] sm:$0xff] %v382_v13  ;;  %v386_v15 = vld [vmem:[%s2595_s15 + $0xf0] sm:$0xff] }
  0x17   : > { %385 = vst [vmem:[%s2600_s16 + $0x70] sm:$0xff] %v384_v14  ;;  %v388_v16 = vld [vmem:[%s2595_s15 + $0x100] sm:$0xff]  ;;  %v390_v17 = vld [vmem:[%s2595_s15 + $0x110] sm:$0xff]  ;;  %387 = vst [vmem:[%s2600_s16 + $0x78] sm:$0xff] %v386_v15 }
  0x18   : > { %389 = vst [vmem:[%s2600_s16 + $0x80] sm:$0xff] %v388_v16  ;;  %391 = vst [vmem:[%s2600_s16 + $0x88] sm:$0xff] %v390_v17  ;;  %v392_v18 = vld [vmem:[%s2595_s15 + $0x120] sm:$0xff]  ;;  %v394_v19 = vld [vmem:[%s2595_s15 + $0x130] sm:$0xff] }
  0x19   : > { %v396_v20 = vld [vmem:[%s2595_s15 + $0x140] sm:$0xff]  ;;  %393 = vst [vmem:[%s2600_s16 + $0x90] sm:$0xff] %v392_v18  ;;  %395 = vst [vmem:[%s2600_s16 + $0x98] sm:$0xff] %v394_v19  ;;  %v398_v21 = vld [vmem:[%s2595_s15 + $0x150] sm:$0xff] }
  0x1a   : > { %397 = vst [vmem:[%s2600_s16 + $0xa0] sm:$0xff] %v396_v20  ;;  %v400_v22 = vld [vmem:[%s2595_s15 + $0x160] sm:$0xff]  ;;  %v402_v23 = vld [vmem:[%s2595_s15 + $0x170] sm:$0xff]  ;;  %399 = vst [vmem:[%s2600_s16 + $0xa8] sm:$0xff] %v398_v21 }
  0x1b   : > { %401 = vst [vmem:[%s2600_s16 + $0xb0] sm:$0xff] %v400_v22  ;;  %403 = vst [vmem:[%s2600_s16 + $0xb8] sm:$0xff] %v402_v23  ;;  %v404_v24 = vld [vmem:[%s2595_s15 + $0x180] sm:$0xff]  ;;  %v406_v25 = vld [vmem:[%s2595_s15 + $0x190] sm:$0xff] }
  0x1c   : > { %v408_v26 = vld [vmem:[%s2595_s15 + $0x1a0] sm:$0xff]  ;;  %405 = vst [vmem:[%s2600_s16 + $0xc0] sm:$0xff] %v404_v24  ;;  %407 = vst [vmem:[%s2600_s16 + $0xc8] sm:$0xff] %v406_v25  ;;  %v410_v27 = vld [vmem:[%s2595_s15 + $0x1b0] sm:$0xff] }
  0x1d   : > { %409 = vst [vmem:[%s2600_s16 + $0xd0] sm:$0xff] %v408_v26  ;;  %v412_v28 = vld [vmem:[%s2595_s15 + $0x1c0] sm:$0xff]  ;;  %v414_v29 = vld [vmem:[%s2595_s15 + $0x1d0] sm:$0xff]  ;;  %411 = vst [vmem:[%s2600_s16 + $0xd8] sm:$0xff] %v410_v27 }
  0x1e   : > { %413 = vst [vmem:[%s2600_s16 + $0xe0] sm:$0xff] %v412_v28  ;;  %415 = vst [vmem:[%s2600_s16 + $0xe8] sm:$0xff] %v414_v29  ;;  %v416_v30 = vld [vmem:[%s2595_s15 + $0x1e0] sm:$0xff]  ;;  %v418_v31 = vld [vmem:[%s2595_s15 + $0x1f0] sm:$0xff] }
  0x1f   : > { %417 = vst [vmem:[%s2600_s16 + $0xf0] sm:$0xff] %v416_v30  ;;  %419 = vst [vmem:[%s2600_s16 + $0xf8] sm:$0xff] %v418_v31 }
  0x20 PF: > { %p2152_p6 = scmp.ge.s32.totalorder %s2509_s28, 1  ;;  %p442_p7 = scmp.lt.s32.totalorder %s2509_s28, 3 }
  0x22   : > { %p443_p8 = pnand %p2152_p6, %p442_p7 }
  0x23   : > { %s449_s17 = sand.u32 (!%p443_p8), 1, %s2493_s24   ;;  %s2154_s18 = sshll.u32 (!%p443_p8), %s2501_s26, 1 }
  0x24   : > { %446 = sbr.rel (%p443_p8) target bundleno = 954 (0x3ba), region = 82  ;;  %s2153_s19 = sshll.u32 (!%p443_p8), %s449_s17, 8 }
  0x25   : > { %p506_p9 = scmp.lt.s32.totalorder (!%p443_p8), %s2154_s18, 3  ;;  %s2155_s20 = sshll.u32 (!%p443_p8), %s2501_s26, 5 }
  0x26   : > { %p511_p10 = scmp.lt.s32.totalorder (!%p443_p8), %s2155_s20, 63  ;;  %s2679_s24 = scalar_lea.vmem (!%p443_p8), [#allocation3], %s2153_s19 }
  0x27   : > { %p2158_p11 = scmp.ne.s32.totalorder (!%p443_p8), %s2501_s26, 0 }
  0x29   : > { %s3379_s18 = smov (!%p506_p9, %s2154_s18), 3  ;;  %s3381_s20 = smov (!%p511_p10, %s2155_s20), 63 }
  0x2a   : > { %s508_s23 = scalar_lea.vmem %s3366_s2, %s3379_s18  ;;  %s2261_s30 = sshll.u32 %s3381_s20, 3 }
  0x2b   : > { %s2677_s11 = scalar_lea.vmem %s3367_s3, %s2261_s30  ;;  %527 = sbr.rel (%p2158_p11) target bundleno = 65 (0x41), region = 90 }
  0x30   : > { %v2511_v32 = vmov 0.0  }
  0x31   : > { %528 = vst [vmem:[#allocation2 + $0xb0] sm:$0xff] %v2511_v32  ;;  %529 = vst [vmem:[#allocation2] sm:$0xff] %v2511_v32 }
  0x32   : > { %530 = vst [vmem:[#allocation2 + $0xd8] sm:$0xff] %v2511_v32  ;;  %531 = vst [vmem:[#allocation2 + $0x18] sm:$0xff] %v2511_v32 }
  0x33   : > { %532 = vst [vmem:[#allocation2 + $0x50] sm:$0xff] %v2511_v32  ;;  %533 = vst [vmem:[#allocation2 + $0x68] sm:$0xff] %v2511_v32 }
  0x34   : > { %534 = vst [vmem:[#allocation2 + $0x30] sm:$0xff] %v2511_v32  ;;  %535 = vst [vmem:[#allocation2 + $0x48] sm:$0xff] %v2511_v32 }
  0x35   : > { %536 = vst [vmem:[#allocation2 + $0x80] sm:$0xff] %v2511_v32  ;;  %537 = vst [vmem:[#allocation2 + $0x88] sm:$0xff] %v2511_v32 }
  0x36   : > { %538 = vst [vmem:[#allocation2 + $0xe8] sm:$0xff] %v2511_v32  ;;  %539 = vst [vmem:[#allocation2 + $0xb8] sm:$0xff] %v2511_v32 }
  0x37   : > { %540 = vst [vmem:[#allocation2 + $0x60] sm:$0xff] %v2511_v32  ;;  %541 = vst [vmem:[#allocation2 + $0xf0] sm:$0xff] %v2511_v32 }
  0x38   : > { %542 = vst [vmem:[#allocation2 + $0x8] sm:$0xff] %v2511_v32  ;;  %543 = vst [vmem:[#allocation2 + $0x78] sm:$0xff] %v2511_v32 }
  0x39   : > { %544 = vst [vmem:[#allocation2 + $0x38] sm:$0xff] %v2511_v32  ;;  %545 = vst [vmem:[#allocation2 + $0x58] sm:$0xff] %v2511_v32 }
  0x3a   : > { %546 = vst [vmem:[#allocation2 + $0x40] sm:$0xff] %v2511_v32  ;;  %547 = vst [vmem:[#allocation2 + $0xc8] sm:$0xff] %v2511_v32 }
  0x3b   : > { %548 = vst [vmem:[#allocation2 + $0xe0] sm:$0xff] %v2511_v32  ;;  %549 = vst [vmem:[#allocation2 + $0x90] sm:$0xff] %v2511_v32 }
  0x3c   : > { %550 = vst [vmem:[#allocation2 + $0x70] sm:$0xff] %v2511_v32  ;;  %551 = vst [vmem:[#allocation2 + $0xc0] sm:$0xff] %v2511_v32 }
  0x3d   : > { %552 = vst [vmem:[#allocation2 + $0xa8] sm:$0xff] %v2511_v32  ;;  %553 = vst [vmem:[#allocation2 + $0xd0] sm:$0xff] %v2511_v32 }
  0x3e   : > { %554 = vst [vmem:[#allocation2 + $0x10] sm:$0xff] %v2511_v32  ;;  %555 = vst [vmem:[#allocation2 + $0x28] sm:$0xff] %v2511_v32 }
  0x3f   : > { %556 = vst [vmem:[#allocation2 + $0xa0] sm:$0xff] %v2511_v32  ;;  %557 = vst [vmem:[#allocation2 + $0xf8] sm:$0xff] %v2511_v32 }
  0x40   : > { %558 = vst [vmem:[#allocation2 + $0x20] sm:$0xff] %v2511_v32  ;;  %559 = vst [vmem:[#allocation2 + $0x98] sm:$0xff] %v2511_v32 }
  0x41 PF: > { %v2319_v33 = vld [vmem:[%s2679_s24 + $0x74] ss:$8 sps:$4 sm:$0xff]   ;;  %v2321_v34 = vld [vmem:[%s2679_s24 + $0x70] ss:$8 sps:$4 sm:$0xff]   ;;  %v2322_v35 = vld [vmem:[%s2679_s24 + $0x64] ss:$8 sps:$4 sm:$0xff]  }
  0x42   : > { %860 = vmatprep.subr.bf16.mxu0 %v2319_v33  ;;  %v2324_v36 = vld [vmem:[%s2679_s24 + $0x60] ss:$8 sps:$4 sm:$0xff]   ;;  %v2325_v37 = vld [vmem:[%s2679_s24 + $0x54] ss:$8 sps:$4 sm:$0xff]   ;;  %v2327_v38 = vld [vmem:[%s2679_s24 + $0x50] ss:$8 sps:$4 sm:$0xff]  }
  0x43   : > { %861 = vmatpush1.bf16.msra.mxu0 %v2321_v34  ;;  %v2328_v39 = vld [vmem:[%s2679_s24 + $0x44] ss:$8 sps:$4 sm:$0xff]   ;;  %v2330_v40 = vld [vmem:[%s2679_s24 + $0x40] ss:$8 sps:$4 sm:$0xff]   ;;  %v2331_v41 = vld [vmem:[%s2679_s24 + $0x34] ss:$8 sps:$4 sm:$0xff]  }
  0x44   : > { %862 = vmatprep.subr.bf16.mxu0 %v2322_v35  ;;  %v2333_v42 = vld [vmem:[%s2679_s24 + $0x30] ss:$8 sps:$4 sm:$0xff]   ;;  %v2334_v43 = vld [vmem:[%s2679_s24 + $0x24] ss:$8 sps:$4 sm:$0xff]   ;;  %v2336_v44 = vld [vmem:[%s2679_s24 + $0x20] ss:$8 sps:$4 sm:$0xff]  }
  0x45   : > { %v2337_v45 = vld [vmem:[%s2679_s24 + $0x14] ss:$8 sps:$4 sm:$0xff]   ;;  %v2369_v46 = vld [vmem:[%s3364_s0 + $0x4] ss:$8 sps:$4 sm:$0xff]   ;;  %v2339_v47 = vld [vmem:[%s2679_s24 + $0x10] ss:$8 sps:$4 sm:$0xff]  }
  0x46   : > { %v2340_v48 = vld [vmem:[%s2679_s24 + $0x4] ss:$8 sps:$4 sm:$0xff]   ;;  %892 = vmatprep.mubr.bf16.mxu0 %v2369_v46  ;;  %v2342_v49 = vld [vmem:[%s2679_s24] ss:$8 sps:$4 sm:$0xff]   ;;  %v2343_v50 = vld [vmem:[%s2679_s24 + $0xf4] ss:$8 sps:$4 sm:$0xff]  }
  0x47   : > { %863 = vmatpush1.bf16.msra.mxu0 %v2324_v36  ;;  %v2345_v51 = vld [vmem:[%s2679_s24 + $0xf0] ss:$8 sps:$4 sm:$0xff]   ;;  %v2346_v52 = vld [vmem:[%s2679_s24 + $0xe4] ss:$8 sps:$4 sm:$0xff]   ;;  %v2391_v53 = vld [vmem:[%s2677_s11 + $0x74] ss:$8 sps:$4 sm:$0xff]  }
  0x48   : > { %864 = vmatprep.subr.bf16.mxu0 %v2325_v37  ;;  %v2393_v54 = vld [vmem:[%s2677_s11 + $0x70] ss:$8 sps:$4 sm:$0xff]   ;;  %v2348_v55 = vld [vmem:[%s2679_s24 + $0xe0] ss:$8 sps:$4 sm:$0xff]   ;;  %1245 = vmatprep.subr.bf16.mxu1 %v2391_v53  ;;  %v2394_v56 = vld [vmem:[%s2677_s11 + $0x64] ss:$8 sps:$4 sm:$0xff]  }
  0x49   : > { %v2349_v57 = vld [vmem:[%s2679_s24 + $0xd4] ss:$8 sps:$4 sm:$0xff]   ;;  %1246 = vmatpush1.bf16.msra.mxu1 %v2393_v54  ;;  %v2396_v58 = vld [vmem:[%s2677_s11 + $0x60] ss:$8 sps:$4 sm:$0xff]   ;;  %v2351_v60 = vld [vmem:[%s2679_s24 + $0xd0] ss:$8 sps:$4 sm:$0xff]  }
  0x4a   : > { %1247 = vmatprep.subr.bf16.mxu1 %v2394_v56  ;;  %v2397_v59 = vld [vmem:[%s2677_s11 + $0x54] ss:$8 sps:$4 sm:$0xff]   ;;  %v2352_v61 = vld [vmem:[%s2679_s24 + $0xc4] ss:$8 sps:$4 sm:$0xff]   ;;  %v2399_v62 = vld [vmem:[%s2677_s11 + $0x50] ss:$8 sps:$4 sm:$0xff]  }
  0x4b   : > { %865 = vmatpush1.bf16.msra.mxu0 %v2327_v38  ;;  %v2400_v63 = vld [vmem:[%s2677_s11 + $0x44] ss:$8 sps:$4 sm:$0xff]   ;;  %v2354_v0 = vld [vmem:[%s2679_s24 + $0xc0] ss:$8 sps:$4 sm:$0xff]   ;;  %v2355_v1 = vld [vmem:[%s2679_s24 + $0xb4] ss:$8 sps:$4 sm:$0xff]  }
  0x4c   : > { %866 = vmatprep.subr.bf16.mxu0 %v2328_v39  ;;  %v2402_v2 = vld [vmem:[%s2677_s11 + $0x40] ss:$8 sps:$4 sm:$0xff]   ;;  %v2403_v3 = vld [vmem:[%s2677_s11 + $0x34] ss:$8 sps:$4 sm:$0xff]   ;;  %v2357_v4 = vld [vmem:[%s2679_s24 + $0xb0] ss:$8 sps:$4 sm:$0xff]  }
  0x4d   : > { %1248 = vmatpush1.bf16.msra.mxu1 %v2396_v58  ;;  %v2358_v5 = vld [vmem:[%s2679_s24 + $0xa4] ss:$8 sps:$4 sm:$0xff]   ;;  %v2405_v6 = vld [vmem:[%s2677_s11 + $0x30] ss:$8 sps:$4 sm:$0xff]   ;;  %v2360_v8 = vld [vmem:[%s2679_s24 + $0xa0] ss:$8 sps:$4 sm:$0xff]  }
  0x4e   : > { %1249 = vmatprep.subr.bf16.mxu1 %v2397_v59  ;;  %v2406_v7 = vld [vmem:[%s2677_s11 + $0x24] ss:$8 sps:$4 sm:$0xff]   ;;  %v2408_v9 = vld [vmem:[%s2677_s11 + $0x20] ss:$8 sps:$4 sm:$0xff]   ;;  %v2361_v10 = vld [vmem:[%s2679_s24 + $0x94] ss:$8 sps:$4 sm:$0xff]  }
  0x4f   : > { %867 = vmatpush1.bf16.msra.mxu0 %v2330_v40  ;;  %v2409_v11 = vld [vmem:[%s2677_s11 + $0x14] ss:$8 sps:$4 sm:$0xff]   ;;  %v2363_v12 = vld [vmem:[%s2679_s24 + $0x90] ss:$8 sps:$4 sm:$0xff]   ;;  %v2364_v14 = vld [vmem:[%s2679_s24 + $0x84] ss:$8 sps:$4 sm:$0xff]  }
  0x50   : > { %868 = vmatprep.subr.bf16.mxu0 %v2331_v41  ;;  %v2411_v13 = vld [vmem:[%s2677_s11 + $0x10] ss:$8 sps:$4 sm:$0xff]   ;;  %v2412_v15 = vld [vmem:[%s2677_s11 + $0x4] ss:$8 sps:$4 sm:$0xff]   ;;  %v2366_v16 = vld [vmem:[%s2679_s24 + $0x80] ss:$8 sps:$4 sm:$0xff]  }
  0x51   : > { %1250 = vmatpush1.bf16.msra.mxu1 %v2399_v62  ;;  %v2414_v17 = vld [vmem:[%s2677_s11] ss:$8 sps:$4 sm:$0xff]   ;;  %v2415_v18 = vld [vmem:[%s2677_s11 + $0xf4] ss:$8 sps:$4 sm:$0xff]   ;;  %v2417_v21 = vld [vmem:[%s2677_s11 + $0xf0] ss:$8 sps:$4 sm:$0xff]  }
  0x52   : > { %1251 = vmatprep.subr.bf16.mxu1 %v2400_v63  ;;  %v2367_v19 = vld [vmem:[%s3364_s0] ss:$8 sps:$4 sm:$0xff]   ;;  %v2370_v20 = vld [vmem:[%s3364_s0 + $0x14] ss:$8 sps:$4 sm:$0xff]   ;;  %v2418_v22 = vld [vmem:[%s2677_s11 + $0xe4] ss:$8 sps:$4 sm:$0xff]  }
  0x53   : > { %869 = vmatpush1.bf16.msra.mxu0 %v2333_v42  ;;  %v2420_v23 = vld [vmem:[%s2677_s11 + $0xe0] ss:$8 sps:$4 sm:$0xff]   ;;  %v2421_v24 = vld [vmem:[%s2677_s11 + $0xd4] ss:$8 sps:$4 sm:$0xff]   ;;  %v2372_v25 = vld [vmem:[%s3364_s0 + $0x10] ss:$8 sps:$4 sm:$0xff]  }
  0x54   : > { %870 = vmatprep.subr.bf16.mxu0 %v2334_v43  ;;  %v2373_v26 = vld [vmem:[%s3364_s0 + $0x24] ss:$8 sps:$4 sm:$0xff]   ;;  %v2423_v27 = vld [vmem:[%s2677_s11 + $0xd0] ss:$8 sps:$4 sm:$0xff]   ;;  %v2426_v29 = vld [vmem:[%s2677_s11 + $0xc0] ss:$8 sps:$4 sm:$0xff]  }
  0x55   : > { %1252 = vmatpush1.bf16.msra.mxu1 %v2402_v2  ;;  %v2424_v28 = vld [vmem:[%s2677_s11 + $0xc4] ss:$8 sps:$4 sm:$0xff]   ;;  %v2427_v30 = vld [vmem:[%s2677_s11 + $0xb4] ss:$8 sps:$4 sm:$0xff]   ;;  %v2375_v31 = vld [vmem:[%s3364_s0 + $0x20] ss:$8 sps:$4 sm:$0xff]  }
  0x56   : > { %1253 = vmatprep.subr.bf16.mxu1 %v2403_v3  ;;  %v2376_v32 = vld [vmem:[%s3364_s0 + $0x34] ss:$8 sps:$4 sm:$0xff]   ;;  %v2429_v33 = vld [vmem:[%s2677_s11 + $0xb0] ss:$8 sps:$4 sm:$0xff]   ;;  %v2379_v35 = vld [vmem:[%s3364_s0 + $0x44] ss:$8 sps:$4 sm:$0xff]  }
  0x57   : > { %871 = vmatpush1.bf16.msra.mxu0 %v2336_v44  ;;  %v2378_v34 = vld [vmem:[%s3364_s0 + $0x30] ss:$8 sps:$4 sm:$0xff]   ;;  %v2381_v36 = vld [vmem:[%s3364_s0 + $0x40] ss:$8 sps:$4 sm:$0xff]   ;;  %v2382_v37 = vld [vmem:[%s3364_s0 + $0x54] ss:$8 sps:$4 sm:$0xff]  }
  0x58   : > { %872 = vmatprep.subr.bf16.mxu0 %v2337_v45  ;;  %v2384_v38 = vld [vmem:[%s3364_s0 + $0x50] ss:$8 sps:$4 sm:$0xff]   ;;  %v2385_v39 = vld [vmem:[%s3364_s0 + $0x64] ss:$8 sps:$4 sm:$0xff]   ;;  %v2387_v40 = vld [vmem:[%s3364_s0 + $0x60] ss:$8 sps:$4 sm:$0xff]  }
  0x59   : > { %1254 = vmatpush1.bf16.msra.mxu1 %v2405_v6  ;;  %v2388_v41 = vld [vmem:[%s3364_s0 + $0x74] ss:$8 sps:$4 sm:$0xff]   ;;  %v2390_v42 = vld [vmem:[%s3364_s0 + $0x70] ss:$8 sps:$4 sm:$0xff]   ;;  %v2430_v43 = vld [vmem:[%s2677_s11 + $0xa4] ss:$8 sps:$4 sm:$0xff]  }
  0x5a   : > { %1255 = vmatprep.subr.bf16.mxu1 %v2406_v7  ;;  %v2432_v44 = vld [vmem:[%s2677_s11 + $0xa0] ss:$8 sps:$4 sm:$0xff]   ;;  %v2433_v45 = vld [vmem:[%s2677_s11 + $0x94] ss:$8 sps:$4 sm:$0xff]   ;;  %v2435_v46 = vld [vmem:[%s2677_s11 + $0x90] ss:$8 sps:$4 sm:$0xff]  }
  0x5b   : > { %873 = vmatpush1.bf16.msra.mxu0 %v2339_v47  ;;  %v2436_v47 = vld [vmem:[%s2677_s11 + $0x84] ss:$8 sps:$4 sm:$0xff]   ;;  %v608_v53 = vld [vmem:[%s508_s23] sm:$0x3]  ;;  %p2239_p12 = scmp.ne.s32.totalorder %s2501_s26, 1 }
  0x5c   : > { %874 = vmatprep.subr.bf16.mxu0 %v2340_v48  ;;  %v2438_v48 = vld [vmem:[%s2677_s11 + $0x80] ss:$8 sps:$4 sm:$0xff]  }
  0x5d   : > { %1256 = vmatpush1.bf16.msra.mxu1 %v2408_v9 }
  0x5e   : > { %1257 = vmatprep.subr.bf16.mxu1 %v2409_v11 }
  0x5f   : > { %875 = vmatpush1.bf16.msra.mxu0 %v2342_v49  ;;  %v610_v49 = vlaneseq }
  0x60   : > { %876 = vmatprep.subr.bf16.mxu0 %v2343_v50 }
  0x61   : > { %1258 = vmatpush1.bf16.msra.mxu1 %v2411_v13  ;;  %v611_v50 = vshrl.u32 %v610_v49, 7 }
  0x62   : > { %1259 = vmatprep.subr.bf16.mxu1 %v2412_v15 }
  0x63   : > { %877 = vmatpush2.bf16.msra.mxu0 %v2345_v51  ;;  %v2794_v51 = vsub.s32 1, %v611_v50 }
  0x64   : > { %878 = vmatprep.subr.bf16.mxu0 %v2346_v52  ;;  %v2796_v52 = vsub.s32 0, %v611_v50 }
  0x65   : > { %1260 = vmatpush1.bf16.msra.mxu1 %v2414_v17 }
  0x66   : > { %1261 = vmatprep.subr.bf16.mxu1 %v2415_v18  ;;  %v2807_v56 = vrot.slane %v608_v53, %v2796_v52 }
  0x67   : > { %879 = vmatpush2.bf16.msra.mxu0 %v2348_v55  ;;  %v2804_v55 = vrot.slane %v608_v53, %v2794_v51 }
  0x68   : > { %880 = vmatprep.subr.bf16.mxu0 %v2349_v57 }
  0x69   : > { %1262 = vmatpush2.bf16.msra.mxu1 %v2417_v21 }
  0x6a   : > { %1263 = vmatprep.subr.bf16.mxu1 %v2418_v22 }
  0x6b   : > { %881 = vmatpush2.bf16.msra.mxu0 %v2351_v60 }
  0x6c   : > { %882 = vmatprep.subr.bf16.mxu0 %v2352_v61 }
  0x6d   : > { %1264 = vmatpush2.bf16.msra.mxu1 %v2420_v23 }
  0x6e   : > { %1265 = vmatprep.subr.bf16.mxu1 %v2421_v24 }
  0x6f   : > { %883 = vmatpush2.bf16.msra.mxu0 %v2354_v0 }
  0x70   : > { %884 = vmatprep.subr.bf16.mxu0 %v2355_v1 }
  0x71   : > { %1266 = vmatpush2.bf16.msra.mxu1 %v2423_v27 }
  0x72   : > { %1267 = vmatprep.subr.bf16.mxu1 %v2424_v28 }
  0x73   : > { %885 = vmatpush2.bf16.msra.mxu0 %v2357_v4 }
  0x74   : > { %886 = vmatprep.subr.bf16.mxu0 %v2358_v5 }
  0x75   : > { %1268 = vmatpush2.bf16.msra.mxu1 %v2426_v29 }
  0x76   : > { %1269 = vmatprep.subr.bf16.mxu1 %v2427_v30 }
  0x77   : > { %887 = vmatpush2.bf16.msra.mxu0 %v2360_v8 }
  0x78   : > { %888 = vmatprep.subr.bf16.mxu0 %v2361_v10 }
  0x79   : > { %1270 = vmatpush2.bf16.msra.mxu1 %v2429_v33 }
  0x7a   : > { %1271 = vmatprep.subr.bf16.mxu1 %v2430_v43 }
  0x7b   : > { %889 = vmatpush2.bf16.msra.mxu0 %v2363_v12 }
  0x7c   : > { %890 = vmatprep.subr.bf16.mxu0 %v2364_v14 }
  0x7d   : > { %1272 = vmatpush2.bf16.msra.mxu1 %v2432_v44 }
  0x7e   : > { %1273 = vmatprep.subr.bf16.mxu1 %v2433_v45 }
  0x7f   : > { %891 = vmatpush2.bf16.msra.mxu0 %v2366_v16 }
  0x81   : > { %1274 = vmatpush2.bf16.msra.mxu1 %v2435_v46 }
  0x82   : > { %893 = vmatmul.mubr.bf16.vlgmr.msra.gmra.mxu0 %v2367_v19  ;;  %1275 = vmatprep.subr.bf16.mxu1 %v2436_v47 }
  0x83   : > { %902 = vmatprep.mubr.bf16.mxu0 %v2370_v20 }
  0x85   : > { %1276 = vmatpush2.bf16.msra.mxu1 %v2438_v48 }
  0x8a   : > { %903 = vmatmul.mubr.bf16.gmra.mxu0 %v2372_v25 }
  0x8b   : > { %912 = vmatprep.mubr.bf16.mxu0 %v2373_v26 }
  0x92   : > { %913 = vmatmul.mubr.bf16.gmra.mxu0 %v2375_v31 }
  0x93   : > { %922 = vmatprep.mubr.bf16.mxu0 %v2376_v32 }
  0x9a   : > { %923 = vmatmul.mubr.bf16.gmra.mxu0 %v2378_v34 }
  0x9b   : > { %932 = vmatprep.mubr.bf16.mxu0 %v2379_v35 }
  0xa2   : > { %933 = vmatmul.mubr.bf16.gmra.mxu0 %v2381_v36 }
  0xa3   : > { %942 = vmatprep.mubr.bf16.mxu0 %v2382_v37 }
  0xaa   : > { %943 = vmatmul.mubr.bf16.gmra.mxu0 %v2384_v38 }
  0xab   : > { %952 = vmatprep.mubr.bf16.mxu0 %v2385_v39 }
  0xb2   : > { %953 = vmatmul.mubr.bf16.gmra.mxu0 %v2387_v40 }
  0xb3   : > { %962 = vmatprep.mubr.bf16.mxu0 %v2388_v41 }
  0xba   : > { %963 = vmatmul.mubr.bf16.gmra.mxu0 %v2390_v42 }
 0x142   : > { %v894_v54 = vpop.f32.mrf.mxu0 }
 0x143   : > { %v895_v61 = vadd.f32 %v894_v54, %v2807_v56 }
 0x144   : > { %v896_v57 = vpop.f32.mrf.mxu0 }
 0x145   : > { %v897_v59 = vadd.f32 %v896_v57, %v2804_v55  ;;  %v973_v4 = vmax.f32 %v895_v61, 0.0 }
 0x146   : > { %v898_v58 = vpop.f32.mrf.mxu0 }
 0x147   : > { %v899_v60 = vadd.f32 %v898_v58, %v2807_v56  ;;  %v974_v2 = vmax.f32 %v897_v59, 0.0 }
 0x148   : > { %v900_v62 = vpop.f32.mrf.mxu0 }
 0x149   : > { %v901_v63 = vadd.f32 %v900_v62, %v2804_v55  ;;  %v975_v0 = vmax.f32 %v899_v60, 0.0 }
 0x14a   : > { %v904_v1 = vpop.f32.mrf.mxu0 }
 0x14b   : > { %v976_v3 = vmax.f32 %v901_v63, 0.0  ;;  %v1037_v7 = vpack.c.bf16 %v975_v0, %v973_v4  ;;  %v905_v11 = vadd.f32 %v904_v1, %v2807_v56 }
 0x14c   : > { %v906_v5 = vpop.f32.mrf.mxu0 }
 0x14d   : > { %v1038_v6 = vpack.c.bf16 %v976_v3, %v974_v2  ;;  %v907_v9 = vadd.f32 %v906_v5, %v2804_v55  ;;  %v977_v18 = vmax.f32 %v905_v11, 0.0 }
 0x14e   : > { %v908_v8 = vpop.f32.mrf.mxu0 }
 0x14f   : > { %v909_v10 = vadd.f32 %v908_v8, %v2807_v56  ;;  %1277 = vmatprep.mubr.bf16.mxu1 %v1038_v6  ;;  %v978_v16 = vmax.f32 %v907_v9, 0.0 }
 0x150   : > { %v910_v12 = vpop.f32.mrf.mxu0  ;;  %1278 = vmatmul.mubr.bf16.vlgmr.msra.gmra.mxu1 %v1037_v7 }
 0x151   : > { %v911_v13 = vadd.f32 %v910_v12, %v2804_v55  ;;  %v979_v14 = vmax.f32 %v909_v10, 0.0 }
 0x152   : > { %v914_v15 = vpop.f32.mrf.mxu0 }
 0x153   : > { %v980_v17 = vmax.f32 %v911_v13, 0.0  ;;  %v1039_v21 = vpack.c.bf16 %v979_v14, %v977_v18  ;;  %v915_v25 = vadd.f32 %v914_v15, %v2807_v56 }
 0x154   : > { %v916_v19 = vpop.f32.mrf.mxu0 }
 0x155   : > { %v1040_v20 = vpack.c.bf16 %v980_v17, %v978_v16  ;;  %v917_v23 = vadd.f32 %v916_v19, %v2804_v55  ;;  %v981_v32 = vmax.f32 %v915_v25, 0.0 }
 0x156   : > { %v918_v22 = vpop.f32.mrf.mxu0 }
 0x157   : > { %v919_v24 = vadd.f32 %v918_v22, %v2807_v56  ;;  %1287 = vmatprep.mubr.bf16.mxu1 %v1040_v20  ;;  %v982_v30 = vmax.f32 %v917_v23, 0.0 }
 0x158   : > { %v920_v26 = vpop.f32.mrf.mxu0  ;;  %1288 = vmatmul.mubr.bf16.gmra.mxu1 %v1039_v21 }
 0x159   : > { %v921_v27 = vadd.f32 %v920_v26, %v2804_v55  ;;  %v983_v28 = vmax.f32 %v919_v24, 0.0 }
 0x15a   : > { %v924_v29 = vpop.f32.mrf.mxu0 }
 0x15b   : > { %v984_v31 = vmax.f32 %v921_v27, 0.0  ;;  %v1041_v35 = vpack.c.bf16 %v983_v28, %v981_v32  ;;  %v925_v39 = vadd.f32 %v924_v29, %v2807_v56 }
 0x15c   : > { %v926_v33 = vpop.f32.mrf.mxu0 }
 0x15d   : > { %v1042_v34 = vpack.c.bf16 %v984_v31, %v982_v30  ;;  %v927_v37 = vadd.f32 %v926_v33, %v2804_v55  ;;  %v985_v46 = vmax.f32 %v925_v39, 0.0 }
 0x15e   : > { %v928_v36 = vpop.f32.mrf.mxu0 }
 0x15f   : > { %v929_v38 = vadd.f32 %v928_v36, %v2807_v56  ;;  %1297 = vmatprep.mubr.bf16.mxu1 %v1042_v34  ;;  %v986_v44 = vmax.f32 %v927_v37, 0.0 }
 0x160   : > { %v930_v40 = vpop.f32.mrf.mxu0  ;;  %1298 = vmatmul.mubr.bf16.gmra.mxu1 %v1041_v35 }
 0x161   : > { %v931_v41 = vadd.f32 %v930_v40, %v2804_v55  ;;  %v987_v42 = vmax.f32 %v929_v38, 0.0 }
 0x162   : > { %v934_v43 = vpop.f32.mrf.mxu0 }
 0x163   : > { %v988_v45 = vmax.f32 %v931_v41, 0.0  ;;  %v1043_v49 = vpack.c.bf16 %v987_v42, %v985_v46  ;;  %v935_v57 = vadd.f32 %v934_v43, %v2807_v56  ;;  %v1006_v46 = vld [vmem:[#allocation2] sm:$0xff] }
 0x164   : > { %v936_v47 = vpop.f32.mrf.mxu0 }
 0x165   : > { %v1044_v48 = vpack.c.bf16 %v988_v45, %v986_v44  ;;  %v937_v53 = vadd.f32 %v936_v47, %v2804_v55  ;;  %v989_v0 = vmax.f32 %v935_v57, 0.0  ;;  %v1005_v44 = vld [vmem:[#allocation2 + $0xb0] sm:$0xff] }
 0x166   : > { %v938_v50 = vpop.f32.mrf.mxu0  ;;  %v1009_v57 = vld [vmem:[#allocation2 + $0x50] sm:$0xff] }
 0x167   : > { %v939_v54 = vadd.f32 %v938_v50, %v2807_v56  ;;  %1307 = vmatprep.mubr.bf16.mxu1 %v1044_v48  ;;  %v990_v62 = vmax.f32 %v937_v53, 0.0  ;;  %v1008_v53 = vld [vmem:[#allocation2 + $0x18] sm:$0xff] }
 0x168   : > { %v940_v58 = vpop.f32.mrf.mxu0  ;;  %1308 = vmatmul.mubr.bf16.gmra.mxu1 %v1043_v49  ;;  %v1007_v49 = vld [vmem:[#allocation2 + $0xd8] sm:$0xff] }
 0x169   : > { %v941_v59 = vadd.f32 %v940_v58, %v2804_v55  ;;  %v991_v60 = vmax.f32 %v939_v54, 0.0 }
 0x16a   : > { %v944_v61 = vpop.f32.mrf.mxu0 }
 0x16b   : > { %v992_v63 = vmax.f32 %v941_v59, 0.0  ;;  %v1045_v3 = vpack.c.bf16 %v991_v60, %v989_v0  ;;  %v945_v7 = vadd.f32 %v944_v61, %v2807_v56  ;;  %v1010_v60 = vld [vmem:[#allocation2 + $0x68] sm:$0xff] }
 0x16c   : > { %v946_v1 = vpop.f32.mrf.mxu0 }
 0x16d   : > { %v1046_v2 = vpack.c.bf16 %v992_v63, %v990_v62  ;;  %v947_v5 = vadd.f32 %v946_v1, %v2804_v55  ;;  %v993_v14 = vmax.f32 %v945_v7, 0.0  ;;  %v1011_v63 = vld [vmem:[#allocation2 + $0x30] sm:$0xff] }
 0x16e   : > { %v948_v4 = vpop.f32.mrf.mxu0 }
 0x16f   : > { %v949_v6 = vadd.f32 %v948_v4, %v2807_v56  ;;  %1317 = vmatprep.mubr.bf16.mxu1 %v1046_v2  ;;  %v994_v12 = vmax.f32 %v947_v5, 0.0  ;;  %v1012_v2 = vld [vmem:[#allocation2 + $0x48] sm:$0xff]  ;;  %v1013_v5 = vld [vmem:[#allocation2 + $0x80] sm:$0xff] }
 0x170   : > { %v950_v8 = vpop.f32.mrf.mxu0  ;;  %1318 = vmatmul.mubr.bf16.gmra.mxu1 %v1045_v3 }
 0x171   : > { %v951_v9 = vadd.f32 %v950_v8, %v2804_v55  ;;  %v995_v10 = vmax.f32 %v949_v6, 0.0  ;;  %v1014_v8 = vld [vmem:[#allocation2 + $0x88] sm:$0xff] }
 0x172   : > { %v954_v11 = vpop.f32.mrf.mxu0 }
 0x173   : > { %v996_v13 = vmax.f32 %v951_v9, 0.0  ;;  %v1047_v17 = vpack.c.bf16 %v995_v10, %v993_v14  ;;  %v955_v21 = vadd.f32 %v954_v11, %v2807_v56  ;;  %v1015_v11 = vld [vmem:[#allocation2 + $0xe8] sm:$0xff]  ;;  %v1016_v14 = vld [vmem:[#allocation2 + $0xb8] sm:$0xff] }
 0x174   : > { %v956_v15 = vpop.f32.mrf.mxu0 }
 0x175   : > { %v1048_v16 = vpack.c.bf16 %v996_v13, %v994_v12  ;;  %v957_v19 = vadd.f32 %v956_v15, %v2804_v55  ;;  %v997_v28 = vmax.f32 %v955_v21, 0.0 }
 0x176   : > { %v958_v18 = vpop.f32.mrf.mxu0 }
 0x177   : > { %v959_v20 = vadd.f32 %v958_v18, %v2807_v56  ;;  %1327 = vmatprep.mubr.bf16.mxu1 %v1048_v16  ;;  %v998_v26 = vmax.f32 %v957_v19, 0.0 }
 0x178   : > { %v960_v22 = vpop.f32.mrf.mxu0  ;;  %1328 = vmatmul.mubr.bf16.gmra.mxu1 %v1047_v17  ;;  %v1017_v17 = vld [vmem:[#allocation2 + $0x60] sm:$0xff] }
 0x179   : > { %v961_v23 = vadd.f32 %v960_v22, %v2804_v55  ;;  %v999_v24 = vmax.f32 %v959_v20, 0.0  ;;  %v1018_v20 = vld [vmem:[#allocation2 + $0xf0] sm:$0xff] }
 0x17a   : > { %v964_v25 = vpop.f32.mrf.mxu0 }
 0x17b   : > { %v1000_v27 = vmax.f32 %v961_v23, 0.0  ;;  %v1049_v31 = vpack.c.bf16 %v999_v24, %v997_v28  ;;  %v965_v35 = vadd.f32 %v964_v25, %v2807_v56  ;;  %v1019_v23 = vld [vmem:[#allocation2 + $0x8] sm:$0xff] }
 0x17c   : > { %v966_v29 = vpop.f32.mrf.mxu0 }
 0x17d   : > { %v1050_v30 = vpack.c.bf16 %v1000_v27, %v998_v26  ;;  %v967_v33 = vadd.f32 %v966_v29, %v2804_v55  ;;  %v1001_v41 = vmax.f32 %v965_v35, 0.0  ;;  %v1020_v26 = vld [vmem:[#allocation2 + $0x78] sm:$0xff]  ;;  %v1023_v35 = vld [vmem:[#allocation2 + $0x40] sm:$0xff] }
 0x17e   : > { %v968_v32 = vpop.f32.mrf.mxu0  ;;  %v1021_v29 = vld [vmem:[#allocation2 + $0x38] sm:$0xff] }
 0x17f   : > { %v969_v34 = vadd.f32 %v968_v32, %v2807_v56  ;;  %1337 = vmatprep.mubr.bf16.mxu1 %v1050_v30  ;;  %v1002_v39 = vmax.f32 %v967_v33, 0.0  ;;  %v1022_v32 = vld [vmem:[#allocation2 + $0x58] sm:$0xff] }
 0x180   : > { %v970_v36 = vpop.f32.mrf.mxu0  ;;  %1338 = vmatmul.mubr.bf16.gmra.mxu1 %v1049_v31 }
 0x181   : > { %v971_v37 = vadd.f32 %v970_v36, %v2804_v55  ;;  %v1003_v38 = vmax.f32 %v969_v34, 0.0 }
 0x183   : > { %v1004_v40 = vmax.f32 %v971_v37, 0.0  ;;  %v1051_v43 = vpack.c.bf16 %v1003_v38, %v1001_v41  ;;  %v1024_v38 = vld [vmem:[#allocation2 + $0xc8] sm:$0xff]  ;;  %v1025_v41 = vld [vmem:[#allocation2 + $0xe0] sm:$0xff] }
 0x185   : > { %v1052_v42 = vpack.c.bf16 %v1004_v40, %v1002_v39 }
 0x187   : > { %1347 = vmatprep.mubr.bf16.mxu1 %v1052_v42 }
 0x188   : > { %1348 = vmatmul.mubr.bf16.gmra.mxu1 %v1051_v43 }
 0x210   : > { %v1279_v45 = vpop.f32.mrf.mxu1 }
 0x211   : > { %v1358_v47 = vadd.f32 %v1279_v45, %v1005_v44  ;;  %v1026_v44 = vld [vmem:[#allocation2 + $0x90] sm:$0xff] }
 0x212   : > { %v1281_v48 = vpop.f32.mrf.mxu1 }
 0x213   : > { %1390 = vst [vmem:[#allocation2 + $0xb0] sm:$0xff] %v1358_v47  ;;  %v1359_v56 = vadd.f32 %v1281_v48, %v1006_v46  ;;  %v1027_v47 = vld [vmem:[#allocation2 + $0x70] sm:$0xff] }
 0x214   : > { %v1283_v50 = vpop.f32.mrf.mxu1 }
 0x215   : > { %1391 = vst [vmem:[#allocation2] sm:$0xff] %v1359_v56  ;;  %v1360_v55 = vadd.f32 %v1283_v50, %v1007_v49  ;;  %v1028_v56 = vld [vmem:[#allocation2 + $0xc0] sm:$0xff] }
 0x216   : > { %v1285_v54 = vpop.f32.mrf.mxu1 }
 0x217   : > { %1392 = vst [vmem:[#allocation2 + $0xd8] sm:$0xff] %v1360_v55  ;;  %v1361_v58 = vadd.f32 %v1285_v54, %v1008_v53  ;;  %v1029_v55 = vld [vmem:[#allocation2 + $0xa8] sm:$0xff] }
 0x218   : > { %v1289_v59 = vpop.f32.mrf.mxu1 }
 0x219   : > { %1393 = vst [vmem:[#allocation2 + $0x18] sm:$0xff] %v1361_v58  ;;  %v1362_v61 = vadd.f32 %v1289_v59, %v1009_v57  ;;  %v1030_v58 = vld [vmem:[#allocation2 + $0xd0] sm:$0xff] }
 0x21a   : > { %v1291_v62 = vpop.f32.mrf.mxu1 }
 0x21b   : > { %1394 = vst [vmem:[#allocation2 + $0x50] sm:$0xff] %v1362_v61  ;;  %v1363_v0 = vadd.f32 %v1291_v62, %v1010_v60  ;;  %v1031_v61 = vld [vmem:[#allocation2 + $0x10] sm:$0xff] }
 0x21c   : > { %v1293_v1 = vpop.f32.mrf.mxu1 }
 0x21d   : > { %1395 = vst [vmem:[#allocation2 + $0x68] sm:$0xff] %v1363_v0  ;;  %v1364_v3 = vadd.f32 %v1293_v1, %v1011_v63  ;;  %v1032_v0 = vld [vmem:[#allocation2 + $0x28] sm:$0xff] }
 0x21e   : > { %v1295_v4 = vpop.f32.mrf.mxu1 }
 0x21f   : > { %1396 = vst [vmem:[#allocation2 + $0x30] sm:$0xff] %v1364_v3  ;;  %v1365_v6 = vadd.f32 %v1295_v4, %v1012_v2  ;;  %v1033_v3 = vld [vmem:[#allocation2 + $0xa0] sm:$0xff] }
 0x220   : > { %v1299_v7 = vpop.f32.mrf.mxu1 }
 0x221   : > { %1397 = vst [vmem:[#allocation2 + $0x48] sm:$0xff] %v1365_v6  ;;  %v1366_v9 = vadd.f32 %v1299_v7, %v1013_v5  ;;  %v1034_v6 = vld [vmem:[#allocation2 + $0xf8] sm:$0xff] }
 0x222   : > { %v1301_v10 = vpop.f32.mrf.mxu1 }
 0x223   : > { %1398 = vst [vmem:[#allocation2 + $0x80] sm:$0xff] %v1366_v9  ;;  %v1367_v12 = vadd.f32 %v1301_v10, %v1014_v8  ;;  %v1035_v9 = vld [vmem:[#allocation2 + $0x20] sm:$0xff] }
 0x224   : > { %v1303_v13 = vpop.f32.mrf.mxu1 }
 0x225   : > { %1399 = vst [vmem:[#allocation2 + $0x88] sm:$0xff] %v1367_v12  ;;  %v1368_v15 = vadd.f32 %v1303_v13, %v1015_v11  ;;  %v1036_v12 = vld [vmem:[#allocation2 + $0x98] sm:$0xff] }
 0x226   : > { %v1305_v16 = vpop.f32.mrf.mxu1 }
 0x227   : > { %1400 = vst [vmem:[#allocation2 + $0xe8] sm:$0xff] %v1368_v15  ;;  %v1369_v18 = vadd.f32 %v1305_v16, %v1016_v14 }
 0x228   : > { %v1309_v19 = vpop.f32.mrf.mxu1 }
 0x229   : > { %1401 = vst [vmem:[#allocation2 + $0xb8] sm:$0xff] %v1369_v18  ;;  %v1370_v21 = vadd.f32 %v1309_v19, %v1017_v17 }
 0x22a   : > { %v1311_v22 = vpop.f32.mrf.mxu1 }
 0x22b   : > { %1402 = vst [vmem:[#allocation2 + $0x60] sm:$0xff] %v1370_v21  ;;  %v1371_v24 = vadd.f32 %v1311_v22, %v1018_v20 }
 0x22c   : > { %v1313_v25 = vpop.f32.mrf.mxu1 }
 0x22d   : > { %1403 = vst [vmem:[#allocation2 + $0xf0] sm:$0xff] %v1371_v24  ;;  %v1372_v27 = vadd.f32 %v1313_v25, %v1019_v23 }
 0x22e   : > { %v1315_v28 = vpop.f32.mrf.mxu1 }
 0x22f   : > { %1404 = vst [vmem:[#allocation2 + $0x8] sm:$0xff] %v1372_v27  ;;  %v1373_v30 = vadd.f32 %v1315_v28, %v1020_v26 }
 0x230   : > { %v1319_v31 = vpop.f32.mrf.mxu1 }
 0x231   : > { %1405 = vst [vmem:[#allocation2 + $0x78] sm:$0xff] %v1373_v30  ;;  %v1374_v33 = vadd.f32 %v1319_v31, %v1021_v29 }
 0x232   : > { %v1321_v34 = vpop.f32.mrf.mxu1 }
 0x233   : > { %1406 = vst [vmem:[#allocation2 + $0x38] sm:$0xff] %v1374_v33  ;;  %v1375_v36 = vadd.f32 %v1321_v34, %v1022_v32 }
 0x234   : > { %v1323_v37 = vpop.f32.mrf.mxu1 }
 0x235   : > { %1407 = vst [vmem:[#allocation2 + $0x58] sm:$0xff] %v1375_v36  ;;  %v1376_v39 = vadd.f32 %v1323_v37, %v1023_v35 }
 0x236   : > { %v1325_v40 = vpop.f32.mrf.mxu1 }
 0x237   : > { %1408 = vst [vmem:[#allocation2 + $0x40] sm:$0xff] %v1376_v39  ;;  %v1377_v42 = vadd.f32 %v1325_v40, %v1024_v38 }
 0x238   : > { %v1329_v43 = vpop.f32.mrf.mxu1 }
 0x239   : > { %1409 = vst [vmem:[#allocation2 + $0xc8] sm:$0xff] %v1377_v42  ;;  %v1378_v45 = vadd.f32 %v1329_v43, %v1025_v41 }
 0x23a   : > { %v1331_v46 = vpop.f32.mrf.mxu1 }
 0x23b   : > { %1410 = vst [vmem:[#allocation2 + $0xe0] sm:$0xff] %v1378_v45  ;;  %v1379_v48 = vadd.f32 %v1331_v46, %v1026_v44 }
 0x23c   : > { %v1333_v49 = vpop.f32.mrf.mxu1 }
 0x23d   : > { %1411 = vst [vmem:[#allocation2 + $0x90] sm:$0xff] %v1379_v48  ;;  %v1380_v50 = vadd.f32 %v1333_v49, %v1027_v47 }
 0x23e   : > { %v1335_v53 = vpop.f32.mrf.mxu1 }
 0x23f   : > { %1412 = vst [vmem:[#allocation2 + $0x70] sm:$0xff] %v1380_v50  ;;  %v1381_v54 = vadd.f32 %v1335_v53, %v1028_v56 }
 0x240   : > { %v1339_v57 = vpop.f32.mrf.mxu1 }
 0x241   : > { %1413 = vst [vmem:[#allocation2 + $0xc0] sm:$0xff] %v1381_v54  ;;  %v1382_v59 = vadd.f32 %v1339_v57, %v1029_v55 }
 0x242   : > { %v1341_v60 = vpop.f32.mrf.mxu1 }
 0x243   : > { %1414 = vst [vmem:[#allocation2 + $0xa8] sm:$0xff] %v1382_v59  ;;  %v1383_v62 = vadd.f32 %v1341_v60, %v1030_v58 }
 0x244   : > { %v1343_v63 = vpop.f32.mrf.mxu1 }
 0x245   : > { %1415 = vst [vmem:[#allocation2 + $0xd0] sm:$0xff] %v1383_v62  ;;  %v1384_v1 = vadd.f32 %v1343_v63, %v1031_v61 }
 0x246   : > { %v1345_v2 = vpop.f32.mrf.mxu1 }
 0x247   : > { %1416 = vst [vmem:[#allocation2 + $0x10] sm:$0xff] %v1384_v1  ;;  %v1385_v4 = vadd.f32 %v1345_v2, %v1032_v0 }
 0x248   : > { %v1349_v5 = vpop.f32.mrf.mxu1 }
 0x249   : > { %1417 = vst [vmem:[#allocation2 + $0x28] sm:$0xff] %v1385_v4  ;;  %v1386_v7 = vadd.f32 %v1349_v5, %v1033_v3 }
 0x24a   : > { %v1351_v8 = vpop.f32.mrf.mxu1 }
 0x24b   : > { %1418 = vst [vmem:[#allocation2 + $0xa0] sm:$0xff] %v1386_v7  ;;  %v1387_v10 = vadd.f32 %v1351_v8, %v1034_v6 }
 0x24c   : > { %v1353_v11 = vpop.f32.mrf.mxu1 }
 0x24d   : > { %1419 = vst [vmem:[#allocation2 + $0xf8] sm:$0xff] %v1387_v10  ;;  %v1388_v13 = vadd.f32 %v1353_v11, %v1035_v9  ;;  %1425 = sbr.rel (%p2239_p12) target bundleno = 954 (0x3ba), region = 94 }
 0x24e   : > { %v1355_v14 = vpop.f32.mrf.mxu1 }
 0x24f   : > { %1420 = vst [vmem:[#allocation2 + $0x20] sm:$0xff] %v1388_v13  ;;  %v1389_v15 = vadd.f32 %v1355_v14, %v1036_v12 }
 0x251   : > { %1421 = vst [vmem:[#allocation2 + $0x98] sm:$0xff] %v1389_v15 }
 0x252   : > { %v1426_v16 = vld [vmem:[%s3364_s0] sm:$0xff]  ;;  %v1474_v17 = vld [vmem:[#allocation2 + $0xb0] sm:$0xff]  ;;  %v1479_v28 = vld [vmem:[#allocation2 + $0x68] sm:$0xff] }
 0x253   : > { %v1475_v18 = vld [vmem:[#allocation2] sm:$0xff]  ;;  %v1442_v19 = vunpack.c.l.bf16 %v1426_v16  ;;  %v1443_v20 = vunpack.c.h.bf16 %v1426_v16  ;;  %v1428_v22 = vld [vmem:[%s3364_s0 + $0x10] sm:$0xff]  ;;  %v1427_v29 = vld [vmem:[%s3364_s0 + $0x8] sm:$0xff] }
 0x254   : > { %v1538_v21 = vld [vmem:[%s3368_s4] sm:$0x3]  ;;  %v1478_v23 = vld [vmem:[#allocation2 + $0x50] sm:$0xff]  ;;  %v1446_v26 = vunpack.c.l.bf16 %v1428_v22  ;;  %v1447_v27 = vunpack.c.h.bf16 %v1428_v22  ;;  %v1476_v30 = vld [vmem:[#allocation2 + $0xd8] sm:$0xff]  ;;  %v1444_v33 = vunpack.c.l.bf16 %v1427_v29  ;;  %v1445_v34 = vunpack.c.h.bf16 %v1427_v29 }
 0x255   : > { %v2852_v24 = vrot.slane %v1538_v21, %v2796_v52  ;;  %v2855_v25 = vrot.slane %v1538_v21, %v2794_v51  ;;  %v1506_v31 = vadd.f32 %v1474_v17, %v1442_v19  ;;  %v1507_v32 = vadd.f32 %v1475_v18, %v1443_v20  ;;  %v1477_v35 = vld [vmem:[#allocation2 + $0x18] sm:$0xff]  ;;  %v1480_v37 = vld [vmem:[#allocation2 + $0x30] sm:$0xff]  ;;  %v1481_v42 = vld [vmem:[#allocation2 + $0x48] sm:$0xff] }
 0x256   : > { %v1429_v36 = vld [vmem:[%s3364_s0 + $0x18] sm:$0xff]  ;;  %v1510_v38 = vadd.f32 %v1478_v23, %v1446_v26  ;;  %v1511_v39 = vadd.f32 %v1479_v28, %v1447_v27  ;;  %v1430_v43 = vld [vmem:[%s3364_s0 + $0x20] sm:$0xff]  ;;  %v1508_v46 = vadd.f32 %v1476_v30, %v1444_v33  ;;  %v1509_v47 = vadd.f32 %v1477_v35, %v1445_v34  ;;  %v1431_v55 = vld [vmem:[%s3364_s0 + $0x28] sm:$0xff] }
 0x257   : > { %v1448_v40 = vunpack.c.l.bf16 %v1429_v36  ;;  %v1449_v41 = vunpack.c.h.bf16 %v1429_v36  ;;  %v2867_v44 = vadd.f32 %v2852_v24, %v1506_v31  ;;  %v2870_v45 = vadd.f32 %v2855_v25, %v1507_v32  ;;  %v1482_v53 = vld [vmem:[#allocation2 + $0x80] sm:$0xff]  ;;  %v1483_v60 = vld [vmem:[#allocation2 + $0x88] sm:$0xff]  ;;  %v1432_v61 = vld [vmem:[%s3364_s0 + $0x30] sm:$0xff] }
 0x258   : > { %v2873_v48 = vadd.f32 %v2852_v24, %v1510_v38  ;;  %v2876_v49 = vadd.f32 %v2855_v25, %v1511_v39  ;;  %v2884_v57 = vadd.f32 %v2852_v24, %v1508_v46  ;;  %v2887_v58 = vadd.f32 %v2855_v25, %v1509_v47  ;;  %v1484_v2 = vld [vmem:[#allocation2 + $0xe8] sm:$0xff]  ;;  %v1485_v3 = vld [vmem:[#allocation2 + $0xb8] sm:$0xff]  ;;  %v1486_v9 = vld [vmem:[#allocation2 + $0x60] sm:$0xff] }
 0x259   : > { %v1512_v56 = vadd.f32 %v1480_v37, %v1448_v40  ;;  %v1513_v50 = vadd.f32 %v1481_v42, %v1449_v41  ;;  %v1584_v54 = vadd.f32 %v2870_v45, %v2867_v44  ;;  %v1450_v59 = vunpack.c.l.bf16 %v1430_v43  ;;  %v1433_v4 = vld [vmem:[%s3364_s0 + $0x38] sm:$0xff]  ;;  %v1487_v10 = vld [vmem:[#allocation2 + $0xf0] sm:$0xff]  ;;  %v1488_v15 = vld [vmem:[#allocation2 + $0x8] sm:$0xff] }
 0x25a   : > { %v1590_v62 = vadd.f32 %v2876_v49, %v2873_v48  ;;  %v1451_v1 = vunpack.c.h.bf16 %v1430_v43  ;;  %v1587_v5 = vadd.f32 %v2887_v58, %v2884_v57  ;;  %v1452_v7 = vunpack.c.l.bf16 %v1431_v55  ;;  %v1434_v16 = vld [vmem:[%s3364_s0 + $0x40] sm:$0xff]  ;;  %v1489_v21 = vld [vmem:[#allocation2 + $0x78] sm:$0xff]  ;;  %v1435_v33 = vld [vmem:[%s3364_s0 + $0x48] sm:$0xff] }
 0x25b   : > { %v2895_v63 = vadd.f32 %v2852_v24, %v1512_v56  ;;  %v2898_v0 = vadd.f32 %v2855_v25, %v1513_v50  ;;  %1585 = vadd.xlane.f32.xlu0 %v1584_v54  ;;  %v1514_v6 = vadd.f32 %v1482_v53, %v1450_v59  ;;  %v1453_v8 = vunpack.c.h.bf16 %v1431_v55  ;;  %v1490_v28 = vld [vmem:[#allocation2 + $0x38] sm:$0xff]  ;;  %v1436_v39 = vld [vmem:[%s3364_s0 + $0x50] sm:$0xff]  ;;  %v1492_v46 = vld [vmem:[#allocation2 + $0x40] sm:$0xff] }
 0x25c   : > { %1591 = vadd.xlane.f32.xlu1 %v1590_v62  ;;  %v1515_v12 = vadd.f32 %v1483_v60, %v1451_v1  ;;  %v1454_v13 = vunpack.c.l.bf16 %v1432_v61  ;;  %v1455_v14 = vunpack.c.h.bf16 %v1432_v61  ;;  %v1516_v18 = vadd.f32 %v1484_v2, %v1452_v7  ;;  %v1491_v38 = vld [vmem:[#allocation2 + $0x58] sm:$0xff]  ;;  %v1493_v47 = vld [vmem:[#allocation2 + $0xc8] sm:$0xff]  ;;  %v1494_v59 = vld [vmem:[#allocation2 + $0xe0] sm:$0xff] }
 0x25d   : > { %v1593_v11 = vadd.f32 %v2898_v0, %v2895_v63  ;;  %v2911_v17 = vadd.f32 %v2852_v24, %v1514_v6  ;;  %v1517_v19 = vadd.f32 %v1485_v3, %v1453_v8  ;;  %v1456_v20 = vunpack.c.l.bf16 %v1433_v4  ;;  %v1437_v56 = vld [vmem:[%s3364_s0 + $0x58] sm:$0xff]  ;;  %v1495_v60 = vld [vmem:[#allocation2 + $0x90] sm:$0xff] }
 0x25e   : > { %v2914_v22 = vadd.f32 %v2855_v25, %v1515_v12  ;;  %v1518_v23 = vadd.f32 %v1486_v9, %v1454_v13  ;;  %v1519_v26 = vadd.f32 %v1487_v10, %v1455_v14  ;;  %v1457_v27 = vunpack.c.h.bf16 %v1433_v4  ;;  %v1496_v3 = vld [vmem:[#allocation2 + $0x70] sm:$0xff]  ;;  %v1438_v4 = vld [vmem:[%s3364_s0 + $0x60] sm:$0xff]  ;;  %v1498_v14 = vld [vmem:[#allocation2 + $0xa8] sm:$0xff] }
 0x25f   : > { %1588 = vadd.xlane.f32.xlu0 %v1587_v5  ;;  %v2917_v29 = vadd.f32 %v2852_v24, %v1516_v18  ;;  %v2920_v30 = vadd.f32 %v2855_v25, %v1517_v19  ;;  %v1520_v31 = vadd.f32 %v1488_v15, %v1456_v20  ;;  %v1458_v32 = vunpack.c.l.bf16 %v1434_v16  ;;  %v1497_v9 = vld [vmem:[#allocation2 + $0xc0] sm:$0xff]  ;;  %v1439_v20 = vld [vmem:[%s3364_s0 + $0x68] sm:$0xff] }
 0x260   : > { %1594 = vadd.xlane.f32.xlu1 %v1593_v11  ;;  %v1596_v34 = vadd.f32 %v2914_v22, %v2911_v17  ;;  %v2928_v35 = vadd.f32 %v2852_v24, %v1518_v23  ;;  %v2931_v36 = vadd.f32 %v2855_v25, %v1519_v26  ;;  %v1521_v37 = vadd.f32 %v1489_v21, %v1457_v27 }
 0x261   : > { %v1599_v40 = vadd.f32 %v2920_v30, %v2917_v29  ;;  %v2939_v41 = vadd.f32 %v2852_v24, %v1520_v31  ;;  %v1459_v42 = vunpack.c.h.bf16 %v1434_v16  ;;  %v1522_v43 = vadd.f32 %v1490_v28, %v1458_v32  ;;  %v1499_v28 = vld [vmem:[#allocation2 + $0xd0] sm:$0xff] }
 0x262   : > { %v1602_v50 = vadd.f32 %v2931_v36, %v2928_v35  ;;  %v2947_v53 = vadd.f32 %v2855_v25, %v1521_v37  ;;  %v1460_v55 = vunpack.c.l.bf16 %v1435_v33  ;;  %v1461_v54 = vunpack.c.h.bf16 %v1435_v33  ;;  %v1440_v31 = vld [vmem:[%s3364_s0 + $0x70] sm:$0xff] }
 0x263   : > { %1597 = vadd.xlane.f32.xlu0 %v1596_v34  ;;  %v1523_v61 = vadd.f32 %v1491_v38, %v1459_v42  ;;  %v2950_v62 = vadd.f32 %v2852_v24, %v1522_v43  ;;  %v1462_v1 = vunpack.c.l.bf16 %v1436_v39  ;;  %v1463_v2 = vunpack.c.h.bf16 %v1436_v39  ;;  %v1500_v38 = vld [vmem:[#allocation2 + $0x10] sm:$0xff]  ;;  %v1501_v39 = vld [vmem:[#allocation2 + $0x28] sm:$0xff] }
 0x264   : > { %1600 = vadd.xlane.f32.xlu1 %v1599_v40  ;;  %v1605_v5 = vadd.f32 %v2947_v53, %v2939_v41  ;;  %v1524_v6 = vadd.f32 %v1492_v46, %v1460_v55  ;;  %v1525_v7 = vadd.f32 %v1493_v47, %v1461_v54  ;;  %v1464_v8 = vunpack.c.l.bf16 %v1437_v56  ;;  %v1441_v40 = vld [vmem:[%s3364_s0 + $0x78] sm:$0xff] }
 0x265   : > { %v2958_v10 = vadd.f32 %v2855_v25, %v1523_v61  ;;  %v1526_v11 = vadd.f32 %v1494_v59, %v1462_v1  ;;  %v1527_v12 = vadd.f32 %v1495_v60, %v1463_v2  ;;  %v1465_v13 = vunpack.c.h.bf16 %v1437_v56  ;;  %v1502_v56 = vld [vmem:[#allocation2 + $0xa0] sm:$0xff] }
 0x266   : > { %v2961_v15 = vadd.f32 %v2852_v24, %v1524_v6  ;;  %v2964_v16 = vadd.f32 %v2855_v25, %v1525_v7  ;;  %v1528_v18 = vadd.f32 %v1496_v3, %v1464_v8  ;;  %v1466_v19 = vunpack.c.l.bf16 %v1438_v4  ;;  %v1504_v61 = vld [vmem:[#allocation2 + $0x20] sm:$0xff] }
 0x267   : > { %1603 = vadd.xlane.f32.xlu0 %v1602_v50  ;;  %v1608_v21 = vadd.f32 %v2958_v10, %v2950_v62  ;;  %v2972_v23 = vadd.f32 %v2852_v24, %v1526_v11  ;;  %v2975_v26 = vadd.f32 %v2855_v25, %v1527_v12  ;;  %v1529_v27 = vadd.f32 %v1497_v9, %v1465_v13  ;;  %v1503_v50 = vld [vmem:[#allocation2 + $0xf8] sm:$0xff] }
 0x268   : > { %1606 = vadd.xlane.f32.xlu1 %v1605_v5  ;;  %v1611_v32 = vadd.f32 %v2964_v16, %v2961_v15  ;;  %v2983_v33 = vadd.f32 %v2852_v24, %v1528_v18  ;;  %v1467_v34 = vunpack.c.h.bf16 %v1438_v4  ;;  %v1530_v37 = vadd.f32 %v1498_v14, %v1466_v19  ;;  %v1505_v5 = vld [vmem:[#allocation2 + $0x98] sm:$0xff] }
 0x269   : > { %v1614_v42 = vadd.f32 %v2975_v26, %v2972_v23  ;;  %v2991_v43 = vadd.f32 %v2855_v25, %v1529_v27  ;;  %v1468_v46 = vunpack.c.l.bf16 %v1439_v20  ;;  %v1469_v47 = vunpack.c.h.bf16 %v1439_v20 }
 0x26a   : > { %v1531_v55 = vadd.f32 %v1499_v28, %v1467_v34  ;;  %v2994_v54 = vadd.f32 %v2852_v24, %v1530_v37  ;;  %v1470_v59 = vunpack.c.l.bf16 %v1440_v31  ;;  %v1471_v60 = vunpack.c.h.bf16 %v1440_v31 }
 0x26b   : > { %1609 = vadd.xlane.f32.xlu0 %v1608_v21  ;;  %v1617_v1 = vadd.f32 %v2991_v43, %v2983_v33  ;;  %v1532_v2 = vadd.f32 %v1500_v38, %v1468_v46  ;;  %v1533_v3 = vadd.f32 %v1501_v39, %v1469_v47  ;;  %v1472_v4 = vunpack.c.l.bf16 %v1441_v40 }
 0x26c   : > { %1612 = vadd.xlane.f32.xlu1 %v1611_v32  ;;  %v2999_v6 = vadd.f32 %v2855_v25, %v1531_v55  ;;  %v1534_v7 = vadd.f32 %v1502_v56, %v1470_v59  ;;  %v1535_v8 = vadd.f32 %v1503_v50, %v1471_v60  ;;  %v1473_v9 = vunpack.c.h.bf16 %v1441_v40 }
 0x26d   : > { %v3002_v11 = vadd.f32 %v2852_v24, %v1532_v2  ;;  %v3005_v12 = vadd.f32 %v2855_v25, %v1533_v3  ;;  %v1536_v13 = vadd.f32 %v1504_v61, %v1472_v4 }
 0x26e   : > { %v1537_v14 = vadd.f32 %v1505_v5, %v1473_v9  ;;  %v1620_v18 = vadd.f32 %v2999_v6, %v2994_v54  ;;  %v3010_v19 = vadd.f32 %v2852_v24, %v1534_v7  ;;  %v3013_v20 = vadd.f32 %v2855_v25, %v1535_v8 }
 0x26f   : > { %1615 = vadd.xlane.f32.xlu0 %v1614_v42  ;;  %v1623_v21 = vadd.f32 %v3005_v12, %v3002_v11  ;;  %v3018_v27 = vadd.f32 %v2852_v24, %v1536_v13 }
 0x270   : > { %1618 = vadd.xlane.f32.xlu1 %v1617_v1  ;;  %v3021_v28 = vadd.f32 %v2855_v25, %v1537_v14  ;;  %v1626_v31 = vadd.f32 %v3013_v20, %v3010_v19 }
 0x272   : > { %v1629_v32 = vadd.f32 %v3021_v28, %v3018_v27 }
 0x273   : > { %1621 = vadd.xlane.f32.xlu0 %v1620_v18 }
 0x274   : > { %1624 = vadd.xlane.f32.xlu1 %v1623_v21 }
 0x277   : > { %1627 = vadd.xlane.f32.xlu0 %v1626_v31 }
 0x278   : > { %1630 = vadd.xlane.f32.xlu1 %v1629_v32 }
 0x2e4   : > { %v1586_v34 = vpop.xlane.xlu0 %1585 }
 0x2e5   : > { %v1633_v37 = vmul.f32 0.00390625, %v1586_v34  ;;  %v1592_v38 = vpop.xlane.xlu1 %1591 }
 0x2e6   : > { %v1635_v39 = vmul.f32 0.00390625, %v1592_v38 }
 0x2e7   : > { %v3028_v24 = vsub.f32 %v2867_v44, %v1633_v37  ;;  %v3031_v25 = vsub.f32 %v2870_v45, %v1633_v37 }
 0x2e8   : > { %v3034_v40 = vsub.f32 %v2873_v48, %v1635_v39  ;;  %v3037_v42 = vsub.f32 %v2876_v49, %v1635_v39  ;;  %v1589_v46 = vpop.xlane.xlu0 %1588 }
 0x2e9   : > { %v1634_v47 = vmul.f32 0.00390625, %v1589_v46  ;;  %v1595_v56 = vpop.xlane.xlu1 %1594  ;;  %v1681_v50 = vmul.f32 %v3028_v24, %v3028_v24  ;;  %v1682_v55 = vmul.f32 %v3031_v25, %v3031_v25 }
 0x2ea   : > { %v1636_v44 = vmul.f32 0.00390625, %v1595_v56  ;;  %v1685_v45 = vmul.f32 %v3034_v40, %v3034_v40  ;;  %v1686_v48 = vmul.f32 %v3037_v42, %v3037_v42 }
 0x2eb   : > { %v3048_v59 = vsub.f32 %v2884_v57, %v1634_v47  ;;  %v3051_v49 = vsub.f32 %v2887_v58, %v1634_v47  ;;  %v1713_v60 = vadd.f32 %v1682_v55, %v1681_v50 }
 0x2ec   : > { %v3054_v61 = vsub.f32 %v2895_v63, %v1636_v44  ;;  %v3057_v1 = vsub.f32 %v2898_v0, %v1636_v44  ;;  %v1598_v2 = vpop.xlane.xlu0 %1597  ;;  %v1719_v5 = vadd.f32 %v1686_v48, %v1685_v45 }
 0x2ed   : > { %v1637_v3 = vmul.f32 0.00390625, %v1598_v2  ;;  %1714 = vadd.xlane.f32.xlu0 %v1713_v60  ;;  %v1601_v4 = vpop.xlane.xlu1 %1600  ;;  %v1683_v7 = vmul.f32 %v3048_v59, %v3048_v59  ;;  %v1684_v57 = vmul.f32 %v3051_v49, %v3051_v49 }
 0x2ee   : > { %v1638_v58 = vmul.f32 0.00390625, %v1601_v4  ;;  %v1687_v8 = vmul.f32 %v3054_v61, %v3054_v61  ;;  %v1688_v63 = vmul.f32 %v3057_v1, %v3057_v1 }
 0x2ef   : > { %v3068_v0 = vsub.f32 %v2911_v17, %v1637_v3  ;;  %v3071_v9 = vsub.f32 %v2914_v22, %v1637_v3  ;;  %v1716_v13 = vadd.f32 %v1684_v57, %v1683_v7 }
 0x2f0   : > { %v3074_v14 = vsub.f32 %v2917_v29, %v1638_v58  ;;  %v3077_v18 = vsub.f32 %v2920_v30, %v1638_v58  ;;  %v1604_v21 = vpop.xlane.xlu0 %1603  ;;  %v1722_v34 = vadd.f32 %v1688_v63, %v1687_v8 }
 0x2f1   : > { %v1639_v31 = vmul.f32 0.00390625, %v1604_v21  ;;  %1720 = vadd.xlane.f32.xlu0 %v1719_v5  ;;  %1717 = vadd.xlane.f32.xlu1 %v1716_v13  ;;  %v1607_v32 = vpop.xlane.xlu1 %1606  ;;  %v1689_v17 = vmul.f32 %v3068_v0, %v3068_v0  ;;  %v1690_v22 = vmul.f32 %v3071_v9, %v3071_v9 }
 0x2f2   : > { %v1640_v37 = vmul.f32 0.00390625, %v1607_v32  ;;  %v1691_v29 = vmul.f32 %v3074_v14, %v3074_v14  ;;  %v1692_v30 = vmul.f32 %v3077_v18, %v3077_v18 }
 0x2f3   : > { %v3088_v38 = vsub.f32 %v2928_v35, %v1639_v31  ;;  %v3091_v39 = vsub.f32 %v2931_v36, %v1639_v31  ;;  %v1725_v46 = vadd.f32 %v1690_v22, %v1689_v17 }
 0x2f4   : > { %v3094_v47 = vsub.f32 %v2939_v41, %v1640_v37  ;;  %v3097_v56 = vsub.f32 %v2947_v53, %v1640_v37  ;;  %v1610_v50 = vpop.xlane.xlu0 %1609  ;;  %v1728_v45 = vadd.f32 %v1692_v30, %v1691_v29 }
 0x2f5   : > { %v1641_v55 = vmul.f32 0.00390625, %v1610_v50  ;;  %1723 = vadd.xlane.f32.xlu1 %v1722_v34  ;;  %1726 = vadd.xlane.f32.xlu0 %v1725_v46  ;;  %v1613_v44 = vpop.xlane.xlu1 %1612  ;;  %v1693_v35 = vmul.f32 %v3088_v38, %v3088_v38  ;;  %v1694_v36 = vmul.f32 %v3091_v39, %v3091_v39 }
 0x2f6   : > { %v1642_v48 = vmul.f32 0.00390625, %v1613_v44  ;;  %v1695_v41 = vmul.f32 %v3094_v47, %v3094_v47  ;;  %v1696_v53 = vmul.f32 %v3097_v56, %v3097_v56 }
 0x2f7   : > { %v3108_v60 = vsub.f32 %v2950_v62, %v1641_v55  ;;  %v3111_v2 = vsub.f32 %v2958_v10, %v1641_v55  ;;  %v1731_v3 = vadd.f32 %v1694_v36, %v1693_v35 }
 0x2f8   : > { %v3114_v4 = vsub.f32 %v2961_v15, %v1642_v48  ;;  %v3117_v5 = vsub.f32 %v2964_v16, %v1642_v48  ;;  %v1616_v7 = vpop.xlane.xlu0 %1615  ;;  %v1734_v8 = vadd.f32 %v1696_v53, %v1695_v41 }
 0x2f9   : > { %v1643_v57 = vmul.f32 0.00390625, %v1616_v7  ;;  %1729 = vadd.xlane.f32.xlu1 %v1728_v45  ;;  %1732 = vadd.xlane.f32.xlu0 %v1731_v3  ;;  %v1619_v58 = vpop.xlane.xlu1 %1618  ;;  %v1697_v62 = vmul.f32 %v3108_v60, %v3108_v60  ;;  %v1698_v10 = vmul.f32 %v3111_v2, %v3111_v2 }
 0x2fa   : > { %v1644_v63 = vmul.f32 0.00390625, %v1619_v58  ;;  %v1699_v15 = vmul.f32 %v3114_v4, %v3114_v4  ;;  %v1700_v16 = vmul.f32 %v3117_v5, %v3117_v5 }
 0x2fb   : > { %v3128_v13 = vsub.f32 %v2972_v23, %v1643_v57  ;;  %v3131_v21 = vsub.f32 %v2975_v26, %v1643_v57  ;;  %v1737_v31 = vadd.f32 %v1698_v10, %v1697_v62 }
 0x2fc   : > { %v3134_v32 = vsub.f32 %v2983_v33, %v1644_v63  ;;  %v3137_v34 = vsub.f32 %v2991_v43, %v1644_v63  ;;  %v1622_v17 = vpop.xlane.xlu0 %1621  ;;  %v1740_v29 = vadd.f32 %v1700_v16, %v1699_v15 }
 0x2fd   : > { %v1645_v22 = vmul.f32 0.00390625, %v1622_v17  ;;  %1735 = vadd.xlane.f32.xlu1 %v1734_v8  ;;  %1738 = vadd.xlane.f32.xlu0 %v1737_v31  ;;  %v1625_v37 = vpop.xlane.xlu1 %1624  ;;  %v1701_v23 = vmul.f32 %v3128_v13, %v3128_v13  ;;  %v1702_v26 = vmul.f32 %v3131_v21, %v3131_v21 }
 0x2fe   : > { %v1646_v30 = vmul.f32 0.00390625, %v1625_v37  ;;  %v1703_v33 = vmul.f32 %v3134_v32, %v3134_v32  ;;  %v1704_v43 = vmul.f32 %v3137_v34, %v3137_v34 }
 0x2ff   : > { %v3148_v46 = vsub.f32 %v2994_v54, %v1645_v22  ;;  %v3151_v50 = vsub.f32 %v2999_v6, %v1645_v22  ;;  %v1743_v55 = vadd.f32 %v1702_v26, %v1701_v23 }
 0x300   : > { %v3154_v44 = vsub.f32 %v3002_v11, %v1646_v30  ;;  %v3157_v45 = vsub.f32 %v3005_v12, %v1646_v30  ;;  %v1628_v35 = vpop.xlane.xlu0 %1627  ;;  %v1746_v41 = vadd.f32 %v1704_v43, %v1703_v33 }
 0x301   : > { %v1647_v36 = vmul.f32 0.00390625, %v1628_v35  ;;  %1741 = vadd.xlane.f32.xlu1 %v1740_v29  ;;  %1744 = vadd.xlane.f32.xlu0 %v1743_v55  ;;  %v1631_v48 = vpop.xlane.xlu1 %1630  ;;  %v1705_v54 = vmul.f32 %v3148_v46, %v3148_v46  ;;  %v1706_v6 = vmul.f32 %v3151_v50, %v3151_v50 }
 0x302   : > { %v1648_v53 = vmul.f32 0.00390625, %v1631_v48  ;;  %v1707_v11 = vmul.f32 %v3154_v44, %v3154_v44  ;;  %v1708_v12 = vmul.f32 %v3157_v45, %v3157_v45 }
 0x303   : > { %v3168_v3 = vsub.f32 %v3010_v19, %v1647_v36  ;;  %v3171_v7 = vsub.f32 %v3013_v20, %v1647_v36  ;;  %v1749_v57 = vadd.f32 %v1706_v6, %v1705_v54  ;;  %v1582_v54 = vld [vmem:[%s3369_s5] sm:$0x3] }
 0x304   : > { %v3174_v58 = vsub.f32 %v3018_v27, %v1648_v53  ;;  %v3177_v8 = vsub.f32 %v3021_v28, %v1648_v53  ;;  %v1752_v62 = vadd.f32 %v1708_v12, %v1707_v11  ;;  %v1583_v11 = vld [vmem:[%s3370_s6] sm:$0x3] }
 0x305   : > { %1747 = vadd.xlane.f32.xlu1 %v1746_v41  ;;  %1750 = vadd.xlane.f32.xlu0 %v1749_v57  ;;  %v1709_v10 = vmul.f32 %v3168_v3, %v3168_v3  ;;  %v1710_v19 = vmul.f32 %v3171_v7, %v3171_v7 }
 0x306   : > { %v1711_v20 = vmul.f32 %v3174_v58, %v3174_v58  ;;  %v1712_v63 = vmul.f32 %v3177_v8, %v3177_v8 }
 0x307   : > { %v1755_v27 = vadd.f32 %v1710_v19, %v1709_v10 }
 0x308   : > { %v1758_v28 = vadd.f32 %v1712_v63, %v1711_v20  ;;  %v3197_v20 = vrot.slane %v1582_v54, %v2794_v51 }
 0x309   : > { %1753 = vadd.xlane.f32.xlu1 %v1752_v62  ;;  %1756 = vadd.xlane.f32.xlu0 %v1755_v27  ;;  %v3194_v62 = vrot.slane %v1582_v54, %v2796_v52 }
 0x30d   : > { %1759 = vadd.xlane.f32.xlu1 %v1758_v28 }
 0x376   : > { %v1715_v15 = vpop.xlane.xlu0 %1714 }
 0x377   : > { %v1761_v16 = vmul.f32 0.00390625, %v1715_v15  ;;  %v3200_v15 = vrot.slane %v1583_v11, %v2796_v52 }
 0x379   : > { %v1777_v31 = vadd.f32 1e-05, %v1761_v16  ;;  %v3203_v16 = vrot.slane %v1583_v11, %v2794_v51 }
 0x37a   : > { %v1718_v17 = vpop.xlane.xlu1 %1717  ;;  %v1721_v22 = vpop.xlane.xlu0 %1720 }
 0x37b   : > { %2439 = vrsqrt.f32 %v1777_v31  ;;  %v1762_v37 = vmul.f32 0.00390625, %v1718_v17  ;;  %v1763_v29 = vmul.f32 0.00390625, %v1721_v22 }
 0x37d   : > { %v1778_v23 = vadd.f32 1e-05, %v1762_v37  ;;  %v1779_v26 = vadd.f32 1e-05, %v1763_v29 }
 0x37e   : > { %v1724_v30 = vpop.xlane.xlu1 %1723  ;;  %v1727_v33 = vpop.xlane.xlu0 %1726 }
 0x37f   : > { %2441 = vrsqrt.f32 %v1778_v23  ;;  %v1764_v43 = vmul.f32 0.00390625, %v1724_v30  ;;  %v1765_v55 = vmul.f32 0.00390625, %v1727_v33 }
 0x380   : > { %2443 = vrsqrt.f32 %v1779_v26 }
 0x381   : > { %v1780_v35 = vadd.f32 1e-05, %v1764_v43  ;;  %v1781_v36 = vadd.f32 1e-05, %v1765_v55 }
 0x382   : > { %v1730_v48 = vpop.xlane.xlu1 %1729  ;;  %v1733_v41 = vpop.xlane.xlu0 %1732 }
 0x383   : > { %2445 = vrsqrt.f32 %v1780_v35  ;;  %v1766_v6 = vmul.f32 0.00390625, %v1730_v48  ;;  %v1767_v53 = vmul.f32 0.00390625, %v1733_v41 }
 0x384   : > { %2447 = vrsqrt.f32 %v1781_v36 }
 0x385   : > { %v1782_v12 = vadd.f32 1e-05, %v1766_v6  ;;  %v1783_v57 = vadd.f32 1e-05, %v1767_v53 }
 0x386   : > { %v1736_v10 = vpop.xlane.xlu1 %1735  ;;  %v1739_v19 = vpop.xlane.xlu0 %1738 }
 0x387   : > { %2449 = vrsqrt.f32 %v1782_v12  ;;  %v1768_v63 = vmul.f32 0.00390625, %v1736_v10  ;;  %v1769_v27 = vmul.f32 0.00390625, %v1739_v19 }
 0x388   : > { %v2440_v28 = vpop.eup %2439  ;;  %2451 = vrsqrt.f32 %v1783_v57 }
 0x389   : > { %v1809_v31 = vmul.f32 %v2440_v28, %v3028_v24  ;;  %v1810_v17 = vmul.f32 %v2440_v28, %v3031_v25  ;;  %v1784_v22 = vadd.f32 1e-05, %v1768_v63  ;;  %v1785_v37 = vadd.f32 1e-05, %v1769_v27 }
 0x38a   : > { %v1742_v29 = vpop.xlane.xlu1 %1741  ;;  %v1745_v23 = vpop.xlane.xlu0 %1744 }
 0x38b   : > { %v1852_v26 = vmul.f32 %v3194_v62, %v1809_v31  ;;  %v1853_v30 = vmul.f32 %v3197_v20, %v1810_v17  ;;  %2453 = vrsqrt.f32 %v1784_v22  ;;  %v1770_v33 = vmul.f32 0.00390625, %v1742_v29 }
 0x38c   : > { %v2442_v52 = vpop.eup %2441  ;;  %2455 = vrsqrt.f32 %v1785_v37  ;;  %v1771_v43 = vmul.f32 0.00390625, %v1745_v23 }
 0x38d   : > { %v2444_v51 = vpop.eup %2443  ;;  %v1895_v55 = vadd.f32 %v3200_v15, %v1852_v26  ;;  %v1896_v24 = vadd.f32 %v3203_v16, %v1853_v30  ;;  %v1811_v25 = vmul.f32 %v2442_v52, %v3048_v59  ;;  %v1812_v35 = vmul.f32 %v2442_v52, %v3051_v49 }
 0x38e   : > { %v1813_v36 = vmul.f32 %v2444_v51, %v3034_v40  ;;  %v1814_v48 = vmul.f32 %v2444_v51, %v3037_v42  ;;  %v1786_v41 = vadd.f32 1e-05, %v1770_v33  ;;  %v1787_v54 = vadd.f32 1e-05, %v1771_v43  ;;  %v1748_v6 = vpop.xlane.xlu1 %1747  ;;  %v1751_v53 = vpop.xlane.xlu0 %1750 }
 0x38f   : > { %v2262_v11 = vpack.c.bf16 %v1896_v24, %v1895_v55  ;;  %v1854_v12 = vmul.f32 %v3194_v62, %v1811_v25  ;;  %v1855_v57 = vmul.f32 %v3197_v20, %v1812_v35  ;;  %v1772_v10 = vmul.f32 0.00390625, %v1748_v6 }
 0x390   : > { %v2446_v19 = vpop.eup %2445  ;;  %v1856_v63 = vmul.f32 %v3194_v62, %v1813_v36  ;;  %v1857_v59 = vmul.f32 %v3197_v20, %v1814_v48  ;;  %2457 = vrsqrt.f32 %v1786_v41  ;;  %v1773_v49 = vmul.f32 0.00390625, %v1751_v53 }
 0x391   : > { %v2448_v40 = vpop.eup %2447  ;;  %2023 = vst [vmem:[%s3371_s7] sm:$0xff] %v2262_v11  ;;  %v1897_v42 = vadd.f32 %v3200_v15, %v1854_v12  ;;  %v1898_v27 = vadd.f32 %v3203_v16, %v1855_v57  ;;  %v1815_v28 = vmul.f32 %v2446_v19, %v3054_v61  ;;  %v1816_v31 = vmul.f32 %v2446_v19, %v3057_v1 }
 0x392   : > { %v1899_v17 = vadd.f32 %v3200_v15, %v1856_v63  ;;  %v1900_v22 = vadd.f32 %v3203_v16, %v1857_v59  ;;  %v1817_v37 = vmul.f32 %v2448_v40, %v3068_v0  ;;  %v1818_v29 = vmul.f32 %v2448_v40, %v3071_v9  ;;  %v1754_v51 = vpop.xlane.xlu1 %1753 }
 0x393   : > { %v2263_v23 = vpack.c.bf16 %v1898_v27, %v1897_v42  ;;  %v1858_v26 = vmul.f32 %v3194_v62, %v1815_v28  ;;  %v1859_v30 = vmul.f32 %v3197_v20, %v1816_v31  ;;  %2459 = vrsqrt.f32 %v1787_v54  ;;  %v1757_v27 = vpop.xlane.xlu0 %1756 }
 0x394   : > { %v2450_v33 = vpop.eup %2449  ;;  %v2264_v52 = vpack.c.bf16 %v1900_v22, %v1899_v17  ;;  %v1860_v61 = vmul.f32 %v3194_v62, %v1817_v37  ;;  %v1861_v1 = vmul.f32 %v3197_v20, %v1818_v29  ;;  %v1788_v43 = vadd.f32 1e-05, %v1772_v10 }
 0x395   : > { %v2452_v55 = vpop.eup %2451  ;;  %2024 = vst [vmem:[%s3371_s7 + $0x8] sm:$0xff] %v2263_v23  ;;  %v1901_v0 = vadd.f32 %v3200_v15, %v1858_v26  ;;  %v1902_v9 = vadd.f32 %v3203_v16, %v1859_v30  ;;  %v1819_v24 = vmul.f32 %v2450_v33, %v3074_v14  ;;  %v1820_v25 = vmul.f32 %v2450_v33, %v3077_v18 }
 0x396   : > { %2025 = vst [vmem:[%s3371_s7 + $0x10] sm:$0xff] %v2264_v52  ;;  %v1903_v35 = vadd.f32 %v3200_v15, %v1860_v61  ;;  %v1904_v36 = vadd.f32 %v3203_v16, %v1861_v1  ;;  %v1821_v48 = vmul.f32 %v2452_v55, %v3088_v38  ;;  %v1822_v41 = vmul.f32 %v2452_v55, %v3091_v39  ;;  %v1760_v28 = vpop.xlane.xlu1 %1759 }
 0x397   : > { %v2265_v54 = vpack.c.bf16 %v1902_v9, %v1901_v0  ;;  %v1862_v6 = vmul.f32 %v3194_v62, %v1819_v24  ;;  %v1863_v53 = vmul.f32 %v3197_v20, %v1820_v25  ;;  %2461 = vrsqrt.f32 %v1788_v43 }
 0x398   : > { %v2454_v14 = vpop.eup %2453  ;;  %v2266_v18 = vpack.c.bf16 %v1904_v36, %v1903_v35  ;;  %v1864_v11 = vmul.f32 %v3194_v62, %v1821_v48  ;;  %v1865_v12 = vmul.f32 %v3197_v20, %v1822_v41  ;;  %v1789_v57 = vadd.f32 1e-05, %v1773_v49 }
 0x399   : > { %v2456_v10 = vpop.eup %2455  ;;  %2026 = vst [vmem:[%s3371_s7 + $0x18] sm:$0xff] %v2265_v54  ;;  %v1905_v38 = vadd.f32 %v3200_v15, %v1862_v6  ;;  %v1906_v39 = vadd.f32 %v3203_v16, %v1863_v53  ;;  %v1823_v19 = vmul.f32 %v2454_v14, %v3094_v47  ;;  %v1824_v63 = vmul.f32 %v2454_v14, %v3097_v56 }
 0x39a   : > { %2027 = vst [vmem:[%s3371_s7 + $0x20] sm:$0xff] %v2266_v18  ;;  %v1907_v59 = vadd.f32 %v3200_v15, %v1864_v11  ;;  %v1908_v49 = vadd.f32 %v3203_v16, %v1865_v12  ;;  %v1825_v40 = vmul.f32 %v2456_v10, %v3108_v60  ;;  %v1826_v42 = vmul.f32 %v2456_v10, %v3111_v2 }
 0x39b   : > { %v2267_v31 = vpack.c.bf16 %v1906_v39, %v1905_v38  ;;  %v1866_v17 = vmul.f32 %v3194_v62, %v1823_v19  ;;  %v1867_v47 = vmul.f32 %v3197_v20, %v1824_v63  ;;  %2463 = vrsqrt.f32 %v1789_v57 }
 0x39c   : > { %v2268_v56 = vpack.c.bf16 %v1908_v49, %v1907_v59  ;;  %v1868_v22 = vmul.f32 %v3194_v62, %v1825_v40  ;;  %v1869_v37 = vmul.f32 %v3197_v20, %v1826_v42  ;;  %v1774_v29 = vmul.f32 0.00390625, %v1754_v51 }
 0x39d   : > { %v2458_v23 = vpop.eup %2457  ;;  %2028 = vst [vmem:[%s3371_s7 + $0x28] sm:$0xff] %v2267_v31  ;;  %v1909_v60 = vadd.f32 %v3200_v15, %v1866_v17  ;;  %v1910_v2 = vadd.f32 %v3203_v16, %v1867_v47  ;;  %v1775_v26 = vmul.f32 0.00390625, %v1757_v27  ;;  %v1776_v30 = vmul.f32 0.00390625, %v1760_v28 }
 0x39e   : > { %2029 = vst [vmem:[%s3371_s7 + $0x30] sm:$0xff] %v2268_v56  ;;  %v1911_v33 = vadd.f32 %v3200_v15, %v1868_v22  ;;  %v1912_v52 = vadd.f32 %v3203_v16, %v1869_v37  ;;  %v1827_v61 = vmul.f32 %v2458_v23, %v3114_v4  ;;  %v1828_v1 = vmul.f32 %v2458_v23, %v3117_v5 }
 0x39f   : > { %v2269_v43 = vpack.c.bf16 %v1910_v2, %v1909_v60  ;;  %v1790_v51 = vadd.f32 1e-05, %v1774_v29  ;;  %v1791_v55 = vadd.f32 1e-05, %v1775_v26  ;;  %v1792_v0 = vadd.f32 1e-05, %v1776_v30 }
 0x3a0   : > { %v2460_v9 = vpop.eup %2459  ;;  %v2270_v24 = vpack.c.bf16 %v1912_v52, %v1911_v33  ;;  %v1870_v25 = vmul.f32 %v3194_v62, %v1827_v61  ;;  %v1871_v35 = vmul.f32 %v3197_v20, %v1828_v1 }
 0x3a1   : > { %2030 = vst [vmem:[%s3371_s7 + $0x38] sm:$0xff] %v2269_v43  ;;  %v1829_v36 = vmul.f32 %v2460_v9, %v3128_v13  ;;  %v1830_v4 = vmul.f32 %v2460_v9, %v3131_v21  ;;  %2465 = vrsqrt.f32 %v1790_v51 }
 0x3a2   : > { %2031 = vst [vmem:[%s3371_s7 + $0x40] sm:$0xff] %v2270_v24  ;;  %v1913_v5 = vadd.f32 %v3200_v15, %v1870_v25  ;;  %v1914_v48 = vadd.f32 %v3203_v16, %v1871_v35  ;;  %2467 = vrsqrt.f32 %v1791_v55 }
 0x3a3   : > { %v1872_v41 = vmul.f32 %v3194_v62, %v1829_v36  ;;  %v1873_v54 = vmul.f32 %v3197_v20, %v1830_v4  ;;  %2469 = vrsqrt.f32 %v1792_v0 }
 0x3a4   : > { %v2462_v6 = vpop.eup %2461  ;;  %v2271_v53 = vpack.c.bf16 %v1914_v48, %v1913_v5 }
 0x3a5   : > { %v1915_v13 = vadd.f32 %v3200_v15, %v1872_v41  ;;  %v1916_v21 = vadd.f32 %v3203_v16, %v1873_v54  ;;  %v1831_v14 = vmul.f32 %v2462_v6, %v3134_v32  ;;  %v1832_v18 = vmul.f32 %v2462_v6, %v3137_v34 }
 0x3a6   : > { %2032 = vst [vmem:[%s3371_s7 + $0x48] sm:$0xff] %v2271_v53 }
 0x3a7   : > { %v2272_v11 = vpack.c.bf16 %v1916_v21, %v1915_v13  ;;  %v1874_v12 = vmul.f32 %v3194_v62, %v1831_v14  ;;  %v1875_v57 = vmul.f32 %v3197_v20, %v1832_v18 }
 0x3a8   : > { %v2464_v10 = vpop.eup %2463 }
 0x3a9   : > { %2033 = vst [vmem:[%s3371_s7 + $0x50] sm:$0xff] %v2272_v11  ;;  %v1917_v38 = vadd.f32 %v3200_v15, %v1874_v12  ;;  %v1918_v32 = vadd.f32 %v3203_v16, %v1875_v57  ;;  %v1833_v34 = vmul.f32 %v2464_v10, %v3148_v46  ;;  %v1834_v39 = vmul.f32 %v2464_v10, %v3151_v50 }
 0x3ab   : > { %v2273_v19 = vpack.c.bf16 %v1918_v32, %v1917_v38  ;;  %v1876_v63 = vmul.f32 %v3194_v62, %v1833_v34  ;;  %v1877_v59 = vmul.f32 %v3197_v20, %v1834_v39 }
 0x3ad   : > { %2034 = vst [vmem:[%s3371_s7 + $0x58] sm:$0xff] %v2273_v19  ;;  %v1919_v49 = vadd.f32 %v3200_v15, %v1876_v63  ;;  %v1920_v40 = vadd.f32 %v3203_v16, %v1877_v59 }
 0x3ae   : > { %v2466_v42 = vpop.eup %2465 }
 0x3af   : > { %v2468_v27 = vpop.eup %2467  ;;  %v2274_v28 = vpack.c.bf16 %v1920_v40, %v1919_v49  ;;  %v1835_v46 = vmul.f32 %v2466_v42, %v3154_v44  ;;  %v1836_v50 = vmul.f32 %v2466_v42, %v3157_v45 }
 0x3b0   : > { %v2470_v31 = vpop.eup %2469  ;;  %v1837_v17 = vmul.f32 %v2468_v27, %v3168_v3  ;;  %v1838_v47 = vmul.f32 %v2468_v27, %v3171_v7 }
 0x3b1   : > { %2035 = vst [vmem:[%s3371_s7 + $0x60] sm:$0xff] %v2274_v28  ;;  %v1878_v56 = vmul.f32 %v3194_v62, %v1835_v46  ;;  %v1879_v22 = vmul.f32 %v3197_v20, %v1836_v50  ;;  %v1839_v37 = vmul.f32 %v2470_v31, %v3174_v58  ;;  %v1840_v29 = vmul.f32 %v2470_v31, %v3177_v8 }
 0x3b2   : > { %v1880_v44 = vmul.f32 %v3194_v62, %v1837_v17  ;;  %v1881_v45 = vmul.f32 %v3197_v20, %v1838_v47 }
 0x3b3   : > { %v1921_v3 = vadd.f32 %v3200_v15, %v1878_v56  ;;  %v1922_v7 = vadd.f32 %v3203_v16, %v1879_v22  ;;  %v1882_v23 = vmul.f32 %v3194_v62, %v1839_v37  ;;  %v1883_v60 = vmul.f32 %v3197_v20, %v1840_v29 }
 0x3b4   : > { %v1923_v2 = vadd.f32 %v3200_v15, %v1880_v44  ;;  %v1924_v26 = vadd.f32 %v3203_v16, %v1881_v45 }
 0x3b5   : > { %v2275_v30 = vpack.c.bf16 %v1922_v7, %v1921_v3  ;;  %v1925_v58 = vadd.f32 %v3200_v15, %v1882_v23  ;;  %v1926_v8 = vadd.f32 %v3203_v16, %v1883_v60 }
 0x3b6   : > { %v2276_v33 = vpack.c.bf16 %v1924_v26, %v1923_v2 }
 0x3b7   : > { %2036 = vst [vmem:[%s3371_s7 + $0x68] sm:$0xff] %v2275_v30  ;;  %v2277_v52 = vpack.c.bf16 %v1926_v8, %v1925_v58 }
 0x3b8   : > { %2037 = vst [vmem:[%s3371_s7 + $0x70] sm:$0xff] %v2276_v33 }
 0x3b9   : > { %2038 = vst [vmem:[%s3371_s7 + $0x78] sm:$0xff] %v2277_v52 }
 0x3ba PF: > { %s17_s28 = sadd.s32 1, %s2509_s28   ;;  %s3372_s24 = smov %s2497_s25 }
 0x3bb   : > { %p14_p13 = scmp.ge.s32.totalorder %s17_s28, 4   ;;  %s3373_s25 = smov %s2587_s9 }
 0x3bc   : > { %s3374_s26 = smov %s2505_s27  ;;  %s3375_s27 = smov %s3377_s29 }
 0x3bd   :  { %16 = sbr.rel (!%p14_p13) target bundleno = 3 (0x3), region = 138 }

// kernel: seq2seq_forward.18
= control target key start
LH: loop header
LB: loop body
LE: loop exit
PB: predicated region body
PF: predicated region fallthrough
CT: control target
= control target key end

     0   :  { %s2620_s17 = smov 0   ;;  %s3147_s0 = inlined_call_operand.vmem [shape: bf16[128,256], index: 0, kind: input, shape index: {}]   ;;  %s3148_s1 = inlined_call_operand.vmem [shape: bf16[128,256], index: 1, kind: input, shape index: {}]   ;;  %s3149_s2 = inlined_call_operand.vmem [shape: bf16[256,256], index: 2, kind: input, shape index: {}]   ;;  %s3150_s3 = inlined_call_operand.vmem [shape: f32[1,256], index: 3, kind: input, shape index: {}]   ;;  %s3151_s4 = inlined_call_operand.vmem [shape: bf16[256,512], index: 4, kind: input, shape index: {}]   ;;  %s3152_s5 = inlined_call_operand.vmem [shape: f32[1,512], index: 5, kind: input, shape index: {}]   ;;  %s3153_s6 = inlined_call_operand.vmem [shape: bf16[256,256], index: 6, kind: input, shape index: {}]   ;;  %s3154_s7 = inlined_call_operand.vmem [shape: f32[1,256], index: 7, kind: input, shape index: {}]   ;;  %s3155_s8 = inlined_call_operand.vmem [shape: f32[1,256], index: 8, kind: input, shape index: {}]   ;;  %s3156_s9 = inlined_call_operand.vmem [shape: f32[1,256], index: 9, kind: input, shape index: {}]   ;;  %s3157_s10 = inlined_call_operand.vmem [shape: f32[4,32,32], index: 10, kind: input, shape index: {}]   ;;  %s3158_s11 = inlined_call_operand.vmem [shape: bf16[128,256], index: 11, kind: output, shape index: {}]  }
   0x1 LB: > { %s2626_s18 = sadd.s32 4294967295, %s2558_s17   ;;  %p2087_p0 = scmp.ge.s32.totalorder %s2558_s17, 1  ;;  %s2558_s17 = sphi %s2620_s17, %s21_s17  }
   0x2   : > { %p361_p1 = scmp.lt.s32.totalorder %s2558_s17, 5 }
   0x4   : > { %p362_p2 = pnand %p2087_p0, %p361_p1 }
   0x5   : > { %s2088_s22 = sshll.u32 (!%p362_p2), %s2626_s18, 2  ;;  %p428_p4 = scmp.lt.s32.totalorder (!%p362_p2), %s2626_s18, 3 }
   0x6   : > { %365 = sbr.rel (%p362_p2) target bundleno = 1564 (0x61c), region = 64  ;;  %p415_p3 = scmp.lt.s32.totalorder (!%p362_p2), %s2088_s22, 15 }
   0xb   : > { %v2309_v0 = vld [vmem:[%s3151_s4 + $0xe4] ss:$16 sps:$4 sm:$0xff]   ;;  %v2311_v1 = vld [vmem:[%s3151_s4 + $0xe0] ss:$16 sps:$4 sm:$0xff]   ;;  %s3160_s22 = smov (!%p415_p3, %s2088_s22), 15  ;;  %s3162_s18 = smov (!%p428_p4, %s2626_s18), 3 }
   0xc   : > { %1152 = vmatprep.subr.bf16.mxu1 %v2309_v0  ;;  %v2312_v2 = vld [vmem:[%s3151_s4 + $0xc4] ss:$16 sps:$4 sm:$0xff]   ;;  %v2314_v3 = vld [vmem:[%s3151_s4 + $0xc0] ss:$16 sps:$4 sm:$0xff]   ;;  %s2742_s27 = sshll.u32 %s3160_s22, 3  ;;  %s2247_s21 = sshll.u32 %s3162_s18, 5 }
   0xd   : > { %1153 = vmatpush1.bf16.msra.mxu1 %v2311_v1  ;;  %v2315_v4 = vld [vmem:[%s3151_s4 + $0xa4] ss:$16 sps:$4 sm:$0xff]   ;;  %v2320_v6 = vld [vmem:[%s3149_s2 + $0x70] ss:$8 sps:$4 sm:$0xff]   ;;  %v2326_v9 = vld [vmem:[%s3149_s2 + $0x60] ss:$8 sps:$4 sm:$0xff]   ;;  %s2757_s16 = scalar_lea.vmem %s3148_s1, %s2742_s27  ;;  %s2782_s14 = scalar_lea.vmem %s3147_s0, %s2742_s27 }
   0xe   : > { %1154 = vmatprep.subr.bf16.mxu1 %v2312_v2  ;;  %v2318_v5 = vld [vmem:[%s3149_s2 + $0x74] ss:$8 sps:$4 sm:$0xff]   ;;  %v2317_v7 = vld [vmem:[%s3151_s4 + $0xa0] ss:$16 sps:$4 sm:$0xff]   ;;  %v2324_v8 = vld [vmem:[%s3149_s2 + $0x64] ss:$8 sps:$4 sm:$0xff]   ;;  %s438_s13 = scalar_lea.vmem %s3158_s11, %s2742_s27 }
   0xf   : > { %673 = vmatprep.subr.bf16.mxu0 %v2318_v5  ;;  %v2321_v10 = vld [vmem:[%s3151_s4 + $0x84] ss:$16 sps:$4 sm:$0xff]   ;;  %v2323_v11 = vld [vmem:[%s3151_s4 + $0x80] ss:$16 sps:$4 sm:$0xff]   ;;  %v442_v50 = vld [vmem:[%s2782_s14 + $0x8] sm:$0xff]  ;;  %vm1325_vm0 = vcmask 261120  }
  0x10   : > { %674 = vmatpush1.bf16.msra.mxu0 %v2320_v6  ;;  %v2330_v12 = vld [vmem:[%s3149_s2 + $0x54] ss:$8 sps:$4 sm:$0xff]   ;;  %v2332_v14 = vld [vmem:[%s3149_s2 + $0x50] ss:$8 sps:$4 sm:$0xff]   ;;  %v2336_v15 = vld [vmem:[%s3149_s2 + $0x44] ss:$8 sps:$4 sm:$0xff]  }
  0x11   : > { %1155 = vmatpush1.bf16.msra.mxu1 %v2314_v3  ;;  %675 = vmatprep.subr.bf16.mxu0 %v2324_v8  ;;  %v2327_v13 = vld [vmem:[%s3151_s4 + $0x64] ss:$16 sps:$4 sm:$0xff]   ;;  %v2329_v16 = vld [vmem:[%s3151_s4 + $0x60] ss:$16 sps:$4 sm:$0xff]   ;;  %v2417_v8 = vld [vmem:[%s3151_s4 + $0xec] ss:$16 sps:$4 sm:$0xff]  }
  0x12   : > { %1156 = vmatprep.subr.bf16.mxu1 %v2315_v4  ;;  %v2333_v17 = vld [vmem:[%s3151_s4 + $0x44] ss:$16 sps:$4 sm:$0xff]   ;;  %v2338_v18 = vld [vmem:[%s3149_s2 + $0x40] ss:$8 sps:$4 sm:$0xff]   ;;  %v2344_v22 = vld [vmem:[%s3149_s2 + $0x30] ss:$8 sps:$4 sm:$0xff]  }
  0x13   : > { %v2342_v19 = vld [vmem:[%s3149_s2 + $0x34] ss:$8 sps:$4 sm:$0xff]   ;;  %v2335_v20 = vld [vmem:[%s3151_s4 + $0x40] ss:$16 sps:$4 sm:$0xff]   ;;  %v2348_v23 = vld [vmem:[%s3149_s2 + $0x24] ss:$8 sps:$4 sm:$0xff]  }
  0x14   : > { %676 = vmatpush1.bf16.msra.mxu0 %v2326_v9  ;;  %v2339_v21 = vld [vmem:[%s3151_s4 + $0x24] ss:$16 sps:$4 sm:$0xff]   ;;  %v2341_v24 = vld [vmem:[%s3151_s4 + $0x20] ss:$16 sps:$4 sm:$0xff]  }
  0x15   : > { %1157 = vmatpush1.bf16.msra.mxu1 %v2317_v7  ;;  %677 = vmatprep.subr.bf16.mxu0 %v2330_v12  ;;  %v2345_v25 = vld [vmem:[%s3151_s4 + $0x4] ss:$16 sps:$4 sm:$0xff]   ;;  %v2350_v26 = vld [vmem:[%s3149_s2 + $0x20] ss:$8 sps:$4 sm:$0xff]   ;;  %v2356_v30 = vld [vmem:[%s3149_s2 + $0x10] ss:$8 sps:$4 sm:$0xff]  }
  0x16   : > { %1158 = vmatprep.subr.bf16.mxu1 %v2321_v10  ;;  %v2354_v27 = vld [vmem:[%s3149_s2 + $0x14] ss:$8 sps:$4 sm:$0xff]   ;;  %v2347_v28 = vld [vmem:[%s3151_s4] ss:$16 sps:$4 sm:$0xff]   ;;  %v2360_v31 = vld [vmem:[%s3149_s2 + $0x4] ss:$8 sps:$4 sm:$0xff]  }
  0x17   : > { %v2351_v29 = vld [vmem:[%s3151_s4 + $0x1e4] ss:$16 sps:$4 sm:$0xff]   ;;  %v2353_v32 = vld [vmem:[%s3151_s4 + $0x1e0] ss:$16 sps:$4 sm:$0xff]   ;;  %v2856_v7 = vld [vmem:[%s2782_s14 + $0x18] sm:$0xff] }
  0x18   : > { %678 = vmatpush1.bf16.msra.mxu0 %v2332_v14  ;;  %v2357_v33 = vld [vmem:[%s3151_s4 + $0x1c4] ss:$16 sps:$4 sm:$0xff]   ;;  %v2362_v34 = vld [vmem:[%s3149_s2] ss:$8 sps:$4 sm:$0xff]   ;;  %v2368_v38 = vld [vmem:[%s3149_s2 + $0xf0] ss:$8 sps:$4 sm:$0xff]  }
  0x19   : > { %1159 = vmatpush1.bf16.msra.mxu1 %v2323_v11  ;;  %679 = vmatprep.subr.bf16.mxu0 %v2336_v15  ;;  %v2366_v35 = vld [vmem:[%s3149_s2 + $0xf4] ss:$8 sps:$4 sm:$0xff]   ;;  %v2359_v36 = vld [vmem:[%s3151_s4 + $0x1c0] ss:$16 sps:$4 sm:$0xff]   ;;  %v2372_v39 = vld [vmem:[%s3149_s2 + $0xe4] ss:$8 sps:$4 sm:$0xff]  }
  0x1a   : > { %1160 = vmatprep.subr.bf16.mxu1 %v2327_v13  ;;  %v2363_v37 = vld [vmem:[%s3151_s4 + $0x1a4] ss:$16 sps:$4 sm:$0xff]   ;;  %v2365_v40 = vld [vmem:[%s3151_s4 + $0x1a0] ss:$16 sps:$4 sm:$0xff]   ;;  %v2415_v11 = vld [vmem:[%s3151_s4 + $0xe8] ss:$16 sps:$4 sm:$0xff]  }
  0x1b   : > { %v2369_v41 = vld [vmem:[%s3151_s4 + $0x184] ss:$16 sps:$4 sm:$0xff]   ;;  %v2374_v42 = vld [vmem:[%s3149_s2 + $0xe0] ss:$8 sps:$4 sm:$0xff]   ;;  %v2380_v46 = vld [vmem:[%s3149_s2 + $0xd0] ss:$8 sps:$4 sm:$0xff]  }
  0x1c   : > { %680 = vmatpush1.bf16.msra.mxu0 %v2338_v18  ;;  %v2378_v43 = vld [vmem:[%s3149_s2 + $0xd4] ss:$8 sps:$4 sm:$0xff]   ;;  %v2772_v44 = vld [vmem:[%s2757_s16 + $0x4] ss:$8 sps:$4 sm:$0xff]   ;;  %v2371_v45 = vld [vmem:[%s3151_s4 + $0x180] ss:$16 sps:$4 sm:$0xff]  }
  0x1d   : > { %1161 = vmatpush1.bf16.msra.mxu1 %v2329_v16  ;;  %681 = vmatprep.subr.bf16.mxu0 %v2342_v19  ;;  %v2375_v47 = vld [vmem:[%s3151_s4 + $0x164] ss:$16 sps:$4 sm:$0xff]   ;;  %v2377_v51 = vld [vmem:[%s3151_s4 + $0x160] ss:$16 sps:$4 sm:$0xff]   ;;  %v2420_v13 = vld [vmem:[%s3151_s4 + $0xcc] ss:$16 sps:$4 sm:$0xff]  }
  0x1e   : > { %1162 = vmatprep.subr.bf16.mxu1 %v2333_v17  ;;  %1184 = vmatprep.mubr.bf16.mxu1 %v2772_v44  ;;  %v2384_v48 = vld [vmem:[%s3149_s2 + $0xc4] ss:$8 sps:$4 sm:$0xff]   ;;  %v2386_v54 = vld [vmem:[%s3149_s2 + $0xc0] ss:$8 sps:$4 sm:$0xff]   ;;  %v2390_v55 = vld [vmem:[%s3149_s2 + $0xb4] ss:$8 sps:$4 sm:$0xff]  }
  0x1f   : > { %v2794_v49 = vld [vmem:[%s2782_s14] sm:$0xff]  ;;  %v2392_v58 = vld [vmem:[%s3149_s2 + $0xb0] ss:$8 sps:$4 sm:$0xff]   ;;  %v2402_v63 = vld [vmem:[%s3149_s2 + $0x94] ss:$8 sps:$4 sm:$0xff]  }
  0x20   : > { %682 = vmatpush1.bf16.msra.mxu0 %v2344_v22  ;;  %v2100_v52 = vcombine.high %v2794_v49, %v442_v50  ;;  %v2381_v53 = vld [vmem:[%s3151_s4 + $0x144] ss:$16 sps:$4 sm:$0xff]   ;;  %v2383_v56 = vld [vmem:[%s3151_s4 + $0x140] ss:$16 sps:$4 sm:$0xff]   ;;  %v2099_v9 = vcombine.low %v2794_v49, %v442_v50  ;;  %v2418_v14 = vld [vmem:[%s3151_s4 + $0xc8] ss:$16 sps:$4 sm:$0xff]  }
  0x21   : > { %1163 = vmatpush1.bf16.msra.mxu1 %v2335_v20  ;;  %683 = vmatprep.subr.bf16.mxu0 %v2348_v23  ;;  %v2387_v57 = vld [vmem:[%s3151_s4 + $0x124] ss:$16 sps:$4 sm:$0xff]   ;;  %v2389_v60 = vld [vmem:[%s3151_s4 + $0x120] ss:$16 sps:$4 sm:$0xff]   ;;  %v2423_v15 = vld [vmem:[%s3151_s4 + $0xac] ss:$16 sps:$4 sm:$0xff]  }
  0x22   : > { %1164 = vmatprep.subr.bf16.mxu1 %v2339_v21  ;;  %705 = vmatprep.mubr.bf16.mxu0 %v2100_v52  ;;  %v2396_v59 = vld [vmem:[%s3149_s2 + $0xa4] ss:$8 sps:$4 sm:$0xff]   ;;  %v2401_v62 = vld [vmem:[%s3149_s2 + $0xa0] ss:$8 sps:$4 sm:$0xff]   ;;  %v2404_v1 = vld [vmem:[%s3149_s2 + $0x90] ss:$8 sps:$4 sm:$0xff]  }
  0x23   : > { %v2393_v61 = vld [vmem:[%s3151_s4 + $0x104] ss:$16 sps:$4 sm:$0xff]   ;;  %v2395_v0 = vld [vmem:[%s3151_s4 + $0x100] ss:$16 sps:$4 sm:$0xff]   ;;  %v2421_v16 = vld [vmem:[%s3151_s4 + $0xa8] ss:$16 sps:$4 sm:$0xff]  }
  0x24   : > { %684 = vmatpush1.bf16.msra.mxu0 %v2350_v26  ;;  %v2405_v2 = vld [vmem:[%s3149_s2 + $0x84] ss:$8 sps:$4 sm:$0xff]   ;;  %v2844_v3 = vld [vmem:[%s2757_s16] ss:$8 sps:$4 sm:$0xff]   ;;  %v2847_v4 = vld [vmem:[%s2757_s16 + $0x14] ss:$8 sps:$4 sm:$0xff]  }
  0x25   : > { %1165 = vmatpush1.bf16.msra.mxu1 %v2341_v24  ;;  %685 = vmatprep.subr.bf16.mxu0 %v2354_v27  ;;  %v2409_v5 = vld [vmem:[%s3149_s2 + $0x80] ss:$8 sps:$4 sm:$0xff]   ;;  %v2853_v6 = vld [vmem:[%s2782_s14 + $0x10] sm:$0xff]  ;;  %v2426_v18 = vld [vmem:[%s3151_s4 + $0x8c] ss:$16 sps:$4 sm:$0xff]  }
  0x26   : > { %1166 = vmatprep.subr.bf16.mxu1 %v2345_v25  ;;  %v2102_v10 = vcombine.high %v2853_v6, %v2856_v7  ;;  %v2870_v12 = vld [vmem:[%s2757_s16 + $0x10] ss:$8 sps:$4 sm:$0xff]   ;;  %v2101_v17 = vcombine.low %v2853_v6, %v2856_v7  ;;  %v2429_v20 = vld [vmem:[%s3151_s4 + $0x6c] ss:$16 sps:$4 sm:$0xff]   ;;  %s432_s16 = scalar_lea.vmem %s3157_s10, %s2247_s21 }
  0x27   : > { %v2424_v19 = vld [vmem:[%s3151_s4 + $0x88] ss:$16 sps:$4 sm:$0xff]   ;;  %v2432_v22 = vld [vmem:[%s3151_s4 + $0x4c] ss:$16 sps:$4 sm:$0xff]  }
  0x28   : > { %686 = vmatpush1.bf16.msra.mxu0 %v2356_v30  ;;  %v2427_v21 = vld [vmem:[%s3151_s4 + $0x68] ss:$16 sps:$4 sm:$0xff]   ;;  %v2435_v24 = vld [vmem:[%s3151_s4 + $0x2c] ss:$16 sps:$4 sm:$0xff]  }
  0x29   : > { %1167 = vmatpush1.bf16.msra.mxu1 %v2347_v28  ;;  %687 = vmatprep.subr.bf16.mxu0 %v2360_v31  ;;  %v2430_v23 = vld [vmem:[%s3151_s4 + $0x48] ss:$16 sps:$4 sm:$0xff]   ;;  %v2438_v26 = vld [vmem:[%s3151_s4 + $0xc] ss:$16 sps:$4 sm:$0xff]  }
  0x2a   : > { %1168 = vmatprep.subr.bf16.mxu1 %v2351_v29  ;;  %v2433_v25 = vld [vmem:[%s3151_s4 + $0x28] ss:$16 sps:$4 sm:$0xff]   ;;  %v2441_v28 = vld [vmem:[%s3151_s4 + $0x1ec] ss:$16 sps:$4 sm:$0xff]  }
  0x2b   : > { %v2436_v27 = vld [vmem:[%s3151_s4 + $0x8] ss:$16 sps:$4 sm:$0xff]   ;;  %v2444_v30 = vld [vmem:[%s3151_s4 + $0x1cc] ss:$16 sps:$4 sm:$0xff]  }
  0x2c   : > { %688 = vmatpush1.bf16.msra.mxu0 %v2362_v34  ;;  %v2439_v29 = vld [vmem:[%s3151_s4 + $0x1e8] ss:$16 sps:$4 sm:$0xff]   ;;  %v2450_v34 = vld [vmem:[%s3151_s4 + $0x18c] ss:$16 sps:$4 sm:$0xff]  }
  0x2d   : > { %1169 = vmatpush2.bf16.msra.mxu1 %v2353_v32  ;;  %689 = vmatprep.subr.bf16.mxu0 %v2366_v35  ;;  %v2442_v31 = vld [vmem:[%s3151_s4 + $0x1c8] ss:$16 sps:$4 sm:$0xff]   ;;  %v2447_v32 = vld [vmem:[%s3151_s4 + $0x1ac] ss:$16 sps:$4 sm:$0xff]  }
  0x2e   : > { %1170 = vmatprep.subr.bf16.mxu1 %v2357_v33  ;;  %v2445_v33 = vld [vmem:[%s3151_s4 + $0x1a8] ss:$16 sps:$4 sm:$0xff]  }
  0x2f   : > { %v2448_v35 = vld [vmem:[%s3151_s4 + $0x188] ss:$16 sps:$4 sm:$0xff]  }
  0x30   : > { %690 = vmatpush2.bf16.msra.mxu0 %v2368_v38  ;;  %v2456_v38 = vld [vmem:[%s3151_s4 + $0x14c] ss:$16 sps:$4 sm:$0xff]  }
  0x31   : > { %1171 = vmatpush2.bf16.msra.mxu1 %v2359_v36  ;;  %691 = vmatprep.subr.bf16.mxu0 %v2372_v39  ;;  %v2453_v36 = vld [vmem:[%s3151_s4 + $0x16c] ss:$16 sps:$4 sm:$0xff]   ;;  %v2454_v39 = vld [vmem:[%s3151_s4 + $0x148] ss:$16 sps:$4 sm:$0xff]  }
  0x32   : > { %1172 = vmatprep.subr.bf16.mxu1 %v2363_v37  ;;  %v2451_v37 = vld [vmem:[%s3151_s4 + $0x168] ss:$16 sps:$4 sm:$0xff]  }
  0x34   : > { %692 = vmatpush2.bf16.msra.mxu0 %v2374_v42  ;;  %v2462_v42 = vld [vmem:[%s3151_s4 + $0x10c] ss:$16 sps:$4 sm:$0xff]  }
  0x35   : > { %1173 = vmatpush2.bf16.msra.mxu1 %v2365_v40  ;;  %693 = vmatprep.subr.bf16.mxu0 %v2378_v43  ;;  %v2459_v40 = vld [vmem:[%s3151_s4 + $0x12c] ss:$16 sps:$4 sm:$0xff]   ;;  %v2460_v43 = vld [vmem:[%s3151_s4 + $0x108] ss:$16 sps:$4 sm:$0xff]  }
  0x36   : > { %1174 = vmatprep.subr.bf16.mxu1 %v2369_v41  ;;  %v2457_v41 = vld [vmem:[%s3151_s4 + $0x128] ss:$16 sps:$4 sm:$0xff]  }
  0x38   : > { %694 = vmatpush2.bf16.msra.mxu0 %v2380_v46 }
  0x39   : > { %1175 = vmatpush2.bf16.msra.mxu1 %v2371_v45  ;;  %695 = vmatprep.subr.bf16.mxu0 %v2384_v48 }
  0x3a   : > { %1176 = vmatprep.subr.bf16.mxu1 %v2375_v47  ;;  %v481_v47 = vld [vmem:[%s3150_s3] sm:$0x3] }
  0x3c   : > { %696 = vmatpush2.bf16.msra.mxu0 %v2386_v54 }
  0x3d   : > { %1177 = vmatpush2.bf16.msra.mxu1 %v2377_v51  ;;  %697 = vmatprep.subr.bf16.mxu0 %v2390_v55 }
  0x3e   : > { %1178 = vmatprep.subr.bf16.mxu1 %v2381_v53 }
  0x40   : > { %698 = vmatpush2.bf16.msra.mxu0 %v2392_v58 }
  0x41   : > { %1179 = vmatpush2.bf16.msra.mxu1 %v2383_v56  ;;  %699 = vmatprep.subr.bf16.mxu0 %v2396_v59 }
  0x42   : > { %1180 = vmatprep.subr.bf16.mxu1 %v2387_v57  ;;  %v790_v57 = vld [vmem:[%s3152_s5] sm:$0xf] }
  0x44   : > { %700 = vmatpush2.bf16.msra.mxu0 %v2401_v62 }
  0x45   : > { %1181 = vmatpush2.bf16.msra.mxu1 %v2389_v60  ;;  %701 = vmatprep.subr.bf16.mxu0 %v2402_v63 }
  0x46   : > { %1182 = vmatprep.subr.bf16.mxu1 %v2393_v61 }
  0x48   : > { %702 = vmatpush2.bf16.msra.mxu0 %v2404_v1 }
  0x49   : > { %1183 = vmatpush2.bf16.msra.mxu1 %v2395_v0  ;;  %703 = vmatprep.subr.bf16.mxu0 %v2405_v2 }
  0x4c   : > { %1185 = vmatmul.mubr.bf16.vlgmr.msra.gmra.mxu1 %v2844_v3  ;;  %704 = vmatpush2.bf16.msra.mxu0 %v2409_v5 }
  0x4d   : > { %1194 = vmatprep.mubr.bf16.mxu1 %v2847_v4  ;;  %1205 = vmatprep.subr.bf16.mxu0 %v2417_v8 }
  0x4f   : > { %706 = vmatmul.mubr.bf16.vlgmr.msra.gmra.mxu0 %v2099_v9 }
  0x50   : > { %715 = vmatprep.mubr.bf16.mxu0 %v2102_v10  ;;  %1206 = vmatpush1.bf16.msra.mxu0 %v2415_v11 }
  0x51   : > { %1207 = vmatprep.subr.bf16.mxu0 %v2420_v13 }
  0x54   : > { %1195 = vmatmul.mubr.bf16.gmra.mxu1 %v2870_v12  ;;  %1208 = vmatpush1.bf16.msra.mxu0 %v2418_v14 }
  0x55   : > { %1209 = vmatprep.subr.bf16.mxu0 %v2423_v15 }
  0x57   : > { %716 = vmatmul.mubr.bf16.gmra.mxu0 %v2101_v17 }
  0x58   : > { %1210 = vmatpush1.bf16.msra.mxu0 %v2421_v16  ;;  %1237 = vmatprep.mubr.bf16.mxu0 %v2772_v44  ;;  %v483_v44 = vlaneseq }
  0x59   : > { %1211 = vmatprep.subr.bf16.mxu0 %v2426_v18 }
  0x5a   : > { %v2969_v45 = vshrl.u32 %v483_v44, 7 }
  0x5c   : > { %1212 = vmatpush1.bf16.msra.mxu0 %v2424_v19  ;;  %v2975_v48 = vsub.s32 0, %v2969_v45  ;;  %v2983_v8 = vsub.s32 1, %v2969_v45 }
  0x5d   : > { %1213 = vmatprep.subr.bf16.mxu0 %v2429_v20 }
  0x5e   : > { %v486_v51 = vrot.slane %v481_v47, %v2975_v48  ;;  %v795_v62 = vrot.slane %v790_v57, %v2975_v48  ;;  %v799_v13 = vrot.slane %v790_v57, %v2983_v8  ;;  %v490_v17 = vrot.slane %v481_v47, %v2983_v8 }
  0x60   : > { %1214 = vmatpush1.bf16.msra.mxu0 %v2427_v21 }
  0x61   : > { %1215 = vmatprep.subr.bf16.mxu0 %v2432_v22 }
  0x64   : > { %1216 = vmatpush1.bf16.msra.mxu0 %v2430_v23 }
  0x65   : > { %1217 = vmatprep.subr.bf16.mxu0 %v2435_v24 }
  0x68   : > { %1218 = vmatpush1.bf16.msra.mxu0 %v2433_v25 }
  0x69   : > { %1219 = vmatprep.subr.bf16.mxu0 %v2438_v26 }
  0x6c   : > { %1220 = vmatpush1.bf16.msra.mxu0 %v2436_v27 }
  0x6d   : > { %1221 = vmatprep.subr.bf16.mxu0 %v2441_v28 }
  0x70   : > { %1222 = vmatpush2.bf16.msra.mxu0 %v2439_v29 }
  0x71   : > { %1223 = vmatprep.subr.bf16.mxu0 %v2444_v30 }
  0x74   : > { %1224 = vmatpush2.bf16.msra.mxu0 %v2442_v31 }
  0x75   : > { %1225 = vmatprep.subr.bf16.mxu0 %v2447_v32 }
  0x78   : > { %1226 = vmatpush2.bf16.msra.mxu0 %v2445_v33  ;;  %v806_v33 = vsub.s32 3, %v2969_v45 }
  0x79   : > { %1227 = vmatprep.subr.bf16.mxu0 %v2450_v34 }
  0x7a   : > { %v807_v34 = vrot.slane %v790_v57, %v806_v33 }
  0x7c   : > { %1228 = vmatpush2.bf16.msra.mxu0 %v2448_v35 }
  0x7d   : > { %1229 = vmatprep.subr.bf16.mxu0 %v2453_v36 }
  0x80   : > { %1230 = vmatpush2.bf16.msra.mxu0 %v2451_v37  ;;  %v802_v37 = vsub.s32 2, %v2969_v45 }
  0x81   : > { %1231 = vmatprep.subr.bf16.mxu0 %v2456_v38 }
  0x84   : > { %1232 = vmatpush2.bf16.msra.mxu0 %v2454_v39 }
  0x85   : > { %1233 = vmatprep.subr.bf16.mxu0 %v2459_v40 }
  0x88   : > { %1234 = vmatpush2.bf16.msra.mxu0 %v2457_v41  ;;  %v803_v41 = vrot.slane %v790_v57, %v802_v37 }
  0x89   : > { %1235 = vmatprep.subr.bf16.mxu0 %v2462_v42 }
  0x8c   : > { %1236 = vmatpush2.bf16.msra.mxu0 %v2460_v43 }
  0x8f   : > { %1238 = vmatmul.mubr.bf16.vlgmr.msra.gmra.mxu0 %v2844_v3 }
  0x90   : > { %1247 = vmatprep.mubr.bf16.mxu0 %v2847_v4 }
  0x97   : > { %1248 = vmatmul.mubr.bf16.gmra.mxu0 %v2870_v12 }
 0x10c   : > { %v1186_v46 = vpop.f32.mrf.mxu1 }
 0x10d   : > { %v1187_v5 = vadd.f32 %v1186_v46, %v795_v62 }
 0x10e   : > { %v1188_v50 = vpop.f32.mrf.mxu1 }
 0x10f   : > { %v707_v53 = vpop.f32.mrf.mxu0  ;;  %v1189_v25 = vadd.f32 %v1188_v50, %v799_v13 }
 0x110   : > { %v1190_v52 = vpop.f32.mrf.mxu1  ;;  %v708_v56 = vadd.f32 %v707_v53, %v486_v51 }
 0x111   : > { %v709_v55 = vpop.f32.mrf.mxu0  ;;  %v1191_v1 = vadd.f32 %v1190_v52, %v795_v62 }
 0x112   : > { %v1192_v54 = vpop.f32.mrf.mxu1  ;;  %v710_v22 = vadd.f32 %v709_v55, %v490_v17 }
 0x113   : > { %v711_v59 = vpop.f32.mrf.mxu0  ;;  %v1264_v10 = vpack.c.bf16 %v1191_v1, %v1187_v5  ;;  %v1193_v24 = vadd.f32 %v1192_v54, %v799_v13 }
 0x114   : > { %v1196_v58 = vpop.f32.mrf.mxu1  ;;  %v712_v60 = vadd.f32 %v711_v59, %v486_v51 }
 0x115   : > { %v1197_v2 = vadd.f32 %v1196_v58, %v795_v62  ;;  %v713_v4 = vpop.f32.mrf.mxu0  ;;  %v1429_v28 = vpack.c.bf16 %v1193_v24, %v1189_v25 }
 0x116   : > { %v1198_v61 = vpop.f32.mrf.mxu1  ;;  %v1262_v63 = vpack.c.bf16 %v712_v60, %v708_v56  ;;  %v714_v23 = vadd.f32 %v713_v4, %v490_v17  ;;  %v1260_v60 = vld [vmem:[%s432_s16 + $0x10] sm:$0xff] }
 0x117   : > { %v717_v12 = vpop.f32.mrf.mxu0  ;;  %v1199_v16 = vadd.f32 %v1198_v61, %v799_v13 }
 0x118   : > { %v1200_v0 = vpop.f32.mrf.mxu1  ;;  %2273 = vmatprep.mubr.bf16.mxu0 %v1262_v63  ;;  %v718_v20 = vadd.f32 %v717_v12, %v486_v51  ;;  %v1427_v27 = vpack.c.bf16 %v714_v23, %v710_v22  ;;  %v1258_v63 = vld [vmem:[%s432_s16] sm:$0xff] }
 0x119   : > { %v1201_v3 = vadd.f32 %v1200_v0, %v795_v62  ;;  %v719_v15 = vpop.f32.mrf.mxu0 }
 0x11a   : > { %v1202_v11 = vpop.f32.mrf.mxu1  ;;  %v720_v30 = vadd.f32 %v719_v15, %v490_v17 }
 0x11b   : > { %v1265_v9 = vpack.c.bf16 %v1201_v3, %v1197_v2  ;;  %v1203_v14 = vadd.f32 %v1202_v11, %v799_v13  ;;  %v721_v19 = vpop.f32.mrf.mxu0  ;;  %v1261_v3 = vld [vmem:[%s432_s16 + $0x18] sm:$0xff]  ;;  %v1259_v11 = vld [vmem:[%s432_s16 + $0x8] sm:$0xff] }
 0x11c   : > { %v722_v21 = vadd.f32 %v721_v19, %v486_v51 }
 0x11d   : > { %2269 = vmatprep.subr.bf16.mxu0 %v1265_v9  ;;  %v1430_v18 = vpack.c.bf16 %v1203_v14, %v1199_v16  ;;  %v723_v29 = vpop.f32.mrf.mxu0 }
 0x11e   : > { %2270 = vmatpush3.bf16.xpose.msra.mxu0 %v1265_v9  ;;  %v1263_v26 = vpack.c.bf16 %v722_v21, %v718_v20  ;;  %v724_v31 = vadd.f32 %v723_v29, %v490_v17 }
 0x11f   : > { %2271 = vmatprep.subr.bf16.mxu0 %v1264_v10 }
 0x120   : > { %v1428_v32 = vpack.c.bf16 %v724_v31, %v720_v30 }
 0x126   : > { %2272 = vmatpush3.bf16.xpose.msra.mxu0 %v1264_v10 }
 0x127   : > { %2285 = vmatprep.subr.bf16.mxu0 %v1430_v18 }
 0x12d   : > { %2274 = vmatmul.mubr.bf16.vlgmr.msra.gmra.mxu0 %v1263_v26 }
 0x12e   : > { %2286 = vmatpush3.bf16.xpose.msra.mxu0 %v1430_v18  ;;  %2289 = vmatprep.mubr.bf16.mxu0 %v1427_v27 }
 0x12f   : > { %2287 = vmatprep.subr.bf16.mxu0 %v1429_v28 }
 0x136   : > { %2288 = vmatpush3.bf16.xpose.msra.mxu0 %v1429_v28 }
 0x13d   : > { %2290 = vmatmul.mubr.bf16.vlgmr.msra.gmra.mxu0 %v1428_v32 }
 0x14f   : > { %v1239_v35 = vpop.f32.mrf.mxu0 }
 0x150   : > { %v1240_v47 = vadd.f32 %v1239_v35, %v803_v41 }
 0x151   : > { %v1241_v36 = vpop.f32.mrf.mxu0 }
 0x152   : > { %v1242_v38 = vadd.f32 %v1241_v36, %v807_v34 }
 0x153   : > { %v1243_v39 = vpop.f32.mrf.mxu0 }
 0x154   : > { %v1244_v50 = vadd.f32 %v1243_v39, %v803_v41 }
 0x155   : > { %v1245_v40 = vpop.f32.mrf.mxu0 }
 0x156   : > { %v1246_v42 = vadd.f32 %v1245_v40, %v807_v34  ;;  %v1266_v55 = vpack.c.bf16 %v1244_v50, %v1240_v47 }
 0x157   : > { %v1249_v43 = vpop.f32.mrf.mxu0 }
 0x158   : > { %v2989_v44 = vpack.c.bf16 %v1246_v42, %v1242_v38  ;;  %v1250_v51 = vadd.f32 %v1249_v43, %v803_v41 }
 0x159   : > { %v1251_v46 = vpop.f32.mrf.mxu0 }
 0x15a   : > { %v1252_v56 = vadd.f32 %v1251_v46, %v807_v34 }
 0x15b   : > { %v1253_v52 = vpop.f32.mrf.mxu0 }
 0x15c   : > { %v1254_v53 = vadd.f32 %v1253_v52, %v803_v41 }
 0x15d   : > { %v1255_v54 = vpop.f32.mrf.mxu0 }
 0x15e   : > { %v1267_v45 = vpack.c.bf16 %v1254_v53, %v1250_v51  ;;  %v1256_v58 = vadd.f32 %v1255_v54, %v807_v34 }
 0x160   : > { %2277 = vmatprep.subr.bf16.mxu1 %v1267_v45  ;;  %v2991_v57 = vpack.c.bf16 %v1256_v58, %v1252_v56 }
 0x161   : > { %2278 = vmatpush3.bf16.msra.mxu1 %v1267_v45 }
 0x162   : > { %2279 = vmatprep.subr.bf16.mxu1 %v1266_v55 }
 0x165   : > { %2280 = vmatpush3.bf16.msra.mxu1 %v1266_v55 }
 0x166   : > { %2293 = vmatprep.subr.bf16.mxu1 %v2991_v57 }
 0x1ed   : > { %v2275_v59 = vpop.f32.mrf.mxu0 }
 0x1ee   : > { %v1319_v61 = vmul.f32 0.088388346, %v2275_v59 }
 0x1ef   : > { %v1302_v62 = vpop.f32.mrf.mxu0 }
 0x1f0   : > { %v1317_v0 = vmul.f32 0.088388346, %v1302_v62  ;;  %v1323_v1 = vadd.f32 %v1319_v61, %v1260_v60 }
 0x1f1   : > { %v2276_v2 = vpop.f32.mrf.mxu0 }
 0x1f2   : > { %v1320_v4 = vmul.f32 0.088388346, %v2276_v2  ;;  %v1332_v5 = vsel %vm1325_vm0, %v1323_v1, -inf  ;;  %v1321_v9 = vadd.f32 %v1317_v0, %v1258_v63 }
 0x1f3   : > { %1333 = vmax.xlane.f32.xlu1 %v1332_v5  ;;  %v1305_v10 = vpop.f32.mrf.mxu0 }
 0x1f4   : > { %v1318_v12 = vmul.f32 0.088388346, %v1305_v10  ;;  %v1326_v13 = vsel %vm1325_vm0, %v1321_v9, -inf  ;;  %v1324_v14 = vadd.f32 %v1320_v4, %v1261_v3 }
 0x1f5   : > { %1327 = vmax.xlane.f32.xlu0 %v1326_v13 }
 0x1f6   : > { %v1335_v15 = vsel %vm1325_vm0, %v1324_v14, -inf  ;;  %v1322_v16 = vadd.f32 %v1318_v12, %v1259_v11 }
 0x1f7   : > { %1336 = vmax.xlane.f32.xlu1 %v1335_v15 }
 0x1f8   : > { %v1329_v17 = vsel %vm1325_vm0, %v1322_v16, -inf }
 0x1f9   : > { %1330 = vmax.xlane.f32.xlu0 %v1329_v17 }
 0x1fd   : > { %v2291_v18 = vpop.f32.mrf.mxu0 }
 0x1fe   : > { %v1484_v20 = vmul.f32 0.088388346, %v2291_v18 }
 0x1ff   : > { %v1467_v19 = vpop.f32.mrf.mxu0 }
 0x200   : > { %v1482_v21 = vmul.f32 0.088388346, %v1467_v19  ;;  %v1488_v28 = vadd.f32 %v1484_v20, %v1260_v60 }
 0x201   : > { %v2292_v22 = vpop.f32.mrf.mxu0 }
 0x202   : > { %v1486_v23 = vadd.f32 %v1482_v21, %v1258_v63  ;;  %v1485_v25 = vmul.f32 0.088388346, %v2292_v22  ;;  %v1496_v31 = vsel %vm1325_vm0, %v1488_v28, -inf }
 0x203   : > { %v1470_v24 = vpop.f32.mrf.mxu0 }
 0x204   : > { %v1483_v26 = vmul.f32 0.088388346, %v1470_v24  ;;  %v1490_v27 = vsel %vm1325_vm0, %v1486_v23, -inf  ;;  %v1489_v32 = vadd.f32 %v1485_v25, %v1261_v3 }
 0x205   : > { %1491 = vmax.xlane.f32.xlu0 %v1490_v27 }
 0x206   : > { %v1487_v29 = vadd.f32 %v1483_v26, %v1259_v11  ;;  %v1499_v33 = vsel %vm1325_vm0, %v1489_v32, -inf }
 0x208   : > { %v1493_v30 = vsel %vm1325_vm0, %v1487_v29, -inf }
 0x209   : > { %1494 = vmax.xlane.f32.xlu1 %v1493_v30  ;;  %1497 = vmax.xlane.f32.xlu0 %v1496_v31 }
 0x20d   : > { %1500 = vmax.xlane.f32.xlu1 %v1499_v33 }
 0x27c   : > { %v1334_v34 = vpop.xlane.xlu1 %1333 }
 0x27d   : > { %v1340_v35 = vsub.f32 %v1323_v1, %v1334_v34 }
 0x27e   : > { %v1328_v36 = vpop.xlane.xlu0 %1327 }
 0x27f   : > { %v1338_v37 = vsub.f32 %v1321_v9, %v1328_v36  ;;  %v1346_v39 = vmul.f32 1.442695, %v1340_v35  ;;  %v2465_v35 = vld [vmem:[%s3153_s6 + $0x74] ss:$8 sps:$4 sm:$0xff]  }
 0x280   : > { %v1337_v38 = vpop.xlane.xlu1 %1336 }
 0x281   : > { %v1342_v40 = vmul.f32 1.442695, %v1338_v37  ;;  %v1341_v41 = vsub.f32 %v1324_v14, %v1337_v38 }
 0x282   : > { %v1331_v42 = vpop.xlane.xlu0 %1330 }
 0x283   : > { %2511 = vpow2.f32 %v1342_v40  ;;  %v1339_v43 = vsub.f32 %v1322_v16, %v1331_v42  ;;  %v1348_v46 = vmul.f32 1.442695, %v1341_v41 }
 0x284   : > { %2513 = vpow2.f32 %v1346_v39 }
 0x285   : > { %v1344_v47 = vmul.f32 1.442695, %v1339_v43 }
 0x287   : > { %2515 = vpow2.f32 %v1344_v47 }
 0x288   : > { %2517 = vpow2.f32 %v1348_v46  ;;  %v2463_v46 = vld [vmem:[%s3153_s6 + $0x70] ss:$8 sps:$4 sm:$0xff]  }
 0x28e   : > { %v1492_v50 = vpop.xlane.xlu0 %1491 }
 0x28f   : > { %v1502_v51 = vsub.f32 %v1486_v23, %v1492_v50  ;;  %v2466_v50 = vld [vmem:[%s3153_s6 + $0x60] ss:$8 sps:$4 sm:$0xff]  }
 0x290   : > { %v2512_v52 = vpop.eup %2511 }
 0x291   : > { %v1506_v53 = vmul.f32 1.442695, %v1502_v51  ;;  %v1350_v54 = vsel %vm1325_vm0, %v2512_v52, 0.0  ;;  %v2514_v55 = vpop.eup %2513  ;;  %v2471_v51 = vld [vmem:[%s3153_s6 + $0x54] ss:$8 sps:$4 sm:$0xff]  }
 0x292   : > { %v1495_v56 = vpop.xlane.xlu1 %1494  ;;  %1351 = vadd.xlane.f32.xlu0 %v1350_v54  ;;  %v1498_v45 = vpop.xlane.xlu0 %1497  ;;  %v1356_v63 = vsel %vm1325_vm0, %v2514_v55, 0.0  ;;  %v2472_v54 = vld [vmem:[%s3153_s6 + $0x40] ss:$8 sps:$4 sm:$0xff]  }
 0x293   : > { %2519 = vpow2.f32 %v1506_v53  ;;  %v1503_v58 = vsub.f32 %v1487_v29, %v1495_v56  ;;  %v1504_v59 = vsub.f32 %v1488_v28, %v1498_v45  ;;  %v2474_v53 = vld [vmem:[%s3153_s6 + $0x44] ss:$8 sps:$4 sm:$0xff]   ;;  %v2475_v56 = vld [vmem:[%s3153_s6 + $0x30] ss:$8 sps:$4 sm:$0xff]  }
 0x294   : > { %v2516_v60 = vpop.eup %2515  ;;  %v2480_v45 = vld [vmem:[%s3153_s6 + $0x24] ss:$8 sps:$4 sm:$0xff]  }
 0x295   : > { %v1508_v61 = vmul.f32 1.442695, %v1503_v58  ;;  %v1510_v62 = vmul.f32 1.442695, %v1504_v59  ;;  %v1353_v0 = vsel %vm1325_vm0, %v2516_v60, 0.0  ;;  %v2518_v1 = vpop.eup %2517 }
 0x296   : > { %v1501_v2 = vpop.xlane.xlu1 %1500  ;;  %1357 = vadd.xlane.f32.xlu0 %v1356_v63  ;;  %1354 = vadd.xlane.f32.xlu1 %v1353_v0  ;;  %v1359_v5 = vsel %vm1325_vm0, %v2518_v1, 0.0  ;;  %v2478_v58 = vld [vmem:[%s3153_s6 + $0x20] ss:$8 sps:$4 sm:$0xff]   ;;  %v2483_v59 = vld [vmem:[%s3153_s6 + $0x14] ss:$8 sps:$4 sm:$0xff]  }
 0x297   : > { %2521 = vpow2.f32 %v1508_v61  ;;  %v1505_v3 = vsub.f32 %v1489_v32, %v1501_v2  ;;  %v2486_v61 = vld [vmem:[%s3153_s6 + $0x4] ss:$8 sps:$4 sm:$0xff]   ;;  %v2489_v63 = vld [vmem:[%s3153_s6 + $0xf4] ss:$8 sps:$4 sm:$0xff]   ;;  %v2487_v0 = vld [vmem:[%s3153_s6 + $0xf0] ss:$8 sps:$4 sm:$0xff]  }
 0x298   : > { %2523 = vpow2.f32 %v1510_v62  ;;  %v2484_v62 = vld [vmem:[%s3153_s6] ss:$8 sps:$4 sm:$0xff]  }
 0x299   : > { %v1512_v4 = vmul.f32 1.442695, %v1505_v3  ;;  %v2490_v2 = vld [vmem:[%s3153_s6 + $0xe0] ss:$8 sps:$4 sm:$0xff]   ;;  %v2495_v3 = vld [vmem:[%s3153_s6 + $0xd4] ss:$8 sps:$4 sm:$0xff]  }
 0x29a   : > { %1360 = vadd.xlane.f32.xlu1 %v1359_v5  ;;  %v2498_v5 = vld [vmem:[%s3153_s6 + $0xc4] ss:$8 sps:$4 sm:$0xff]  }
 0x29b   : > { %2525 = vpow2.f32 %v1512_v4  ;;  %v2493_v4 = vld [vmem:[%s3153_s6 + $0xd0] ss:$8 sps:$4 sm:$0xff]  }
 0x2a0   : > { %v2520_v9 = vpop.eup %2519 }
 0x2a1   : > { %v1514_v10 = vsel %vm1325_vm0, %v2520_v9, 0.0 }
 0x2a2   : > { %1515 = vadd.xlane.f32.xlu0 %v1514_v10  ;;  %v2501_v10 = vld [vmem:[%s3153_s6 + $0xb4] ss:$8 sps:$4 sm:$0xff]  }
 0x2a4   : > { %v2522_v11 = vpop.eup %2521 }
 0x2a5   : > { %v2524_v12 = vpop.eup %2523  ;;  %v1517_v13 = vsel %vm1325_vm0, %v2522_v11, 0.0 }
 0x2a6   : > { %1518 = vadd.xlane.f32.xlu1 %v1517_v13  ;;  %v1520_v14 = vsel %vm1325_vm0, %v2524_v12, 0.0  ;;  %v2502_v13 = vld [vmem:[%s3153_s6 + $0xa0] ss:$8 sps:$4 sm:$0xff]  }
 0x2a7   : > { %1521 = vadd.xlane.f32.xlu0 %v1520_v14  ;;  %v2507_v14 = vld [vmem:[%s3153_s6 + $0x94] ss:$8 sps:$4 sm:$0xff]  }
 0x2a8   : > { %v2526_v15 = vpop.eup %2525 }
 0x2a9   : > { %v1523_v16 = vsel %vm1325_vm0, %v2526_v15, 0.0 }
 0x2aa   : > { %1524 = vadd.xlane.f32.xlu1 %v1523_v16  ;;  %v2510_v16 = vld [vmem:[%s3153_s6 + $0x84] ss:$8 sps:$4 sm:$0xff]  }
 0x31b   : > { %v1352_v17 = vpop.xlane.xlu0 %1351 }
 0x31c   : > { %2527 = vrcp.f32 %v1352_v17  ;;  %v2508_v17 = vld [vmem:[%s3153_s6 + $0x80] ss:$8 sps:$4 sm:$0xff]  }
 0x31f   : > { %v1355_v18 = vpop.xlane.xlu1 %1354  ;;  %v1358_v19 = vpop.xlane.xlu0 %1357 }
 0x320   : > { %2529 = vrcp.f32 %v1355_v18 }
 0x321   : > { %2531 = vrcp.f32 %v1358_v19 }
 0x323   : > { %v1361_v20 = vpop.xlane.xlu1 %1360 }
 0x324   : > { %2533 = vrcp.f32 %v1361_v20 }
 0x329   : > { %v2528_v21 = vpop.eup %2527 }
 0x32a   : > { %v1366_v24 = vmul.f32 %v2528_v21, %v2512_v52  ;;  %v2469_v52 = vld [vmem:[%s3153_s6 + $0x50] ss:$8 sps:$4 sm:$0xff]  }
 0x32b   : > { %v1516_v22 = vpop.xlane.xlu0 %1515 }
 0x32c   : > { %2535 = vrcp.f32 %v1516_v22 }
 0x32d   : > { %v2530_v23 = vpop.eup %2529 }
 0x32e   : > { %v1367_v25 = vmul.f32 %v2530_v23, %v2516_v60  ;;  %v2532_v26 = vpop.eup %2531  ;;  %v2481_v60 = vld [vmem:[%s3153_s6 + $0x10] ss:$8 sps:$4 sm:$0xff]  }
 0x32f   : > { %v1519_v27 = vpop.xlane.xlu1 %1518  ;;  %v1368_v31 = vmul.f32 %v2532_v26, %v2514_v55  ;;  %v2477_v55 = vld [vmem:[%s3153_s6 + $0x34] ss:$8 sps:$4 sm:$0xff]  }
 0x330   : > { %2537 = vrcp.f32 %v1519_v27  ;;  %v1522_v28 = vpop.xlane.xlu0 %1521  ;;  %v1370_v29 = vpack.c.bf16 %v1367_v25, %v1366_v24 }
 0x331   : > { %v2534_v30 = vpop.eup %2533  ;;  %2539 = vrcp.f32 %v1522_v28 }
 0x332   : > { %v1369_v32 = vmul.f32 %v2534_v30, %v2518_v1  ;;  %2281 = vmatprep.mubr.msk.bf16.mxu1 %vm1325_vm0, %v1370_v29  ;;  %v2492_v1 = vld [vmem:[%s3153_s6 + $0xe4] ss:$8 sps:$4 sm:$0xff]   ;;  %v1627_v30 = vld [vmem:[%s3154_s7] sm:$0x3] }
 0x333   : > { %v1525_v33 = vpop.xlane.xlu1 %1524 }
 0x334   : > { %v1371_v34 = vpack.c.bf16 %v1369_v32, %v1368_v31  ;;  %2541 = vrcp.f32 %v1525_v33  ;;  %v1632_v31 = vrot.slane %v1627_v30, %v2975_v48  ;;  %v1636_v32 = vrot.slane %v1627_v30, %v2983_v8 }
 0x336   : > { %2282 = vmatmul.mubr.msk.bf16.vlgmr.msra.gmra.mxu1 %vm1325_vm0, %v1371_v34 }
 0x337   : > { %2294 = vmatpush3.bf16.msra.mxu1 %v2991_v57 }
 0x338   : > { %2295 = vmatprep.subr.bf16.mxu1 %v2989_v44 }
 0x339   : > { %v2536_v36 = vpop.eup %2535 }
 0x33a   : > { %v1530_v38 = vmul.f32 %v2536_v36, %v2520_v9  ;;  %v2496_v9 = vld [vmem:[%s3153_s6 + $0xc0] ss:$8 sps:$4 sm:$0xff]   ;;  %v1853_v36 = vunpack.c.h.bf16 %v2794_v49 }
 0x33b   : > { %2296 = vmatpush3.bf16.msra.mxu1 %v2989_v44  ;;  %v2468_v44 = vld [vmem:[%s3153_s6 + $0x64] ss:$8 sps:$4 sm:$0xff]  }
 0x33c   : > { %1799 = vmatprep.subr.bf16.mxu1 %v2465_v35  ;;  %v1852_v35 = vunpack.c.l.bf16 %v2794_v49  ;;  %v1857_v49 = vunpack.c.h.bf16 %v2853_v6 }
 0x33d   : > { %v2538_v37 = vpop.eup %2537 }
 0x33e   : > { %v1531_v39 = vmul.f32 %v2538_v37, %v2522_v11  ;;  %v2540_v40 = vpop.eup %2539  ;;  %v2499_v11 = vld [vmem:[%s3153_s6 + $0xb0] ss:$8 sps:$4 sm:$0xff]  }
 0x33f   : > { %v1532_v43 = vmul.f32 %v2540_v40, %v2524_v12  ;;  %v2504_v12 = vld [vmem:[%s3153_s6 + $0xa4] ss:$8 sps:$4 sm:$0xff]  }
 0x340   : > { %v1534_v41 = vpack.c.bf16 %v1531_v39, %v1530_v38  ;;  %v2551_v40 = vld [vmem:[%s2782_s14 + $0x8] sm:$0xff] }
 0x341   : > { %v2542_v42 = vpop.eup %2541 }
 0x342   : > { %2297 = vmatprep.mubr.msk.bf16.mxu1 %vm1325_vm0, %v1534_v41  ;;  %v1533_v57 = vmul.f32 %v2542_v42, %v2526_v15  ;;  %v2505_v15 = vld [vmem:[%s3153_s6 + $0x90] ss:$8 sps:$4 sm:$0xff]   ;;  %v1854_v41 = vunpack.c.l.bf16 %v2551_v40 }
 0x344   : > { %v1535_v47 = vpack.c.bf16 %v1533_v57, %v1532_v43 }
 0x346   : > { %2298 = vmatmul.mubr.msk.bf16.vlgmr.msra.gmra.mxu1 %vm1325_vm0, %v1535_v47 }
 0x347   : > { %1800 = vmatpush1.bf16.msra.mxu1 %v2463_v46  ;;  %v1855_v46 = vunpack.c.h.bf16 %v2551_v40 }
 0x348   : > { %1801 = vmatprep.subr.bf16.mxu1 %v2468_v44 }
 0x34b   : > { %1802 = vmatpush1.bf16.msra.mxu1 %v2466_v50 }
 0x34c   : > { %1803 = vmatprep.subr.bf16.mxu1 %v2471_v51 }
 0x34f   : > { %1804 = vmatpush1.bf16.msra.mxu1 %v2469_v52  ;;  %v1856_v52 = vunpack.c.l.bf16 %v2853_v6 }
 0x350   : > { %1805 = vmatprep.subr.bf16.mxu1 %v2474_v53 }
 0x353   : > { %1806 = vmatpush1.bf16.msra.mxu1 %v2472_v54 }
 0x354   : > { %1807 = vmatprep.subr.bf16.mxu1 %v2477_v55 }
 0x357   : > { %1808 = vmatpush1.bf16.msra.mxu1 %v2475_v56 }
 0x358   : > { %1809 = vmatprep.subr.bf16.mxu1 %v2480_v45 }
 0x35b   : > { %1810 = vmatpush1.bf16.msra.mxu1 %v2478_v58 }
 0x35c   : > { %1811 = vmatprep.subr.bf16.mxu1 %v2483_v59 }
 0x35f   : > { %1812 = vmatpush1.bf16.msra.mxu1 %v2481_v60  ;;  %v1858_v60 = vunpack.c.l.bf16 %v2856_v7 }
 0x360   : > { %1813 = vmatprep.subr.bf16.mxu1 %v2486_v61 }
 0x363   : > { %1814 = vmatpush1.bf16.msra.mxu1 %v2484_v62 }
 0x364   : > { %1815 = vmatprep.subr.bf16.mxu1 %v2489_v63 }
 0x367   : > { %1816 = vmatpush2.bf16.msra.mxu1 %v2487_v0  ;;  %v1859_v0 = vunpack.c.h.bf16 %v2856_v7 }
 0x368   : > { %1817 = vmatprep.subr.bf16.mxu1 %v2492_v1 }
 0x36b   : > { %1818 = vmatpush2.bf16.msra.mxu1 %v2490_v2 }
 0x36c   : > { %1819 = vmatprep.subr.bf16.mxu1 %v2495_v3 }
 0x36f   : > { %1820 = vmatpush2.bf16.msra.mxu1 %v2493_v4 }
 0x370   : > { %1821 = vmatprep.subr.bf16.mxu1 %v2498_v5 }
 0x373   : > { %1822 = vmatpush2.bf16.msra.mxu1 %v2496_v9 }
 0x374   : > { %1823 = vmatprep.subr.bf16.mxu1 %v2501_v10 }
 0x377   : > { %1824 = vmatpush2.bf16.msra.mxu1 %v2499_v11 }
 0x378   : > { %1825 = vmatprep.subr.bf16.mxu1 %v2504_v12 }
 0x37b   : > { %1826 = vmatpush2.bf16.msra.mxu1 %v2502_v13 }
 0x37c   : > { %1827 = vmatprep.subr.bf16.mxu1 %v2507_v14 }
 0x37f   : > { %1828 = vmatpush2.bf16.msra.mxu1 %v2505_v15 }
 0x380   : > { %1829 = vmatprep.subr.bf16.mxu1 %v2510_v16 }
 0x383   : > { %1830 = vmatpush2.bf16.msra.mxu1 %v2508_v17 }
 0x3f6   : > { %v2283_v18 = vpop.f32.mrf.mxu1 }
 0x3f8   : > { %v1412_v19 = vpop.f32.mrf.mxu1 }
 0x3fa   : > { %v2284_v20 = vpop.f32.mrf.mxu1 }
 0x3fb   : > { %v1593_v29 = vpack.c.bf16 %v2284_v20, %v2283_v18 }
 0x3fc   : > { %v1415_v21 = vpop.f32.mrf.mxu1 }
 0x3fd   : > { %v1591_v27 = vpack.c.bf16 %v1415_v21, %v1412_v19 }
 0x406   : > { %v2299_v22 = vpop.f32.mrf.mxu1 }
 0x408   : > { %v1576_v23 = vpop.f32.mrf.mxu1 }
 0x40a   : > { %v2300_v24 = vpop.f32.mrf.mxu1 }
 0x40b   : > { %v1594_v28 = vpack.c.bf16 %v2300_v24, %v2299_v22 }
 0x40c   : > { %v1579_v25 = vpop.f32.mrf.mxu1 }
 0x40d   : > { %v1592_v26 = vpack.c.bf16 %v1579_v25, %v1576_v23 }
 0x40f   : > { %1831 = vmatprep.mubr.bf16.mxu1 %v1592_v26 }
 0x410   : > { %1832 = vmatmul.mubr.bf16.vlgmr.msra.gmra.mxu1 %v1591_v27 }
 0x411   : > { %1841 = vmatprep.mubr.bf16.mxu1 %v1594_v28 }
 0x418   : > { %1842 = vmatmul.mubr.bf16.gmra.mxu1 %v1593_v29 }
 0x4d0   : > { %v1833_v33 = vpop.f32.mrf.mxu1 }
 0x4d1   : > { %v1834_v34 = vadd.f32 %v1833_v33, %v1632_v31 }
 0x4d2   : > { %v1835_v37 = vpop.f32.mrf.mxu1 }
 0x4d3   : > { %v1836_v38 = vadd.f32 %v1835_v37, %v1636_v32  ;;  %v1860_v42 = vadd.f32 %v1852_v35, %v1834_v34 }
 0x4d4   : > { %v1837_v39 = vpop.f32.mrf.mxu1 }
 0x4d5   : > { %v1861_v43 = vadd.f32 %v1853_v36, %v1836_v38  ;;  %v1838_v57 = vadd.f32 %v1837_v39, %v1632_v31 }
 0x4d6   : > { %v1839_v47 = vpop.f32.mrf.mxu1 }
 0x4d7   : > { %v1840_v44 = vadd.f32 %v1839_v47, %v1636_v32  ;;  %v1870_v50 = vadd.f32 %v1861_v43, %v1860_v42  ;;  %v1862_v53 = vadd.f32 %v1854_v41, %v1838_v57 }
 0x4d8   : > { %v1843_v51 = vpop.f32.mrf.mxu1 }
 0x4d9   : > { %v1863_v54 = vadd.f32 %v1855_v46, %v1840_v44  ;;  %v1844_v55 = vadd.f32 %v1843_v51, %v1632_v31  ;;  %1871 = vadd.xlane.f32.xlu0 %v1870_v50  ;;  %v1868_v44 = vld [vmem:[%s3155_s8] sm:$0x3] }
 0x4da   : > { %v1845_v56 = vpop.f32.mrf.mxu1  ;;  %v1869_v51 = vld [vmem:[%s3156_s9] sm:$0x3] }
 0x4db   : > { %v1846_v45 = vadd.f32 %v1845_v56, %v1636_v32  ;;  %v1873_v58 = vadd.f32 %v1863_v54, %v1862_v53  ;;  %v1864_v61 = vadd.f32 %v1856_v52, %v1844_v55  ;;  %v1939_v52 = vrot.slane %v1868_v44, %v2975_v48 }
 0x4dc   : > { %v1847_v59 = vpop.f32.mrf.mxu1  ;;  %v1958_v55 = vrot.slane %v1869_v51, %v2975_v48 }
 0x4dd   : > { %v1865_v62 = vadd.f32 %v1857_v49, %v1846_v45  ;;  %v1848_v63 = vadd.f32 %v1847_v59, %v1632_v31  ;;  %1874 = vadd.xlane.f32.xlu1 %v1873_v58  ;;  %v1962_v49 = vrot.slane %v1869_v51, %v2983_v8 }
 0x4de   : > { %v1849_v1 = vpop.f32.mrf.mxu1 }
 0x4df   : > { %v1850_v2 = vadd.f32 %v1849_v1, %v1636_v32  ;;  %v1876_v3 = vadd.f32 %v1865_v62, %v1864_v61  ;;  %v1866_v4 = vadd.f32 %v1858_v60, %v1848_v63 }
 0x4e1   : > { %v1867_v5 = vadd.f32 %v1859_v0, %v1850_v2  ;;  %1877 = vadd.xlane.f32.xlu0 %v1876_v3 }
 0x4e3   : > { %v1879_v9 = vadd.f32 %v1867_v5, %v1866_v4 }
 0x4e5   : > { %1880 = vadd.xlane.f32.xlu1 %v1879_v9 }
 0x562   : > { %v1872_v6 = vpop.xlane.xlu0 %1871 }
 0x563   : > { %v1883_v10 = vmul.f32 0.00390625, %v1872_v6 }
 0x565   : > { %v1887_v11 = vsub.f32 %v1860_v42, %v1883_v10  ;;  %v1888_v12 = vsub.f32 %v1861_v43, %v1883_v10 }
 0x566   : > { %v1875_v13 = vpop.xlane.xlu1 %1874 }
 0x567   : > { %v1884_v14 = vmul.f32 0.00390625, %v1875_v13  ;;  %v1895_v15 = vmul.f32 %v1887_v11, %v1887_v11  ;;  %v1896_v16 = vmul.f32 %v1888_v12, %v1888_v12 }
 0x569   : > { %v1889_v17 = vsub.f32 %v1862_v53, %v1884_v14  ;;  %v1890_v18 = vsub.f32 %v1863_v54, %v1884_v14  ;;  %v1903_v19 = vadd.f32 %v1896_v16, %v1895_v15  ;;  %v1943_v53 = vrot.slane %v1868_v44, %v2983_v8 }
 0x56a   : > { %v1878_v7 = vpop.xlane.xlu0 %1877 }
 0x56b   : > { %v1885_v20 = vmul.f32 0.00390625, %v1878_v7  ;;  %1904 = vadd.xlane.f32.xlu0 %v1903_v19  ;;  %v1897_v21 = vmul.f32 %v1889_v17, %v1889_v17  ;;  %v1898_v22 = vmul.f32 %v1890_v18, %v1890_v18 }
 0x56d   : > { %v1891_v23 = vsub.f32 %v1864_v61, %v1885_v20  ;;  %v1892_v24 = vsub.f32 %v1865_v62, %v1885_v20  ;;  %v1906_v25 = vadd.f32 %v1898_v22, %v1897_v21 }
 0x56e   : > { %v1881_v26 = vpop.xlane.xlu1 %1880 }
 0x56f   : > { %v1886_v27 = vmul.f32 0.00390625, %v1881_v26  ;;  %1907 = vadd.xlane.f32.xlu1 %v1906_v25  ;;  %v1899_v28 = vmul.f32 %v1891_v23, %v1891_v23  ;;  %v1900_v29 = vmul.f32 %v1892_v24, %v1892_v24 }
 0x571   : > { %v1893_v30 = vsub.f32 %v1866_v4, %v1886_v27  ;;  %v1894_v31 = vsub.f32 %v1867_v5, %v1886_v27  ;;  %v1909_v32 = vadd.f32 %v1900_v29, %v1899_v28 }
 0x573   : > { %1910 = vadd.xlane.f32.xlu0 %v1909_v32  ;;  %v1901_v33 = vmul.f32 %v1893_v30, %v1893_v30  ;;  %v1902_v34 = vmul.f32 %v1894_v31, %v1894_v31 }
 0x575   : > { %v1912_v35 = vadd.f32 %v1902_v34, %v1901_v33 }
 0x577   : > { %1913 = vadd.xlane.f32.xlu1 %v1912_v35 }
 0x5f4   : > { %v1905_v36 = vpop.xlane.xlu0 %1904 }
 0x5f5   : > { %v1915_v37 = vmul.f32 0.00390625, %v1905_v36 }
 0x5f7   : > { %v1919_v38 = vadd.f32 1e-05, %v1915_v37 }
 0x5f8   : > { %v1908_v39 = vpop.xlane.xlu1 %1907 }
 0x5f9   : > { %2543 = vrsqrt.f32 %v1919_v38  ;;  %v1916_v40 = vmul.f32 0.00390625, %v1908_v39 }
 0x5fb   : > { %v1920_v41 = vadd.f32 1e-05, %v1916_v40 }
 0x5fc   : > { %v1911_v42 = vpop.xlane.xlu0 %1910 }
 0x5fd   : > { %2545 = vrsqrt.f32 %v1920_v41  ;;  %v1917_v43 = vmul.f32 0.00390625, %v1911_v42 }
 0x5ff   : > { %v1921_v57 = vadd.f32 1e-05, %v1917_v43 }
 0x600   : > { %v1914_v46 = vpop.xlane.xlu1 %1913 }
 0x601   : > { %2547 = vrsqrt.f32 %v1921_v57  ;;  %v1918_v47 = vmul.f32 0.00390625, %v1914_v46 }
 0x603   : > { %v1922_v50 = vadd.f32 1e-05, %v1918_v47 }
 0x605   : > { %2549 = vrsqrt.f32 %v1922_v50 }
 0x606   : > { %v2544_v54 = vpop.eup %2543 }
 0x607   : > { %v1927_v56 = vmul.f32 %v2544_v54, %v1887_v11  ;;  %v1928_v45 = vmul.f32 %v2544_v54, %v1888_v12 }
 0x609   : > { %v1946_v58 = vmul.f32 %v1939_v52, %v1927_v56  ;;  %v1947_v59 = vmul.f32 %v1943_v53, %v1928_v45 }
 0x60a   : > { %v2546_v60 = vpop.eup %2545 }
 0x60b   : > { %v1965_v61 = vadd.f32 %v1958_v55, %v1946_v58  ;;  %v1966_v62 = vadd.f32 %v1962_v49, %v1947_v59  ;;  %v1929_v63 = vmul.f32 %v2546_v60, %v1889_v17  ;;  %v1930_v0 = vmul.f32 %v2546_v60, %v1890_v18 }
 0x60d   : > { %v2249_v1 = vpack.c.bf16 %v1966_v62, %v1965_v61  ;;  %v1948_v2 = vmul.f32 %v1939_v52, %v1929_v63  ;;  %v1949_v3 = vmul.f32 %v1943_v53, %v1930_v0 }
 0x60e   : > { %v2548_v4 = vpop.eup %2547 }
 0x60f   : > { %1997 = vst [vmem:[%s438_s13] sm:$0xff] %v2249_v1  ;;  %v1967_v48 = vadd.f32 %v1958_v55, %v1948_v2  ;;  %v1968_v8 = vadd.f32 %v1962_v49, %v1949_v3  ;;  %v1931_v5 = vmul.f32 %v2548_v4, %v1891_v23  ;;  %v1932_v9 = vmul.f32 %v2548_v4, %v1892_v24 }
 0x611   : > { %v2250_v6 = vpack.c.bf16 %v1968_v8, %v1967_v48  ;;  %v1950_v10 = vmul.f32 %v1939_v52, %v1931_v5  ;;  %v1951_v11 = vmul.f32 %v1943_v53, %v1932_v9 }
 0x612   : > { %v2550_v12 = vpop.eup %2549 }
 0x613   : > { %1998 = vst [vmem:[%s438_s13 + $0x8] sm:$0xff] %v2250_v6  ;;  %v1969_v13 = vadd.f32 %v1958_v55, %v1950_v10  ;;  %v1970_v14 = vadd.f32 %v1962_v49, %v1951_v11  ;;  %v1933_v15 = vmul.f32 %v2550_v12, %v1893_v30  ;;  %v1934_v16 = vmul.f32 %v2550_v12, %v1894_v31 }
 0x615   : > { %v2251_v17 = vpack.c.bf16 %v1970_v14, %v1969_v13  ;;  %v1952_v18 = vmul.f32 %v1939_v52, %v1933_v15  ;;  %v1953_v19 = vmul.f32 %v1943_v53, %v1934_v16 }
 0x617   : > { %1999 = vst [vmem:[%s438_s13 + $0x10] sm:$0xff] %v2251_v17  ;;  %v1971_v7 = vadd.f32 %v1958_v55, %v1952_v18  ;;  %v1972_v20 = vadd.f32 %v1962_v49, %v1953_v19 }
 0x619   : > { %v2252_v21 = vpack.c.bf16 %v1972_v20, %v1971_v7 }
 0x61b   : > { %2000 = vst [vmem:[%s438_s13 + $0x18] sm:$0xff] %v2252_v21 }
 0x61c PF: > { %s21_s17 = sadd.s32 1, %s2558_s17  }
 0x61d   : > { %p18_p5 = scmp.ge.s32.totalorder %s21_s17, 6  }
 0x61f   :  { %20 = sbr.rel (!%p18_p5) target bundleno = 1 (0x1), region = 100 }

// kernel: seq2seq_forward.23
= control target key start
LH: loop header
LB: loop body
LE: loop exit
PB: predicated region body
PF: predicated region fallthrough
CT: control target
= control target key end

     0   :  { %s1655_s18 = smov 0   ;;  %s1657_s19 = smov 0   ;;  %s2461_s0 = inlined_call_operand.vmem [shape: bf16[128,256], index: 0, kind: input, shape index: {}]   ;;  %s2462_s1 = inlined_call_operand.vmem [shape: f32[1,256], index: 1, kind: input, shape index: {}]   ;;  %s2463_s2 = inlined_call_operand.vmem [shape: f32[1,256], index: 2, kind: input, shape index: {}]   ;;  %s2464_s3 = inlined_call_operand.vmem [shape: bf16[256,512], index: 3, kind: input, shape index: {}]   ;;  %s2465_s4 = inlined_call_operand.vmem [shape: f32[1,512], index: 4, kind: input, shape index: {}]   ;;  %s2466_s5 = inlined_call_operand.vmem [shape: f32[128,512], index: 5, kind: output, shape index: {}]  }
   0x1   :  { %s1659_s20 = smov 0   ;;  %s1661_s21 = smov 0  }
   0x2   :  { %s1663_s22 = smov 0  }
   0x3 LB: > { %s24_s23 = sadd.s32 1, %s1619_s21  ;;  %s1382_s24 = sadd.s32 4294967295, %s1623_s22   ;;  %s1623_s22 = sphi %s1663_s22, %s15_s22   ;;  %s1619_s21 = sphi %s1661_s21, %s2471_s21   ;;  %s1615_s20 = sphi %s1659_s20, %s2470_s20   ;;  %s1611_s19 = sphi %s1657_s19, %s2469_s19   ;;  %s1607_s18 = sphi %s1655_s18, %s2468_s18  }
   0x4   : > { %p25_p0 = scmp.ge.s32.totalorder %s24_s23, 2  ;;  %p109_p1 = scmp.ne.s32.totalorder %s1611_s19, %s1607_s18 }
   0x5   : > { %p110_p2 = scmp.eq.s32.totalorder %s1623_s22, 0  ;;  %p167_p4 = scmp.eq.s32.totalorder %s1382_s24, 1 }
   0x6   : > { %s2473_s23 = smov (%p25_p0, %s24_s23), 0  ;;  %s102_s26 = sadd.s32 1, %s1611_s19 }
   0x7   : > { %p111_p3 = por %p110_p2, %p109_p1  ;;  %s99_s25 = ssub.s32 %s1619_s21, %s2473_s23 }
   0x8   : > { %p100_p5 = scmp.eq.s32.totalorder %s99_s25, 0  ;;  %p1690_p6 = por %p167_p4, %p109_p1 }
   0x9   : > { %p1386_p7 = scmp.ge.s32.totalorder %s1623_s22, 2 }
   0xa   : > { %s1695_s28 = scalar_select %p100_p5, %s1611_s19, %s102_s26  }
   0xb   : > { %205 = sbr.rel (%p1386_p7) target bundleno = 36 (0x24), region = 28 }
  0x10   : > { %208 = sbr.rel (!%p111_p3) target bundleno = 36 (0x24), region = 32  ;;  %s210_s29 = sand.u32 (%p111_p3), 1, %s1611_s19  }
  0x11   : > { %s1431_s30 = sshll.u32 (%p111_p3), %s1619_s21, 3  ;;  %s1387_s6 = sshll.u32 (%p111_p3), %s210_s29, 8 }
  0x12   : > { %s1703_s9 = scalar_lea.vmem (%p111_p3), %s2464_s3, %s1431_s30  ;;  %s1708_s10 = scalar_lea.vmem (%p111_p3), [#allocation2], %s1387_s6 }
  0x13   : > { %v306_v0 = vld [vmem:[%s1703_s9] sm:$0xff] (%p111_p3)  ;;  %v308_v1 = vld [vmem:[%s1703_s9 + $0x10] sm:$0xff] (%p111_p3) }
  0x14   : > { %v310_v2 = vld [vmem:[%s1703_s9 + $0x20] sm:$0xff] (%p111_p3)  ;;  %307 = vst [vmem:[%s1708_s10] sm:$0xff] (%p111_p3), %v306_v0  ;;  %309 = vst [vmem:[%s1708_s10 + $0x8] sm:$0xff] (%p111_p3), %v308_v1  ;;  %v312_v3 = vld [vmem:[%s1703_s9 + $0x30] sm:$0xff] (%p111_p3) }
  0x15   : > { %311 = vst [vmem:[%s1708_s10 + $0x10] sm:$0xff] %v310_v2  ;;  %v314_v4 = vld [vmem:[%s1703_s9 + $0x40] sm:$0xff]  ;;  %v316_v5 = vld [vmem:[%s1703_s9 + $0x50] sm:$0xff]  ;;  %313 = vst [vmem:[%s1708_s10 + $0x18] sm:$0xff] %v312_v3 }
  0x16   : > { %315 = vst [vmem:[%s1708_s10 + $0x20] sm:$0xff] %v314_v4  ;;  %317 = vst [vmem:[%s1708_s10 + $0x28] sm:$0xff] %v316_v5  ;;  %v318_v6 = vld [vmem:[%s1703_s9 + $0x60] sm:$0xff]  ;;  %v320_v7 = vld [vmem:[%s1703_s9 + $0x70] sm:$0xff] }
  0x17   : > { %v322_v8 = vld [vmem:[%s1703_s9 + $0x80] sm:$0xff]  ;;  %319 = vst [vmem:[%s1708_s10 + $0x30] sm:$0xff] %v318_v6  ;;  %321 = vst [vmem:[%s1708_s10 + $0x38] sm:$0xff] %v320_v7  ;;  %v324_v9 = vld [vmem:[%s1703_s9 + $0x90] sm:$0xff] }
  0x18   : > { %323 = vst [vmem:[%s1708_s10 + $0x40] sm:$0xff] %v322_v8  ;;  %v326_v10 = vld [vmem:[%s1703_s9 + $0xa0] sm:$0xff]  ;;  %v328_v11 = vld [vmem:[%s1703_s9 + $0xb0] sm:$0xff]  ;;  %325 = vst [vmem:[%s1708_s10 + $0x48] sm:$0xff] %v324_v9 }
  0x19   : > { %327 = vst [vmem:[%s1708_s10 + $0x50] sm:$0xff] %v326_v10  ;;  %329 = vst [vmem:[%s1708_s10 + $0x58] sm:$0xff] %v328_v11  ;;  %v330_v12 = vld [vmem:[%s1703_s9 + $0xc0] sm:$0xff]  ;;  %v332_v13 = vld [vmem:[%s1703_s9 + $0xd0] sm:$0xff] }
  0x1a   : > { %v334_v14 = vld [vmem:[%s1703_s9 + $0xe0] sm:$0xff]  ;;  %331 = vst [vmem:[%s1708_s10 + $0x60] sm:$0xff] %v330_v12  ;;  %333 = vst [vmem:[%s1708_s10 + $0x68] sm:$0xff] %v332_v13  ;;  %v336_v15 = vld [vmem:[%s1703_s9 + $0xf0] sm:$0xff] }
  0x1b   : > { %335 = vst [vmem:[%s1708_s10 + $0x70] sm:$0xff] %v334_v14  ;;  %v338_v16 = vld [vmem:[%s1703_s9 + $0x100] sm:$0xff]  ;;  %v340_v17 = vld [vmem:[%s1703_s9 + $0x110] sm:$0xff]  ;;  %337 = vst [vmem:[%s1708_s10 + $0x78] sm:$0xff] %v336_v15 }
  0x1c   : > { %339 = vst [vmem:[%s1708_s10 + $0x80] sm:$0xff] %v338_v16  ;;  %341 = vst [vmem:[%s1708_s10 + $0x88] sm:$0xff] %v340_v17  ;;  %v342_v18 = vld [vmem:[%s1703_s9 + $0x120] sm:$0xff]  ;;  %v344_v19 = vld [vmem:[%s1703_s9 + $0x130] sm:$0xff] }
  0x1d   : > { %v346_v20 = vld [vmem:[%s1703_s9 + $0x140] sm:$0xff]  ;;  %343 = vst [vmem:[%s1708_s10 + $0x90] sm:$0xff] %v342_v18  ;;  %345 = vst [vmem:[%s1708_s10 + $0x98] sm:$0xff] %v344_v19  ;;  %v348_v21 = vld [vmem:[%s1703_s9 + $0x150] sm:$0xff] }
  0x1e   : > { %347 = vst [vmem:[%s1708_s10 + $0xa0] sm:$0xff] %v346_v20  ;;  %v350_v22 = vld [vmem:[%s1703_s9 + $0x160] sm:$0xff]  ;;  %v352_v23 = vld [vmem:[%s1703_s9 + $0x170] sm:$0xff]  ;;  %349 = vst [vmem:[%s1708_s10 + $0xa8] sm:$0xff] %v348_v21 }
  0x1f   : > { %351 = vst [vmem:[%s1708_s10 + $0xb0] sm:$0xff] %v350_v22  ;;  %353 = vst [vmem:[%s1708_s10 + $0xb8] sm:$0xff] %v352_v23  ;;  %v354_v24 = vld [vmem:[%s1703_s9 + $0x180] sm:$0xff]  ;;  %v356_v25 = vld [vmem:[%s1703_s9 + $0x190] sm:$0xff] }
  0x20   : > { %v358_v26 = vld [vmem:[%s1703_s9 + $0x1a0] sm:$0xff]  ;;  %355 = vst [vmem:[%s1708_s10 + $0xc0] sm:$0xff] %v354_v24  ;;  %357 = vst [vmem:[%s1708_s10 + $0xc8] sm:$0xff] %v356_v25  ;;  %v360_v27 = vld [vmem:[%s1703_s9 + $0x1b0] sm:$0xff] }
  0x21   : > { %359 = vst [vmem:[%s1708_s10 + $0xd0] sm:$0xff] %v358_v26  ;;  %v362_v28 = vld [vmem:[%s1703_s9 + $0x1c0] sm:$0xff]  ;;  %v364_v29 = vld [vmem:[%s1703_s9 + $0x1d0] sm:$0xff]  ;;  %361 = vst [vmem:[%s1708_s10 + $0xd8] sm:$0xff] %v360_v27 }
  0x22   : > { %363 = vst [vmem:[%s1708_s10 + $0xe0] sm:$0xff] %v362_v28  ;;  %365 = vst [vmem:[%s1708_s10 + $0xe8] sm:$0xff] %v364_v29  ;;  %v366_v30 = vld [vmem:[%s1703_s9 + $0x1e0] sm:$0xff]  ;;  %v368_v31 = vld [vmem:[%s1703_s9 + $0x1f0] sm:$0xff] }
  0x23   : > { %367 = vst [vmem:[%s1708_s10 + $0xf0] sm:$0xff] %v366_v30  ;;  %369 = vst [vmem:[%s1708_s10 + $0xf8] sm:$0xff] %v368_v31 }
  0x24 PF: > { %p1390_p8 = scmp.ge.s32.totalorder %s1623_s22, 1  ;;  %p382_p9 = scmp.lt.s32.totalorder %s1623_s22, 3 }
  0x26   : > { %p383_p10 = pnand %p1390_p8, %p382_p9 }
  0x27   : > { %s389_s9 = sand.u32 (!%p383_p10), 1, %s1607_s18   ;;  %s1393_s15 = sshll.u32 (!%p383_p10), %s1615_s20, 1 }
  0x28   : > { %386 = sbr.rel (%p383_p10) target bundleno = 604 (0x25c), region = 74  ;;  %s1950_s10 = sshll.u32 (!%p383_p10), %s389_s9, 8 }
  0x29   : > { %s1953_s11 = scalar_lea.vmem (!%p383_p10), [#allocation2], %s1950_s10  ;;  %p434_p11 = scmp.lt.s32.totalorder (!%p383_p10), %s1393_s15, 3 }
  0x2a   : > { %s2309_s25 = scalar_lea.vmem (!%p383_p10), [#allocation3], %s1950_s10 }
  0x2d   : > { %v1776_v32 = vld [vmem:[%s2461_s0] sm:$0xff]  ;;  %v1786_v34 = vld [vmem:[%s2461_s0 + $0x8] sm:$0xff]  ;;  %v1800_v40 = vld [vmem:[%s2461_s0 + $0x10] sm:$0xff]  ;;  %s2475_s15 = smov (!%p434_p11, %s1393_s15), 3  ;;  %s1432_s26 = sshll.u32 (%p1690_p6), %s1615_s20, 4 }
  0x2e   : > { %v1781_v33 = vld [vmem:[%s2461_s0 + $0x40] sm:$0xff]  ;;  %v456_v35 = vunpack.c.l.bf16 %v1776_v32  ;;  %v457_v36 = vunpack.c.h.bf16 %v1776_v32  ;;  %v1795_v39 = vld [vmem:[%s2461_s0 + $0x48] sm:$0xff]  ;;  %v458_v41 = vunpack.c.l.bf16 %v1786_v34  ;;  %v459_v42 = vunpack.c.h.bf16 %v1786_v34  ;;  %v1809_v45 = vld [vmem:[%s2461_s0 + $0x18] sm:$0xff]  ;;  %s436_s24 = scalar_lea.vmem %s2465_s4, %s2475_s15  ;;  %s2383_s6 = scalar_lea.vmem (%p1690_p6), %s2466_s5, %s1432_s26 }
  0x2f   : > { %v472_v37 = vunpack.c.l.bf16 %v1781_v33  ;;  %v473_v38 = vunpack.c.h.bf16 %v1781_v33  ;;  %v474_v43 = vunpack.c.l.bf16 %v1795_v39  ;;  %v475_v44 = vunpack.c.h.bf16 %v1795_v39  ;;  %v1834_v54 = vld [vmem:[%s2461_s0 + $0x50] sm:$0xff]  ;;  %v1839_v55 = vld [vmem:[%s2461_s0 + $0x58] sm:$0xff]  ;;  %v1856_v62 = vld [vmem:[%s2461_s0 + $0x20] sm:$0xff] }
  0x30   : > { %v490_v46 = vadd.f32 %v457_v36, %v456_v35  ;;  %v460_v48 = vunpack.c.l.bf16 %v1800_v40  ;;  %v461_v49 = vunpack.c.h.bf16 %v1800_v40  ;;  %v493_v50 = vadd.f32 %v459_v42, %v458_v41  ;;  %v1861_v63 = vld [vmem:[%s2461_s0 + $0x28] sm:$0xff]  ;;  %v1878_v6 = vld [vmem:[%s2461_s0 + $0x60] sm:$0xff]  ;;  %v1900_v14 = vld [vmem:[%s2461_s0 + $0x30] sm:$0xff] }
  0x31   : > { %v514_v47 = vadd.f32 %v473_v38, %v472_v37  ;;  %v517_v51 = vadd.f32 %v475_v44, %v474_v43  ;;  %v462_v52 = vunpack.c.l.bf16 %v1809_v45  ;;  %v463_v53 = vunpack.c.h.bf16 %v1809_v45  ;;  %v1883_v7 = vld [vmem:[%s2461_s0 + $0x68] sm:$0xff]  ;;  %v1905_v15 = vld [vmem:[%s2461_s0 + $0x38] sm:$0xff]  ;;  %v1922_v22 = vld [vmem:[%s2461_s0 + $0x70] sm:$0xff] }
  0x32   : > { %491 = vadd.xlane.f32.xlu0 %v490_v46  ;;  %v496_v56 = vadd.f32 %v461_v49, %v460_v48  ;;  %v476_v57 = vunpack.c.l.bf16 %v1834_v54  ;;  %v477_v59 = vunpack.c.h.bf16 %v1834_v54  ;;  %v478_v60 = vunpack.c.l.bf16 %v1839_v55  ;;  %v1927_v23 = vld [vmem:[%s2461_s0 + $0x78] sm:$0xff] }
  0x33   : > { %515 = vadd.xlane.f32.xlu1 %v514_v47  ;;  %v499_v58 = vadd.f32 %v463_v53, %v462_v52  ;;  %v479_v61 = vunpack.c.h.bf16 %v1839_v55  ;;  %v464_v0 = vunpack.c.l.bf16 %v1856_v62  ;;  %v465_v1 = vunpack.c.h.bf16 %v1856_v62  ;;  %v1505_v46 = vld [vmem:[%s1953_s11 + $0x74] ss:$8 sps:$4 sm:$0xff]   ;;  %v1507_v47 = vld [vmem:[%s1953_s11 + $0x70] ss:$8 sps:$4 sm:$0xff]  }
  0x34   : > { %v520_v2 = vadd.f32 %v477_v59, %v476_v57  ;;  %v466_v4 = vunpack.c.l.bf16 %v1861_v63  ;;  %v467_v5 = vunpack.c.h.bf16 %v1861_v63  ;;  %v480_v9 = vunpack.c.l.bf16 %v1878_v6  ;;  %1053 = vmatprep.subr.bf16.mxu0 %v1505_v46  ;;  %1433 = vmatprep.subr.bf16.mxu1 %v1505_v46 }
  0x35   : > { %v523_v3 = vadd.f32 %v479_v61, %v478_v60  ;;  %v502_v8 = vadd.f32 %v465_v1, %v464_v0  ;;  %v481_v11 = vunpack.c.h.bf16 %v1878_v6  ;;  %v482_v12 = vunpack.c.l.bf16 %v1883_v7  ;;  %1054 = vmatpush1.bf16.msra.mxu0 %v1507_v47  ;;  %1449 = vmatpush1.bf16.msra.mxu1 %v1507_v47 }
  0x36   : > { %494 = vadd.xlane.f32.xlu0 %v493_v50  ;;  %v505_v10 = vadd.f32 %v467_v5, %v466_v4  ;;  %v483_v13 = vunpack.c.h.bf16 %v1883_v7  ;;  %v468_v16 = vunpack.c.l.bf16 %v1900_v14  ;;  %v469_v17 = vunpack.c.h.bf16 %v1900_v14  ;;  %v1508_v50 = vld [vmem:[%s1953_s11 + $0x64] ss:$8 sps:$4 sm:$0xff]  }
  0x37   : > { %518 = vadd.xlane.f32.xlu1 %v517_v51  ;;  %v526_v18 = vadd.f32 %v481_v11, %v480_v9  ;;  %v470_v20 = vunpack.c.l.bf16 %v1905_v15  ;;  %v471_v21 = vunpack.c.h.bf16 %v1905_v15  ;;  %v484_v25 = vunpack.c.l.bf16 %v1922_v22  ;;  %v1510_v51 = vld [vmem:[%s1953_s11 + $0x60] ss:$8 sps:$4 sm:$0xff]   ;;  %1055 = vmatprep.subr.bf16.mxu0 %v1508_v50 }
  0x38   : > { %v529_v19 = vadd.f32 %v483_v13, %v482_v12  ;;  %v508_v24 = vadd.f32 %v469_v17, %v468_v16  ;;  %v485_v27 = vunpack.c.h.bf16 %v1922_v22  ;;  %v486_v28 = vunpack.c.l.bf16 %v1927_v23  ;;  %1434 = vmatprep.subr.bf16.mxu1 %v1508_v50 }
  0x39   : > { %v511_v26 = vadd.f32 %v471_v21, %v470_v20  ;;  %v487_v29 = vunpack.c.h.bf16 %v1927_v23  ;;  %1056 = vmatpush1.bf16.msra.mxu0 %v1510_v51  ;;  %1450 = vmatpush1.bf16.msra.mxu1 %v1510_v51 }
  0x3a   : > { %497 = vadd.xlane.f32.xlu0 %v496_v56  ;;  %v532_v30 = vadd.f32 %v485_v27, %v484_v25  ;;  %v1511_v56 = vld [vmem:[%s1953_s11 + $0x54] ss:$8 sps:$4 sm:$0xff]  }
  0x3b   : > { %500 = vadd.xlane.f32.xlu1 %v499_v58  ;;  %v535_v31 = vadd.f32 %v487_v29, %v486_v28  ;;  %v1513_v58 = vld [vmem:[%s1953_s11 + $0x50] ss:$8 sps:$4 sm:$0xff]   ;;  %1057 = vmatprep.subr.bf16.mxu0 %v1511_v56 }
  0x3c   : > { %1435 = vmatprep.subr.bf16.mxu1 %v1511_v56 }
  0x3d   : > { %1058 = vmatpush1.bf16.msra.mxu0 %v1513_v58  ;;  %1451 = vmatpush1.bf16.msra.mxu1 %v1513_v58 }
  0x3e   : > { %521 = vadd.xlane.f32.xlu0 %v520_v2  ;;  %v1514_v2 = vld [vmem:[%s1953_s11 + $0x44] ss:$8 sps:$4 sm:$0xff]  }
  0x3f   : > { %524 = vadd.xlane.f32.xlu1 %v523_v3  ;;  %v1516_v3 = vld [vmem:[%s1953_s11 + $0x40] ss:$8 sps:$4 sm:$0xff]   ;;  %1059 = vmatprep.subr.bf16.mxu0 %v1514_v2 }
  0x40   : > { %1436 = vmatprep.subr.bf16.mxu1 %v1514_v2 }
  0x41   : > { %1060 = vmatpush1.bf16.msra.mxu0 %v1516_v3  ;;  %1452 = vmatpush1.bf16.msra.mxu1 %v1516_v3 }
  0x42   : > { %503 = vadd.xlane.f32.xlu0 %v502_v8  ;;  %v1517_v8 = vld [vmem:[%s1953_s11 + $0x34] ss:$8 sps:$4 sm:$0xff]  }
  0x43   : > { %506 = vadd.xlane.f32.xlu1 %v505_v10  ;;  %v1519_v10 = vld [vmem:[%s1953_s11 + $0x30] ss:$8 sps:$4 sm:$0xff]   ;;  %1061 = vmatprep.subr.bf16.mxu0 %v1517_v8 }
  0x44   : > { %1437 = vmatprep.subr.bf16.mxu1 %v1517_v8 }
  0x45   : > { %1062 = vmatpush1.bf16.msra.mxu0 %v1519_v10  ;;  %1453 = vmatpush1.bf16.msra.mxu1 %v1519_v10 }
  0x46   : > { %527 = vadd.xlane.f32.xlu0 %v526_v18  ;;  %v1520_v18 = vld [vmem:[%s1953_s11 + $0x24] ss:$8 sps:$4 sm:$0xff]  }
  0x47   : > { %530 = vadd.xlane.f32.xlu1 %v529_v19  ;;  %v1522_v19 = vld [vmem:[%s1953_s11 + $0x20] ss:$8 sps:$4 sm:$0xff]   ;;  %1063 = vmatprep.subr.bf16.mxu0 %v1520_v18 }
  0x48   : > { %1438 = vmatprep.subr.bf16.mxu1 %v1520_v18 }
  0x49   : > { %1064 = vmatpush1.bf16.msra.mxu0 %v1522_v19  ;;  %1454 = vmatpush1.bf16.msra.mxu1 %v1522_v19 }
  0x4a   : > { %509 = vadd.xlane.f32.xlu0 %v508_v24  ;;  %v1523_v24 = vld [vmem:[%s1953_s11 + $0x14] ss:$8 sps:$4 sm:$0xff]  }
  0x4b   : > { %512 = vadd.xlane.f32.xlu1 %v511_v26  ;;  %v1525_v26 = vld [vmem:[%s1953_s11 + $0x10] ss:$8 sps:$4 sm:$0xff]   ;;  %1065 = vmatprep.subr.bf16.mxu0 %v1523_v24 }
  0x4c   : > { %1439 = vmatprep.subr.bf16.mxu1 %v1523_v24 }
  0x4d   : > { %1066 = vmatpush1.bf16.msra.mxu0 %v1525_v26  ;;  %1455 = vmatpush1.bf16.msra.mxu1 %v1525_v26 }
  0x4e   : > { %533 = vadd.xlane.f32.xlu0 %v532_v30  ;;  %v1526_v30 = vld [vmem:[%s1953_s11 + $0x4] ss:$8 sps:$4 sm:$0xff]  }
  0x4f   : > { %536 = vadd.xlane.f32.xlu1 %v535_v31  ;;  %v1528_v31 = vld [vmem:[%s1953_s11] ss:$8 sps:$4 sm:$0xff]   ;;  %1067 = vmatprep.subr.bf16.mxu0 %v1526_v30 }
  0x50   : > { %1440 = vmatprep.subr.bf16.mxu1 %v1526_v30 }
  0x51   : > { %1068 = vmatpush1.bf16.msra.mxu0 %v1528_v31  ;;  %1456 = vmatpush1.bf16.msra.mxu1 %v1528_v31 }
  0xbb   : > { %v492_v46 = vpop.xlane.xlu0 %491 }
  0xbc   : > { %v516_v47 = vpop.xlane.xlu1 %515  ;;  %v539_v50 = vmul.f32 0.00390625, %v492_v46 }
  0xbd   : > { %v547_v51 = vmul.f32 0.00390625, %v516_v47 }
  0xbe   : > { %v1973_v56 = vsub.f32 %v456_v35, %v539_v50  ;;  %v1977_v58 = vsub.f32 %v457_v36, %v539_v50 }
  0xbf   : > { %v1981_v2 = vsub.f32 %v472_v37, %v547_v51  ;;  %v1985_v3 = vsub.f32 %v473_v38, %v547_v51  ;;  %v495_v8 = vpop.xlane.xlu0 %494 }
  0xc0   : > { %v519_v10 = vpop.xlane.xlu1 %518  ;;  %v540_v18 = vmul.f32 0.00390625, %v495_v8  ;;  %v587_v35 = vmul.f32 %v1973_v56, %v1973_v56  ;;  %v588_v32 = vmul.f32 %v1977_v58, %v1977_v58 }
  0xc1   : > { %v548_v19 = vmul.f32 0.00390625, %v519_v10  ;;  %v603_v36 = vmul.f32 %v1981_v2, %v1981_v2  ;;  %v604_v37 = vmul.f32 %v1985_v3, %v1985_v3 }
  0xc2   : > { %v1997_v33 = vsub.f32 %v458_v41, %v540_v18  ;;  %v2001_v38 = vsub.f32 %v459_v42, %v540_v18  ;;  %v619_v31 = vadd.f32 %v588_v32, %v587_v35 }
  0xc3   : > { %v2005_v24 = vsub.f32 %v474_v43, %v548_v19  ;;  %v2009_v26 = vsub.f32 %v475_v44, %v548_v19  ;;  %v498_v30 = vpop.xlane.xlu0 %497  ;;  %v643_v42 = vadd.f32 %v604_v37, %v603_v36 }
  0xc4   : > { %v501_v46 = vpop.xlane.xlu1 %500  ;;  %v541_v47 = vmul.f32 0.00390625, %v498_v30  ;;  %v589_v41 = vmul.f32 %v1997_v33, %v1997_v33  ;;  %v590_v34 = vmul.f32 %v2001_v38, %v2001_v38  ;;  %620 = vadd.xlane.f32.xlu0 %v619_v31 }
  0xc5   : > { %v542_v50 = vmul.f32 0.00390625, %v501_v46  ;;  %v605_v43 = vmul.f32 %v2005_v24, %v2005_v24  ;;  %v606_v39 = vmul.f32 %v2009_v26, %v2009_v26 }
  0xc6   : > { %v2021_v44 = vsub.f32 %v460_v48, %v541_v47  ;;  %v2025_v51 = vsub.f32 %v461_v49, %v541_v47  ;;  %v622_v19 = vadd.f32 %v590_v34, %v589_v41 }
  0xc7   : > { %v2029_v8 = vsub.f32 %v462_v52, %v542_v50  ;;  %v2033_v10 = vsub.f32 %v463_v53, %v542_v50  ;;  %v522_v18 = vpop.xlane.xlu0 %521  ;;  %v646_v49 = vadd.f32 %v606_v39, %v605_v43 }
  0xc8   : > { %v525_v35 = vpop.xlane.xlu1 %524  ;;  %v549_v32 = vmul.f32 0.00390625, %v522_v18  ;;  %v591_v48 = vmul.f32 %v2021_v44, %v2021_v44  ;;  %v592_v40 = vmul.f32 %v2025_v51, %v2025_v51  ;;  %644 = vadd.xlane.f32.xlu0 %v643_v42  ;;  %623 = vadd.xlane.f32.xlu1 %v622_v19  ;;  %v1531_v42 = vld [vmem:[%s1953_s11 + $0xf0] ss:$8 sps:$4 sm:$0xff]  }
  0xc9   : > { %v550_v36 = vmul.f32 0.00390625, %v525_v35  ;;  %v593_v45 = vmul.f32 %v2029_v8, %v2029_v8  ;;  %v594_v52 = vmul.f32 %v2033_v10, %v2033_v10 }
  0xca   : > { %v2045_v53 = vsub.f32 %v476_v57, %v549_v32  ;;  %v2049_v37 = vsub.f32 %v477_v59, %v549_v32  ;;  %v625_v47 = vadd.f32 %v592_v40, %v591_v48  ;;  %v1529_v59 = vld [vmem:[%s1953_s11 + $0xf4] ss:$8 sps:$4 sm:$0xff]   ;;  %v1532_v40 = vld [vmem:[%s1953_s11 + $0xe4] ss:$8 sps:$4 sm:$0xff]  }
  0xcb   : > { %v2053_v30 = vsub.f32 %v478_v60, %v550_v36  ;;  %v2057_v31 = vsub.f32 %v479_v61, %v550_v36  ;;  %v504_v46 = vpop.xlane.xlu0 %503  ;;  %v628_v60 = vadd.f32 %v594_v52, %v593_v45  ;;  %1069 = vmatprep.subr.bf16.mxu0 %v1529_v59  ;;  %1441 = vmatprep.subr.bf16.mxu1 %v1529_v59 }
  0xcc   : > { %v507_v50 = vpop.xlane.xlu1 %506  ;;  %v543_v41 = vmul.f32 0.00390625, %v504_v46  ;;  %v607_v57 = vmul.f32 %v2045_v53, %v2045_v53  ;;  %v608_v54 = vmul.f32 %v2049_v37, %v2049_v37  ;;  %647 = vadd.xlane.f32.xlu1 %v646_v49  ;;  %626 = vadd.xlane.f32.xlu0 %v625_v47  ;;  %v1534_v47 = vld [vmem:[%s1953_s11 + $0xe0] ss:$8 sps:$4 sm:$0xff]  }
  0xcd   : > { %v544_v34 = vmul.f32 0.00390625, %v507_v50  ;;  %v609_v55 = vmul.f32 %v2053_v30, %v2053_v30  ;;  %v610_v61 = vmul.f32 %v2057_v31, %v2057_v31  ;;  %1070 = vmatpush2.bf16.msra.mxu0 %v1531_v42  ;;  %1457 = vmatpush2.bf16.msra.mxu1 %v1531_v42  ;;  %v1537_v42 = vld [vmem:[%s1953_s11 + $0xd0] ss:$8 sps:$4 sm:$0xff]  }
  0xce   : > { %v2071_v43 = vsub.f32 %v464_v0, %v543_v41  ;;  %v2075_v39 = vsub.f32 %v465_v1, %v543_v41  ;;  %v649_v32 = vadd.f32 %v608_v54, %v607_v57  ;;  %1071 = vmatprep.subr.bf16.mxu0 %v1532_v40  ;;  %1442 = vmatprep.subr.bf16.mxu1 %v1532_v40  ;;  %v1535_v54 = vld [vmem:[%s1953_s11 + $0xd4] ss:$8 sps:$4 sm:$0xff]  }
  0xcf   : > { %v2079_v18 = vsub.f32 %v466_v4, %v544_v34  ;;  %v2083_v19 = vsub.f32 %v467_v5, %v544_v34  ;;  %v528_v35 = vpop.xlane.xlu0 %527  ;;  %v652_v63 = vadd.f32 %v610_v61, %v609_v55 }
  0xd0   : > { %v531_v36 = vpop.xlane.xlu1 %530  ;;  %v551_v0 = vmul.f32 0.00390625, %v528_v35  ;;  %v595_v1 = vmul.f32 %v2071_v43, %v2071_v43  ;;  %v596_v4 = vmul.f32 %v2075_v39, %v2075_v39  ;;  %629 = vadd.xlane.f32.xlu1 %v628_v60  ;;  %650 = vadd.xlane.f32.xlu0 %v649_v32 }
  0xd1   : > { %v552_v62 = vmul.f32 0.00390625, %v531_v36  ;;  %v597_v5 = vmul.f32 %v2079_v18, %v2079_v18  ;;  %v598_v48 = vmul.f32 %v2083_v19, %v2083_v19  ;;  %1072 = vmatpush2.bf16.msra.mxu0 %v1534_v47  ;;  %1458 = vmatpush2.bf16.msra.mxu1 %v1534_v47 }
  0xd2   : > { %v2096_v49 = vsub.f32 %v480_v9, %v551_v0  ;;  %v2100_v45 = vsub.f32 %v481_v11, %v551_v0  ;;  %v631_v41 = vadd.f32 %v596_v4, %v595_v1  ;;  %1073 = vmatprep.subr.bf16.mxu0 %v1535_v54  ;;  %1443 = vmatprep.subr.bf16.mxu1 %v1535_v54 }
  0xd3   : > { %v2104_v52 = vsub.f32 %v482_v12, %v552_v62  ;;  %v2108_v46 = vsub.f32 %v483_v13, %v552_v62  ;;  %v510_v50 = vpop.xlane.xlu0 %509  ;;  %v634_v7 = vadd.f32 %v598_v48, %v597_v5  ;;  %v1538_v62 = vld [vmem:[%s1953_s11 + $0xc4] ss:$8 sps:$4 sm:$0xff]   ;;  %v1540_v48 = vld [vmem:[%s1953_s11 + $0xc0] ss:$8 sps:$4 sm:$0xff]  }
  0xd4   : > { %v513_v34 = vpop.xlane.xlu1 %512  ;;  %v545_v9 = vmul.f32 0.00390625, %v510_v50  ;;  %v611_v11 = vmul.f32 %v2096_v49, %v2096_v49  ;;  %v612_v12 = vmul.f32 %v2100_v45, %v2100_v45  ;;  %653 = vadd.xlane.f32.xlu1 %v652_v63  ;;  %632 = vadd.xlane.f32.xlu0 %v631_v41  ;;  %v1543_v50 = vld [vmem:[%s1953_s11 + $0xb0] ss:$8 sps:$4 sm:$0xff]  }
  0xd5   : > { %v546_v6 = vmul.f32 0.00390625, %v513_v34  ;;  %v613_v13 = vmul.f32 %v2104_v52, %v2104_v52  ;;  %v614_v57 = vmul.f32 %v2108_v46, %v2108_v46  ;;  %1074 = vmatpush2.bf16.msra.mxu0 %v1537_v42  ;;  %1459 = vmatpush2.bf16.msra.mxu1 %v1537_v42  ;;  %v1544_v34 = vld [vmem:[%s1953_s11 + $0xa4] ss:$8 sps:$4 sm:$0xff]  }
  0xd6   : > { %v2122_v59 = vsub.f32 %v468_v16, %v545_v9  ;;  %v2126_v60 = vsub.f32 %v469_v17, %v545_v9  ;;  %v655_v32 = vadd.f32 %v612_v12, %v611_v11  ;;  %1075 = vmatprep.subr.bf16.mxu0 %v1538_v62  ;;  %1444 = vmatprep.subr.bf16.mxu1 %v1538_v62  ;;  %v1546_v9 = vld [vmem:[%s1953_s11 + $0xa0] ss:$8 sps:$4 sm:$0xff]   ;;  %v1549_v11 = vld [vmem:[%s1953_s11 + $0x90] ss:$8 sps:$4 sm:$0xff]   ;;  %v1550_v12 = vld [vmem:[%s1953_s11 + $0x84] ss:$8 sps:$4 sm:$0xff]  }
  0xd7   : > { %v2130_v55 = vsub.f32 %v470_v20, %v546_v6  ;;  %v2134_v61 = vsub.f32 %v471_v21, %v546_v6  ;;  %v534_v35 = vpop.xlane.xlu0 %533  ;;  %v658_v15 = vadd.f32 %v614_v57, %v613_v13  ;;  %v1547_v6 = vld [vmem:[%s1953_s11 + $0x94] ss:$8 sps:$4 sm:$0xff]  }
  0xd8   : > { %v537_v36 = vpop.xlane.xlu1 %536  ;;  %v553_v16 = vmul.f32 0.00390625, %v534_v35  ;;  %v599_v17 = vmul.f32 %v2122_v59, %v2122_v59  ;;  %v600_v20 = vmul.f32 %v2126_v60, %v2126_v60  ;;  %635 = vadd.xlane.f32.xlu1 %v634_v7  ;;  %656 = vadd.xlane.f32.xlu0 %v655_v32  ;;  %v1552_v7 = vld [vmem:[%s1953_s11 + $0x80] ss:$8 sps:$4 sm:$0xff]  }
  0xd9   : > { %v554_v14 = vmul.f32 0.00390625, %v537_v36  ;;  %v601_v21 = vmul.f32 %v2130_v55, %v2130_v55  ;;  %v602_v0 = vmul.f32 %v2134_v61, %v2134_v61  ;;  %1076 = vmatpush2.bf16.msra.mxu0 %v1540_v48  ;;  %1460 = vmatpush2.bf16.msra.mxu1 %v1540_v48 }
  0xda   : > { %v2148_v1 = vsub.f32 %v484_v25, %v553_v16  ;;  %v2152_v4 = vsub.f32 %v485_v27, %v553_v16  ;;  %v637_v40 = vadd.f32 %v600_v20, %v599_v17  ;;  %v748_v16 = vlaneseq }
  0xdb   : > { %v2156_v63 = vsub.f32 %v486_v28, %v554_v14  ;;  %v2160_v5 = vsub.f32 %v487_v29, %v554_v14  ;;  %v640_v27 = vadd.f32 %v602_v0, %v601_v21  ;;  %v1541_v29 = vld [vmem:[%s1953_s11 + $0xb4] ss:$8 sps:$4 sm:$0xff]  }
  0xdc   : > { %v615_v25 = vmul.f32 %v2148_v1, %v2148_v1  ;;  %v616_v22 = vmul.f32 %v2152_v4, %v2152_v4  ;;  %659 = vadd.xlane.f32.xlu1 %v658_v15  ;;  %638 = vadd.xlane.f32.xlu0 %v637_v40  ;;  %v749_v62 = vshrl.u32 %v748_v16, 7 }
  0xdd   : > { %v617_v23 = vmul.f32 %v2156_v63, %v2156_v63  ;;  %v618_v28 = vmul.f32 %v2160_v5, %v2160_v5  ;;  %1077 = vmatprep.subr.bf16.mxu0 %v1541_v29  ;;  %1445 = vmatprep.subr.bf16.mxu1 %v1541_v29  ;;  %v488_v29 = vld [vmem:[%s2462_s1] sm:$0x3] }
  0xde   : > { %v661_v47 = vadd.f32 %v616_v22, %v615_v25  ;;  %1078 = vmatpush2.bf16.msra.mxu0 %v1543_v50  ;;  %1461 = vmatpush2.bf16.msra.mxu1 %v1543_v50 }
  0xdf   : > { %v664_v41 = vadd.f32 %v618_v28, %v617_v23  ;;  %1079 = vmatprep.subr.bf16.mxu0 %v1544_v34  ;;  %1446 = vmatprep.subr.bf16.mxu1 %v1544_v34  ;;  %v2179_v28 = vsub.s32 1, %v749_v62 }
  0xe0   : > { %641 = vadd.xlane.f32.xlu1 %v640_v27  ;;  %662 = vadd.xlane.f32.xlu0 %v661_v47  ;;  %v2184_v47 = vsub.s32 0, %v749_v62 }
  0xe2   : > { %1080 = vmatpush2.bf16.msra.mxu0 %v1546_v9  ;;  %1462 = vmatpush2.bf16.msra.mxu1 %v1546_v9 }
  0xe3   : > { %1081 = vmatprep.subr.bf16.mxu0 %v1547_v6  ;;  %1447 = vmatprep.subr.bf16.mxu1 %v1547_v6 }
  0xe4   : > { %665 = vadd.xlane.f32.xlu1 %v664_v41  ;;  %v489_v41 = vld [vmem:[%s2463_s2] sm:$0x3] }
  0xe6   : > { %1082 = vmatpush2.bf16.msra.mxu0 %v1549_v11  ;;  %1463 = vmatpush2.bf16.msra.mxu1 %v1549_v11 }
  0xe7   : > { %1083 = vmatprep.subr.bf16.mxu0 %v1550_v12  ;;  %1448 = vmatprep.subr.bf16.mxu1 %v1550_v12 }
  0xea   : > { %1084 = vmatpush2.bf16.msra.mxu0 %v1552_v7  ;;  %1464 = vmatpush2.bf16.msra.mxu1 %v1552_v7  ;;  %v2190_v7 = vrot.slane %v488_v29, %v2179_v28 }
 0x14d   : > { %v621_v13 = vpop.xlane.xlu0 %620 }
 0x14e   : > { %v667_v57 = vmul.f32 0.00390625, %v621_v13 }
 0x150   : > { %v683_v54 = vadd.f32 1e-05, %v667_v57  ;;  %v2193_v57 = vrot.slane %v488_v29, %v2184_v47 }
 0x151   : > { %v624_v42 = vpop.xlane.xlu1 %623  ;;  %v645_v35 = vpop.xlane.xlu0 %644 }
 0x152   : > { %1553 = vrsqrt.f32 %v683_v54  ;;  %v668_v32 = vmul.f32 0.00390625, %v624_v42  ;;  %v675_v36 = vmul.f32 0.00390625, %v645_v35  ;;  %v2196_v54 = vrot.slane %v489_v41, %v2179_v28 }
 0x154   : > { %v684_v14 = vadd.f32 1e-05, %v668_v32  ;;  %v691_v17 = vadd.f32 1e-05, %v675_v36 }
 0x155   : > { %v648_v20 = vpop.xlane.xlu1 %647  ;;  %v627_v15 = vpop.xlane.xlu0 %626 }
 0x156   : > { %1555 = vrsqrt.f32 %v684_v14  ;;  %v676_v21 = vmul.f32 0.00390625, %v648_v20  ;;  %v669_v0 = vmul.f32 0.00390625, %v627_v15 }
 0x157   : > { %1557 = vrsqrt.f32 %v691_v17  ;;  %v2201_v17 = vrot.slane %v489_v41, %v2184_v47 }
 0x158   : > { %v692_v48 = vadd.f32 1e-05, %v676_v21  ;;  %v685_v40 = vadd.f32 1e-05, %v669_v0 }
 0x159   : > { %v630_v25 = vpop.xlane.xlu1 %629  ;;  %v651_v22 = vpop.xlane.xlu0 %650 }
 0x15a   : > { %1559 = vrsqrt.f32 %v692_v48  ;;  %v670_v27 = vmul.f32 0.00390625, %v630_v25  ;;  %v677_v23 = vmul.f32 0.00390625, %v651_v22 }
 0x15b   : > { %1561 = vrsqrt.f32 %v685_v40 }
 0x15c   : > { %v686_v50 = vadd.f32 1e-05, %v670_v27  ;;  %v693_v34 = vadd.f32 1e-05, %v677_v23 }
 0x15d   : > { %v654_v9 = vpop.xlane.xlu1 %653  ;;  %v633_v6 = vpop.xlane.xlu0 %632 }
 0x15e   : > { %1563 = vrsqrt.f32 %v686_v50  ;;  %v678_v11 = vmul.f32 0.00390625, %v654_v9  ;;  %v671_v12 = vmul.f32 0.00390625, %v633_v6 }
 0x15f   : > { %v1554_v13 = vpop.eup %1553  ;;  %1565 = vrsqrt.f32 %v693_v34 }
 0x160   : > { %v694_v42 = vadd.f32 1e-05, %v678_v11  ;;  %v687_v35 = vadd.f32 1e-05, %v671_v12  ;;  %v716_v32 = vmul.f32 %v1554_v13, %v1977_v58  ;;  %v715_v36 = vmul.f32 %v1554_v13, %v1973_v56 }
 0x161   : > { %v636_v16 = vpop.xlane.xlu1 %635  ;;  %v657_v14 = vpop.xlane.xlu0 %656 }
 0x162   : > { %1567 = vrsqrt.f32 %v694_v42  ;;  %v672_v20 = vmul.f32 0.00390625, %v636_v16  ;;  %v679_v15 = vmul.f32 0.00390625, %v657_v14  ;;  %v759_v21 = vmul.f32 %v2190_v7, %v716_v32 }
 0x163   : > { %v1556_v0 = vpop.eup %1555  ;;  %1569 = vrsqrt.f32 %v687_v35  ;;  %v758_v62 = vmul.f32 %v2193_v57, %v715_v36 }
 0x164   : > { %v1558_v48 = vpop.eup %1557  ;;  %v688_v40 = vadd.f32 1e-05, %v672_v20  ;;  %v695_v58 = vadd.f32 1e-05, %v679_v15  ;;  %v718_v56 = vmul.f32 %v1556_v0, %v2001_v38  ;;  %v802_v25 = vadd.f32 %v2196_v54, %v759_v21 }
 0x165   : > { %v660_v22 = vpop.xlane.xlu1 %659  ;;  %v639_v27 = vpop.xlane.xlu0 %638  ;;  %v717_v23 = vmul.f32 %v1556_v0, %v1997_v33  ;;  %v801_v29 = vadd.f32 %v2201_v17, %v758_v62  ;;  %v732_v50 = vmul.f32 %v1558_v48, %v1985_v3  ;;  %v731_v41 = vmul.f32 %v1558_v48, %v1981_v2 }
 0x166   : > { %1571 = vrsqrt.f32 %v688_v40  ;;  %v680_v34 = vmul.f32 0.00390625, %v660_v22  ;;  %v673_v9 = vmul.f32 0.00390625, %v639_v27  ;;  %v761_v6 = vmul.f32 %v2190_v7, %v718_v56 }
 0x167   : > { %v1560_v11 = vpop.eup %1559  ;;  %1573 = vrsqrt.f32 %v695_v58  ;;  %v760_v38 = vmul.f32 %v2193_v57, %v717_v23  ;;  %v775_v12 = vmul.f32 %v2190_v7, %v732_v50  ;;  %v774_v13 = vmul.f32 %v2193_v57, %v731_v41 }
 0x168   : > { %v696_v33 = vadd.f32 1e-05, %v680_v34  ;;  %v689_v42 = vadd.f32 1e-05, %v673_v9  ;;  %v804_v35 = vadd.f32 %v2196_v54, %v761_v6  ;;  %v734_v3 = vmul.f32 %v1560_v11, %v2009_v26  ;;  %v1562_v2 = vpop.eup %1561 }
 0x169   : > { %v642_v32 = vpop.xlane.xlu1 %641  ;;  %v663_v36 = vpop.xlane.xlu0 %662  ;;  %v803_v16 = vadd.f32 %v2201_v17, %v760_v38  ;;  %v818_v14 = vadd.f32 %v2196_v54, %v775_v12  ;;  %v733_v20 = vmul.f32 %v1560_v11, %v2005_v24  ;;  %v817_v15 = vadd.f32 %v2201_v17, %v774_v13 }
 0x16a   : > { %1575 = vrsqrt.f32 %v696_v33  ;;  %v674_v21 = vmul.f32 0.00390625, %v642_v32  ;;  %v681_v0 = vmul.f32 0.00390625, %v663_v36  ;;  %v834_v62 = vpack.c.bf16 %v804_v35, %v802_v25 }
 0x16b   : > { %v1564_v48 = vpop.eup %1563  ;;  %1577 = vrsqrt.f32 %v689_v42  ;;  %v833_v40 = vpack.c.bf16 %v803_v16, %v801_v29  ;;  %v777_v26 = vmul.f32 %v2190_v7, %v734_v3  ;;  %v776_v58 = vmul.f32 %v2193_v57, %v733_v20 }
 0x16c   : > { %v690_v56 = vadd.f32 1e-05, %v674_v21  ;;  %v697_v22 = vadd.f32 1e-05, %v681_v0  ;;  %1085 = vmatprep.mubr.bf16.mxu0 %v834_v62  ;;  %v720_v27 = vmul.f32 %v1562_v2, %v2025_v51  ;;  %v722_v24 = vmul.f32 %v1564_v48, %v2033_v10  ;;  %v1566_v34 = vpop.eup %1565 }
 0x16d   : > { %v666_v23 = vpop.xlane.xlu1 %665  ;;  %1086 = vmatmul.mubr.bf16.vlgmr.msra.gmra.mxu0 %v833_v40  ;;  %v820_v50 = vadd.f32 %v2196_v54, %v777_v26  ;;  %v819_v25 = vadd.f32 %v2201_v17, %v776_v58  ;;  %v719_v41 = vmul.f32 %v1562_v2, %v2021_v44  ;;  %v721_v29 = vmul.f32 %v1564_v48, %v2029_v8 }
 0x16e   : > { %1579 = vrsqrt.f32 %v690_v56  ;;  %v682_v9 = vmul.f32 0.00390625, %v666_v23  ;;  %v763_v6 = vmul.f32 %v2190_v7, %v720_v27  ;;  %v765_v11 = vmul.f32 %v2190_v7, %v722_v24 }
 0x16f   : > { %v1568_v51 = vpop.eup %1567  ;;  %1581 = vrsqrt.f32 %v697_v22  ;;  %v842_v10 = vpack.c.bf16 %v820_v50, %v818_v14  ;;  %v841_v38 = vpack.c.bf16 %v819_v25, %v817_v15  ;;  %v762_v12 = vmul.f32 %v2193_v57, %v719_v41 }
 0x170   : > { %v1570_v13 = vpop.eup %1569  ;;  %v698_v33 = vadd.f32 1e-05, %v682_v9  ;;  %v806_v42 = vadd.f32 %v2196_v54, %v763_v6  ;;  %v808_v44 = vadd.f32 %v2196_v54, %v765_v11  ;;  %v764_v8 = vmul.f32 %v2193_v57, %v721_v29 }
 0x171   : > { %1125 = vmatprep.mubr.bf16.mxu1 %v842_v10  ;;  %v805_v35 = vadd.f32 %v2201_v17, %v762_v12  ;;  %v736_v3 = vmul.f32 %v1566_v34, %v2049_v37  ;;  %v738_v2 = vmul.f32 %v1568_v51, %v2057_v31  ;;  %v735_v32 = vmul.f32 %v1566_v34, %v2045_v53 }
 0x172   : > { %1583 = vrsqrt.f32 %v698_v33  ;;  %1126 = vmatmul.mubr.bf16.vlgmr.msra.gmra.mxu1 %v841_v38  ;;  %v836_v36 = vpack.c.bf16 %v808_v44, %v806_v42  ;;  %v807_v16 = vadd.f32 %v2201_v17, %v764_v8  ;;  %v737_v14 = vmul.f32 %v1568_v51, %v2053_v30 }
 0x173   : > { %v1572_v20 = vpop.eup %1571  ;;  %v779_v15 = vmul.f32 %v2190_v7, %v736_v3  ;;  %v781_v21 = vmul.f32 %v2190_v7, %v738_v2  ;;  %v778_v0 = vmul.f32 %v2193_v57, %v735_v32  ;;  %v724_v37 = vmul.f32 %v1570_v13, %v2075_v39 }
 0x174   : > { %v1574_v62 = vpop.eup %1573  ;;  %1095 = vmatprep.mubr.bf16.mxu0 %v836_v36  ;;  %v835_v31 = vpack.c.bf16 %v807_v16, %v805_v35  ;;  %v780_v53 = vmul.f32 %v2193_v57, %v737_v14  ;;  %v726_v48 = vmul.f32 %v1572_v20, %v2083_v19  ;;  %v723_v40 = vmul.f32 %v1570_v13, %v2071_v43 }
 0x175   : > { %v822_v30 = vadd.f32 %v2196_v54, %v779_v15  ;;  %v824_v26 = vadd.f32 %v2196_v54, %v781_v21  ;;  %v821_v58 = vadd.f32 %v2201_v17, %v778_v0  ;;  %v767_v56 = vmul.f32 %v2190_v7, %v724_v37 }
 0x176   : > { %1096 = vmatmul.mubr.bf16.gmra.mxu0 %v835_v31  ;;  %v823_v39 = vadd.f32 %v2201_v17, %v780_v53  ;;  %v769_v22 = vmul.f32 %v2190_v7, %v726_v48  ;;  %v725_v27 = vmul.f32 %v1572_v20, %v2079_v18  ;;  %v766_v24 = vmul.f32 %v2193_v57, %v723_v40 }
 0x177   : > { %v1576_v19 = vpop.eup %1575  ;;  %v844_v23 = vpack.c.bf16 %v824_v26, %v822_v30  ;;  %v810_v43 = vadd.f32 %v2196_v54, %v767_v56  ;;  %v740_v50 = vmul.f32 %v1574_v62, %v2100_v45  ;;  %v739_v25 = vmul.f32 %v1574_v62, %v2096_v49 }
 0x178   : > { %v1578_v41 = vpop.eup %1577  ;;  %v843_v29 = vpack.c.bf16 %v823_v39, %v821_v58  ;;  %v812_v34 = vadd.f32 %v2196_v54, %v769_v22  ;;  %v768_v9 = vmul.f32 %v2193_v57, %v725_v27  ;;  %v809_v6 = vadd.f32 %v2201_v17, %v766_v24 }
 0x179   : > { %1135 = vmatprep.mubr.bf16.mxu1 %v844_v23  ;;  %v742_v18 = vmul.f32 %v1576_v19, %v2108_v46  ;;  %v783_v11 = vmul.f32 %v2190_v7, %v740_v50  ;;  %v741_v51 = vmul.f32 %v1576_v19, %v2104_v52  ;;  %v782_v10 = vmul.f32 %v2193_v57, %v739_v25 }
 0x17a   : > { %1136 = vmatmul.mubr.bf16.gmra.mxu1 %v843_v29  ;;  %v838_v45 = vpack.c.bf16 %v812_v34, %v810_v43  ;;  %v811_v49 = vadd.f32 %v2201_v17, %v768_v9  ;;  %v728_v38 = vmul.f32 %v1578_v41, %v2126_v60  ;;  %v727_v12 = vmul.f32 %v1578_v41, %v2122_v59 }
 0x17b   : > { %v1580_v13 = vpop.eup %1579  ;;  %v785_v33 = vmul.f32 %v2190_v7, %v742_v18  ;;  %v826_v42 = vadd.f32 %v2196_v54, %v783_v11  ;;  %v784_v46 = vmul.f32 %v2193_v57, %v741_v51  ;;  %v825_v44 = vadd.f32 %v2201_v17, %v782_v10 }
 0x17c   : > { %v1582_v52 = vpop.eup %1581  ;;  %1105 = vmatprep.mubr.bf16.mxu0 %v838_v45  ;;  %v837_v8 = vpack.c.bf16 %v811_v49, %v809_v6  ;;  %v730_v35 = vmul.f32 %v1580_v13, %v2134_v61  ;;  %v771_v3 = vmul.f32 %v2190_v7, %v728_v38  ;;  %v729_v60 = vmul.f32 %v1580_v13, %v2130_v55 }
 0x17d   : > { %v828_v59 = vadd.f32 %v2196_v54, %v785_v33  ;;  %v827_v2 = vadd.f32 %v2201_v17, %v784_v46  ;;  %v770_v32 = vmul.f32 %v2193_v57, %v727_v12  ;;  %v744_v36 = vmul.f32 %v1582_v52, %v2152_v4 }
 0x17e   : > { %1106 = vmatmul.mubr.bf16.gmra.mxu0 %v837_v8  ;;  %v773_v16 = vmul.f32 %v2190_v7, %v730_v35  ;;  %v814_v14 = vadd.f32 %v2196_v54, %v771_v3  ;;  %v772_v20 = vmul.f32 %v2193_v57, %v729_v60  ;;  %v743_v61 = vmul.f32 %v1582_v52, %v2148_v1 }
 0x17f   : > { %v1584_v15 = vpop.eup %1583  ;;  %v846_v21 = vpack.c.bf16 %v828_v59, %v826_v42  ;;  %v845_v55 = vpack.c.bf16 %v827_v2, %v825_v44  ;;  %v813_v0 = vadd.f32 %v2201_v17, %v770_v32  ;;  %v787_v37 = vmul.f32 %v2190_v7, %v744_v36 }
 0x180   : > { %v816_v62 = vadd.f32 %v2196_v54, %v773_v16  ;;  %v815_v4 = vadd.f32 %v2201_v17, %v772_v20  ;;  %v746_v31 = vmul.f32 %v1584_v15, %v2160_v5  ;;  %v745_v53 = vmul.f32 %v1584_v15, %v2156_v63 }
 0x181   : > { %1145 = vmatprep.mubr.bf16.mxu1 %v846_v21  ;;  %v786_v48 = vmul.f32 %v2193_v57, %v743_v61  ;;  %v830_v58 = vadd.f32 %v2196_v54, %v787_v37 }
 0x182   : > { %1146 = vmatmul.mubr.bf16.gmra.mxu1 %v845_v55  ;;  %v840_v1 = vpack.c.bf16 %v816_v62, %v814_v14  ;;  %v839_v40 = vpack.c.bf16 %v815_v4, %v813_v0  ;;  %v789_v30 = vmul.f32 %v2190_v7, %v746_v31  ;;  %v788_v26 = vmul.f32 %v2193_v57, %v745_v53  ;;  %v881_v7 = vld [vmem:[%s436_s24] sm:$0x3] }
 0x183   : > { %v829_v5 = vadd.f32 %v2201_v17, %v786_v48  ;;  %v2302_v57 = vrot.slane %v881_v7, %v2184_v47 }
 0x184   : > { %1115 = vmatprep.mubr.bf16.mxu0 %v840_v1  ;;  %v832_v56 = vadd.f32 %v2196_v54, %v789_v30  ;;  %v831_v63 = vadd.f32 %v2201_v17, %v788_v26  ;;  %v2305_v54 = vrot.slane %v881_v7, %v2179_v28 }
 0x186   : > { %1116 = vmatmul.mubr.bf16.gmra.mxu0 %v839_v40  ;;  %v848_v39 = vpack.c.bf16 %v832_v56, %v830_v58  ;;  %v847_v22 = vpack.c.bf16 %v831_v63, %v829_v5 }
 0x188   : > { %1155 = vmatprep.mubr.bf16.mxu1 %v848_v39 }
 0x18a   : > { %1156 = vmatmul.mubr.bf16.gmra.mxu1 %v847_v22 }
 0x22d   : > { %v1087_v17 = vpop.f32.mrf.mxu0 }
 0x22e   : > { %v1088_v27 = vadd.f32 %v1087_v17, %v2302_v57 }
 0x22f   : > { %v1089_v24 = vpop.f32.mrf.mxu0 }
 0x230   : > { %1166 = vst [vmem:[%s2309_s25] sm:$0xff] %v1088_v27  ;;  %v1090_v19 = vadd.f32 %v1089_v24, %v2305_v54 }
 0x231   : > { %v1091_v47 = vpop.f32.mrf.mxu0 }
 0x232   : > { %1167 = vst [vmem:[%s2309_s25 + $0x8] sm:$0xff] %v1090_v19  ;;  %v1092_v28 = vadd.f32 %v1091_v47, %v2302_v57  ;;  %v1127_v23 = vpop.f32.mrf.mxu1 }
 0x233   : > { %v1128_v43 = vadd.f32 %v1127_v23, %v2302_v57  ;;  %v1093_v50 = vpop.f32.mrf.mxu0 }
 0x234   : > { %1168 = vst [vmem:[%s2309_s25 + $0x10] sm:$0xff] %v1092_v28  ;;  %v1094_v25 = vadd.f32 %v1093_v50, %v2305_v54  ;;  %v1129_v41 = vpop.f32.mrf.mxu1 }
 0x235   : > { %1182 = vst [vmem:[%s2309_s25 + $0x80] sm:$0xff] %v1128_v43  ;;  %v1130_v29 = vadd.f32 %v1129_v41, %v2305_v54 }
 0x236   : > { %1169 = vst [vmem:[%s2309_s25 + $0x18] sm:$0xff] %v1094_v25  ;;  %v1097_v34 = vpop.f32.mrf.mxu0  ;;  %v1131_v9 = vpop.f32.mrf.mxu1 }
 0x237   : > { %1183 = vst [vmem:[%s2309_s25 + $0x88] sm:$0xff] %v1130_v29  ;;  %v1098_v6 = vadd.f32 %v1097_v34, %v2302_v57  ;;  %v1132_v18 = vadd.f32 %v1131_v9, %v2302_v57 }
 0x238   : > { %v1099_v11 = vpop.f32.mrf.mxu0  ;;  %v1133_v51 = vpop.f32.mrf.mxu1 }
 0x239   : > { %1170 = vst [vmem:[%s2309_s25 + $0x20] sm:$0xff] %v1098_v6  ;;  %1184 = vst [vmem:[%s2309_s25 + $0x90] sm:$0xff] %v1132_v18  ;;  %v1100_v10 = vadd.f32 %v1099_v11, %v2305_v54  ;;  %v1134_v45 = vadd.f32 %v1133_v51, %v2305_v54  ;;  %v1225_v24 = vld [vmem:[%s2309_s25 + $0x8] sm:$0xff] (%p1690_p6) }
 0x23a   : > { %v1101_v49 = vpop.f32.mrf.mxu0  ;;  %v1137_v38 = vpop.f32.mrf.mxu1  ;;  %1226 = vst [vmem:[%s2383_s6 + $0x8] sm:$0xff] (%p1690_p6), %v1225_v24 }
 0x23b   : > { %1171 = vst [vmem:[%s2309_s25 + $0x28] sm:$0xff] %v1100_v10  ;;  %1185 = vst [vmem:[%s2309_s25 + $0x98] sm:$0xff] %v1134_v45  ;;  %v1102_v12 = vadd.f32 %v1101_v49, %v2302_v57  ;;  %v1138_v13 = vadd.f32 %v1137_v38, %v2302_v57  ;;  %v1227_v19 = vld [vmem:[%s2309_s25 + $0x10] sm:$0xff] (%p1690_p6) }
 0x23c   : > { %v1103_v33 = vpop.f32.mrf.mxu0  ;;  %v1139_v42 = vpop.f32.mrf.mxu1  ;;  %1228 = vst [vmem:[%s2383_s6 + $0x20] sm:$0xff] (%p1690_p6), %v1227_v19  ;;  %v1255_v11 = vld [vmem:[%s2309_s25 + $0x80] sm:$0xff] (%p1690_p6) }
 0x23d   : > { %1172 = vst [vmem:[%s2309_s25 + $0x30] sm:$0xff] %v1102_v12  ;;  %1186 = vst [vmem:[%s2309_s25 + $0xa0] sm:$0xff] %v1138_v13  ;;  %v1104_v46 = vadd.f32 %v1103_v33, %v2305_v54  ;;  %v1140_v44 = vadd.f32 %v1139_v42, %v2305_v54 }
 0x23e   : > { %v1107_v52 = vpop.f32.mrf.mxu0  ;;  %v1141_v8 = vpop.f32.mrf.mxu1  ;;  %v1257_v51 = vld [vmem:[%s2309_s25 + $0x88] sm:$0xff] (%p1690_p6)  ;;  %1256 = vst [vmem:[%s2383_s6 + $0x100] sm:$0xff] (%p1690_p6), %v1255_v11 }
 0x23f   : > { %1173 = vst [vmem:[%s2309_s25 + $0x38] sm:$0xff] %v1104_v46  ;;  %1187 = vst [vmem:[%s2309_s25 + $0xa8] sm:$0xff] %v1140_v44  ;;  %v1108_v35 = vadd.f32 %v1107_v52, %v2302_v57  ;;  %v1142_v3 = vadd.f32 %v1141_v8, %v2302_v57 }
 0x240   : > { %v1109_v60 = vpop.f32.mrf.mxu0  ;;  %v1143_v59 = vpop.f32.mrf.mxu1  ;;  %v1231_v47 = vld [vmem:[%s2309_s25 + $0x20] sm:$0xff] (%p1690_p6)  ;;  %1258 = vst [vmem:[%s2383_s6 + $0x108] sm:$0xff] (%p1690_p6), %v1257_v51  ;;  %v1259_v10 = vld [vmem:[%s2309_s25 + $0x90] sm:$0xff] (%p1690_p6) }
 0x241   : > { %1174 = vst [vmem:[%s2309_s25 + $0x40] sm:$0xff] %v1108_v35  ;;  %1188 = vst [vmem:[%s2309_s25 + $0xb0] sm:$0xff] %v1142_v3  ;;  %v1110_v2 = vadd.f32 %v1109_v60, %v2305_v54  ;;  %v1144_v32 = vadd.f32 %v1143_v59, %v2305_v54 }
 0x242   : > { %v1111_v36 = vpop.f32.mrf.mxu0  ;;  %v1147_v16 = vpop.f32.mrf.mxu1  ;;  %v1233_v28 = vld [vmem:[%s2309_s25 + $0x28] sm:$0xff] (%p1690_p6)  ;;  %1232 = vst [vmem:[%s2383_s6 + $0x40] sm:$0xff] (%p1690_p6), %v1231_v47  ;;  %v1261_v45 = vld [vmem:[%s2309_s25 + $0x98] sm:$0xff] (%p1690_p6)  ;;  %1260 = vst [vmem:[%s2383_s6 + $0x120] sm:$0xff] (%p1690_p6), %v1259_v10 }
 0x243   : > { %1175 = vst [vmem:[%s2309_s25 + $0x48] sm:$0xff] %v1110_v2  ;;  %1189 = vst [vmem:[%s2309_s25 + $0xb8] sm:$0xff] %v1144_v32  ;;  %v1112_v14 = vadd.f32 %v1111_v36, %v2302_v57  ;;  %v1148_v20 = vadd.f32 %v1147_v16, %v2302_v57 }
 0x244   : > { %v1113_v61 = vpop.f32.mrf.mxu0  ;;  %v1149_v15 = vpop.f32.mrf.mxu1  ;;  %1234 = vst [vmem:[%s2383_s6 + $0x48] sm:$0xff] (%p1690_p6), %v1233_v28  ;;  %v1235_v23 = vld [vmem:[%s2309_s25 + $0x30] sm:$0xff] (%p1690_p6)  ;;  %v1263_v49 = vld [vmem:[%s2309_s25 + $0xa0] sm:$0xff] (%p1690_p6)  ;;  %1262 = vst [vmem:[%s2383_s6 + $0x128] sm:$0xff] (%p1690_p6), %v1261_v45 }
 0x245   : > { %1176 = vst [vmem:[%s2309_s25 + $0x50] sm:$0xff] %v1112_v14  ;;  %1190 = vst [vmem:[%s2309_s25 + $0xc0] sm:$0xff] %v1148_v20  ;;  %v1114_v21 = vadd.f32 %v1113_v61, %v2305_v54  ;;  %v1150_v55 = vadd.f32 %v1149_v15, %v2305_v54 }
 0x246   : > { %v1117_v0 = vpop.f32.mrf.mxu0  ;;  %v1151_v37 = vpop.f32.mrf.mxu1  ;;  %v1237_v43 = vld [vmem:[%s2309_s25 + $0x38] sm:$0xff] (%p1690_p6)  ;;  %1236 = vst [vmem:[%s2383_s6 + $0x60] sm:$0xff] (%p1690_p6), %v1235_v23  ;;  %1264 = vst [vmem:[%s2383_s6 + $0x140] sm:$0xff] (%p1690_p6), %v1263_v49  ;;  %v1265_v38 = vld [vmem:[%s2309_s25 + $0xa8] sm:$0xff] (%p1690_p6) }
 0x247   : > { %1177 = vst [vmem:[%s2309_s25 + $0x58] sm:$0xff] %v1114_v21  ;;  %1191 = vst [vmem:[%s2309_s25 + $0xc8] sm:$0xff] %v1150_v55  ;;  %v1118_v62 = vadd.f32 %v1117_v0, %v2302_v57  ;;  %v1152_v4 = vadd.f32 %v1151_v37, %v2302_v57 }
 0x248   : > { %v1119_v31 = vpop.f32.mrf.mxu0  ;;  %v1153_v53 = vpop.f32.mrf.mxu1  ;;  %v1239_v50 = vld [vmem:[%s2309_s25 + $0x40] sm:$0xff] (%p1690_p6)  ;;  %1238 = vst [vmem:[%s2383_s6 + $0x68] sm:$0xff] (%p1690_p6), %v1237_v43  ;;  %v1267_v12 = vld [vmem:[%s2309_s25 + $0xb0] sm:$0xff] (%p1690_p6)  ;;  %1266 = vst [vmem:[%s2383_s6 + $0x148] sm:$0xff] (%p1690_p6), %v1265_v38 }
 0x249   : > { %1178 = vst [vmem:[%s2309_s25 + $0x60] sm:$0xff] %v1118_v62  ;;  %1192 = vst [vmem:[%s2309_s25 + $0xd0] sm:$0xff] %v1152_v4  ;;  %v1120_v48 = vadd.f32 %v1119_v31, %v2305_v54  ;;  %v1154_v1 = vadd.f32 %v1153_v53, %v2305_v54 }
 0x24a   : > { %v1121_v40 = vpop.f32.mrf.mxu0  ;;  %v1157_v30 = vpop.f32.mrf.mxu1  ;;  %1240 = vst [vmem:[%s2383_s6 + $0x80] sm:$0xff] (%p1690_p6), %v1239_v50  ;;  %v1241_v25 = vld [vmem:[%s2309_s25 + $0x48] sm:$0xff] (%p1690_p6)  ;;  %v1269_v13 = vld [vmem:[%s2309_s25 + $0xb8] sm:$0xff] (%p1690_p6)  ;;  %1268 = vst [vmem:[%s2383_s6 + $0x160] sm:$0xff] (%p1690_p6), %v1267_v12 }
 0x24b   : > { %1179 = vst [vmem:[%s2309_s25 + $0x68] sm:$0xff] %v1120_v48  ;;  %1193 = vst [vmem:[%s2309_s25 + $0xd8] sm:$0xff] %v1154_v1  ;;  %v1122_v26 = vadd.f32 %v1121_v40, %v2302_v57  ;;  %v1158_v58 = vadd.f32 %v1157_v30, %v2302_v57 }
 0x24c   : > { %v1123_v56 = vpop.f32.mrf.mxu0  ;;  %v1159_v5 = vpop.f32.mrf.mxu1  ;;  %v1243_v41 = vld [vmem:[%s2309_s25 + $0x50] sm:$0xff] (%p1690_p6)  ;;  %1242 = vst [vmem:[%s2383_s6 + $0x88] sm:$0xff] (%p1690_p6), %v1241_v25  ;;  %1270 = vst [vmem:[%s2383_s6 + $0x168] sm:$0xff] (%p1690_p6), %v1269_v13  ;;  %v1271_v33 = vld [vmem:[%s2309_s25 + $0xc0] sm:$0xff] (%p1690_p6) }
 0x24d   : > { %1180 = vst [vmem:[%s2309_s25 + $0x70] sm:$0xff] %v1122_v26  ;;  %1194 = vst [vmem:[%s2309_s25 + $0xe0] sm:$0xff] %v1158_v58  ;;  %v1124_v63 = vadd.f32 %v1123_v56, %v2305_v54  ;;  %v1160_v39 = vadd.f32 %v1159_v5, %v2305_v54 }
 0x24e   : > { %v1161_v22 = vpop.f32.mrf.mxu1  ;;  %v1245_v29 = vld [vmem:[%s2309_s25 + $0x58] sm:$0xff] (%p1690_p6)  ;;  %1244 = vst [vmem:[%s2383_s6 + $0xa0] sm:$0xff] (%p1690_p6), %v1243_v41  ;;  %v1273_v42 = vld [vmem:[%s2309_s25 + $0xc8] sm:$0xff] (%p1690_p6)  ;;  %1272 = vst [vmem:[%s2383_s6 + $0x180] sm:$0xff] (%p1690_p6), %v1271_v33 }
 0x24f   : > { %1181 = vst [vmem:[%s2309_s25 + $0x78] sm:$0xff] %v1124_v63  ;;  %1195 = vst [vmem:[%s2309_s25 + $0xe8] sm:$0xff] %v1160_v39  ;;  %v1162_v7 = vadd.f32 %v1161_v22, %v2302_v57  ;;  %1204 = sbr.rel (!%p1690_p6) target bundleno = 604 (0x25c), region = 82  ;;  %v1223_v57 = vld [vmem:[%s2309_s25] sm:$0xff] (%p1690_p6) }
 0x250   : > { %v1163_v17 = vpop.f32.mrf.mxu1  ;;  %1224 = vst [vmem:[%s2383_s6] sm:$0xff] (%p1690_p6), %v1223_v57  ;;  %1246 = vst [vmem:[%s2383_s6 + $0xa8] sm:$0xff] (%p1690_p6), %v1245_v29  ;;  %v1247_v34 = vld [vmem:[%s2309_s25 + $0x60] sm:$0xff] (%p1690_p6)  ;;  %v1275_v46 = vld [vmem:[%s2309_s25 + $0xd0] sm:$0xff] (%p1690_p6) }
 0x251   : > { %1196 = vst [vmem:[%s2309_s25 + $0xf0] sm:$0xff] %v1162_v7  ;;  %v1164_v27 = vadd.f32 %v1163_v17, %v2305_v54  ;;  %v1229_v54 = vld [vmem:[%s2309_s25 + $0x18] sm:$0xff] (%p1690_p6)  ;;  %1248 = vst [vmem:[%s2383_s6 + $0xc0] sm:$0xff] (%p1690_p6), %v1247_v34 }
 0x252   : > { %1230 = vst [vmem:[%s2383_s6 + $0x28] sm:$0xff] (%p1690_p6), %v1229_v54  ;;  %v1249_v9 = vld [vmem:[%s2309_s25 + $0x68] sm:$0xff] (%p1690_p6)  ;;  %1274 = vst [vmem:[%s2383_s6 + $0x188] sm:$0xff] (%p1690_p6), %v1273_v42  ;;  %v1277_v44 = vld [vmem:[%s2309_s25 + $0xd8] sm:$0xff] (%p1690_p6) }
 0x253   : > { %1197 = vst [vmem:[%s2309_s25 + $0xf8] sm:$0xff] %v1164_v27  ;;  %1250 = vst [vmem:[%s2383_s6 + $0xc8] sm:$0xff] (%p1690_p6), %v1249_v9 }
 0x254   : > { %v1251_v6 = vld [vmem:[%s2309_s25 + $0x70] sm:$0xff]  ;;  %1276 = vst [vmem:[%s2383_s6 + $0x1a0] sm:$0xff] %v1275_v46  ;;  %v1279_v52 = vld [vmem:[%s2309_s25 + $0xe0] sm:$0xff]  ;;  %1278 = vst [vmem:[%s2383_s6 + $0x1a8] sm:$0xff] %v1277_v44 }
 0x255   : > { %1252 = vst [vmem:[%s2383_s6 + $0xe0] sm:$0xff] %v1251_v6  ;;  %1280 = vst [vmem:[%s2383_s6 + $0x1c0] sm:$0xff] %v1279_v52 }
 0x256   : > { %v1253_v18 = vld [vmem:[%s2309_s25 + $0x78] sm:$0xff]  ;;  %v1281_v8 = vld [vmem:[%s2309_s25 + $0xe8] sm:$0xff] }
 0x257   : > { %1254 = vst [vmem:[%s2383_s6 + $0xe8] sm:$0xff] %v1253_v18  ;;  %1282 = vst [vmem:[%s2383_s6 + $0x1c8] sm:$0xff] %v1281_v8 }
 0x258   : > { %v1283_v35 = vld [vmem:[%s2309_s25 + $0xf0] sm:$0xff] }
 0x259   : > { %1284 = vst [vmem:[%s2383_s6 + $0x1e0] sm:$0xff] %v1283_v35 }
 0x25a   : > { %v1285_v3 = vld [vmem:[%s2309_s25 + $0xf8] sm:$0xff] }
 0x25b   : > { %1286 = vst [vmem:[%s2383_s6 + $0x1e8] sm:$0xff] %v1285_v3 }
 0x25c PF: > { %s15_s22 = sadd.s32 1, %s1623_s22   ;;  %s2468_s18 = smov %s1611_s19 }
 0x25d   : > { %p12_p12 = scmp.ge.s32.totalorder %s15_s22, 4   ;;  %s2469_s19 = smov %s1695_s28 }
 0x25e   : > { %s2470_s20 = smov %s1619_s21  ;;  %s2471_s21 = smov %s2473_s23 }
 0x25f   :  { %14 = sbr.rel (!%p12_p12) target bundleno = 3 (0x3), region = 142 }

</bundles_post_ra>
